<compile_context>
chip_gen: v7x
topology: tpu7x:2x2x1
jax: 0.10.0
libtpu: 0.0.40
codegen_flags: <defaults>
</compile_context>

<pallas_src>
import functools

import jax
import jax.numpy as jnp
from jax.experimental import pallas as pl
from jax.experimental.pallas import tpu as pltpu

BN_EPS = 1e-5
LRELU_SLOPE = 0.01  # nn.LeakyReLU default negative_slope


# ----------------------------- kernel-side math ---------------------------
def _bn_lrelu(y, g, b, inv_count):
    # train-mode BatchNorm2d over the row (= N*H*W) axis, single pass (sum / sumsq),
    # biased variance, affine, then LeakyReLU.
    s = jnp.sum(y, axis=0, keepdims=True)
    ss = jnp.sum(y * y, axis=0, keepdims=True)
    mean = s * inv_count
    var = ss * inv_count - mean * mean
    z = g * ((y - mean) * jax.lax.rsqrt(var + BN_EPS)) + b
    return jnp.maximum(z, LRELU_SLOPE * z)


def _conv_bn_lrelu_kernel(p_ref, w_ref, g_ref, b_ref, o_ref, *, inv_count):
    # conv as an MXU matmul (bf16 inputs, f32 accumulation) + fused BN + LeakyReLU.
    y = jnp.dot(p_ref[...], w_ref[...], preferred_element_type=jnp.float32)
    o_ref[...] = _bn_lrelu(y, g_ref[...], b_ref[...], inv_count).astype(o_ref.dtype)


def _conv3_tail_kernel(p3_ref, w3_ref, g3_ref, b3_ref,
                       w4_ref, g4_ref, b4_ref,
                       w5_ref, g5_ref, b5_ref,
                       w6_ref, bias6_ref,
                       out_ref, x3_ref, x2_ref, x1_ref):
    # conv3 (5x5, s2): one matmul over the pre-built (16*B, 1600) patch matrix, rows (i,j,b).
    m3 = p3_ref.shape[0]
    x1 = _bn_lrelu(jnp.dot(p3_ref[...], w3_ref[...], preferred_element_type=jnp.float32),
                   g3_ref[...], b3_ref[...], 1.0 / m3)
    x1_ref[...] = x1.astype(x1_ref.dtype)

    # conv4 (4x4 kernel == whole 4x4 map): sum of 16 taps, each (B,128)@(128,256).
    # x1 rows are ordered (i, j, b) so tap s=i*4+j is a contiguous (B,128) row slice.
    n_taps = w4_ref.shape[0]
    bsz = x2_ref.shape[0]
    acc4 = jnp.zeros((bsz, w4_ref.shape[2]), jnp.float32)
    for s_idx in range(n_taps):
        xs = x1_ref[pl.ds(s_idx * bsz, bsz), :].astype(jnp.bfloat16)
        acc4 = acc4 + jnp.dot(xs, w4_ref[s_idx], preferred_element_type=jnp.float32)
    x2 = _bn_lrelu(acc4, g4_ref[...], b4_ref[...], 1.0 / bsz)
    x2_ref[...] = x2.astype(x2_ref.dtype)

    # conv5 (1x1) + BN + LReLU
    x3 = _bn_lrelu(jnp.dot(x2.astype(jnp.bfloat16), w5_ref[...],
                           preferred_element_type=jnp.float32),
                   g5_ref[...], b5_ref[...], 1.0 / bsz)
    x3_ref[...] = x3.astype(x3_ref.dtype)

    # conv6 (1x1, with bias)
    out_ref[...] = (jnp.dot(x3.astype(jnp.bfloat16), w6_ref[...],
                            preferred_element_type=jnp.float32)
                    + bias6_ref[...]).astype(out_ref.dtype)


# ----------------------------- glue helpers -------------------------------
def _round_up(x, m):
    return (x + m - 1) // m * m


def _full_spec(shape):
    return pl.BlockSpec(shape, lambda *_: (0,) * len(shape))


_COMPILER_PARAMS = pltpu.CompilerParams(dimension_semantics=("arbitrary",))


def _im2col_nhwc(x, kh, kw, stride, spatial_major=False):
    """x: (B,H,W,C) -> (rows, kh*kw*C); K columns ordered (ki,kj,c).
    Row order (b,oh,ow), or (oh,ow,b) when spatial_major=True."""
    B, H, W, C = x.shape
    OH = (H - kh) // stride + 1
    OW = (W - kw) // stride + 1
    cols = []
    for i in range(kh):
        for j in range(kw):
            cols.append(x[:, i:i + stride * (OH - 1) + 1:stride,
                          j:j + stride * (OW - 1) + 1:stride, :])
    p = jnp.stack(cols, axis=3)                    # (B, OH, OW, kh*kw, C)
    if spatial_major:
        p = jnp.transpose(p, (1, 2, 0, 3, 4))      # (OH, OW, B, kh*kw, C)
    return p.reshape(-1, kh * kw * C), OH, OW


def _conv_bn_lrelu(p, w2d, gamma, beta, *, rows_true, out_dtype=jnp.bfloat16):
    M, K = p.shape
    N = w2d.shape[1]
    kern = functools.partial(_conv_bn_lrelu_kernel, inv_count=1.0 / rows_true)
    return pl.pallas_call(
        kern,
        out_shape=jax.ShapeDtypeStruct((M, N), out_dtype),
        grid=(1,),
        in_specs=[_full_spec((M, K)), _full_spec((K, N)),
                  _full_spec((1, N)), _full_spec((1, N))],
        out_specs=_full_spec((M, N)),
        compiler_params=_COMPILER_PARAMS,
    )(p, w2d, gamma, beta)


def _conv3_tail(p3, params, B):
    M3, K3 = p3.shape
    w3, g3, b3 = params["w3"], params["g3"], params["b3"]
    w4, g4, b4 = params["w4"], params["g4"], params["b4"]
    w5, g5, b5 = params["w5"], params["g5"], params["b5"]
    w6, bias6 = params["w6"], params["bias6"]
    N3 = w3.shape[1]
    N4 = w4.shape[2]
    N5 = w5.shape[1]
    N6 = w6.shape[1]
    out, x3, x2, x1 = pl.pallas_call(
        _conv3_tail_kernel,
        out_shape=(jax.ShapeDtypeStruct((B, N6), jnp.float32),
                   jax.ShapeDtypeStruct((B, N5), jnp.float32),
                   jax.ShapeDtypeStruct((B, N4), jnp.float32),
                   jax.ShapeDtypeStruct((M3, N3), jnp.float32)),
        grid=(1,),
        in_specs=[_full_spec((M3, K3)),
                  _full_spec((K3, N3)), _full_spec((1, N3)), _full_spec((1, N3)),
                  _full_spec(w4.shape), _full_spec((1, N4)), _full_spec((1, N4)),
                  _full_spec((N4, N5)), _full_spec((1, N5)), _full_spec((1, N5)),
                  _full_spec((N5, N6)), _full_spec((1, N6))],
        out_specs=[_full_spec((B, N6)), _full_spec((B, N5)),
                   _full_spec((B, N4)), _full_spec((M3, N3))],
        compiler_params=_COMPILER_PARAMS,
    )(p3, w3, g3, b3, w4, g4, b4, w5, g5, b5, w6, bias6)
    return out, x3, x2, x1


# ----------------------------- params -------------------------------------
def _prep_conv_w(w, k_pad=None):
    """(cout,cin,kh,kw) -> (K[,padded], cout) bf16 with K ordered (ki,kj,cin)."""
    cout, cin, kh, kw = w.shape
    K = kh * kw * cin
    w2d = jnp.transpose(w, (2, 3, 1, 0)).reshape(K, cout)
    if k_pad is not None and k_pad > K:
        w2d = jnp.pad(w2d, ((0, k_pad - K), (0, 0)))
    return w2d.astype(jnp.bfloat16)


def init_params(key, latent_size):
    shapes = [(32, 1, 5, 5), (64, 32, 4, 4), (128, 64, 5, 5),
              (256, 128, 4, 4), (512, 256, 1, 1), (latent_size, 512, 1, 1)]
    keys = jax.random.split(key, len(shapes) + 1)
    raw = [0.05 * jax.random.normal(k, s, dtype=jnp.float32)
           for k, s in zip(keys[:-1], shapes)]
    params = {
        "w1": _prep_conv_w(raw[0], k_pad=32),        # K 25 -> 32 only (not 128)
        "w2": _prep_conv_w(raw[1]),                  # (512, 64)
        "w3": _prep_conv_w(raw[2]),                  # (1600, 128)
        # conv4 kept as 16 per-tap (cin, cout) slices, tap index s = ki*4+kj
        "w4": jnp.transpose(raw[3], (2, 3, 1, 0)).reshape(16, 128, 256).astype(jnp.bfloat16),
        "w5": _prep_conv_w(raw[4]),                  # (256, 512)
        "w6": _prep_conv_w(raw[5]),                  # (512, latent)
    }
    for idx, c in ((1, 32), (2, 64), (3, 128), (4, 256), (5, 512)):
        params[f"g{idx}"] = jnp.ones((1, c), jnp.float32)
        params[f"b{idx}"] = jnp.zeros((1, c), jnp.float32)
    params["bias6"] = 0.05 * jax.random.normal(keys[-1], (1, latent_size), jnp.float32)
    return params


# ----------------------------- Encoder forward -----------------------------
def encoder_forward(params, x, latent_size):
    B = x.shape[0]
    h = jnp.transpose(x, (0, 2, 3, 1))               # NCHW -> NHWC once at the boundary

    # conv1 (5x5, s1) + BN + LReLU : M = B*24*24 rows
    p1, oh1, ow1 = _im2col_nhwc(h, 5, 5, 1)          # (1152, 25)
    p1 = jnp.pad(p1, ((0, 0), (0, 32 - p1.shape[1]))).astype(jnp.bfloat16)
    a1 = _conv_bn_lrelu(p1, params["w1"], params["g1"], params["b1"],
                        rows_true=p1.shape[0])       # (1152, 32) bf16
    a1 = a1.reshape(B, oh1, ow1, 32)

    # conv2 (4x4, s2) + BN + LReLU : M = 242 rows padded to 256, stats over true 242
    p2, oh2, ow2 = _im2col_nhwc(a1, 4, 4, 2)         # (242, 512) bf16
    m2 = p2.shape[0]
    m2_pad = _round_up(m2, 16)                       # 242 -> 256 (aligned sublanes)
    p2 = jnp.pad(p2, ((0, m2_pad - m2), (0, 0)))
    a2 = _conv_bn_lrelu(p2, params["w2"], params["g2"], params["b2"],
                        rows_true=m2)                # (256, 64) bf16; rows >= 242 unused
    a2 = a2[:m2].reshape(B, oh2, ow2, 64)

    # conv3 + conv4 + conv5 + conv6 fused in one kernel (intermediates stay in VMEM)
    p3, oh3, ow3 = _im2col_nhwc(a2, 5, 5, 2, spatial_major=True)  # (16*B, 1600), rows (i,j,b)
    out, x3, x2, x1 = _conv3_tail(p3, params, B)

    output = out.reshape(B, latent_size, 1, 1)
    # PyTorch x1.view(B,-1) flattens NCHW (c,i,j); kernel x1 rows are (i,j,b)
    x1_flat = jnp.transpose(x1.reshape(oh3, ow3, B, 128), (2, 3, 0, 1)).reshape(B, -1)
    # TODO(synk): BatchNorm running_mean/running_var buffer updates (training-mode side
    # effect) are not modeled; only the normalization itself is computed.
    return output, x3, x2, x1_flat


if __name__ == "__main__":
    latent_size = 32
    key = jax.random.PRNGKey(0)
    kx, kp = jax.random.split(key)
    # MNIST-like input: (B=2, C=1, H=28, W=28) -> spatial 28 -> 24 -> 11 -> 4 -> 1
    x = jax.random.normal(kx, (2, 1, 28, 28), dtype=jnp.float32)
    params = init_params(kp, latent_size)

    fwd = jax.jit(functools.partial(encoder_forward, latent_size=latent_size))
    out = jax.block_until_ready(fwd(params, x))

    output, x3f, x2f, x1f = out
    assert output.shape == (2, latent_size, 1, 1)
    assert x3f.shape == (2, 512)
    assert x2f.shape == (2, 256)
    assert x1f.shape == (2, 128 * 4 * 4)
    assert all(bool(jnp.all(jnp.isfinite(o))) for o in (output, x3f, x2f, x1f))
    print("KERNEL_OK")
</pallas_src>

<mosaic_0001>
module attributes {stable_mosaic.version = 11 : i64} {
  func.func @_conv_bn_lrelu_kernel(%arg0: i32, %arg1: memref<1152x32xbf16, #tpu.memory_space<vmem>>, %arg2: memref<32x32xbf16, #tpu.memory_space<vmem>>, %arg3: memref<1x32xf32, #tpu.memory_space<vmem>>, %arg4: memref<1x32xf32, #tpu.memory_space<vmem>>, %arg5: memref<1152x32xbf16, #tpu.memory_space<vmem>>) attributes {dimension_semantics = [#tpu.dimension_semantics<arbitrary>], iteration_bounds = array<i64: 1>, scalar_prefetch = 0 : i64, scratch_operands = 0 : i64, tpu.core_type = #tpu.core_type<tc>, window_params = [{pipeline_mode = #tpu.pipeline_mode<synchronous>, transform_indices = @transform_0, window_bounds = array<i64: 1152, 32>}, {pipeline_mode = #tpu.pipeline_mode<synchronous>, transform_indices = @transform_1, window_bounds = array<i64: 32, 32>}, {pipeline_mode = #tpu.pipeline_mode<synchronous>, transform_indices = @transform_2, window_bounds = array<i64: 1, 32>}, {pipeline_mode = #tpu.pipeline_mode<synchronous>, transform_indices = @transform_3, window_bounds = array<i64: 1, 32>}, {pipeline_mode = #tpu.pipeline_mode<synchronous>, transform_indices = @transform_4, window_bounds = array<i64: 1152, 32>}]} {
    %c0 = arith.constant 0 : index
    %c0_0 = arith.constant 0 : index
    %0 = vector.load %arg1[%c0, %c0_0] : memref<1152x32xbf16, #tpu.memory_space<vmem>>, vector<1152x32xbf16>
    %c0_1 = arith.constant 0 : index
    %c0_2 = arith.constant 0 : index
    %1 = vector.load %arg2[%c0_1, %c0_2] : memref<32x32xbf16, #tpu.memory_space<vmem>>, vector<32x32xbf16>
    %cst = arith.constant dense<0.000000e+00> : vector<1152x32xf32>
    %2 = tpu.matmul %0, %1, %cst {dimension_numbers = #tpu.dot_dimension_numbers<[1], [0], [0], [1], [0, 0, 1, 1], [], []>} : vector<1152x32xbf16>, vector<32x32xbf16>, vector<1152x32xf32> -> vector<1152x32xf32>
    %c0_3 = arith.constant 0 : index
    %c0_4 = arith.constant 0 : index
    %3 = vector.load %arg3[%c0_3, %c0_4] : memref<1x32xf32, #tpu.memory_space<vmem>>, vector<1x32xf32>
    %c0_5 = arith.constant 0 : index
    %c0_6 = arith.constant 0 : index
    %4 = vector.load %arg4[%c0_5, %c0_6] : memref<1x32xf32, #tpu.memory_space<vmem>>, vector<1x32xf32>
    %cst_7 = arith.constant dense<0.000000e+00> : vector<32xf32>
    %5 = vector.multi_reduction <add>, %2, %cst_7 [0] : vector<1152x32xf32> to vector<32xf32>
    %6 = vector.shape_cast %5 : vector<32xf32> to vector<1x32xf32>
    %7 = arith.mulf %2, %2 : vector<1152x32xf32>
    %cst_8 = arith.constant dense<0.000000e+00> : vector<32xf32>
    %8 = vector.multi_reduction <add>, %7, %cst_8 [0] : vector<1152x32xf32> to vector<32xf32>
    %9 = vector.shape_cast %8 : vector<32xf32> to vector<1x32xf32>
    %cst_9 = arith.constant 8.68055562E-4 : f32
    %10 = vector.broadcast %cst_9 : f32 to vector<1x32xf32>
    %11 = arith.mulf %6, %10 : vector<1x32xf32>
    %cst_10 = arith.constant 8.68055562E-4 : f32
    %12 = vector.broadcast %cst_10 : f32 to vector<1x32xf32>
    %13 = arith.mulf %9, %12 : vector<1x32xf32>
    %14 = arith.mulf %11, %11 : vector<1x32xf32>
    %15 = arith.subf %13, %14 : vector<1x32xf32>
    %16 = vector.broadcast %11 : vector<1x32xf32> to vector<1152x32xf32>
    %17 = arith.subf %2, %16 : vector<1152x32xf32>
    %cst_11 = arith.constant 9.99999974E-6 : f32
    %18 = vector.broadcast %cst_11 : f32 to vector<1x32xf32>
    %19 = arith.addf %15, %18 : vector<1x32xf32>
    %20 = math.rsqrt %19 : vector<1x32xf32>
    %21 = vector.broadcast %20 : vector<1x32xf32> to vector<1152x32xf32>
    %22 = arith.mulf %17, %21 : vector<1152x32xf32>
    %23 = vector.broadcast %3 : vector<1x32xf32> to vector<1152x32xf32>
    %24 = arith.mulf %23, %22 : vector<1152x32xf32>
    %25 = vector.broadcast %4 : vector<1x32xf32> to vector<1152x32xf32>
    %26 = arith.addf %24, %25 : vector<1152x32xf32>
    %cst_12 = arith.constant 0.00999999977 : f32
    %27 = vector.broadcast %cst_12 : f32 to vector<1152x32xf32>
    %28 = arith.mulf %27, %26 : vector<1152x32xf32>
    %29 = arith.maximumf %26, %28 : vector<1152x32xf32>
    %30 = arith.truncf %29 : vector<1152x32xf32> to vector<1152x32xbf16>
    %c0_13 = arith.constant 0 : index
    %c0_14 = arith.constant 0 : index
    %31 = vector.load %arg5[%c0_13, %c0_14] : memref<1152x32xbf16, #tpu.memory_space<vmem>>, vector<1152x32xbf16>
    tpu.vector_store %arg5[%c0_13, %c0_14], %30 {strides = array<i32>} : memref<1152x32xbf16, #tpu.memory_space<vmem>>, vector<1152x32xbf16>,
    return
  }
  func.func @transform_0(%arg0: i32) -> (i32, i32) {
    %c0_i32 = arith.constant 0 : i32
    %c0_i32_0 = arith.constant 0 : i32
    %c0_i32_1 = arith.constant 0 : i32
    return %c0_i32, %c0_i32_0 : i32, i32
  }
  func.func @transform_1(%arg0: i32) -> (i32, i32) {
    %c0_i32 = arith.constant 0 : i32
    %c0_i32_0 = arith.constant 0 : i32
    %c0_i32_1 = arith.constant 0 : i32
    return %c0_i32, %c0_i32_0 : i32, i32
  }
  func.func @transform_2(%arg0: i32) -> (i32, i32) {
    %c0_i32 = arith.constant 0 : i32
    %c0_i32_0 = arith.constant 0 : i32
    %c0_i32_1 = arith.constant 0 : i32
    return %c0_i32, %c0_i32_0 : i32, i32
  }
  func.func @transform_3(%arg0: i32) -> (i32, i32) {
    %c0_i32 = arith.constant 0 : i32
    %c0_i32_0 = arith.constant 0 : i32
    %c0_i32_1 = arith.constant 0 : i32
    return %c0_i32, %c0_i32_0 : i32, i32
  }
  func.func @transform_4(%arg0: i32) -> (i32, i32) {
    %c0_i32 = arith.constant 0 : i32
    %c0_i32_0 = arith.constant 0 : i32
    %c0_i32_1 = arith.constant 0 : i32
    return %c0_i32, %c0_i32_0 : i32, i32
  }
}

module attributes {stable_mosaic.version = 11 : i64} {
  func.func @_conv_bn_lrelu_kernel(%arg0: i32, %arg1: memref<256x512xbf16, #tpu.memory_space<vmem>>, %arg2: memref<512x64xbf16, #tpu.memory_space<vmem>>, %arg3: memref<1x64xf32, #tpu.memory_space<vmem>>, %arg4: memref<1x64xf32, #tpu.memory_space<vmem>>, %arg5: memref<256x64xbf16, #tpu.memory_space<vmem>>) attributes {dimension_semantics = [#tpu.dimension_semantics<arbitrary>], iteration_bounds = array<i64: 1>, scalar_prefetch = 0 : i64, scratch_operands = 0 : i64, tpu.core_type = #tpu.core_type<tc>, window_params = [{pipeline_mode = #tpu.pipeline_mode<synchronous>, transform_indices = @transform_0, window_bounds = array<i64: 256, 512>}, {pipeline_mode = #tpu.pipeline_mode<synchronous>, transform_indices = @transform_1, window_bounds = array<i64: 512, 64>}, {pipeline_mode = #tpu.pipeline_mode<synchronous>, transform_indices = @transform_2, window_bounds = array<i64: 1, 64>}, {pipeline_mode = #tpu.pipeline_mode<synchronous>, transform_indices = @transform_3, window_bounds = array<i64: 1, 64>}, {pipeline_mode = #tpu.pipeline_mode<synchronous>, transform_indices = @transform_4, window_bounds = array<i64: 256, 64>}]} {
    %c0 = arith.constant 0 : index
    %c0_0 = arith.constant 0 : index
    %0 = vector.load %arg1[%c0, %c0_0] : memref<256x512xbf16, #tpu.memory_space<vmem>>, vector<256x512xbf16>
    %c0_1 = arith.constant 0 : index
    %c0_2 = arith.constant 0 : index
    %1 = vector.load %arg2[%c0_1, %c0_2] : memref<512x64xbf16, #tpu.memory_space<vmem>>, vector<512x64xbf16>
    %cst = arith.constant dense<0.000000e+00> : vector<256x64xf32>
    %2 = tpu.matmul %0, %1, %cst {dimension_numbers = #tpu.dot_dimension_numbers<[1], [0], [0], [1], [0, 0, 1, 1], [], []>} : vector<256x512xbf16>, vector<512x64xbf16>, vector<256x64xf32> -> vector<256x64xf32>
    %c0_3 = arith.constant 0 : index
    %c0_4 = arith.constant 0 : index
    %3 = vector.load %arg3[%c0_3, %c0_4] : memref<1x64xf32, #tpu.memory_space<vmem>>, vector<1x64xf32>
    %c0_5 = arith.constant 0 : index
    %c0_6 = arith.constant 0 : index
    %4 = vector.load %arg4[%c0_5, %c0_6] : memref<1x64xf32, #tpu.memory_space<vmem>>, vector<1x64xf32>
    %cst_7 = arith.constant dense<0.000000e+00> : vector<64xf32>
    %5 = vector.multi_reduction <add>, %2, %cst_7 [0] : vector<256x64xf32> to vector<64xf32>
    %6 = vector.shape_cast %5 : vector<64xf32> to vector<1x64xf32>
    %7 = arith.mulf %2, %2 : vector<256x64xf32>
    %cst_8 = arith.constant dense<0.000000e+00> : vector<64xf32>
    %8 = vector.multi_reduction <add>, %7, %cst_8 [0] : vector<256x64xf32> to vector<64xf32>
    %9 = vector.shape_cast %8 : vector<64xf32> to vector<1x64xf32>
    %cst_9 = arith.constant 0.00413223123 : f32
    %10 = vector.broadcast %cst_9 : f32 to vector<1x64xf32>
    %11 = arith.mulf %6, %10 : vector<1x64xf32>
    %cst_10 = arith.constant 0.00413223123 : f32
    %12 = vector.broadcast %cst_10 : f32 to vector<1x64xf32>
    %13 = arith.mulf %9, %12 : vector<1x64xf32>
    %14 = arith.mulf %11, %11 : vector<1x64xf32>
    %15 = arith.subf %13, %14 : vector<1x64xf32>
    %16 = vector.broadcast %11 : vector<1x64xf32> to vector<256x64xf32>
    %17 = arith.subf %2, %16 : vector<256x64xf32>
    %cst_11 = arith.constant 9.99999974E-6 : f32
    %18 = vector.broadcast %cst_11 : f32 to vector<1x64xf32>
    %19 = arith.addf %15, %18 : vector<1x64xf32>
    %20 = math.rsqrt %19 : vector<1x64xf32>
    %21 = vector.broadcast %20 : vector<1x64xf32> to vector<256x64xf32>
    %22 = arith.mulf %17, %21 : vector<256x64xf32>
    %23 = vector.broadcast %3 : vector<1x64xf32> to vector<256x64xf32>
    %24 = arith.mulf %23, %22 : vector<256x64xf32>
    %25 = vector.broadcast %4 : vector<1x64xf32> to vector<256x64xf32>
    %26 = arith.addf %24, %25 : vector<256x64xf32>
    %cst_12 = arith.constant 0.00999999977 : f32
    %27 = vector.broadcast %cst_12 : f32 to vector<256x64xf32>
    %28 = arith.mulf %27, %26 : vector<256x64xf32>
    %29 = arith.maximumf %26, %28 : vector<256x64xf32>
    %30 = arith.truncf %29 : vector<256x64xf32> to vector<256x64xbf16>
    %c0_13 = arith.constant 0 : index
    %c0_14 = arith.constant 0 : index
    %31 = vector.load %arg5[%c0_13, %c0_14] : memref<256x64xbf16, #tpu.memory_space<vmem>>, vector<256x64xbf16>
    tpu.vector_store %arg5[%c0_13, %c0_14], %30 {strides = array<i32>} : memref<256x64xbf16, #tpu.memory_space<vmem>>, vector<256x64xbf16>,
    return
  }
  func.func @transform_0(%arg0: i32) -> (i32, i32) {
    %c0_i32 = arith.constant 0 : i32
    %c0_i32_0 = arith.constant 0 : i32
    %c0_i32_1 = arith.constant 0 : i32
    return %c0_i32, %c0_i32_0 : i32, i32
  }
  func.func @transform_1(%arg0: i32) -> (i32, i32) {
    %c0_i32 = arith.constant 0 : i32
    %c0_i32_0 = arith.constant 0 : i32
    %c0_i32_1 = arith.constant 0 : i32
    return %c0_i32, %c0_i32_0 : i32, i32
  }
  func.func @transform_2(%arg0: i32) -> (i32, i32) {
    %c0_i32 = arith.constant 0 : i32
    %c0_i32_0 = arith.constant 0 : i32
    %c0_i32_1 = arith.constant 0 : i32
    return %c0_i32, %c0_i32_0 : i32, i32
  }
  func.func @transform_3(%arg0: i32) -> (i32, i32) {
    %c0_i32 = arith.constant 0 : i32
    %c0_i32_0 = arith.constant 0 : i32
    %c0_i32_1 = arith.constant 0 : i32
    return %c0_i32, %c0_i32_0 : i32, i32
  }
  func.func @transform_4(%arg0: i32) -> (i32, i32) {
    %c0_i32 = arith.constant 0 : i32
    %c0_i32_0 = arith.constant 0 : i32
    %c0_i32_1 = arith.constant 0 : i32
    return %c0_i32, %c0_i32_0 : i32, i32
  }
}

module attributes {stable_mosaic.version = 11 : i64} {
  func.func @_conv3_tail_kernel(%arg0: i32, %arg1: memref<32x1600xbf16, #tpu.memory_space<vmem>>, %arg2: memref<1600x128xbf16, #tpu.memory_space<vmem>>, %arg3: memref<1x128xf32, #tpu.memory_space<vmem>>, %arg4: memref<1x128xf32, #tpu.memory_space<vmem>>, %arg5: memref<16x128x256xbf16, #tpu.memory_space<vmem>>, %arg6: memref<1x256xf32, #tpu.memory_space<vmem>>, %arg7: memref<1x256xf32, #tpu.memory_space<vmem>>, %arg8: memref<256x512xbf16, #tpu.memory_space<vmem>>, %arg9: memref<1x512xf32, #tpu.memory_space<vmem>>, %arg10: memref<1x512xf32, #tpu.memory_space<vmem>>, %arg11: memref<512x32xbf16, #tpu.memory_space<vmem>>, %arg12: memref<1x32xf32, #tpu.memory_space<vmem>>, %arg13: memref<2x32xf32, #tpu.memory_space<vmem>>, %arg14: memref<2x512xf32, #tpu.memory_space<vmem>>, %arg15: memref<2x256xf32, #tpu.memory_space<vmem>>, %arg16: memref<32x128xf32, #tpu.memory_space<vmem>>) attributes {dimension_semantics = [#tpu.dimension_semantics<arbitrary>], iteration_bounds = array<i64: 1>, scalar_prefetch = 0 : i64, scratch_operands = 0 : i64, tpu.core_type = #tpu.core_type<tc>, window_params = [{pipeline_mode = #tpu.pipeline_mode<synchronous>, transform_indices = @transform_0, window_bounds = array<i64: 32, 1600>}, {pipeline_mode = #tpu.pipeline_mode<synchronous>, transform_indices = @transform_1, window_bounds = array<i64: 1600, 128>}, {pipeline_mode = #tpu.pipeline_mode<synchronous>, transform_indices = @transform_2, window_bounds = array<i64: 1, 128>}, {pipeline_mode = #tpu.pipeline_mode<synchronous>, transform_indices = @transform_3, window_bounds = array<i64: 1, 128>}, {pipeline_mode = #tpu.pipeline_mode<synchronous>, transform_indices = @transform_4, window_bounds = array<i64: 16, 128, 256>}, {pipeline_mode = #tpu.pipeline_mode<synchronous>, transform_indices = @transform_5, window_bounds = array<i64: 1, 256>}, {pipeline_mode = #tpu.pipeline_mode<synchronous>, transform_indices = @transform_6, window_bounds = array<i64: 1, 256>}, {pipeline_mode = #tpu.pipeline_mode<synchronous>, transform_indices = @transform_7, window_bounds = array<i64: 256, 512>}, {pipeline_mode = #tpu.pipeline_mode<synchronous>, transform_indices = @transform_8, window_bounds = array<i64: 1, 512>}, {pipeline_mode = #tpu.pipeline_mode<synchronous>, transform_indices = @transform_9, window_bounds = array<i64: 1, 512>}, {pipeline_mode = #tpu.pipeline_mode<synchronous>, transform_indices = @transform_10, window_bounds = array<i64: 512, 32>}, {pipeline_mode = #tpu.pipeline_mode<synchronous>, transform_indices = @transform_11, window_bounds = array<i64: 1, 32>}, {pipeline_mode = #tpu.pipeline_mode<synchronous>, transform_indices = @transform_12, window_bounds = array<i64: 2, 32>}, {pipeline_mode = #tpu.pipeline_mode<synchronous>, transform_indices = @transform_13, window_bounds = array<i64: 2, 512>}, {pipeline_mode = #tpu.pipeline_mode<synchronous>, transform_indices = @transform_14, window_bounds = array<i64: 2, 256>}, {pipeline_mode = #tpu.pipeline_mode<synchronous>, transform_indices = @transform_15, window_bounds = array<i64: 32, 128>}]} {
    %c0 = arith.constant 0 : index
    %c0_0 = arith.constant 0 : index
    %0 = vector.load %arg1[%c0, %c0_0] : memref<32x1600xbf16, #tpu.memory_space<vmem>>, vector<32x1600xbf16>
    %c0_1 = arith.constant 0 : index
    %c0_2 = arith.constant 0 : index
    %1 = vector.load %arg2[%c0_1, %c0_2] : memref<1600x128xbf16, #tpu.memory_space<vmem>>, vector<1600x128xbf16>
    %cst = arith.constant dense<0.000000e+00> : vector<32x128xf32>
    %2 = tpu.matmul %0, %1, %cst {dimension_numbers = #tpu.dot_dimension_numbers<[1], [0], [0], [1], [0, 0, 1, 1], [], []>} : vector<32x1600xbf16>, vector<1600x128xbf16>, vector<32x128xf32> -> vector<32x128xf32>
    %c0_3 = arith.constant 0 : index
    %c0_4 = arith.constant 0 : index
    %3 = vector.load %arg3[%c0_3, %c0_4] : memref<1x128xf32, #tpu.memory_space<vmem>>, vector<1x128xf32>
    %c0_5 = arith.constant 0 : index
    %c0_6 = arith.constant 0 : index
    %4 = vector.load %arg4[%c0_5, %c0_6] : memref<1x128xf32, #tpu.memory_space<vmem>>, vector<1x128xf32>
    %cst_7 = arith.constant dense<0.000000e+00> : vector<128xf32>
    %5 = vector.multi_reduction <add>, %2, %cst_7 [0] : vector<32x128xf32> to vector<128xf32>
    %6 = vector.shape_cast %5 : vector<128xf32> to vector<1x128xf32>
    %7 = arith.mulf %2, %2 : vector<32x128xf32>
    %cst_8 = arith.constant dense<0.000000e+00> : vector<128xf32>
    %8 = vector.multi_reduction <add>, %7, %cst_8 [0] : vector<32x128xf32> to vector<128xf32>
    %9 = vector.shape_cast %8 : vector<128xf32> to vector<1x128xf32>
    %cst_9 = arith.constant 3.125000e-02 : f32
    %10 = vector.broadcast %cst_9 : f32 to vector<1x128xf32>
    %11 = arith.mulf %6, %10 : vector<1x128xf32>
    %cst_10 = arith.constant 3.125000e-02 : f32
    %12 = vector.broadcast %cst_10 : f32 to vector<1x128xf32>
    %13 = arith.mulf %9, %12 : vector<1x128xf32>
    %14 = arith.mulf %11, %11 : vector<1x128xf32>
    %15 = arith.subf %13, %14 : vector<1x128xf32>
    %16 = vector.broadcast %11 : vector<1x128xf32> to vector<32x128xf32>
    %17 = arith.subf %2, %16 : vector<32x128xf32>
    %cst_11 = arith.constant 9.99999974E-6 : f32
    %18 = vector.broadcast %cst_11 : f32 to vector<1x128xf32>
    %19 = arith.addf %15, %18 : vector<1x128xf32>
    %20 = math.rsqrt %19 : vector<1x128xf32>
    %21 = vector.broadcast %20 : vector<1x128xf32> to vector<32x128xf32>
    %22 = arith.mulf %17, %21 : vector<32x128xf32>
    %23 = vector.broadcast %3 : vector<1x128xf32> to vector<32x128xf32>
    %24 = arith.mulf %23, %22 : vector<32x128xf32>
    %25 = vector.broadcast %4 : vector<1x128xf32> to vector<32x128xf32>
    %26 = arith.addf %24, %25 : vector<32x128xf32>
    %cst_12 = arith.constant 0.00999999977 : f32
    %27 = vector.broadcast %cst_12 : f32 to vector<32x128xf32>
    %28 = arith.mulf %27, %26 : vector<32x128xf32>
    %29 = arith.maximumf %26, %28 : vector<32x128xf32>
    %c0_13 = arith.constant 0 : index
    %c0_14 = arith.constant 0 : index
    %30 = vector.load %arg16[%c0_13, %c0_14] : memref<32x128xf32, #tpu.memory_space<vmem>>, vector<32x128xf32>
    tpu.vector_store %arg16[%c0_13, %c0_14], %29 {strides = array<i32>} : memref<32x128xf32, #tpu.memory_space<vmem>>, vector<32x128xf32>,
    %cst_15 = arith.constant 0.000000e+00 : f32
    %31 = vector.broadcast %cst_15 : f32 to vector<2x256xf32>
    %c0_16 = arith.constant 0 : index
    %c0_17 = arith.constant 0 : index
    %32 = vector.load %arg16[%c0_16, %c0_17] : memref<32x128xf32, #tpu.memory_space<vmem>>, vector<2x128xf32>
    %33 = arith.truncf %32 : vector<2x128xf32> to vector<2x128xbf16>
    %c0_18 = arith.constant 0 : index
    %c0_19 = arith.constant 0 : index
    %c0_20 = arith.constant 0 : index
    %34 = vector.load %arg5[%c0_18, %c0_19, %c0_20] : memref<16x128x256xbf16, #tpu.memory_space<vmem>>, vector<1x128x256xbf16>
    %35 = vector.shape_cast %34 : vector<1x128x256xbf16> to vector<128x256xbf16>
    %cst_21 = arith.constant dense<0.000000e+00> : vector<2x256xf32>
    %36 = tpu.matmul %33, %35, %cst_21 {dimension_numbers = #tpu.dot_dimension_numbers<[1], [0], [0], [1], [0, 0, 1, 1], [], []>} : vector<2x128xbf16>, vector<128x256xbf16>, vector<2x256xf32> -> vector<2x256xf32>
    %37 = arith.addf %31, %36 : vector<2x256xf32>
    %c2 = arith.constant 2 : index
    %c0_22 = arith.constant 0 : index
    %38 = vector.load %arg16[%c2, %c0_22] : memref<32x128xf32, #tpu.memory_space<vmem>>, vector<2x128xf32>
    %39 = arith.truncf %38 : vector<2x128xf32> to vector<2x128xbf16>
    %c1 = arith.constant 1 : index
    %c0_23 = arith.constant 0 : index
    %c0_24 = arith.constant 0 : index
    %40 = vector.load %arg5[%c1, %c0_23, %c0_24] : memref<16x128x256xbf16, #tpu.memory_space<vmem>>, vector<1x128x256xbf16>
    %41 = vector.shape_cast %40 : vector<1x128x256xbf16> to vector<128x256xbf16>
    %cst_25 = arith.constant dense<0.000000e+00> : vector<2x256xf32>
    %42 = tpu.matmul %39, %41, %cst_25 {dimension_numbers = #tpu.dot_dimension_numbers<[1], [0], [0], [1], [0, 0, 1, 1], [], []>} : vector<2x128xbf16>, vector<128x256xbf16>, vector<2x256xf32> -> vector<2x256xf32>
    %43 = arith.addf %37, %42 : vector<2x256xf32>
    %c4 = arith.constant 4 : index
    %c0_26 = arith.constant 0 : index
    %44 = vector.load %arg16[%c4, %c0_26] : memref<32x128xf32, #tpu.memory_space<vmem>>, vector<2x128xf32>
    %45 = arith.truncf %44 : vector<2x128xf32> to vector<2x128xbf16>
    %c2_27 = arith.constant 2 : index
    %c0_28 = arith.constant 0 : index
    %c0_29 = arith.constant 0 : index
    %46 = vector.load %arg5[%c2_27, %c0_28, %c0_29] : memref<16x128x256xbf16, #tpu.memory_space<vmem>>, vector<1x128x256xbf16>
    %47 = vector.shape_cast %46 : vector<1x128x256xbf16> to vector<128x256xbf16>
    %cst_30 = arith.constant dense<0.000000e+00> : vector<2x256xf32>
    %48 = tpu.matmul %45, %47, %cst_30 {dimension_numbers = #tpu.dot_dimension_numbers<[1], [0], [0], [1], [0, 0, 1, 1], [], []>} : vector<2x128xbf16>, vector<128x256xbf16>, vector<2x256xf32> -> vector<2x256xf32>
    %49 = arith.addf %43, %48 : vector<2x256xf32>
    %c6 = arith.constant 6 : index
    %c0_31 = arith.constant 0 : index
    %50 = vector.load %arg16[%c6, %c0_31] : memref<32x128xf32, #tpu.memory_space<vmem>>, vector<2x128xf32>
    %51 = arith.truncf %50 : vector<2x128xf32> to vector<2x128xbf16>
    %c3 = arith.constant 3 : index
    %c0_32 = arith.constant 0 : index
    %c0_33 = arith.constant 0 : index
    %52 = vector.load %arg5[%c3, %c0_32, %c0_33] : memref<16x128x256xbf16, #tpu.memory_space<vmem>>, vector<1x128x256xbf16>
    %53 = vector.shape_cast %52 : vector<1x128x256xbf16> to vector<128x256xbf16>
    %cst_34 = arith.constant dense<0.000000e+00> : vector<2x256xf32>
    %54 = tpu.matmul %51, %53, %cst_34 {dimension_numbers = #tpu.dot_dimension_numbers<[1], [0], [0], [1], [0, 0, 1, 1], [], []>} : vector<2x128xbf16>, vector<128x256xbf16>, vector<2x256xf32> -> vector<2x256xf32>
    %55 = arith.addf %49, %54 : vector<2x256xf32>
    %c8 = arith.constant 8 : index
    %c0_35 = arith.constant 0 : index
    %56 = vector.load %arg16[%c8, %c0_35] : memref<32x128xf32, #tpu.memory_space<vmem>>, vector<2x128xf32>
    %57 = arith.truncf %56 : vector<2x128xf32> to vector<2x128xbf16>
    %c4_36 = arith.constant 4 : index
    %c0_37 = arith.constant 0 : index
    %c0_38 = arith.constant 0 : index
    %58 = vector.load %arg5[%c4_36, %c0_37, %c0_38] : memref<16x128x256xbf16, #tpu.memory_space<vmem>>, vector<1x128x256xbf16>
    %59 = vector.shape_cast %58 : vector<1x128x256xbf16> to vector<128x256xbf16>
    %cst_39 = arith.constant dense<0.000000e+00> : vector<2x256xf32>
    %60 = tpu.matmul %57, %59, %cst_39 {dimension_numbers = #tpu.dot_dimension_numbers<[1], [0], [0], [1], [0, 0, 1, 1], [], []>} : vector<2x128xbf16>, vector<128x256xbf16>, vector<2x256xf32> -> vector<2x256xf32>
    %61 = arith.addf %55, %60 : vector<2x256xf32>
    %c10 = arith.constant 10 : index
    %c0_40 = arith.constant 0 : index
    %62 = vector.load %arg16[%c10, %c0_40] : memref<32x128xf32, #tpu.memory_space<vmem>>, vector<2x128xf32>
    %63 = arith.truncf %62 : vector<2x128xf32> to vector<2x128xbf16>
    %c5 = arith.constant 5 : index
    %c0_41 = arith.constant 0 : index
    %c0_42 = arith.constant 0 : index
    %64 = vector.load %arg5[%c5, %c0_41, %c0_42] : memref<16x128x256xbf16, #tpu.memory_space<vmem>>, vector<1x128x256xbf16>
    %65 = vector.shape_cast %64 : vector<1x128x256xbf16> to vector<128x256xbf16>
    %cst_43 = arith.constant dense<0.000000e+00> : vector<2x256xf32>
    %66 = tpu.matmul %63, %65, %cst_43 {dimension_numbers = #tpu.dot_dimension_numbers<[1], [0], [0], [1], [0, 0, 1, 1], [], []>} : vector<2x128xbf16>, vector<128x256xbf16>, vector<2x256xf32> -> vector<2x256xf32>
    %67 = arith.addf %61, %66 : vector<2x256xf32>
    %c12 = arith.constant 12 : index
    %c0_44 = arith.constant 0 : index
    %68 = vector.load %arg16[%c12, %c0_44] : memref<32x128xf32, #tpu.memory_space<vmem>>, vector<2x128xf32>
    %69 = arith.truncf %68 : vector<2x128xf32> to vector<2x128xbf16>
    %c6_45 = arith.constant 6 : index
    %c0_46 = arith.constant 0 : index
    %c0_47 = arith.constant 0 : index
    %70 = vector.load %arg5[%c6_45, %c0_46, %c0_47] : memref<16x128x256xbf16, #tpu.memory_space<vmem>>, vector<1x128x256xbf16>
    %71 = vector.shape_cast %70 : vector<1x128x256xbf16> to vector<128x256xbf16>
    %cst_48 = arith.constant dense<0.000000e+00> : vector<2x256xf32>
    %72 = tpu.matmul %69, %71, %cst_48 {dimension_numbers = #tpu.dot_dimension_numbers<[1], [0], [0], [1], [0, 0, 1, 1], [], []>} : vector<2x128xbf16>, vector<128x256xbf16>, vector<2x256xf32> -> vector<2x256xf32>
    %73 = arith.addf %67, %72 : vector<2x256xf32>
    %c14 = arith.constant 14 : index
    %c0_49 = arith.constant 0 : index
    %74 = vector.load %arg16[%c14, %c0_49] : memref<32x128xf32, #tpu.memory_space<vmem>>, vector<2x128xf32>
    %75 = arith.truncf %74 : vector<2x128xf32> to vector<2x128xbf16>
    %c7 = arith.constant 7 : index
    %c0_50 = arith.constant 0 : index
    %c0_51 = arith.constant 0 : index
    %76 = vector.load %arg5[%c7, %c0_50, %c0_51] : memref<16x128x256xbf16, #tpu.memory_space<vmem>>, vector<1x128x256xbf16>
    %77 = vector.shape_cast %76 : vector<1x128x256xbf16> to vector<128x256xbf16>
    %cst_52 = arith.constant dense<0.000000e+00> : vector<2x256xf32>
    %78 = tpu.matmul %75, %77, %cst_52 {dimension_numbers = #tpu.dot_dimension_numbers<[1], [0], [0], [1], [0, 0, 1, 1], [], []>} : vector<2x128xbf16>, vector<128x256xbf16>, vector<2x256xf32> -> vector<2x256xf32>
    %79 = arith.addf %73, %78 : vector<2x256xf32>
    %c16 = arith.constant 16 : index
    %c0_53 = arith.constant 0 : index
    %80 = vector.load %arg16[%c16, %c0_53] : memref<32x128xf32, #tpu.memory_space<vmem>>, vector<2x128xf32>
    %81 = arith.truncf %80 : vector<2x128xf32> to vector<2x128xbf16>
    %c8_54 = arith.constant 8 : index
    %c0_55 = arith.constant 0 : index
    %c0_56 = arith.constant 0 : index
    %82 = vector.load %arg5[%c8_54, %c0_55, %c0_56] : memref<16x128x256xbf16, #tpu.memory_space<vmem>>, vector<1x128x256xbf16>
    %83 = vector.shape_cast %82 : vector<1x128x256xbf16> to vector<128x256xbf16>
    %cst_57 = arith.constant dense<0.000000e+00> : vector<2x256xf32>
    %84 = tpu.matmul %81, %83, %cst_57 {dimension_numbers = #tpu.dot_dimension_numbers<[1], [0], [0], [1], [0, 0, 1, 1], [], []>} : vector<2x128xbf16>, vector<128x256xbf16>, vector<2x256xf32> -> vector<2x256xf32>
    %85 = arith.addf %79, %84 : vector<2x256xf32>
    %c18 = arith.constant 18 : index
    %c0_58 = arith.constant 0 : index
    %86 = vector.load %arg16[%c18, %c0_58] : memref<32x128xf32, #tpu.memory_space<vmem>>, vector<2x128xf32>
    %87 = arith.truncf %86 : vector<2x128xf32> to vector<2x128xbf16>
    %c9 = arith.constant 9 : index
    %c0_59 = arith.constant 0 : index
    %c0_60 = arith.constant 0 : index
    %88 = vector.load %arg5[%c9, %c0_59, %c0_60] : memref<16x128x256xbf16, #tpu.memory_space<vmem>>, vector<1x128x256xbf16>
    %89 = vector.shape_cast %88 : vector<1x128x256xbf16> to vector<128x256xbf16>
    %cst_61 = arith.constant dense<0.000000e+00> : vector<2x256xf32>
    %90 = tpu.matmul %87, %89, %cst_61 {dimension_numbers = #tpu.dot_dimension_numbers<[1], [0], [0], [1], [0, 0, 1, 1], [], []>} : vector<2x128xbf16>, vector<128x256xbf16>, vector<2x256xf32> -> vector<2x256xf32>
    %91 = arith.addf %85, %90 : vector<2x256xf32>
    %c20 = arith.constant 20 : index
    %c0_62 = arith.constant 0 : index
    %92 = vector.load %arg16[%c20, %c0_62] : memref<32x128xf32, #tpu.memory_space<vmem>>, vector<2x128xf32>
    %93 = arith.truncf %92 : vector<2x128xf32> to vector<2x128xbf16>
    %c10_63 = arith.constant 10 : index
    %c0_64 = arith.constant 0 : index
    %c0_65 = arith.constant 0 : index
    %94 = vector.load %arg5[%c10_63, %c0_64, %c0_65] : memref<16x128x256xbf16, #tpu.memory_space<vmem>>, vector<1x128x256xbf16>
    %95 = vector.shape_cast %94 : vector<1x128x256xbf16> to vector<128x256xbf16>
    %cst_66 = arith.constant dense<0.000000e+00> : vector<2x256xf32>
    %96 = tpu.matmul %93, %95, %cst_66 {dimension_numbers = #tpu.dot_dimension_numbers<[1], [0], [0], [1], [0, 0, 1, 1], [], []>} : vector<2x128xbf16>, vector<128x256xbf16>, vector<2x256xf32> -> vector<2x256xf32>
    %97 = arith.addf %91, %96 : vector<2x256xf32>
    %c22 = arith.constant 22 : index
    %c0_67 = arith.constant 0 : index
    %98 = vector.load %arg16[%c22, %c0_67] : memref<32x128xf32, #tpu.memory_space<vmem>>, vector<2x128xf32>
    %99 = arith.truncf %98 : vector<2x128xf32> to vector<2x128xbf16>
    %c11 = arith.constant 11 : index
    %c0_68 = arith.constant 0 : index
    %c0_69 = arith.constant 0 : index
    %100 = vector.load %arg5[%c11, %c0_68, %c0_69] : memref<16x128x256xbf16, #tpu.memory_space<vmem>>, vector<1x128x256xbf16>
    %101 = vector.shape_cast %100 : vector<1x128x256xbf16> to vector<128x256xbf16>
    %cst_70 = arith.constant dense<0.000000e+00> : vector<2x256xf32>
    %102 = tpu.matmul %99, %101, %cst_70 {dimension_numbers = #tpu.dot_dimension_numbers<[1], [0], [0], [1], [0, 0, 1, 1], [], []>} : vector<2x128xbf16>, vector<128x256xbf16>, vector<2x256xf32> -> vector<2x256xf32>
    %103 = arith.addf %97, %102 : vector<2x256xf32>
    %c24 = arith.constant 24 : index
    %c0_71 = arith.constant 0 : index
    %104 = vector.load %arg16[%c24, %c0_71] : memref<32x128xf32, #tpu.memory_space<vmem>>, vector<2x128xf32>
    %105 = arith.truncf %104 : vector<2x128xf32> to vector<2x128xbf16>
    %c12_72 = arith.constant 12 : index
    %c0_73 = arith.constant 0 : index
    %c0_74 = arith.constant 0 : index
    %106 = vector.load %arg5[%c12_72, %c0_73, %c0_74] : memref<16x128x256xbf16, #tpu.memory_space<vmem>>, vector<1x128x256xbf16>
    %107 = vector.shape_cast %106 : vector<1x128x256xbf16> to vector<128x256xbf16>
    %cst_75 = arith.constant dense<0.000000e+00> : vector<2x256xf32>
    %108 = tpu.matmul %105, %107, %cst_75 {dimension_numbers = #tpu.dot_dimension_numbers<[1], [0], [0], [1], [0, 0, 1, 1], [], []>} : vector<2x128xbf16>, vector<128x256xbf16>, vector<2x256xf32> -> vector<2x256xf32>
    %109 = arith.addf %103, %108 : vector<2x256xf32>
    %c26 = arith.constant 26 : index
    %c0_76 = arith.constant 0 : index
    %110 = vector.load %arg16[%c26, %c0_76] : memref<32x128xf32, #tpu.memory_space<vmem>>, vector<2x128xf32>
    %111 = arith.truncf %110 : vector<2x128xf32> to vector<2x128xbf16>
    %c13 = arith.constant 13 : index
    %c0_77 = arith.constant 0 : index
    %c0_78 = arith.constant 0 : index
    %112 = vector.load %arg5[%c13, %c0_77, %c0_78] : memref<16x128x256xbf16, #tpu.memory_space<vmem>>, vector<1x128x256xbf16>
    %113 = vector.shape_cast %112 : vector<1x128x256xbf16> to vector<128x256xbf16>
    %cst_79 = arith.constant dense<0.000000e+00> : vector<2x256xf32>
    %114 = tpu.matmul %111, %113, %cst_79 {dimension_numbers = #tpu.dot_dimension_numbers<[1], [0], [0], [1], [0, 0, 1, 1], [], []>} : vector<2x128xbf16>, vector<128x256xbf16>, vector<2x256xf32> -> vector<2x256xf32>
    %115 = arith.addf %109, %114 : vector<2x256xf32>
    %c28 = arith.constant 28 : index
    %c0_80 = arith.constant 0 : index
    %116 = vector.load %arg16[%c28, %c0_80] : memref<32x128xf32, #tpu.memory_space<vmem>>, vector<2x128xf32>
    %117 = arith.truncf %116 : vector<2x128xf32> to vector<2x128xbf16>
    %c14_81 = arith.constant 14 : index
    %c0_82 = arith.constant 0 : index
    %c0_83 = arith.constant 0 : index
    %118 = vector.load %arg5[%c14_81, %c0_82, %c0_83] : memref<16x128x256xbf16, #tpu.memory_space<vmem>>, vector<1x128x256xbf16>
    %119 = vector.shape_cast %118 : vector<1x128x256xbf16> to vector<128x256xbf16>
    %cst_84 = arith.constant dense<0.000000e+00> : vector<2x256xf32>
    %120 = tpu.matmul %117, %119, %cst_84 {dimension_numbers = #tpu.dot_dimension_numbers<[1], [0], [0], [1], [0, 0, 1, 1], [], []>} : vector<2x128xbf16>, vector<128x256xbf16>, vector<2x256xf32> -> vector<2x256xf32>
    %121 = arith.addf %115, %120 : vector<2x256xf32>
    %c30 = arith.constant 30 : index
    %c0_85 = arith.constant 0 : index
    %122 = vector.load %arg16[%c30, %c0_85] : memref<32x128xf32, #tpu.memory_space<vmem>>, vector<2x128xf32>
    %123 = arith.truncf %122 : vector<2x128xf32> to vector<2x128xbf16>
    %c15 = arith.constant 15 : index
    %c0_86 = arith.constant 0 : index
    %c0_87 = arith.constant 0 : index
    %124 = vector.load %arg5[%c15, %c0_86, %c0_87] : memref<16x128x256xbf16, #tpu.memory_space<vmem>>, vector<1x128x256xbf16>
    %125 = vector.shape_cast %124 : vector<1x128x256xbf16> to vector<128x256xbf16>
    %cst_88 = arith.constant dense<0.000000e+00> : vector<2x256xf32>
    %126 = tpu.matmul %123, %125, %cst_88 {dimension_numbers = #tpu.dot_dimension_numbers<[1], [0], [0], [1], [0, 0, 1, 1], [], []>} : vector<2x128xbf16>, vector<128x256xbf16>, vector<2x256xf32> -> vector<2x256xf32>
    %127 = arith.addf %121, %126 : vector<2x256xf32>
    %c0_89 = arith.constant 0 : index
    %c0_90 = arith.constant 0 : index
    %128 = vector.load %arg6[%c0_89, %c0_90] : memref<1x256xf32, #tpu.memory_space<vmem>>, vector<1x256xf32>
    %c0_91 = arith.constant 0 : index
    %c0_92 = arith.constant 0 : index
    %129 = vector.load %arg7[%c0_91, %c0_92] : memref<1x256xf32, #tpu.memory_space<vmem>>, vector<1x256xf32>
    %cst_93 = arith.constant dense<0.000000e+00> : vector<256xf32>
    %130 = vector.multi_reduction <add>, %127, %cst_93 [0] : vector<2x256xf32> to vector<256xf32>
    %131 = vector.shape_cast %130 : vector<256xf32> to vector<1x256xf32>
    %132 = arith.mulf %127, %127 : vector<2x256xf32>
    %cst_94 = arith.constant dense<0.000000e+00> : vector<256xf32>
    %133 = vector.multi_reduction <add>, %132, %cst_94 [0] : vector<2x256xf32> to vector<256xf32>
    %134 = vector.shape_cast %133 : vector<256xf32> to vector<1x256xf32>
    %cst_95 = arith.constant 5.000000e-01 : f32
    %135 = vector.broadcast %cst_95 : f32 to vector<1x256xf32>
    %136 = arith.mulf %131, %135 : vector<1x256xf32>
    %cst_96 = arith.constant 5.000000e-01 : f32
    %137 = vector.broadcast %cst_96 : f32 to vector<1x256xf32>
    %138 = arith.mulf %134, %137 : vector<1x256xf32>
    %139 = arith.mulf %136, %136 : vector<1x256xf32>
    %140 = arith.subf %138, %139 : vector<1x256xf32>
    %141 = vector.broadcast %136 : vector<1x256xf32> to vector<2x256xf32>
    %142 = arith.subf %127, %141 : vector<2x256xf32>
    %cst_97 = arith.constant 9.99999974E-6 : f32
    %143 = vector.broadcast %cst_97 : f32 to vector<1x256xf32>
    %144 = arith.addf %140, %143 : vector<1x256xf32>
    %145 = math.rsqrt %144 : vector<1x256xf32>
    %146 = vector.broadcast %145 : vector<1x256xf32> to vector<2x256xf32>
    %147 = arith.mulf %142, %146 : vector<2x256xf32>
    %148 = vector.broadcast %128 : vector<1x256xf32> to vector<2x256xf32>
    %149 = arith.mulf %148, %147 : vector<2x256xf32>
    %150 = vector.broadcast %129 : vector<1x256xf32> to vector<2x256xf32>
    %151 = arith.addf %149, %150 : vector<2x256xf32>
    %cst_98 = arith.constant 0.00999999977 : f32
    %152 = vector.broadcast %cst_98 : f32 to vector<2x256xf32>
    %153 = arith.mulf %152, %151 : vector<2x256xf32>
    %154 = arith.maximumf %151, %153 : vector<2x256xf32>
    %c0_99 = arith.constant 0 : index
    %c0_100 = arith.constant 0 : index
    %155 = vector.load %arg15[%c0_99, %c0_100] : memref<2x256xf32, #tpu.memory_space<vmem>>, vector<2x256xf32>
    tpu.vector_store %arg15[%c0_99, %c0_100], %154 {strides = array<i32>} : memref<2x256xf32, #tpu.memory_space<vmem>>, vector<2x256xf32>,
    %156 = arith.truncf %154 : vector<2x256xf32> to vector<2x256xbf16>
    %c0_101 = arith.constant 0 : index
    %c0_102 = arith.constant 0 : index
    %157 = vector.load %arg8[%c0_101, %c0_102] : memref<256x512xbf16, #tpu.memory_space<vmem>>, vector<256x512xbf16>
    %cst_103 = arith.constant dense<0.000000e+00> : vector<2x512xf32>
    %158 = tpu.matmul %156, %157, %cst_103 {dimension_numbers = #tpu.dot_dimension_numbers<[1], [0], [0], [1], [0, 0, 1, 1], [], []>} : vector<2x256xbf16>, vector<256x512xbf16>, vector<2x512xf32> -> vector<2x512xf32>
    %c0_104 = arith.constant 0 : index
    %c0_105 = arith.constant 0 : index
    %159 = vector.load %arg9[%c0_104, %c0_105] : memref<1x512xf32, #tpu.memory_space<vmem>>, vector<1x512xf32>
    %c0_106 = arith.constant 0 : index
    %c0_107 = arith.constant 0 : index
    %160 = vector.load %arg10[%c0_106, %c0_107] : memref<1x512xf32, #tpu.memory_space<vmem>>, vector<1x512xf32>
    %cst_108 = arith.constant dense<0.000000e+00> : vector<512xf32>
    %161 = vector.multi_reduction <add>, %158, %cst_108 [0] : vector<2x512xf32> to vector<512xf32>
    %162 = vector.shape_cast %161 : vector<512xf32> to vector<1x512xf32>
    %163 = arith.mulf %158, %158 : vector<2x512xf32>
    %cst_109 = arith.constant dense<0.000000e+00> : vector<512xf32>
    %164 = vector.multi_reduction <add>, %163, %cst_109 [0] : vector<2x512xf32> to vector<512xf32>
    %165 = vector.shape_cast %164 : vector<512xf32> to vector<1x512xf32>
    %cst_110 = arith.constant 5.000000e-01 : f32
    %166 = vector.broadcast %cst_110 : f32 to vector<1x512xf32>
    %167 = arith.mulf %162, %166 : vector<1x512xf32>
    %cst_111 = arith.constant 5.000000e-01 : f32
    %168 = vector.broadcast %cst_111 : f32 to vector<1x512xf32>
    %169 = arith.mulf %165, %168 : vector<1x512xf32>
    %170 = arith.mulf %167, %167 : vector<1x512xf32>
    %171 = arith.subf %169, %170 : vector<1x512xf32>
    %172 = vector.broadcast %167 : vector<1x512xf32> to vector<2x512xf32>
    %173 = arith.subf %158, %172 : vector<2x512xf32>
    %cst_112 = arith.constant 9.99999974E-6 : f32
    %174 = vector.broadcast %cst_112 : f32 to vector<1x512xf32>
    %175 = arith.addf %171, %174 : vector<1x512xf32>
    %176 = math.rsqrt %175 : vector<1x512xf32>
    %177 = vector.broadcast %176 : vector<1x512xf32> to vector<2x512xf32>
    %178 = arith.mulf %173, %177 : vector<2x512xf32>
    %179 = vector.broadcast %159 : vector<1x512xf32> to vector<2x512xf32>
    %180 = arith.mulf %179, %178 : vector<2x512xf32>
    %181 = vector.broadcast %160 : vector<1x512xf32> to vector<2x512xf32>
    %182 = arith.addf %180, %181 : vector<2x512xf32>
    %cst_113 = arith.constant 0.00999999977 : f32
    %183 = vector.broadcast %cst_113 : f32 to vector<2x512xf32>
    %184 = arith.mulf %183, %182 : vector<2x512xf32>
    %185 = arith.maximumf %182, %184 : vector<2x512xf32>
    %c0_114 = arith.constant 0 : index
    %c0_115 = arith.constant 0 : index
    %186 = vector.load %arg14[%c0_114, %c0_115] : memref<2x512xf32, #tpu.memory_space<vmem>>, vector<2x512xf32>
    tpu.vector_store %arg14[%c0_114, %c0_115], %185 {strides = array<i32>} : memref<2x512xf32, #tpu.memory_space<vmem>>, vector<2x512xf32>,
    %187 = arith.truncf %185 : vector<2x512xf32> to vector<2x512xbf16>
    %c0_116 = arith.constant 0 : index
    %c0_117 = arith.constant 0 : index
    %188 = vector.load %arg11[%c0_116, %c0_117] : memref<512x32xbf16, #tpu.memory_space<vmem>>, vector<512x32xbf16>
    %cst_118 = arith.constant dense<0.000000e+00> : vector<2x32xf32>
    %189 = tpu.matmul %187, %188, %cst_118 {dimension_numbers = #tpu.dot_dimension_numbers<[1], [0], [0], [1], [0, 0, 1, 1], [], []>} : vector<2x512xbf16>, vector<512x32xbf16>, vector<2x32xf32> -> vector<2x32xf32>
    %c0_119 = arith.constant 0 : index
    %c0_120 = arith.constant 0 : index
    %190 = vector.load %arg12[%c0_119, %c0_120] : memref<1x32xf32, #tpu.memory_space<vmem>>, vector<1x32xf32>
    %191 = vector.broadcast %190 : vector<1x32xf32> to vector<2x32xf32>
    %192 = arith.addf %189, %191 : vector<2x32xf32>
    %c0_121 = arith.constant 0 : index
    %c0_122 = arith.constant 0 : index
    %193 = vector.load %arg13[%c0_121, %c0_122] : memref<2x32xf32, #tpu.memory_space<vmem>>, vector<2x32xf32>
    tpu.vector_store %arg13[%c0_121, %c0_122], %192 {strides = array<i32>} : memref<2x32xf32, #tpu.memory_space<vmem>>, vector<2x32xf32>,
    return
  }
  func.func @transform_0(%arg0: i32) -> (i32, i32) {
    %c0_i32 = arith.constant 0 : i32
    %c0_i32_0 = arith.constant 0 : i32
    %c0_i32_1 = arith.constant 0 : i32
    return %c0_i32, %c0_i32_0 : i32, i32
  }
  func.func @transform_1(%arg0: i32) -> (i32, i32) {
    %c0_i32 = arith.constant 0 : i32
    %c0_i32_0 = arith.constant 0 : i32
    %c0_i32_1 = arith.constant 0 : i32
    return %c0_i32, %c0_i32_0 : i32, i32
  }
  func.func @transform_2(%arg0: i32) -> (i32, i32) {
    %c0_i32 = arith.constant 0 : i32
    %c0_i32_0 = arith.constant 0 : i32
    %c0_i32_1 = arith.constant 0 : i32
    return %c0_i32, %c0_i32_0 : i32, i32
  }
  func.func @transform_3(%arg0: i32) -> (i32, i32) {
    %c0_i32 = arith.constant 0 : i32
    %c0_i32_0 = arith.constant 0 : i32
    %c0_i32_1 = arith.constant 0 : i32
    return %c0_i32, %c0_i32_0 : i32, i32
  }
  func.func @transform_4(%arg0: i32) -> (i32, i32, i32) {
    %c0_i32 = arith.constant 0 : i32
    %c0_i32_0 = arith.constant 0 : i32
    %c0_i32_1 = arith.constant 0 : i32
    %c0_i32_2 = arith.constant 0 : i32
    return %c0_i32, %c0_i32_0, %c0_i32_1 : i32, i32, i32
  }
  func.func @transform_5(%arg0: i32) -> (i32, i32) {
    %c0_i32 = arith.constant 0 : i32
    %c0_i32_0 = arith.constant 0 : i32
    %c0_i32_1 = arith.constant 0 : i32
    return %c0_i32, %c0_i32_0 : i32, i32
  }
  func.func @transform_6(%arg0: i32) -> (i32, i32) {
    %c0_i32 = arith.constant 0 : i32
    %c0_i32_0 = arith.constant 0 : i32
    %c0_i32_1 = arith.constant 0 : i32
    return %c0_i32, %c0_i32_0 : i32, i32
  }
  func.func @transform_7(%arg0: i32) -> (i32, i32) {
    %c0_i32 = arith.constant 0 : i32
    %c0_i32_0 = arith.constant 0 : i32
    %c0_i32_1 = arith.constant 0 : i32
    return %c0_i32, %c0_i32_0 : i32, i32
  }
  func.func @transform_8(%arg0: i32) -> (i32, i32) {
    %c0_i32 = arith.constant 0 : i32
    %c0_i32_0 = arith.constant 0 : i32
    %c0_i32_1 = arith.constant 0 : i32
    return %c0_i32, %c0_i32_0 : i32, i32
  }
  func.func @transform_9(%arg0: i32) -> (i32, i32) {
    %c0_i32 = arith.constant 0 : i32
    %c0_i32_0 = arith.constant 0 : i32
    %c0_i32_1 = arith.constant 0 : i32
    return %c0_i32, %c0_i32_0 : i32, i32
  }
  func.func @transform_10(%arg0: i32) -> (i32, i32) {
    %c0_i32 = arith.constant 0 : i32
    %c0_i32_0 = arith.constant 0 : i32
    %c0_i32_1 = arith.constant 0 : i32
    return %c0_i32, %c0_i32_0 : i32, i32
  }
  func.func @transform_11(%arg0: i32) -> (i32, i32) {
    %c0_i32 = arith.constant 0 : i32
    %c0_i32_0 = arith.constant 0 : i32
    %c0_i32_1 = arith.constant 0 : i32
    return %c0_i32, %c0_i32_0 : i32, i32
  }
  func.func @transform_12(%arg0: i32) -> (i32, i32) {
    %c0_i32 = arith.constant 0 : i32
    %c0_i32_0 = arith.constant 0 : i32
    %c0_i32_1 = arith.constant 0 : i32
    return %c0_i32, %c0_i32_0 : i32, i32
  }
  func.func @transform_13(%arg0: i32) -> (i32, i32) {
    %c0_i32 = arith.constant 0 : i32
    %c0_i32_0 = arith.constant 0 : i32
    %c0_i32_1 = arith.constant 0 : i32
    return %c0_i32, %c0_i32_0 : i32, i32
  }
  func.func @transform_14(%arg0: i32) -> (i32, i32) {
    %c0_i32 = arith.constant 0 : i32
    %c0_i32_0 = arith.constant 0 : i32
    %c0_i32_1 = arith.constant 0 : i32
    return %c0_i32, %c0_i32_0 : i32, i32
  }
  func.func @transform_15(%arg0: i32) -> (i32, i32) {
    %c0_i32 = arith.constant 0 : i32
    %c0_i32_0 = arith.constant 0 : i32
    %c0_i32_1 = arith.constant 0 : i32
    return %c0_i32, %c0_i32_0 : i32, i32
  }
}

</mosaic_0001>

<bundles_post_ra>
// kernel: encoder_forward.3
= control target key start
LH: loop header
LB: loop body
LE: loop exit
PB: predicated region body
PF: predicated region fallthrough
CT: control target
= control target key end

     0   :  { %vm538_vm0 = vcmask 261120   ;;  %vm3554_vm1 = vcmask 257024   ;;  %s10341_s1 = inlined_call_operand.vmem [shape: bf16[32,32], index: 1, kind: input, shape index: {}]   ;;  %s10342_s0 = inlined_call_operand.vmem [shape: bf16[1152,32], index: 0, kind: input, shape index: {}]   ;;  %s10343_s2 = inlined_call_operand.vmem [shape: f32[1,32], index: 2, kind: input, shape index: {}]   ;;  %s10344_s3 = inlined_call_operand.vmem [shape: f32[1,32], index: 3, kind: input, shape index: {}]   ;;  %s10345_s4 = inlined_call_operand.vmem [shape: bf16[1152,32], index: 4, kind: output, shape index: {}]  }
   0x1   :  { %v4365_v0 = vld [vmem:[%s10341_s1] sm:$0xff]   ;;  %v4366_v1 = vld [vmem:[%s10341_s1 + $0x8] sm:$0xff]   ;;  %v4369_v4 = vld [vmem:[%s10342_s0 + $0x10] sm:$0xff]  }
   0x2   :  { %4213 = vmatprep.subr.bf16.mxu0 %v4365_v0  ;;  %v4367_v2 = vld [vmem:[%s10342_s0] sm:$0xff]   ;;  %4361 = vmatprep.subr.bf16.mxu1 %v4365_v0  ;;  %v4368_v3 = vld [vmem:[%s10342_s0 + $0x8] sm:$0xff]   ;;  %v4370_v5 = vld [vmem:[%s10342_s0 + $0x18] sm:$0xff]  }
   0x3   :  { %4214 = vmatpush3.bf16.msra.mxu0 %v4365_v0  ;;  %4363 = vmatpush3.bf16.msra.mxu1 %v4365_v0  ;;  %v4371_v6 = vld [vmem:[%s10342_s0 + $0x20] sm:$0xff]   ;;  %v4372_v7 = vld [vmem:[%s10342_s0 + $0x28] sm:$0xff]   ;;  %v4373_v8 = vld [vmem:[%s10342_s0 + $0x30] sm:$0xff]  }
   0x4   :  { %4215 = vmatprep.subr.bf16.mxu0 %v4366_v1  ;;  %4217 = vmatprep.mubr.msk.bf16.mxu0 %vm538_vm0, %v4367_v2  ;;  %v4374_v9 = vld [vmem:[%s10342_s0 + $0x38] sm:$0xff]   ;;  %v4375_v10 = vld [vmem:[%s10342_s0 + $0x40] sm:$0xff]   ;;  %v4376_v11 = vld [vmem:[%s10342_s0 + $0x48] sm:$0xff]  }
   0x5   :  { %4362 = vmatprep.subr.bf16.mxu1 %v4366_v1  ;;  %v4377_v12 = vld [vmem:[%s10342_s0 + $0x50] sm:$0xff]   ;;  %v4403_v13 = vld [vmem:[%s10342_s0 + $0x120] sm:$0xff]   ;;  %v4404_v14 = vld [vmem:[%s10342_s0 + $0x128] sm:$0xff]  }
   0x6   :  { %4289 = vmatprep.mubr.msk.bf16.mxu1 %vm538_vm0, %v4403_v13  ;;  %v4405_v15 = vld [vmem:[%s10342_s0 + $0x130] sm:$0xff]   ;;  %v4378_v16 = vld [vmem:[%s10342_s0 + $0x58] sm:$0xff]   ;;  %v4407_v18 = vld [vmem:[%s10342_s0 + $0x140] sm:$0xff]  }
   0x7   :  { %4216 = vmatpush3.bf16.msra.mxu0 %v4366_v1  ;;  %4364 = vmatpush3.bf16.msra.mxu1 %v4366_v1  ;;  %v4406_v17 = vld [vmem:[%s10342_s0 + $0x138] sm:$0xff]   ;;  %v4379_v19 = vld [vmem:[%s10342_s0 + $0x60] sm:$0xff]   ;;  %v4380_v20 = vld [vmem:[%s10342_s0 + $0x68] sm:$0xff]  }
   0x8   :  { %v4408_v21 = vld [vmem:[%s10342_s0 + $0x148] sm:$0xff]   ;;  %v4409_v22 = vld [vmem:[%s10342_s0 + $0x150] sm:$0xff]   ;;  %v4410_v24 = vld [vmem:[%s10342_s0 + $0x158] sm:$0xff]  }
   0x9   :  { %v4381_v23 = vld [vmem:[%s10342_s0 + $0x70] sm:$0xff]   ;;  %v4382_v25 = vld [vmem:[%s10342_s0 + $0x78] sm:$0xff]   ;;  %v4411_v26 = vld [vmem:[%s10342_s0 + $0x160] sm:$0xff]  }
   0xa   :  { %4218 = vmatmul.mubr.msk.bf16.vlgmr.msra.gmra.mrb[0].mxu0 %vm538_vm0, %v4368_v3  ;;  %4290 = vmatmul.mubr.msk.bf16.vlgmr.msra.gmra.mrb[0].mxu1 %vm538_vm0, %v4404_v14  ;;  %v4383_v27 = vld [vmem:[%s10342_s0 + $0x80] sm:$0xff]   ;;  %v4412_v28 = vld [vmem:[%s10342_s0 + $0x168] sm:$0xff]   ;;  %v4413_v30 = vld [vmem:[%s10342_s0 + $0x170] sm:$0xff]  }
   0xb   :  { %4221 = vmatprep.mubr.msk.bf16.mxu0 %vm538_vm0, %v4369_v4  ;;  %4293 = vmatprep.mubr.msk.bf16.mxu1 %vm538_vm0, %v4405_v15  ;;  %v4384_v29 = vld [vmem:[%s10342_s0 + $0x88] sm:$0xff]   ;;  %v4385_v31 = vld [vmem:[%s10342_s0 + $0x90] sm:$0xff]   ;;  %v4414_v32 = vld [vmem:[%s10342_s0 + $0x178] sm:$0xff]  }
   0xc   :  { %v4386_v33 = vld [vmem:[%s10342_s0 + $0x98] sm:$0xff]   ;;  %v4415_v34 = vld [vmem:[%s10342_s0 + $0x180] sm:$0xff]   ;;  %v4416_v36 = vld [vmem:[%s10342_s0 + $0x188] sm:$0xff]  }
   0xd   :  { %v4387_v35 = vld [vmem:[%s10342_s0 + $0xa0] sm:$0xff]   ;;  %v4388_v37 = vld [vmem:[%s10342_s0 + $0xa8] sm:$0xff]   ;;  %v4417_v38 = vld [vmem:[%s10342_s0 + $0x190] sm:$0xff]  }
   0xe   :  { %v4389_v39 = vld [vmem:[%s10342_s0 + $0xb0] sm:$0xff]   ;;  %v4418_v40 = vld [vmem:[%s10342_s0 + $0x198] sm:$0xff]   ;;  %v4419_v42 = vld [vmem:[%s10342_s0 + $0x1a0] sm:$0xff]  }
   0xf   :  { %v4390_v41 = vld [vmem:[%s10342_s0 + $0xb8] sm:$0xff]   ;;  %v4391_v43 = vld [vmem:[%s10342_s0 + $0xc0] sm:$0xff]   ;;  %v4420_v44 = vld [vmem:[%s10342_s0 + $0x1a8] sm:$0xff]  }
  0x10   :  { %v4392_v45 = vld [vmem:[%s10342_s0 + $0xc8] sm:$0xff]   ;;  %v4421_v46 = vld [vmem:[%s10342_s0 + $0x1b0] sm:$0xff]   ;;  %v4422_v48 = vld [vmem:[%s10342_s0 + $0x1b8] sm:$0xff]  }
  0x11   :  { %v4393_v47 = vld [vmem:[%s10342_s0 + $0xd0] sm:$0xff]   ;;  %v4394_v49 = vld [vmem:[%s10342_s0 + $0xd8] sm:$0xff]   ;;  %v4423_v50 = vld [vmem:[%s10342_s0 + $0x1c0] sm:$0xff]  }
  0x12   :  { %4222 = vmatmul.mubr.msk.bf16.gmra.mrb[4].mxu0 %vm538_vm0, %v4370_v5  ;;  %4294 = vmatmul.mubr.msk.bf16.gmra.mrb[4].mxu1 %vm538_vm0, %v4406_v17  ;;  %v4395_v51 = vld [vmem:[%s10342_s0 + $0xe0] sm:$0xff]   ;;  %v4424_v52 = vld [vmem:[%s10342_s0 + $0x1c8] sm:$0xff]   ;;  %v4425_v54 = vld [vmem:[%s10342_s0 + $0x1d0] sm:$0xff]  }
  0x13   :  { %4225 = vmatprep.mubr.msk.bf16.mxu0 %vm538_vm0, %v4371_v6  ;;  %4297 = vmatprep.mubr.msk.bf16.mxu1 %vm538_vm0, %v4407_v18  ;;  %v4396_v53 = vld [vmem:[%s10342_s0 + $0xe8] sm:$0xff]   ;;  %v4397_v55 = vld [vmem:[%s10342_s0 + $0xf0] sm:$0xff]   ;;  %v4426_v56 = vld [vmem:[%s10342_s0 + $0x1d8] sm:$0xff]  }
  0x14   :  { %v4398_v57 = vld [vmem:[%s10342_s0 + $0xf8] sm:$0xff]   ;;  %v4427_v58 = vld [vmem:[%s10342_s0 + $0x1e0] sm:$0xff]   ;;  %v4428_v60 = vld [vmem:[%s10342_s0 + $0x1e8] sm:$0xff]  }
  0x15   :  { %v4399_v59 = vld [vmem:[%s10342_s0 + $0x100] sm:$0xff]   ;;  %v4400_v61 = vld [vmem:[%s10342_s0 + $0x108] sm:$0xff]   ;;  %v4429_v62 = vld [vmem:[%s10342_s0 + $0x1f0] sm:$0xff]  }
  0x16   :  { %v4401_v63 = vld [vmem:[%s10342_s0 + $0x110] sm:$0xff]   ;;  %v4430_v0 = vld [vmem:[%s10342_s0 + $0x1f8] sm:$0xff]   ;;  %v4431_v2 = vld [vmem:[%s10342_s0 + $0x200] sm:$0xff]  }
  0x17   :  { %v4402_v1 = vld [vmem:[%s10342_s0 + $0x118] sm:$0xff]   ;;  %v4432_v3 = vld [vmem:[%s10342_s0 + $0x208] sm:$0xff]   ;;  %v4433_v4 = vld [vmem:[%s10342_s0 + $0x210] sm:$0xff]  }
  0x18   :  { %v4434_v5 = vld [vmem:[%s10342_s0 + $0x218] sm:$0xff]   ;;  %v4435_v6 = vld [vmem:[%s10342_s0 + $0x220] sm:$0xff]  }
  0x1a   :  { %4226 = vmatmul.mubr.msk.bf16.gmra.mrb[8].mxu0 %vm538_vm0, %v4372_v7  ;;  %4298 = vmatmul.mubr.msk.bf16.gmra.mrb[8].mxu1 %vm538_vm0, %v4408_v21  ;;  %v4436_v7 = vld [vmem:[%s10342_s0 + $0x228] sm:$0xff]  }
  0x1b   :  { %4229 = vmatprep.mubr.msk.bf16.mxu0 %vm538_vm0, %v4373_v8  ;;  %4301 = vmatprep.mubr.msk.bf16.mxu1 %vm538_vm0, %v4409_v22  ;;  %v4437_v8 = vld [vmem:[%s10342_s0 + $0x230] sm:$0xff]  }
  0x22   :  { %4230 = vmatmul.mubr.msk.bf16.gmra.mrb[12].mxu0 %vm538_vm0, %v4374_v9  ;;  %4302 = vmatmul.mubr.msk.bf16.gmra.mrb[12].mxu1 %vm538_vm0, %v4410_v24  ;;  %v4438_v9 = vld [vmem:[%s10342_s0 + $0x238] sm:$0xff]  }
  0x23   :  { %4233 = vmatprep.mubr.msk.bf16.mxu0 %vm538_vm0, %v4375_v10  ;;  %4305 = vmatprep.mubr.msk.bf16.mxu1 %vm538_vm0, %v4411_v26 }
  0x2a   :  { %4234 = vmatmul.mubr.msk.bf16.gmra.mrb[16].mxu0 %vm538_vm0, %v4376_v11  ;;  %4306 = vmatmul.mubr.msk.bf16.gmra.mrb[16].mxu1 %vm538_vm0, %v4412_v28 }
  0x2b   :  { %4237 = vmatprep.mubr.msk.bf16.mxu0 %vm538_vm0, %v4377_v12  ;;  %4309 = vmatprep.mubr.msk.bf16.mxu1 %vm538_vm0, %v4413_v30 }
  0x32   :  { %4238 = vmatmul.mubr.msk.bf16.gmra.mrb[20].mxu0 %vm538_vm0, %v4378_v16  ;;  %4310 = vmatmul.mubr.msk.bf16.gmra.mrb[20].mxu1 %vm538_vm0, %v4414_v32 }
  0x33   :  { %4241 = vmatprep.mubr.msk.bf16.mxu0 %vm538_vm0, %v4379_v19  ;;  %4313 = vmatprep.mubr.msk.bf16.mxu1 %vm538_vm0, %v4415_v34 }
  0x3a   :  { %4242 = vmatmul.mubr.msk.bf16.gmra.mrb[24].mxu0 %vm538_vm0, %v4380_v20  ;;  %4314 = vmatmul.mubr.msk.bf16.gmra.mrb[24].mxu1 %vm538_vm0, %v4416_v36 }
  0x3b   :  { %4245 = vmatprep.mubr.msk.bf16.mxu0 %vm538_vm0, %v4381_v23  ;;  %4317 = vmatprep.mubr.msk.bf16.mxu1 %vm538_vm0, %v4417_v38 }
  0x42   :  { %4246 = vmatmul.mubr.msk.bf16.gmra.mrb[28].mxu0 %vm538_vm0, %v4382_v25  ;;  %4318 = vmatmul.mubr.msk.bf16.gmra.mrb[28].mxu1 %vm538_vm0, %v4418_v40 }
  0x43   :  { %4249 = vmatprep.mubr.msk.bf16.mxu0 %vm538_vm0, %v4383_v27  ;;  %4321 = vmatprep.mubr.msk.bf16.mxu1 %vm538_vm0, %v4419_v42 }
  0x4a   :  { %4250 = vmatmul.mubr.msk.bf16.gmra.mrb[32].mxu0 %vm538_vm0, %v4384_v29  ;;  %4322 = vmatmul.mubr.msk.bf16.gmra.mrb[32].mxu1 %vm538_vm0, %v4420_v44 }
  0x4b   :  { %4253 = vmatprep.mubr.msk.bf16.mxu0 %vm538_vm0, %v4385_v31  ;;  %4325 = vmatprep.mubr.msk.bf16.mxu1 %vm538_vm0, %v4421_v46 }
  0x52   :  { %4254 = vmatmul.mubr.msk.bf16.gmra.mrb[36].mxu0 %vm538_vm0, %v4386_v33  ;;  %4326 = vmatmul.mubr.msk.bf16.gmra.mrb[36].mxu1 %vm538_vm0, %v4422_v48 }
  0x53   :  { %4257 = vmatprep.mubr.msk.bf16.mxu0 %vm538_vm0, %v4387_v35  ;;  %4329 = vmatprep.mubr.msk.bf16.mxu1 %vm538_vm0, %v4423_v50 }
  0x5a   :  { %4258 = vmatmul.mubr.msk.bf16.gmra.mrb[40].mxu0 %vm538_vm0, %v4388_v37  ;;  %4330 = vmatmul.mubr.msk.bf16.gmra.mrb[40].mxu1 %vm538_vm0, %v4424_v52 }
  0x5b   :  { %4261 = vmatprep.mubr.msk.bf16.mxu0 %vm538_vm0, %v4389_v39  ;;  %4333 = vmatprep.mubr.msk.bf16.mxu1 %vm538_vm0, %v4425_v54 }
  0x62   :  { %4262 = vmatmul.mubr.msk.bf16.gmra.mrb[44].mxu0 %vm538_vm0, %v4390_v41  ;;  %4334 = vmatmul.mubr.msk.bf16.gmra.mrb[44].mxu1 %vm538_vm0, %v4426_v56 }
  0x63   :  { %4265 = vmatprep.mubr.msk.bf16.mxu0 %vm538_vm0, %v4391_v43  ;;  %4337 = vmatprep.mubr.msk.bf16.mxu1 %vm538_vm0, %v4427_v58 }
  0x6a   :  { %4266 = vmatmul.mubr.msk.bf16.gmra.mrb[48].mxu0 %vm538_vm0, %v4392_v45  ;;  %4338 = vmatmul.mubr.msk.bf16.gmra.mrb[48].mxu1 %vm538_vm0, %v4428_v60 }
  0x6b   :  { %4269 = vmatprep.mubr.msk.bf16.mxu0 %vm538_vm0, %v4393_v47  ;;  %4341 = vmatprep.mubr.msk.bf16.mxu1 %vm538_vm0, %v4429_v62 }
  0x72   :  { %4270 = vmatmul.mubr.msk.bf16.gmra.mrb[52].mxu0 %vm538_vm0, %v4394_v49  ;;  %4342 = vmatmul.mubr.msk.bf16.gmra.mrb[52].mxu1 %vm538_vm0, %v4430_v0 }
  0x73   :  { %4273 = vmatprep.mubr.msk.bf16.mxu0 %vm538_vm0, %v4395_v51  ;;  %4345 = vmatprep.mubr.msk.bf16.mxu1 %vm538_vm0, %v4431_v2 }
  0x7a   :  { %4274 = vmatmul.mubr.msk.bf16.gmra.mrb[56].mxu0 %vm538_vm0, %v4396_v53  ;;  %4346 = vmatmul.mubr.msk.bf16.gmra.mrb[56].mxu1 %vm538_vm0, %v4432_v3 }
  0x7b   :  { %4277 = vmatprep.mubr.msk.bf16.mxu0 %vm538_vm0, %v4397_v55  ;;  %4349 = vmatprep.mubr.msk.bf16.mxu1 %vm538_vm0, %v4433_v4 }
  0x82   :  { %4278 = vmatmul.mubr.msk.bf16.gmra.mrb[60].mxu0 %vm538_vm0, %v4398_v57  ;;  %4350 = vmatmul.mubr.msk.bf16.gmra.mrb[60].mxu1 %vm538_vm0, %v4434_v5 }
  0x83   :  { %4281 = vmatprep.mubr.msk.bf16.mxu0 %vm538_vm0, %v4399_v59  ;;  %4353 = vmatprep.mubr.msk.bf16.mxu1 %vm538_vm0, %v4435_v6 }
  0x8a   :  { %4282 = vmatmul.mubr.msk.bf16.gmra.mrb[64].mxu0 %vm538_vm0, %v4400_v61  ;;  %4354 = vmatmul.mubr.msk.bf16.gmra.mrb[64].mxu1 %vm538_vm0, %v4436_v7 }
  0x8b   :  { %4285 = vmatprep.mubr.msk.bf16.mxu0 %vm538_vm0, %v4401_v63  ;;  %4357 = vmatprep.mubr.msk.bf16.mxu1 %vm538_vm0, %v4437_v8 }
  0x92   :  { %4286 = vmatmul.mubr.msk.bf16.gmra.mrb[68].mxu0 %vm538_vm0, %v4402_v1  ;;  %4358 = vmatmul.mubr.msk.bf16.gmra.mrb[68].mxu1 %vm538_vm0, %v4438_v9 }
  0xdd   :  { %v4760_v10 = vpop.f32.mrb[0].mxu0 }
  0xde   :  { %10825 = vst [vmem:[#allocation2_spill] sm:$0xff] %v4760_v10  ;;  %v4762_v11 = vpop.f32.mrb[1].mxu0  ;;  %v1661_v15 = vmul.f32 %v4760_v10, %v4760_v10  ;;  %v1369_v20 = vsel %vm538_vm0, %v4760_v10, 0.0 }
  0xdf   :  { %10826 = vst [vmem:[#allocation3_spill] sm:$0xff] %v4762_v11  ;;  %v1659_v12 = vmul.f32 %v4762_v11, %v4762_v11  ;;  %v4766_v13 = vpop.f32.mrb[2].mxu0  ;;  %v1366_v16 = vsel %vm538_vm0, %v4762_v11, 0.0 }
  0xe0   :  { %10827 = vst [vmem:[#allocation4_spill] sm:$0xff] %v4766_v13  ;;  %v4768_v14 = vpop.f32.mrb[3].mxu0  ;;  %v1662_v22 = vmul.f32 %v4766_v13, %v4766_v13  ;;  %v1806_v26 = vsel %vm538_vm0, %v1661_v15, 0.0  ;;  %v1371_v27 = vsel %vm538_vm0, %v4766_v13, 0.0 }
  0xe1   :  { %10828 = vst [vmem:[#allocation5_spill] sm:$0xff] %v4768_v14  ;;  %v1367_v17 = vsel %vm538_vm0, %v4768_v14, 0.0  ;;  %v1660_v18 = vmul.f32 %v4768_v14, %v4768_v14  ;;  %v1803_v21 = vsel %vm538_vm0, %v1659_v12, 0.0 }
  0xe2   :  { %v1368_v19 = vadd.f32 %v1367_v17, %v1366_v16  ;;  %v1808_v32 = vsel %vm538_vm0, %v1662_v22, 0.0 }
  0xe3   :  { %v1804_v23 = vsel %vm538_vm0, %v1660_v18, 0.0 }
  0xe4   :  { %v1370_v24 = vadd.f32 %v1369_v20, %v1368_v19  ;;  %v1805_v25 = vadd.f32 %v1804_v23, %v1803_v21 }
  0xe5   :  { %v4787_v28 = vpop.f32.mrb[4].mxu0 }
  0xe6   :  { %10829 = vst [vmem:[#allocation6_spill] sm:$0xff] %v4787_v28  ;;  %v1372_v29 = vadd.f32 %v1371_v27, %v1370_v24  ;;  %v1807_v30 = vadd.f32 %v1806_v26, %v1805_v25  ;;  %v4789_v31 = vpop.f32.mrb[5].mxu0  ;;  %v1665_v39 = vmul.f32 %v4787_v28, %v4787_v28  ;;  %v1377_v45 = vsel %vm538_vm0, %v4787_v28, 0.0 }
  0xe7   :  { %10830 = vst [vmem:[#allocation7_spill] sm:$0xff] %v4789_v31  ;;  %v1373_v33 = vsel %vm538_vm0, %v4789_v31, 0.0  ;;  %v1663_v34 = vmul.f32 %v4789_v31, %v4789_v31  ;;  %v4796_v35 = vpop.f32.mrb[6].mxu0 }
  0xe8   :  { %10831 = vst [vmem:[#allocation8_spill] sm:$0xff] %v4796_v35  ;;  %v1809_v36 = vadd.f32 %v1808_v32, %v1807_v30  ;;  %v1374_v37 = vadd.f32 %v1373_v33, %v1372_v29  ;;  %v4798_v38 = vpop.f32.mrb[7].mxu0  ;;  %v1666_v46 = vmul.f32 %v4796_v35, %v4796_v35  ;;  %v1814_v50 = vsel %vm538_vm0, %v1665_v39, 0.0 }
  0xe9   :  { %10832 = vst [vmem:[#allocation9_spill] sm:$0xff] %v4798_v38  ;;  %v1810_v40 = vsel %vm538_vm0, %v1663_v34, 0.0  ;;  %v1375_v41 = vsel %vm538_vm0, %v4798_v38, 0.0  ;;  %v1664_v42 = vmul.f32 %v4798_v38, %v4798_v38  ;;  %v1379_v51 = vsel %vm538_vm0, %v4796_v35, 0.0 }
  0xea   :  { %v1811_v43 = vadd.f32 %v1810_v40, %v1809_v36  ;;  %v1376_v44 = vadd.f32 %v1375_v41, %v1374_v37  ;;  %v1816_v56 = vsel %vm538_vm0, %v1666_v46, 0.0 }
  0xeb   :  { %v1812_v47 = vsel %vm538_vm0, %v1664_v42, 0.0  ;;  %v4868_v42 = vpop.f32.mrb[0].mxu1 }
  0xec   :  { %v1378_v48 = vadd.f32 %v1377_v45, %v1376_v44  ;;  %v1813_v49 = vadd.f32 %v1812_v47, %v1811_v43  ;;  %10841 = vst [vmem:[#allocation18_spill] sm:$0xff] %v4868_v42  ;;  %v4875_v46 = vpop.f32.mrb[1].mxu1 }
  0xed   :  { %v4815_v52 = vpop.f32.mrb[8].mxu0  ;;  %10843 = vst [vmem:[#allocation20_spill] sm:$0xff] %v4875_v46 }
  0xee   :  { %10833 = vst [vmem:[#allocation10_spill] sm:$0xff] %v4815_v52  ;;  %v1380_v53 = vadd.f32 %v1379_v51, %v1378_v48  ;;  %v1815_v54 = vadd.f32 %v1814_v50, %v1813_v49  ;;  %v4817_v55 = vpop.f32.mrb[9].mxu0  ;;  %v1669_v63 = vmul.f32 %v4815_v52, %v4815_v52  ;;  %v1385_v5 = vsel %vm538_vm0, %v4815_v52, 0.0  ;;  %v4879_v50 = vpop.f32.mrb[2].mxu1 }
  0xef   :  { %10834 = vst [vmem:[#allocation11_spill] sm:$0xff] %v4817_v55  ;;  %v1381_v57 = vsel %vm538_vm0, %v4817_v55, 0.0  ;;  %v1667_v58 = vmul.f32 %v4817_v55, %v4817_v55  ;;  %v4824_v59 = vpop.f32.mrb[10].mxu0  ;;  %10845 = vst [vmem:[#allocation22_spill] sm:$0xff] %v4879_v50 }
  0xf0   :  { %10835 = vst [vmem:[#allocation12_spill] sm:$0xff] %v4824_v59  ;;  %v1817_v60 = vadd.f32 %v1816_v56, %v1815_v54  ;;  %v1382_v61 = vadd.f32 %v1381_v57, %v1380_v53  ;;  %v4826_v62 = vpop.f32.mrb[11].mxu0  ;;  %v1670_v6 = vmul.f32 %v4824_v59, %v4824_v59  ;;  %v1822_v12 = vsel %vm538_vm0, %v1669_v63, 0.0  ;;  %v4888_v57 = vpop.f32.mrb[3].mxu1 }
  0xf1   :  { %10836 = vst [vmem:[#allocation13_spill] sm:$0xff] %v4826_v62  ;;  %v1818_v0 = vsel %vm538_vm0, %v1667_v58, 0.0  ;;  %v1383_v1 = vsel %vm538_vm0, %v4826_v62, 0.0  ;;  %v1668_v2 = vmul.f32 %v4826_v62, %v4826_v62  ;;  %v1387_v15 = vsel %vm538_vm0, %v4824_v59, 0.0  ;;  %10847 = vst [vmem:[#allocation24_spill] sm:$0xff] %v4888_v57 }
  0xf2   :  { %v1819_v3 = vadd.f32 %v1818_v0, %v1817_v60  ;;  %v1384_v4 = vadd.f32 %v1383_v1, %v1382_v61  ;;  %v1824_v20 = vsel %vm538_vm0, %v1670_v6, 0.0 }
  0xf3   :  { %v1820_v7 = vsel %vm538_vm0, %v1668_v2, 0.0 }
  0xf4   :  { %v1386_v8 = vadd.f32 %v1385_v5, %v1384_v4  ;;  %v1821_v9 = vadd.f32 %v1820_v7, %v1819_v3 }
  0xf5   :  { %v4843_v16 = vpop.f32.mrb[12].mxu0 }
  0xf6   :  { %10837 = vst [vmem:[#allocation14_spill] sm:$0xff] %v4843_v16  ;;  %v1388_v17 = vadd.f32 %v1387_v15, %v1386_v8  ;;  %v1823_v18 = vadd.f32 %v1822_v12, %v1821_v9  ;;  %v4845_v19 = vpop.f32.mrb[13].mxu0  ;;  %v1673_v27 = vmul.f32 %v4843_v16, %v4843_v16  ;;  %v1393_v36 = vsel %vm538_vm0, %v4843_v16, 0.0  ;;  %v4904_v12 = vpop.f32.mrb[4].mxu1 }
  0xf7   :  { %10838 = vst [vmem:[#allocation15_spill] sm:$0xff] %v4845_v19  ;;  %v1389_v21 = vsel %vm538_vm0, %v4845_v19, 0.0  ;;  %v1671_v22 = vmul.f32 %v4845_v19, %v4845_v19  ;;  %v4852_v23 = vpop.f32.mrb[14].mxu0  ;;  %10849 = vst [vmem:[#allocation26_spill] sm:$0xff] %v4904_v12 }
  0xf8   :  { %10839 = vst [vmem:[#allocation16_spill] sm:$0xff] %v4852_v23  ;;  %v1825_v24 = vadd.f32 %v1824_v20, %v1823_v18  ;;  %v1390_v25 = vadd.f32 %v1389_v21, %v1388_v17  ;;  %v4854_v26 = vpop.f32.mrb[15].mxu0  ;;  %v1674_v37 = vmul.f32 %v4852_v23, %v4852_v23  ;;  %v1830_v43 = vsel %vm538_vm0, %v1673_v27, 0.0  ;;  %v4911_v20 = vpop.f32.mrb[5].mxu1 }
  0xf9   :  { %10840 = vst [vmem:[#allocation17_spill] sm:$0xff] %v4854_v26  ;;  %v1826_v29 = vsel %vm538_vm0, %v1671_v22, 0.0  ;;  %v1391_v30 = vsel %vm538_vm0, %v4854_v26, 0.0  ;;  %v1672_v32 = vmul.f32 %v4854_v26, %v4854_v26  ;;  %v1395_v44 = vsel %vm538_vm0, %v4852_v23, 0.0  ;;  %10851 = vst [vmem:[#allocation28_spill] sm:$0xff] %v4911_v20 }
  0xfa   :  { %v1827_v33 = vadd.f32 %v1826_v29, %v1825_v24  ;;  %v1392_v34 = vadd.f32 %v1391_v30, %v1390_v25  ;;  %v1832_v51 = vsel %vm538_vm0, %v1674_v37, 0.0  ;;  %v4915_v25 = vpop.f32.mrb[6].mxu1 }
  0xfb   :  { %v1828_v39 = vsel %vm538_vm0, %v1672_v32, 0.0  ;;  %10853 = vst [vmem:[#allocation30_spill] sm:$0xff] %v4915_v25 }
  0xfc   :  { %v1394_v40 = vadd.f32 %v1393_v36, %v1392_v34  ;;  %v1829_v41 = vadd.f32 %v1828_v39, %v1827_v33  ;;  %v4924_v33 = vpop.f32.mrb[7].mxu1 }
  0xfd   :  { %v4873_v45 = vpop.f32.mrb[16].mxu0  ;;  %10855 = vst [vmem:[#allocation32_spill] sm:$0xff] %v4924_v33 }
  0xfe   :  { %10842 = vst [vmem:[#allocation19_spill] sm:$0xff] %v4873_v45  ;;  %v1831_v47 = vadd.f32 %v1830_v43, %v1829_v41  ;;  %v4877_v48 = vpop.f32.mrb[17].mxu0  ;;  %v1396_v49 = vadd.f32 %v1395_v44, %v1394_v40  ;;  %v1677_v63 = vmul.f32 %v4873_v45, %v4873_v45  ;;  %v1401_v5 = vsel %vm538_vm0, %v4873_v45, 0.0 }
  0xff   :  { %10844 = vst [vmem:[#allocation21_spill] sm:$0xff] %v4877_v48  ;;  %v1397_v53 = vsel %vm538_vm0, %v4877_v48, 0.0  ;;  %v1675_v54 = vmul.f32 %v4877_v48, %v4877_v48  ;;  %v4886_v56 = vpop.f32.mrb[18].mxu0 }
 0x100   :  { %10846 = vst [vmem:[#allocation23_spill] sm:$0xff] %v4886_v56  ;;  %v1398_v58 = vadd.f32 %v1397_v53, %v1396_v49  ;;  %v1833_v60 = vadd.f32 %v1832_v51, %v1831_v47  ;;  %v4890_v61 = vpop.f32.mrb[19].mxu0  ;;  %v1678_v6 = vmul.f32 %v4886_v56, %v4886_v56  ;;  %v1838_v15 = vsel %vm538_vm0, %v1677_v63, 0.0 }
 0x101   :  { %10848 = vst [vmem:[#allocation25_spill] sm:$0xff] %v4890_v61  ;;  %v1834_v0 = vsel %vm538_vm0, %v1675_v54, 0.0  ;;  %v1399_v1 = vsel %vm538_vm0, %v4890_v61, 0.0  ;;  %v1676_v2 = vmul.f32 %v4890_v61, %v4890_v61  ;;  %v1403_v17 = vsel %vm538_vm0, %v4886_v56, 0.0 }
 0x102   :  { %v1835_v3 = vadd.f32 %v1834_v0, %v1833_v60  ;;  %v1400_v4 = vadd.f32 %v1399_v1, %v1398_v58  ;;  %v1840_v27 = vsel %vm538_vm0, %v1678_v6, 0.0  ;;  %v4940_v60 = vpop.f32.mrb[8].mxu1 }
 0x103   :  { %v1836_v7 = vsel %vm538_vm0, %v1676_v2, 0.0  ;;  %10857 = vst [vmem:[#allocation34_spill] sm:$0xff] %v4940_v60  ;;  %v4947_v2 = vpop.f32.mrb[9].mxu1 }
 0x104   :  { %v1402_v8 = vadd.f32 %v1401_v5, %v1400_v4  ;;  %v1837_v9 = vadd.f32 %v1836_v7, %v1835_v3  ;;  %10859 = vst [vmem:[#allocation36_spill] sm:$0xff] %v4947_v2  ;;  %v4951_v6 = vpop.f32.mrb[10].mxu1 }
 0x105   :  { %v4909_v18 = vpop.f32.mrb[20].mxu0  ;;  %10861 = vst [vmem:[#allocation38_spill] sm:$0xff] %v4951_v6 }
 0x106   :  { %10850 = vst [vmem:[#allocation27_spill] sm:$0xff] %v4909_v18  ;;  %v1839_v21 = vadd.f32 %v1838_v15, %v1837_v9  ;;  %v4913_v22 = vpop.f32.mrb[21].mxu0  ;;  %v1404_v24 = vadd.f32 %v1403_v17, %v1402_v8  ;;  %v1681_v39 = vmul.f32 %v4909_v18, %v4909_v18  ;;  %v1409_v49 = vsel %vm538_vm0, %v4909_v18, 0.0  ;;  %v4960_v17 = vpop.f32.mrb[11].mxu1 }
 0x107   :  { %10852 = vst [vmem:[#allocation29_spill] sm:$0xff] %v4913_v22  ;;  %v1405_v29 = vsel %vm538_vm0, %v4913_v22, 0.0  ;;  %v1679_v30 = vmul.f32 %v4913_v22, %v4913_v22  ;;  %v4922_v32 = vpop.f32.mrb[22].mxu0  ;;  %10863 = vst [vmem:[#allocation40_spill] sm:$0xff] %v4960_v17 }
 0x108   :  { %10854 = vst [vmem:[#allocation31_spill] sm:$0xff] %v4922_v32  ;;  %v1406_v34 = vadd.f32 %v1405_v29, %v1404_v24  ;;  %v1841_v36 = vadd.f32 %v1840_v27, %v1839_v21  ;;  %v4926_v37 = vpop.f32.mrb[23].mxu0  ;;  %v1682_v51 = vmul.f32 %v4922_v32, %v4922_v32  ;;  %v1846_v63 = vsel %vm538_vm0, %v1681_v39, 0.0 }
 0x109   :  { %10856 = vst [vmem:[#allocation33_spill] sm:$0xff] %v4926_v37  ;;  %v1842_v40 = vsel %vm538_vm0, %v1679_v30, 0.0  ;;  %v1407_v41 = vsel %vm538_vm0, %v4926_v37, 0.0  ;;  %v1680_v43 = vmul.f32 %v4926_v37, %v4926_v37  ;;  %v1411_v0 = vsel %vm538_vm0, %v4922_v32, 0.0 }
 0x10a   :  { %v1843_v44 = vadd.f32 %v1842_v40, %v1841_v36  ;;  %v1408_v47 = vadd.f32 %v1407_v41, %v1406_v34  ;;  %v1848_v7 = vsel %vm538_vm0, %v1682_v51, 0.0  ;;  %v4976_v51 = vpop.f32.mrb[12].mxu1 }
 0x10b   :  { %v1844_v53 = vsel %vm538_vm0, %v1680_v43, 0.0  ;;  %10865 = vst [vmem:[#allocation42_spill] sm:$0xff] %v4976_v51 }
 0x10c   :  { %v1410_v54 = vadd.f32 %v1409_v49, %v1408_v47  ;;  %v1845_v58 = vadd.f32 %v1844_v53, %v1843_v44 }
 0x10d   :  { %v4945_v1 = vpop.f32.mrb[24].mxu0 }
 0x10e   :  { %10858 = vst [vmem:[#allocation35_spill] sm:$0xff] %v4945_v1  ;;  %v1847_v3 = vadd.f32 %v1846_v63, %v1845_v58  ;;  %v4949_v4 = vpop.f32.mrb[25].mxu0  ;;  %v1412_v5 = vadd.f32 %v1411_v0, %v1410_v54  ;;  %v1685_v29 = vmul.f32 %v4945_v1, %v4945_v1  ;;  %v1417_v41 = vsel %vm538_vm0, %v4945_v1, 0.0  ;;  %v4983_v63 = vpop.f32.mrb[13].mxu1 }
 0x10f   :  { %10860 = vst [vmem:[#allocation37_spill] sm:$0xff] %v4949_v4  ;;  %v1413_v8 = vsel %vm538_vm0, %v4949_v4, 0.0  ;;  %v1683_v9 = vmul.f32 %v4949_v4, %v4949_v4  ;;  %v4958_v15 = vpop.f32.mrb[26].mxu0  ;;  %10867 = vst [vmem:[#allocation44_spill] sm:$0xff] %v4983_v63 }
 0x110   :  { %10862 = vst [vmem:[#allocation39_spill] sm:$0xff] %v4958_v15  ;;  %v1414_v21 = vadd.f32 %v1413_v8, %v1412_v5  ;;  %v1849_v24 = vadd.f32 %v1848_v7, %v1847_v3  ;;  %v4962_v27 = vpop.f32.mrb[27].mxu0  ;;  %v1686_v43 = vmul.f32 %v4958_v15, %v4958_v15  ;;  %v1854_v53 = vsel %vm538_vm0, %v1685_v29, 0.0  ;;  %v4987_v7 = vpop.f32.mrb[14].mxu1 }
 0x111   :  { %10864 = vst [vmem:[#allocation41_spill] sm:$0xff] %v4962_v27  ;;  %v1850_v30 = vsel %vm538_vm0, %v1683_v9, 0.0  ;;  %v1415_v34 = vsel %vm538_vm0, %v4962_v27, 0.0  ;;  %v1684_v36 = vmul.f32 %v4962_v27, %v4962_v27  ;;  %v1419_v54 = vsel %vm538_vm0, %v4958_v15, 0.0  ;;  %v4996_v29 = vpop.f32.mrb[15].mxu1 }
 0x112   :  { %v1851_v39 = vadd.f32 %v1850_v30, %v1849_v24  ;;  %v1416_v40 = vadd.f32 %v1415_v34, %v1414_v21  ;;  %v1856_v8 = vsel %vm538_vm0, %v1686_v43, 0.0  ;;  %10870 = vst [vmem:[#allocation47_spill] sm:$0xff] %v4996_v29 }
 0x113   :  { %v1852_v44 = vsel %vm538_vm0, %v1684_v36, 0.0 }
 0x114   :  { %v1418_v47 = vadd.f32 %v1417_v41, %v1416_v40  ;;  %v1853_v49 = vadd.f32 %v1852_v44, %v1851_v39 }
 0x115   :  { %v4981_v58 = vpop.f32.mrb[28].mxu0 }
 0x116   :  { %10866 = vst [vmem:[#allocation43_spill] sm:$0xff] %v4981_v58  ;;  %v1855_v0 = vadd.f32 %v1854_v53, %v1853_v49  ;;  %v4985_v3 = vpop.f32.mrb[29].mxu0  ;;  %v1420_v5 = vadd.f32 %v1419_v54, %v1418_v47  ;;  %v1689_v39 = vmul.f32 %v4981_v58, %v4981_v58  ;;  %v1425_v49 = vsel %vm538_vm0, %v4981_v58, 0.0 }
 0x117   :  { %10868 = vst [vmem:[#allocation45_spill] sm:$0xff] %v4985_v3  ;;  %v1421_v9 = vsel %vm538_vm0, %v4985_v3, 0.0  ;;  %v1687_v21 = vmul.f32 %v4985_v3, %v4985_v3  ;;  %v4994_v24 = vpop.f32.mrb[30].mxu0 }
 0x118   :  { %10869 = vst [vmem:[#allocation46_spill] sm:$0xff] %v4994_v24  ;;  %v1422_v30 = vadd.f32 %v1421_v9, %v1420_v5  ;;  %v1857_v34 = vadd.f32 %v1856_v8, %v1855_v0  ;;  %v4998_v36 = vpop.f32.mrb[31].mxu0  ;;  %v1690_v53 = vmul.f32 %v4994_v24, %v4994_v24  ;;  %v5012_v8 = vpop.f32.mrb[16].mxu1  ;;  %v1862_v9 = vsel %vm538_vm0, %v1689_v39, 0.0 }
 0x119   :  { %10871 = vst [vmem:[#allocation48_spill] sm:$0xff] %v4998_v36  ;;  %v1858_v40 = vsel %vm538_vm0, %v1687_v21, 0.0  ;;  %v1423_v41 = vsel %vm538_vm0, %v4998_v36, 0.0  ;;  %v1688_v43 = vmul.f32 %v4998_v36, %v4998_v36  ;;  %v1427_v21 = vsel %vm538_vm0, %v4994_v24, 0.0 }
 0x11a   :  { %v1859_v44 = vadd.f32 %v1858_v40, %v1857_v34  ;;  %v1424_v47 = vadd.f32 %v1423_v41, %v1422_v30  ;;  %v5019_v30 = vpop.f32.mrb[17].mxu1 }
 0x11b   :  { %v1860_v54 = vsel %vm538_vm0, %v1688_v43, 0.0  ;;  %v5023_v58 = vpop.f32.mrb[18].mxu1  ;;  %v1864_v43 = vsel %vm538_vm0, %v1690_v53, 0.0 }
 0x11c   :  { %v1426_v0 = vadd.f32 %v1425_v49, %v1424_v47  ;;  %v1861_v5 = vadd.f32 %v1860_v54, %v1859_v44  ;;  %v5032_v49 = vpop.f32.mrb[19].mxu1 }
 0x11d   :  { %v5017_v36 = vpop.f32.mrb[32].mxu0  ;;  %v5048_v1 = vpop.f32.mrb[20].mxu1 }
 0x11e   :  { %10872 = vst [vmem:[#allocation49_spill] sm:$0xff] %v5017_v36  ;;  %v1863_v34 = vadd.f32 %v1862_v9, %v1861_v5  ;;  %v5021_v40 = vpop.f32.mrb[33].mxu0  ;;  %v1428_v41 = vadd.f32 %v1427_v21, %v1426_v0  ;;  %v1693_v0 = vmul.f32 %v5017_v36, %v5017_v36  ;;  %v1433_v15 = vsel %vm538_vm0, %v5017_v36, 0.0 }
 0x11f   :  { %10873 = vst [vmem:[#allocation50_spill] sm:$0xff] %v5021_v40  ;;  %v1429_v44 = vsel %vm538_vm0, %v5021_v40, 0.0  ;;  %v1691_v39 = vmul.f32 %v5021_v40, %v5021_v40  ;;  %v5030_v47 = vpop.f32.mrb[34].mxu0 }
 0x120   :  { %10874 = vst [vmem:[#allocation51_spill] sm:$0xff] %v5030_v47  ;;  %v1430_v54 = vadd.f32 %v1429_v44, %v1428_v41  ;;  %v1865_v24 = vadd.f32 %v1864_v43, %v1863_v34  ;;  %v5034_v5 = vpop.f32.mrb[35].mxu0  ;;  %v1694_v34 = vmul.f32 %v5030_v47, %v5030_v47  ;;  %v1435_v27 = vsel %vm538_vm0, %v5030_v47, 0.0 }
 0x121   :  { %10875 = vst [vmem:[#allocation52_spill] sm:$0xff] %v5034_v5  ;;  %v1866_v9 = vsel %vm538_vm0, %v1691_v39, 0.0  ;;  %v1431_v53 = vsel %vm538_vm0, %v5034_v5, 0.0  ;;  %v1692_v21 = vmul.f32 %v5034_v5, %v5034_v5  ;;  %v1870_v39 = vsel %vm538_vm0, %v1693_v0, 0.0 }
 0x122   :  { %v1867_v40 = vadd.f32 %v1866_v9, %v1865_v24  ;;  %v1432_v3 = vadd.f32 %v1431_v53, %v1430_v54  ;;  %v5055_v24 = vpop.f32.mrb[21].mxu1 }
 0x123   :  { %v1868_v41 = vsel %vm538_vm0, %v1692_v21, 0.0  ;;  %v5059_v36 = vpop.f32.mrb[22].mxu1 }
 0x124   :  { %v1434_v43 = vadd.f32 %v1433_v15, %v1432_v3  ;;  %v1869_v44 = vadd.f32 %v1868_v41, %v1867_v40  ;;  %v1872_v15 = vsel %vm538_vm0, %v1694_v34, 0.0  ;;  %v5068_v21 = vpop.f32.mrb[23].mxu1 }
 0x125   :  { %v5053_v5 = vpop.f32.mrb[36].mxu0  ;;  %v5084_v18 = vpop.f32.mrb[24].mxu1 }
 0x126   :  { %10876 = vst [vmem:[#allocation53_spill] sm:$0xff] %v5053_v5  ;;  %v1871_v54 = vadd.f32 %v1870_v39, %v1869_v44  ;;  %v5057_v9 = vpop.f32.mrb[37].mxu0  ;;  %v1436_v53 = vadd.f32 %v1435_v27, %v1434_v43  ;;  %v1697_v27 = vmul.f32 %v5053_v5, %v5053_v5  ;;  %v1441_v32 = vsel %vm538_vm0, %v5053_v5, 0.0 }
 0x127   :  { %10877 = vst [vmem:[#allocation54_spill] sm:$0xff] %v5057_v9  ;;  %v1437_v3 = vsel %vm538_vm0, %v5057_v9, 0.0  ;;  %v1695_v40 = vmul.f32 %v5057_v9, %v5057_v9  ;;  %v5066_v0 = vpop.f32.mrb[38].mxu0 }
 0x128   :  { %10878 = vst [vmem:[#allocation55_spill] sm:$0xff] %v5066_v0  ;;  %v1438_v41 = vadd.f32 %v1437_v3, %v1436_v53  ;;  %v1873_v47 = vadd.f32 %v1872_v15, %v1871_v54  ;;  %v5070_v44 = vpop.f32.mrb[39].mxu0  ;;  %v1698_v54 = vmul.f32 %v5066_v0, %v5066_v0  ;;  %v1443_v37 = vsel %vm538_vm0, %v5066_v0, 0.0 }
 0x129   :  { %10879 = vst [vmem:[#allocation56_spill] sm:$0xff] %v5070_v44  ;;  %v1874_v43 = vsel %vm538_vm0, %v1695_v40, 0.0  ;;  %v1439_v34 = vsel %vm538_vm0, %v5070_v44, 0.0  ;;  %v1696_v39 = vmul.f32 %v5070_v44, %v5070_v44  ;;  %v1878_v40 = vsel %vm538_vm0, %v1697_v27, 0.0 }
 0x12a   :  { %v1875_v9 = vadd.f32 %v1874_v43, %v1873_v47  ;;  %v1440_v4 = vadd.f32 %v1439_v34, %v1438_v41  ;;  %v5091_v47 = vpop.f32.mrb[25].mxu1 }
 0x12b   :  { %v1876_v53 = vsel %vm538_vm0, %v1696_v39, 0.0  ;;  %v5095_v5 = vpop.f32.mrb[26].mxu1 }
 0x12c   :  { %v1442_v15 = vadd.f32 %v1441_v32, %v1440_v4  ;;  %v1877_v3 = vadd.f32 %v1876_v53, %v1875_v9  ;;  %v1880_v32 = vsel %vm538_vm0, %v1698_v54, 0.0  ;;  %v5104_v39 = vpop.f32.mrb[27].mxu1 }
 0x12d   :  { %v5089_v44 = vpop.f32.mrb[40].mxu0  ;;  %v5120_v45 = vpop.f32.mrb[28].mxu1 }
 0x12e   :  { %10880 = vst [vmem:[#allocation57_spill] sm:$0xff] %v5089_v44  ;;  %v1879_v41 = vadd.f32 %v1878_v40, %v1877_v3  ;;  %v5093_v43 = vpop.f32.mrb[41].mxu0  ;;  %v1444_v34 = vadd.f32 %v1443_v37, %v1442_v15  ;;  %v1701_v37 = vmul.f32 %v5089_v44, %v5089_v44  ;;  %v1449_v56 = vsel %vm538_vm0, %v5089_v44, 0.0 }
 0x12f   :  { %10881 = vst [vmem:[#allocation58_spill] sm:$0xff] %v5093_v43  ;;  %v1445_v4 = vsel %vm538_vm0, %v5093_v43, 0.0  ;;  %v1699_v9 = vmul.f32 %v5093_v43, %v5093_v43  ;;  %v5102_v27 = vpop.f32.mrb[42].mxu0 }
 0x130   :  { %10882 = vst [vmem:[#allocation59_spill] sm:$0xff] %v5102_v27  ;;  %v1446_v53 = vadd.f32 %v1445_v4, %v1444_v34  ;;  %v1881_v0 = vadd.f32 %v1880_v32, %v1879_v41  ;;  %v5106_v3 = vpop.f32.mrb[43].mxu0  ;;  %v1702_v41 = vmul.f32 %v5102_v27, %v5102_v27  ;;  %v1451_v61 = vsel %vm538_vm0, %v5102_v27, 0.0 }
 0x131   :  { %10883 = vst [vmem:[#allocation60_spill] sm:$0xff] %v5106_v3  ;;  %v1882_v15 = vsel %vm538_vm0, %v1699_v9, 0.0  ;;  %v1447_v54 = vsel %vm538_vm0, %v5106_v3, 0.0  ;;  %v1700_v40 = vmul.f32 %v5106_v3, %v5106_v3  ;;  %v1886_v9 = vsel %vm538_vm0, %v1701_v37, 0.0 }
 0x132   :  { %v1883_v43 = vadd.f32 %v1882_v15, %v1881_v0  ;;  %v1448_v22 = vadd.f32 %v1447_v54, %v1446_v53  ;;  %v5127_v0 = vpop.f32.mrb[29].mxu1 }
 0x133   :  { %v1884_v34 = vsel %vm538_vm0, %v1700_v40, 0.0  ;;  %v5131_v44 = vpop.f32.mrb[30].mxu1 }
 0x134   :  { %v1450_v32 = vadd.f32 %v1449_v56, %v1448_v22  ;;  %v1885_v4 = vadd.f32 %v1884_v34, %v1883_v43  ;;  %v1888_v56 = vsel %vm538_vm0, %v1702_v41, 0.0  ;;  %v5140_v40 = vpop.f32.mrb[31].mxu1 }
 0x135   :  { %v5125_v3 = vpop.f32.mrb[44].mxu0  ;;  %v5156_v16 = vpop.f32.mrb[32].mxu1 }
 0x136   :  { %10884 = vst [vmem:[#allocation61_spill] sm:$0xff] %v5125_v3  ;;  %v1887_v53 = vadd.f32 %v1886_v9, %v1885_v4  ;;  %v5129_v15 = vpop.f32.mrb[45].mxu0  ;;  %v1452_v54 = vadd.f32 %v1451_v61, %v1450_v32  ;;  %v1705_v61 = vmul.f32 %v5125_v3, %v5125_v3  ;;  %v1457_v23 = vsel %vm538_vm0, %v5125_v3, 0.0 }
 0x137   :  { %10885 = vst [vmem:[#allocation62_spill] sm:$0xff] %v5129_v15  ;;  %v1453_v22 = vsel %vm538_vm0, %v5129_v15, 0.0  ;;  %v1703_v43 = vmul.f32 %v5129_v15, %v5129_v15  ;;  %v5138_v37 = vpop.f32.mrb[46].mxu0 }
 0x138   :  { %10886 = vst [vmem:[#allocation63_spill] sm:$0xff] %v5138_v37  ;;  %v1454_v34 = vadd.f32 %v1453_v22, %v1452_v54  ;;  %v1889_v27 = vadd.f32 %v1888_v56, %v1887_v53  ;;  %v5142_v4 = vpop.f32.mrb[47].mxu0  ;;  %v1706_v53 = vmul.f32 %v5138_v37, %v5138_v37  ;;  %v1459_v26 = vsel %vm538_vm0, %v5138_v37, 0.0 }
 0x139   :  { %10887 = vst [vmem:[#allocation64_spill] sm:$0xff] %v5142_v4  ;;  %v1890_v32 = vsel %vm538_vm0, %v1703_v43, 0.0  ;;  %v1455_v41 = vsel %vm538_vm0, %v5142_v4, 0.0  ;;  %v1704_v9 = vmul.f32 %v5142_v4, %v5142_v4  ;;  %v1894_v43 = vsel %vm538_vm0, %v1705_v61, 0.0 }
 0x13a   :  { %v1891_v15 = vadd.f32 %v1890_v32, %v1889_v27  ;;  %v1456_v48 = vadd.f32 %v1455_v41, %v1454_v34  ;;  %v5163_v27 = vpop.f32.mrb[33].mxu1 }
 0x13b   :  { %v1892_v54 = vsel %vm538_vm0, %v1704_v9, 0.0  ;;  %v5167_v3 = vpop.f32.mrb[34].mxu1 }
 0x13c   :  { %v1458_v56 = vadd.f32 %v1457_v23, %v1456_v48  ;;  %v1893_v22 = vadd.f32 %v1892_v54, %v1891_v15  ;;  %10890 = vst [vmem:[#allocation67_spill] sm:$0xff] %v5167_v3  ;;  %v1896_v23 = vsel %vm538_vm0, %v1706_v53, 0.0  ;;  %v5176_v9 = vpop.f32.mrb[35].mxu1 }
 0x13d   :  { %v5161_v4 = vpop.f32.mrb[48].mxu0  ;;  %v5192_v52 = vpop.f32.mrb[36].mxu1 }
 0x13e   :  { %10888 = vst [vmem:[#allocation65_spill] sm:$0xff] %v5161_v4  ;;  %v1895_v34 = vadd.f32 %v1894_v43, %v1893_v22  ;;  %v5165_v32 = vpop.f32.mrb[49].mxu0  ;;  %v1460_v41 = vadd.f32 %v1459_v26, %v1458_v56  ;;  %v1709_v26 = vmul.f32 %v5161_v4, %v5161_v4  ;;  %v1465_v59 = vsel %vm538_vm0, %v5161_v4, 0.0  ;;  %10893 = vst [vmem:[#allocation70_spill] sm:$0xff] %v5192_v52 }
 0x13f   :  { %10889 = vst [vmem:[#allocation66_spill] sm:$0xff] %v5165_v32  ;;  %v1461_v48 = vsel %vm538_vm0, %v5165_v32, 0.0  ;;  %v1707_v15 = vmul.f32 %v5165_v32, %v5165_v32  ;;  %v5174_v61 = vpop.f32.mrb[50].mxu0 }
 0x140   :  { %10891 = vst [vmem:[#allocation68_spill] sm:$0xff] %v5174_v61  ;;  %v1462_v54 = vadd.f32 %v1461_v48, %v1460_v41  ;;  %v1897_v37 = vadd.f32 %v1896_v23, %v1895_v34  ;;  %v5178_v22 = vpop.f32.mrb[51].mxu0  ;;  %v1710_v34 = vmul.f32 %v5174_v61, %v5174_v61  ;;  %v1467_v62 = vsel %vm538_vm0, %v5174_v61, 0.0 }
 0x141   :  { %10892 = vst [vmem:[#allocation69_spill] sm:$0xff] %v5178_v22  ;;  %v1898_v56 = vsel %vm538_vm0, %v1707_v15, 0.0  ;;  %v1463_v53 = vsel %vm538_vm0, %v5178_v22, 0.0  ;;  %v1708_v43 = vmul.f32 %v5178_v22, %v5178_v22  ;;  %v1902_v15 = vsel %vm538_vm0, %v1709_v26, 0.0 }
 0x142   :  { %v1899_v32 = vadd.f32 %v1898_v56, %v1897_v37  ;;  %v1464_v19 = vadd.f32 %v1463_v53, %v1462_v54  ;;  %v5199_v37 = vpop.f32.mrb[37].mxu1 }
 0x143   :  { %v1900_v41 = vsel %vm538_vm0, %v1708_v43, 0.0  ;;  %10895 = vst [vmem:[#allocation72_spill] sm:$0xff] %v5199_v37  ;;  %v5203_v4 = vpop.f32.mrb[38].mxu1 }
 0x144   :  { %v1466_v23 = vadd.f32 %v1465_v59, %v1464_v19  ;;  %v1901_v48 = vadd.f32 %v1900_v41, %v1899_v32  ;;  %10897 = vst [vmem:[#allocation74_spill] sm:$0xff] %v5203_v4  ;;  %v1904_v59 = vsel %vm538_vm0, %v1710_v34, 0.0  ;;  %v5212_v43 = vpop.f32.mrb[39].mxu1 }
 0x145   :  { %v5197_v22 = vpop.f32.mrb[52].mxu0  ;;  %10899 = vst [vmem:[#allocation76_spill] sm:$0xff] %v5212_v43  ;;  %v5228_v28 = vpop.f32.mrb[40].mxu1 }
 0x146   :  { %10894 = vst [vmem:[#allocation71_spill] sm:$0xff] %v5197_v22  ;;  %v1903_v54 = vadd.f32 %v1902_v15, %v1901_v48  ;;  %v5201_v56 = vpop.f32.mrb[53].mxu0  ;;  %v1468_v53 = vadd.f32 %v1467_v62, %v1466_v23  ;;  %v1713_v62 = vmul.f32 %v5197_v22, %v5197_v22  ;;  %v1473_v35 = vsel %vm538_vm0, %v5197_v22, 0.0  ;;  %10901 = vst [vmem:[#allocation78_spill] sm:$0xff] %v5228_v28 }
 0x147   :  { %10896 = vst [vmem:[#allocation73_spill] sm:$0xff] %v5201_v56  ;;  %v1469_v19 = vsel %vm538_vm0, %v5201_v56, 0.0  ;;  %v1711_v32 = vmul.f32 %v5201_v56, %v5201_v56  ;;  %v5210_v26 = vpop.f32.mrb[54].mxu0 }
 0x148   :  { %10898 = vst [vmem:[#allocation75_spill] sm:$0xff] %v5210_v26  ;;  %v1470_v41 = vadd.f32 %v1469_v19, %v1468_v53  ;;  %v1905_v61 = vadd.f32 %v1904_v59, %v1903_v54  ;;  %v5214_v48 = vpop.f32.mrb[55].mxu0  ;;  %v1714_v54 = vmul.f32 %v5210_v26, %v5210_v26  ;;  %v1475_v38 = vsel %vm538_vm0, %v5210_v26, 0.0 }
 0x149   :  { %10900 = vst [vmem:[#allocation77_spill] sm:$0xff] %v5214_v48  ;;  %v1906_v23 = vsel %vm538_vm0, %v1711_v32, 0.0  ;;  %v1471_v34 = vsel %vm538_vm0, %v5214_v48, 0.0  ;;  %v1712_v15 = vmul.f32 %v5214_v48, %v5214_v48  ;;  %v1910_v32 = vsel %vm538_vm0, %v1713_v62, 0.0 }
 0x14a   :  { %v1907_v56 = vadd.f32 %v1906_v23, %v1905_v61  ;;  %v1472_v55 = vadd.f32 %v1471_v34, %v1470_v41  ;;  %v5235_v61 = vpop.f32.mrb[41].mxu1 }
 0x14b   :  { %v1908_v53 = vsel %vm538_vm0, %v1712_v15, 0.0  ;;  %10903 = vst [vmem:[#allocation80_spill] sm:$0xff] %v5235_v61  ;;  %v5239_v22 = vpop.f32.mrb[42].mxu1 }
 0x14c   :  { %v1474_v59 = vadd.f32 %v1473_v35, %v1472_v55  ;;  %v1909_v19 = vadd.f32 %v1908_v53, %v1907_v56  ;;  %10905 = vst [vmem:[#allocation82_spill] sm:$0xff] %v5239_v22  ;;  %v1912_v35 = vsel %vm538_vm0, %v1714_v54, 0.0  ;;  %v5248_v15 = vpop.f32.mrb[43].mxu1 }
 0x14d   :  { %v5233_v48 = vpop.f32.mrb[56].mxu0  ;;  %10907 = vst [vmem:[#allocation84_spill] sm:$0xff] %v5248_v15  ;;  %v5264_v10 = vpop.f32.mrb[44].mxu1 }
 0x14e   :  { %10902 = vst [vmem:[#allocation79_spill] sm:$0xff] %v5233_v48  ;;  %v1911_v41 = vadd.f32 %v1910_v32, %v1909_v19  ;;  %v5237_v23 = vpop.f32.mrb[57].mxu0  ;;  %v1476_v34 = vadd.f32 %v1475_v38, %v1474_v59  ;;  %v1717_v38 = vmul.f32 %v5233_v48, %v5233_v48  ;;  %v1481_v13 = vsel %vm538_vm0, %v5233_v48, 0.0  ;;  %10909 = vst [vmem:[#allocation86_spill] sm:$0xff] %v5264_v10 }
 0x14f   :  { %10904 = vst [vmem:[#allocation81_spill] sm:$0xff] %v5237_v23  ;;  %v1477_v55 = vsel %vm538_vm0, %v5237_v23, 0.0  ;;  %v1715_v56 = vmul.f32 %v5237_v23, %v5237_v23  ;;  %v5246_v62 = vpop.f32.mrb[58].mxu0 }
 0x150   :  { %10906 = vst [vmem:[#allocation83_spill] sm:$0xff] %v5246_v62  ;;  %v1478_v53 = vadd.f32 %v1477_v55, %v1476_v34  ;;  %v1913_v26 = vadd.f32 %v1912_v35, %v1911_v41  ;;  %v5250_v19 = vpop.f32.mrb[59].mxu0  ;;  %v1718_v41 = vmul.f32 %v5246_v62, %v5246_v62  ;;  %v1483_v14 = vsel %vm538_vm0, %v5246_v62, 0.0 }
 0x151   :  { %10908 = vst [vmem:[#allocation85_spill] sm:$0xff] %v5250_v19  ;;  %v1914_v59 = vsel %vm538_vm0, %v1715_v56, 0.0  ;;  %v1479_v54 = vsel %vm538_vm0, %v5250_v19, 0.0  ;;  %v1716_v32 = vmul.f32 %v5250_v19, %v5250_v19  ;;  %v1918_v56 = vsel %vm538_vm0, %v1717_v38, 0.0 }
 0x152   :  { %v1915_v23 = vadd.f32 %v1914_v59, %v1913_v26  ;;  %v1480_v31 = vadd.f32 %v1479_v54, %v1478_v53  ;;  %v5271_v26 = vpop.f32.mrb[45].mxu1 }
 0x153   :  { %v1916_v34 = vsel %vm538_vm0, %v1716_v32, 0.0  ;;  %10911 = vst [vmem:[#allocation88_spill] sm:$0xff] %v5271_v26  ;;  %v5275_v48 = vpop.f32.mrb[46].mxu1 }
 0x154   :  { %v1482_v35 = vadd.f32 %v1481_v13, %v1480_v31  ;;  %v1917_v55 = vadd.f32 %v1916_v34, %v1915_v23  ;;  %10913 = vst [vmem:[#allocation90_spill] sm:$0xff] %v5275_v48  ;;  %v1920_v13 = vsel %vm538_vm0, %v1718_v41, 0.0  ;;  %v5284_v32 = vpop.f32.mrb[47].mxu1 }
 0x155   :  { %v5269_v19 = vpop.f32.mrb[60].mxu0  ;;  %10915 = vst [vmem:[#allocation92_spill] sm:$0xff] %v5284_v32  ;;  %v5300_v10 = vpop.f32.mrb[48].mxu1 }
 0x156   :  { %10910 = vst [vmem:[#allocation87_spill] sm:$0xff] %v5269_v19  ;;  %v1919_v53 = vadd.f32 %v1918_v56, %v1917_v55  ;;  %v5273_v59 = vpop.f32.mrb[61].mxu0  ;;  %v1484_v54 = vadd.f32 %v1483_v14, %v1482_v35  ;;  %v1721_v14 = vmul.f32 %v5269_v19, %v5269_v19  ;;  %v1489_v48 = vsel %vm538_vm0, %v5269_v19, 0.0  ;;  %10917 = vst [vmem:[#allocation94_spill] sm:$0xff] %v5300_v10 }
 0x157   :  { %10912 = vst [vmem:[#allocation89_spill] sm:$0xff] %v5273_v59  ;;  %v1485_v31 = vsel %vm538_vm0, %v5273_v59, 0.0  ;;  %v1719_v23 = vmul.f32 %v5273_v59, %v5273_v59  ;;  %v5282_v38 = vpop.f32.mrb[62].mxu0 }
 0x158   :  { %10914 = vst [vmem:[#allocation91_spill] sm:$0xff] %v5282_v38  ;;  %v1486_v34 = vadd.f32 %v1485_v31, %v1484_v54  ;;  %v1921_v62 = vadd.f32 %v1920_v13, %v1919_v53  ;;  %v5286_v55 = vpop.f32.mrb[63].mxu0  ;;  %v1722_v53 = vmul.f32 %v5282_v38, %v5282_v38  ;;  %v1491_v32 = vsel %vm538_vm0, %v5282_v38, 0.0 }
 0x159   :  { %10916 = vst [vmem:[#allocation93_spill] sm:$0xff] %v5286_v55  ;;  %v1922_v35 = vsel %vm538_vm0, %v1719_v23, 0.0  ;;  %v1487_v41 = vsel %vm538_vm0, %v5286_v55, 0.0  ;;  %v1720_v56 = vmul.f32 %v5286_v55, %v5286_v55  ;;  %v1926_v23 = vsel %vm538_vm0, %v1721_v14, 0.0 }
 0x15a   :  { %v1923_v59 = vadd.f32 %v1922_v35, %v1921_v62  ;;  %v1488_v11 = vadd.f32 %v1487_v41, %v1486_v34  ;;  %v5307_v62 = vpop.f32.mrb[49].mxu1 }
 0x15b   :  { %v1924_v54 = vsel %vm538_vm0, %v1720_v56, 0.0  ;;  %10919 = vst [vmem:[#allocation96_spill] sm:$0xff] %v5307_v62  ;;  %v5311_v19 = vpop.f32.mrb[50].mxu1 }
 0x15c   :  { %v1490_v13 = vadd.f32 %v1489_v48, %v1488_v11  ;;  %v1925_v31 = vadd.f32 %v1924_v54, %v1923_v59  ;;  %10921 = vst [vmem:[#allocation98_spill] sm:$0xff] %v5311_v19  ;;  %v1928_v11 = vsel %vm538_vm0, %v1722_v53, 0.0  ;;  %v5320_v56 = vpop.f32.mrb[51].mxu1 }
 0x15d   :  { %v5305_v55 = vpop.f32.mrb[64].mxu0  ;;  %10923 = vst [vmem:[#allocation100_spill] sm:$0xff] %v5320_v56  ;;  %v5336_v56 = vpop.f32.mrb[52].mxu1 }
 0x15e   :  { %10918 = vst [vmem:[#allocation95_spill] sm:$0xff] %v5305_v55  ;;  %v1927_v34 = vadd.f32 %v1926_v23, %v1925_v31  ;;  %v5309_v35 = vpop.f32.mrb[65].mxu0  ;;  %v1492_v41 = vadd.f32 %v1491_v32, %v1490_v13  ;;  %v1725_v32 = vmul.f32 %v5305_v55, %v5305_v55  ;;  %v1497_v10 = vsel %vm538_vm0, %v5305_v55, 0.0  ;;  %10925 = vst [vmem:[#allocation102_spill] sm:$0xff] %v5336_v56 }
 0x15f   :  { %10920 = vst [vmem:[#allocation97_spill] sm:$0xff] %v5309_v35  ;;  %v1493_v48 = vsel %vm538_vm0, %v5309_v35, 0.0  ;;  %v1723_v59 = vmul.f32 %v5309_v35, %v5309_v35  ;;  %v5318_v14 = vpop.f32.mrb[66].mxu0 }
 0x160   :  { %10922 = vst [vmem:[#allocation99_spill] sm:$0xff] %v5318_v14  ;;  %v1494_v54 = vadd.f32 %v1493_v48, %v1492_v41  ;;  %v1929_v38 = vadd.f32 %v1928_v11, %v1927_v34  ;;  %v5322_v31 = vpop.f32.mrb[67].mxu0  ;;  %v1726_v34 = vmul.f32 %v5318_v14, %v5318_v14  ;;  %v1499_v62 = vsel %vm538_vm0, %v5318_v14, 0.0 }
 0x161   :  { %10924 = vst [vmem:[#allocation101_spill] sm:$0xff] %v5322_v31  ;;  %v1930_v13 = vsel %vm538_vm0, %v1723_v59, 0.0  ;;  %v1495_v53 = vsel %vm538_vm0, %v5322_v31, 0.0  ;;  %v1724_v23 = vmul.f32 %v5322_v31, %v5322_v31  ;;  %v1934_v59 = vsel %vm538_vm0, %v1725_v32, 0.0 }
 0x162   :  { %v1931_v35 = vadd.f32 %v1930_v13, %v1929_v38  ;;  %v1496_v19 = vadd.f32 %v1495_v53, %v1494_v54  ;;  %v5343_v38 = vpop.f32.mrb[53].mxu1 }
 0x163   :  { %v1932_v41 = vsel %vm538_vm0, %v1724_v23, 0.0  ;;  %10927 = vst [vmem:[#allocation104_spill] sm:$0xff] %v5343_v38  ;;  %v5347_v55 = vpop.f32.mrb[54].mxu1 }
 0x164   :  { %v1498_v11 = vadd.f32 %v1497_v10, %v1496_v19  ;;  %v1933_v48 = vadd.f32 %v1932_v41, %v1931_v35  ;;  %10929 = vst [vmem:[#allocation106_spill] sm:$0xff] %v5347_v55  ;;  %v1936_v10 = vsel %vm538_vm0, %v1726_v34, 0.0  ;;  %v5356_v23 = vpop.f32.mrb[55].mxu1 }
 0x165   :  { %v5341_v31 = vpop.f32.mrb[68].mxu0  ;;  %10931 = vst [vmem:[#allocation108_spill] sm:$0xff] %v5356_v23  ;;  %v5374_v23 = vpop.f32.mrb[56].mxu1 }
 0x166   :  { %10926 = vst [vmem:[#allocation103_spill] sm:$0xff] %v5341_v31  ;;  %v1935_v54 = vadd.f32 %v1934_v59, %v1933_v48  ;;  %v5345_v13 = vpop.f32.mrb[69].mxu0  ;;  %v1500_v53 = vadd.f32 %v1499_v62, %v1498_v11  ;;  %v1729_v62 = vmul.f32 %v5341_v31, %v5341_v31  ;;  %v1505_v56 = vsel %vm538_vm0, %v5341_v31, 0.0 }
 0x167   :  { %10928 = vst [vmem:[#allocation105_spill] sm:$0xff] %v5345_v13  ;;  %v1501_v19 = vsel %vm538_vm0, %v5345_v13, 0.0  ;;  %v1727_v35 = vmul.f32 %v5345_v13, %v5345_v13  ;;  %v5354_v32 = vpop.f32.mrb[70].mxu0 }
 0x168   :  { %10930 = vst [vmem:[#allocation107_spill] sm:$0xff] %v5354_v32  ;;  %v1502_v41 = vadd.f32 %v1501_v19, %v1500_v53  ;;  %v1937_v14 = vadd.f32 %v1936_v10, %v1935_v54  ;;  %v5358_v48 = vpop.f32.mrb[71].mxu0  ;;  %v1730_v54 = vmul.f32 %v5354_v32, %v5354_v32  ;;  %v1731_v10 = vmul.f32 %v4875_v46, %v4875_v46 }
 0x169   :  { %10932 = vst [vmem:[#allocation109_spill] sm:$0xff] %v5358_v48  ;;  %v1938_v11 = vsel %vm538_vm0, %v1727_v35, 0.0  ;;  %v1503_v34 = vsel %vm538_vm0, %v5358_v48, 0.0  ;;  %v1728_v59 = vmul.f32 %v5358_v48, %v5358_v48  ;;  %v1942_v38 = vsel %vm538_vm0, %v1729_v62, 0.0 }
 0x16a   :  { %v1939_v13 = vadd.f32 %v1938_v11, %v1937_v14  ;;  %v1504_v55 = vadd.f32 %v1503_v34, %v1502_v41  ;;  %v1507_v14 = vsel %vm538_vm0, %v5354_v32, 0.0  ;;  %v1509_v41 = vsel %vm538_vm0, %v4875_v46, 0.0  ;;  %v5381_v11 = vpop.f32.mrb[57].mxu1 }
 0x16b   :  { %v1940_v53 = vsel %vm538_vm0, %v1728_v59, 0.0  ;;  %v5383_v59 = vpop.f32.mrb[58].mxu1  ;;  %v1944_v48 = vsel %vm538_vm0, %v1730_v54, 0.0  ;;  %v1733_v46 = vmul.f32 %v4868_v42, %v4868_v42  ;;  %v1513_v54 = vsel %vm538_vm0, %v4868_v42, 0.0 }
 0x16c   :  { %v1506_v19 = vadd.f32 %v1505_v56, %v1504_v55  ;;  %v1941_v35 = vadd.f32 %v1940_v53, %v1939_v13  ;;  %v1946_v55 = vsel %vm538_vm0, %v1731_v10, 0.0  ;;  %v1732_v56 = vmul.f32 %v4888_v57, %v4888_v57  ;;  %v5389_v13 = vpop.f32.mrb[59].mxu1 }
 0x16d   :  { %v1734_v10 = vmul.f32 %v4879_v50, %v4879_v50  ;;  %v1950_v32 = vsel %vm538_vm0, %v1733_v46, 0.0 }
 0x16e   :  { %v1508_v34 = vadd.f32 %v1507_v14, %v1506_v19  ;;  %v1943_v31 = vadd.f32 %v1942_v38, %v1941_v35  ;;  %v1511_v19 = vsel %vm538_vm0, %v4888_v57, 0.0  ;;  %v1948_v14 = vsel %vm538_vm0, %v1732_v56, 0.0 }
 0x16f   :  { %v1952_v57 = vsel %vm538_vm0, %v1734_v10, 0.0  ;;  %v1521_v10 = vsel %vm538_vm0, %v4904_v12, 0.0 }
 0x170   :  { %v1945_v62 = vadd.f32 %v1944_v48, %v1943_v31  ;;  %v1510_v53 = vadd.f32 %v1509_v41, %v1508_v34  ;;  %v1735_v31 = vmul.f32 %v4911_v20, %v4911_v20  ;;  %v5402_v34 = vpop.f32.mrb[60].mxu1 }
 0x171   :  { %10933 = vst [vmem:[#allocation110_spill] sm:$0xff] %v5402_v34 }
 0x172   :  { %v1947_v38 = vadd.f32 %v1946_v55, %v1945_v62  ;;  %v1512_v35 = vadd.f32 %v1511_v19, %v1510_v53  ;;  %v1515_v55 = vsel %vm538_vm0, %v4879_v50, 0.0  ;;  %v1517_v62 = vsel %vm538_vm0, %v4911_v20, 0.0  ;;  %v5409_v53 = vpop.f32.mrb[61].mxu1 }
 0x173   :  { %10934 = vst [vmem:[#allocation111_spill] sm:$0xff] %v5409_v53  ;;  %v5411_v56 = vpop.f32.mrb[62].mxu1  ;;  %v1737_v20 = vmul.f32 %v4904_v12, %v4904_v12 }
 0x174   :  { %v1514_v48 = vadd.f32 %v1513_v54, %v1512_v35  ;;  %v1949_v41 = vadd.f32 %v1948_v14, %v1947_v38  ;;  %10935 = vst [vmem:[#allocation112_spill] sm:$0xff] %v5411_v56  ;;  %v1954_v38 = vsel %vm538_vm0, %v1735_v31, 0.0  ;;  %v1736_v35 = vmul.f32 %v4924_v33, %v4924_v33  ;;  %v5417_v46 = vpop.f32.mrb[63].mxu1 }
 0x175   :  { %10936 = vst [vmem:[#allocation113_spill] sm:$0xff] %v5417_v46  ;;  %v1738_v31 = vmul.f32 %v4915_v25, %v4915_v25  ;;  %v1958_v50 = vsel %vm538_vm0, %v1737_v20, 0.0 }
 0x176   :  { %v1516_v19 = vadd.f32 %v1515_v55, %v1514_v48  ;;  %v1951_v42 = vadd.f32 %v1950_v32, %v1949_v41  ;;  %v1519_v48 = vsel %vm538_vm0, %v4924_v33, 0.0  ;;  %v1956_v55 = vsel %vm538_vm0, %v1736_v35, 0.0 }
 0x177   :  { %v1960_v33 = vsel %vm538_vm0, %v1738_v31, 0.0  ;;  %v1529_v31 = vsel %vm538_vm0, %v4940_v60, 0.0 }
 0x178   :  { %v1953_v54 = vadd.f32 %v1952_v57, %v1951_v42  ;;  %v1518_v14 = vadd.f32 %v1517_v62, %v1516_v19  ;;  %v1739_v42 = vmul.f32 %v4947_v2, %v4947_v2  ;;  %v5430_v19 = vpop.f32.mrb[64].mxu1 }
 0x17a   :  { %v1955_v32 = vadd.f32 %v1954_v38, %v1953_v54  ;;  %v1520_v41 = vadd.f32 %v1519_v48, %v1518_v14  ;;  %v1523_v38 = vsel %vm538_vm0, %v4915_v25, 0.0  ;;  %v1525_v54 = vsel %vm538_vm0, %v4947_v2, 0.0  ;;  %v5437_v14 = vpop.f32.mrb[65].mxu1 }
 0x17b   :  { %10937 = vst [vmem:[#allocation114_spill] sm:$0xff] %v5437_v14  ;;  %v5439_v35 = vpop.f32.mrb[66].mxu1  ;;  %v1741_v2 = vmul.f32 %v4940_v60, %v4940_v60 }
 0x17c   :  { %v1522_v57 = vadd.f32 %v1521_v10, %v1520_v41  ;;  %v1957_v62 = vadd.f32 %v1956_v55, %v1955_v32  ;;  %10938 = vst [vmem:[#allocation115_spill] sm:$0xff] %v5439_v35  ;;  %v1962_v32 = vsel %vm538_vm0, %v1739_v42, 0.0  ;;  %v1740_v41 = vmul.f32 %v4960_v17, %v4960_v17  ;;  %v5445_v20 = vpop.f32.mrb[67].mxu1 }
 0x17d   :  { %10939 = vst [vmem:[#allocation116_spill] sm:$0xff] %v5445_v20  ;;  %v1742_v42 = vmul.f32 %v4951_v6, %v4951_v6  ;;  %v1966_v25 = vsel %vm538_vm0, %v1741_v2, 0.0 }
 0x17e   :  { %v1524_v48 = vadd.f32 %v1523_v38, %v1522_v57  ;;  %v1959_v12 = vadd.f32 %v1958_v50, %v1957_v62  ;;  %v1527_v57 = vsel %vm538_vm0, %v4960_v17, 0.0  ;;  %v1964_v38 = vsel %vm538_vm0, %v1740_v41, 0.0 }
 0x17f   :  { %v1968_v17 = vsel %vm538_vm0, %v1742_v42, 0.0  ;;  %v1537_v42 = vsel %vm538_vm0, %v4976_v51, 0.0 }
 0x180   :  { %v1961_v10 = vadd.f32 %v1960_v33, %v1959_v12  ;;  %v1526_v55 = vadd.f32 %v1525_v54, %v1524_v48  ;;  %v1743_v12 = vmul.f32 %v4983_v63, %v4983_v63  ;;  %v5458_v48 = vpop.f32.mrb[68].mxu1 }
 0x181   :  { %10940 = vst [vmem:[#allocation117_spill] sm:$0xff] %v5458_v48 }
 0x182   :  { %v1963_v50 = vadd.f32 %v1962_v32, %v1961_v10  ;;  %v1528_v62 = vadd.f32 %v1527_v57, %v1526_v55  ;;  %v1531_v32 = vsel %vm538_vm0, %v4951_v6, 0.0  ;;  %v1533_v10 = vsel %vm538_vm0, %v4983_v63, 0.0  ;;  %v5465_v55 = vpop.f32.mrb[69].mxu1 }
 0x183   :  { %10941 = vst [vmem:[#allocation118_spill] sm:$0xff] %v5465_v55  ;;  %v5467_v41 = vpop.f32.mrb[70].mxu1  ;;  %v1745_v63 = vmul.f32 %v4976_v51, %v4976_v51 }
 0x184   :  { %v1530_v33 = vadd.f32 %v1529_v31, %v1528_v62  ;;  %v1965_v54 = vadd.f32 %v1964_v38, %v1963_v50  ;;  %10942 = vst [vmem:[#allocation119_spill] sm:$0xff] %v5467_v41  ;;  %v1970_v50 = vsel %vm538_vm0, %v1743_v12, 0.0  ;;  %v1744_v62 = vmul.f32 %v4996_v29, %v4996_v29  ;;  %v5473_v2 = vpop.f32.mrb[71].mxu1 }
 0x185   :  { %10943 = vst [vmem:[#allocation120_spill] sm:$0xff] %v5473_v2  ;;  %v1746_v12 = vmul.f32 %v4987_v7, %v4987_v7 }
 0x186   :  { %v1967_v57 = vadd.f32 %v1966_v25, %v1965_v54  ;;  %v1532_v60 = vadd.f32 %v1531_v32, %v1530_v33  ;;  %v1535_v25 = vsel %vm538_vm0, %v4996_v29, 0.0  ;;  %v1972_v32 = vsel %vm538_vm0, %v1744_v62, 0.0 }
 0x187   :  { %v1539_v29 = vsel %vm538_vm0, %v4987_v7, 0.0  ;;  %v1748_v62 = vmul.f32 %v5032_v49, %v5032_v49 }
 0x188   :  { %v1534_v31 = vadd.f32 %v1533_v10, %v1532_v60  ;;  %v1969_v38 = vadd.f32 %v1968_v17, %v1967_v57  ;;  %v1747_v60 = vmul.f32 %v5019_v30, %v5019_v30  ;;  %v1974_v57 = vsel %vm538_vm0, %v1745_v63, 0.0 }
 0x189   :  { %v1749_v63 = vmul.f32 %v5012_v8, %v5012_v8 }
 0x18a   :  { %v1971_v33 = vadd.f32 %v1970_v50, %v1969_v38  ;;  %v1536_v54 = vadd.f32 %v1535_v25, %v1534_v31  ;;  %v1541_v50 = vsel %vm538_vm0, %v5019_v30, 0.0  ;;  %v1976_v25 = vsel %vm538_vm0, %v1746_v12, 0.0 }
 0x18b   :  { %v1978_v51 = vsel %vm538_vm0, %v1747_v60, 0.0  ;;  %v1750_v12 = vmul.f32 %v5023_v58, %v5023_v58  ;;  %v1980_v60 = vsel %vm538_vm0, %v1748_v62, 0.0  ;;  %v1752_v62 = vmul.f32 %v5068_v21, %v5068_v21 }
 0x18c   :  { %v1538_v17 = vadd.f32 %v1537_v42, %v1536_v54  ;;  %v1973_v10 = vadd.f32 %v1972_v32, %v1971_v33  ;;  %v1543_v33 = vsel %vm538_vm0, %v5032_v49, 0.0 }
 0x18e   :  { %v1975_v31 = vadd.f32 %v1974_v57, %v1973_v10  ;;  %v1540_v38 = vadd.f32 %v1539_v29, %v1538_v17  ;;  %v1545_v29 = vsel %vm538_vm0, %v5012_v8, 0.0  ;;  %v1751_v17 = vmul.f32 %v5055_v24, %v5055_v24 }
 0x190   :  { %v1542_v6 = vadd.f32 %v1541_v50, %v1540_v38  ;;  %v1977_v54 = vadd.f32 %v1976_v25, %v1975_v31  ;;  %v1982_v50 = vsel %vm538_vm0, %v1749_v63, 0.0  ;;  %v1547_v31 = vsel %vm538_vm0, %v5023_v58, 0.0 }
 0x191   :  { %v1984_v25 = vsel %vm538_vm0, %v1750_v12, 0.0  ;;  %v1753_v63 = vmul.f32 %v5048_v1, %v5048_v1  ;;  %v1754_v12 = vmul.f32 %v5059_v36, %v5059_v36 }
 0x192   :  { %v1979_v42 = vadd.f32 %v1978_v51, %v1977_v54  ;;  %v1544_v32 = vadd.f32 %v1543_v33, %v1542_v6  ;;  %v1549_v6 = vsel %vm538_vm0, %v5055_v24, 0.0  ;;  %v1986_v54 = vsel %vm538_vm0, %v1751_v17, 0.0 }
 0x193   :  { %v1988_v17 = vsel %vm538_vm0, %v1752_v62, 0.0  ;;  %v1756_v62 = vmul.f32 %v5104_v39, %v5104_v39 }
 0x194   :  { %v1546_v10 = vadd.f32 %v1545_v29, %v1544_v32  ;;  %v1981_v57 = vadd.f32 %v1980_v60, %v1979_v42  ;;  %v1551_v42 = vsel %vm538_vm0, %v5068_v21, 0.0 }
 0x196   :  { %v1983_v51 = vadd.f32 %v1982_v50, %v1981_v57  ;;  %v1548_v38 = vadd.f32 %v1547_v31, %v1546_v10  ;;  %v1553_v10 = vsel %vm538_vm0, %v5048_v1, 0.0  ;;  %v1755_v57 = vmul.f32 %v5091_v47, %v5091_v47 }
 0x198   :  { %v1550_v33 = vadd.f32 %v1549_v6, %v1548_v38  ;;  %v1985_v32 = vadd.f32 %v1984_v25, %v1983_v51  ;;  %v1990_v6 = vsel %vm538_vm0, %v1753_v63, 0.0  ;;  %v1555_v51 = vsel %vm538_vm0, %v5059_v36, 0.0 }
 0x199   :  { %v1557_v38 = vsel %vm538_vm0, %v5091_v47, 0.0  ;;  %v1757_v63 = vmul.f32 %v5084_v18, %v5084_v18 }
 0x19a   :  { %v1987_v29 = vadd.f32 %v1986_v54, %v1985_v32  ;;  %v1552_v60 = vadd.f32 %v1551_v42, %v1550_v33  ;;  %v1992_v33 = vsel %vm538_vm0, %v1754_v12, 0.0  ;;  %v1994_v32 = vsel %vm538_vm0, %v1755_v57, 0.0 }
 0x19b   :  { %v1758_v12 = vmul.f32 %v5095_v5, %v5095_v5  ;;  %v1996_v57 = vsel %vm538_vm0, %v1756_v62, 0.0  ;;  %v1760_v62 = vmul.f32 %v5140_v40, %v5140_v40 }
 0x19c   :  { %v1554_v50 = vadd.f32 %v1553_v10, %v1552_v60  ;;  %v1989_v31 = vadd.f32 %v1988_v17, %v1987_v29  ;;  %v1559_v29 = vsel %vm538_vm0, %v5104_v39, 0.0 }
 0x19e   :  { %v1991_v25 = vadd.f32 %v1990_v6, %v1989_v31  ;;  %v1556_v54 = vadd.f32 %v1555_v51, %v1554_v50  ;;  %v1561_v50 = vsel %vm538_vm0, %v5084_v18, 0.0  ;;  %v1759_v31 = vmul.f32 %v5127_v0, %v5127_v0 }
 0x1a0   :  { %v1558_v42 = vadd.f32 %v1557_v38, %v1556_v54  ;;  %v1993_v60 = vadd.f32 %v1992_v33, %v1991_v25  ;;  %v1998_v38 = vsel %vm538_vm0, %v1757_v63, 0.0  ;;  %v1563_v25 = vsel %vm538_vm0, %v5095_v5, 0.0 }
 0x1a1   :  { %v1565_v54 = vsel %vm538_vm0, %v5127_v0, 0.0  ;;  %v1761_v63 = vmul.f32 %v5120_v45, %v5120_v45 }
 0x1a2   :  { %v1995_v10 = vadd.f32 %v1994_v32, %v1993_v60  ;;  %v1560_v17 = vadd.f32 %v1559_v29, %v1558_v42  ;;  %v2000_v42 = vsel %vm538_vm0, %v1758_v12, 0.0  ;;  %v2002_v60 = vsel %vm538_vm0, %v1759_v31, 0.0 }
 0x1a3   :  { %v1762_v12 = vmul.f32 %v5131_v44, %v5131_v44  ;;  %v2004_v31 = vsel %vm538_vm0, %v1760_v62, 0.0  ;;  %v1764_v62 = vmul.f32 %v5176_v9, %v5176_v9 }
 0x1a4   :  { %v1562_v6 = vadd.f32 %v1561_v50, %v1560_v17  ;;  %v1997_v51 = vadd.f32 %v1996_v57, %v1995_v10  ;;  %v1567_v10 = vsel %vm538_vm0, %v5140_v40, 0.0 }
 0x1a6   :  { %v1999_v33 = vadd.f32 %v1998_v38, %v1997_v51  ;;  %v1564_v32 = vadd.f32 %v1563_v25, %v1562_v6  ;;  %v1569_v6 = vsel %vm538_vm0, %v5120_v45, 0.0  ;;  %v1763_v51 = vmul.f32 %v5163_v27, %v5163_v27 }
 0x1a8   :  { %v1566_v29 = vadd.f32 %v1565_v54, %v1564_v32  ;;  %v2001_v17 = vadd.f32 %v2000_v42, %v1999_v33  ;;  %v2006_v54 = vsel %vm538_vm0, %v1761_v63, 0.0  ;;  %v1571_v33 = vsel %vm538_vm0, %v5131_v44, 0.0 }
 0x1a9   :  { %v1573_v32 = vsel %vm538_vm0, %v5163_v27, 0.0  ;;  %v1765_v63 = vmul.f32 %v5156_v16, %v5156_v16 }
 0x1aa   :  { %v2003_v50 = vadd.f32 %v2002_v60, %v2001_v17  ;;  %v1568_v57 = vadd.f32 %v1567_v10, %v1566_v29  ;;  %v2008_v29 = vsel %vm538_vm0, %v1762_v12, 0.0  ;;  %v2010_v17 = vsel %vm538_vm0, %v1763_v51, 0.0 }
 0x1ab   :  { %v1766_v12 = vmul.f32 %v5167_v3, %v5167_v3  ;;  %v2012_v51 = vsel %vm538_vm0, %v1764_v62, 0.0  ;;  %v1768_v62 = vmul.f32 %v5212_v43, %v5212_v43 }
 0x1ac   :  { %v1570_v38 = vadd.f32 %v1569_v6, %v1568_v57  ;;  %v2005_v25 = vadd.f32 %v2004_v31, %v2003_v50  ;;  %v1575_v50 = vsel %vm538_vm0, %v5176_v9, 0.0 }
 0x1ae   :  { %v2007_v42 = vadd.f32 %v2006_v54, %v2005_v25  ;;  %v1572_v60 = vadd.f32 %v1571_v33, %v1570_v38  ;;  %v1577_v38 = vsel %vm538_vm0, %v5156_v16, 0.0  ;;  %v1767_v25 = vmul.f32 %v5199_v37, %v5199_v37 }
 0x1b0   :  { %v1574_v10 = vadd.f32 %v1573_v32, %v1572_v60  ;;  %v2009_v57 = vadd.f32 %v2008_v29, %v2007_v42  ;;  %v2014_v32 = vsel %vm538_vm0, %v1765_v63, 0.0  ;;  %v1579_v42 = vsel %vm538_vm0, %v5167_v3, 0.0  ;;  %v11049_v3 = vld [vmem:[#allocation100_spill] sm:$0xff] }
 0x1b1   :  { %v1581_v60 = vsel %vm538_vm0, %v5199_v37, 0.0  ;;  %v1769_v63 = vmul.f32 %v5192_v52, %v5192_v52  ;;  %v11050_v37 = vld [vmem:[#allocation94_spill] sm:$0xff] }
 0x1b2   :  { %v2011_v6 = vadd.f32 %v2010_v17, %v2009_v57  ;;  %v1576_v31 = vadd.f32 %v1575_v50, %v1574_v10  ;;  %v2016_v10 = vsel %vm538_vm0, %v1766_v12, 0.0  ;;  %v2018_v57 = vsel %vm538_vm0, %v1767_v25, 0.0 }
 0x1b3   :  { %v1770_v12 = vmul.f32 %v5203_v4, %v5203_v4  ;;  %v2020_v25 = vsel %vm538_vm0, %v1768_v62, 0.0  ;;  %v1772_v62 = vmul.f32 %v5248_v15, %v5248_v15 }
 0x1b4   :  { %v1578_v54 = vadd.f32 %v1577_v38, %v1576_v31  ;;  %v2013_v33 = vadd.f32 %v2012_v51, %v2011_v6  ;;  %v1583_v6 = vsel %vm538_vm0, %v5212_v43, 0.0  ;;  %v11051_v43 = vld [vmem:[#allocation98_spill] sm:$0xff] }
 0x1b6   :  { %v2015_v29 = vadd.f32 %v2014_v32, %v2013_v33  ;;  %v1580_v17 = vadd.f32 %v1579_v42, %v1578_v54  ;;  %v1585_v54 = vsel %vm538_vm0, %v5192_v52, 0.0  ;;  %v1771_v33 = vmul.f32 %v5235_v61, %v5235_v61 }
 0x1b8   :  { %v1582_v50 = vadd.f32 %v1581_v60, %v1580_v17  ;;  %v2017_v31 = vadd.f32 %v2016_v10, %v2015_v29  ;;  %v2022_v60 = vsel %vm538_vm0, %v1769_v63, 0.0  ;;  %v1587_v29 = vsel %vm538_vm0, %v5203_v4, 0.0  ;;  %v11053_v4 = vld [vmem:[#allocation115_spill] sm:$0xff] }
 0x1b9   :  { %v1589_v17 = vsel %vm538_vm0, %v5235_v61, 0.0  ;;  %v1773_v63 = vmul.f32 %v5228_v28, %v5228_v28  ;;  %v11052_v61 = vld [vmem:[#allocation102_spill] sm:$0xff] }
 0x1ba   :  { %v2019_v38 = vadd.f32 %v2018_v57, %v2017_v31  ;;  %v1584_v51 = vadd.f32 %v1583_v6, %v1582_v50  ;;  %v2024_v50 = vsel %vm538_vm0, %v1770_v12, 0.0  ;;  %v2026_v31 = vsel %vm538_vm0, %v1771_v33, 0.0 }
 0x1bb   :  { %v1774_v12 = vmul.f32 %v5239_v22, %v5239_v22  ;;  %v2028_v33 = vsel %vm538_vm0, %v1772_v62, 0.0  ;;  %v10944_v62 = vld [vmem:[#allocation92_spill] sm:$0xff] }
 0x1bc   :  { %v1586_v32 = vadd.f32 %v1585_v54, %v1584_v51  ;;  %v2021_v42 = vadd.f32 %v2020_v25, %v2019_v38  ;;  %v1591_v38 = vsel %vm538_vm0, %v5248_v15, 0.0  ;;  %v11055_v15 = vld [vmem:[#allocation120_spill] sm:$0xff] }
 0x1be   :  { %v2023_v10 = vadd.f32 %v2022_v60, %v2021_v42  ;;  %v1588_v57 = vadd.f32 %v1587_v29, %v1586_v32  ;;  %v1593_v32 = vsel %vm538_vm0, %v5228_v28, 0.0  ;;  %v1775_v42 = vmul.f32 %v5271_v26, %v5271_v26 }
 0x1c0   :  { %v1590_v6 = vadd.f32 %v1589_v17, %v1588_v57  ;;  %v2025_v51 = vadd.f32 %v2024_v50, %v2023_v10  ;;  %v2030_v17 = vsel %vm538_vm0, %v1773_v63, 0.0  ;;  %v1595_v10 = vsel %vm538_vm0, %v5239_v22, 0.0 }
 0x1c1   :  { %v1597_v57 = vsel %vm538_vm0, %v5271_v26, 0.0 }
 0x1c2   :  { %v2027_v54 = vadd.f32 %v2026_v31, %v2025_v51  ;;  %v1592_v25 = vadd.f32 %v1591_v38, %v1590_v6  ;;  %v2032_v6 = vsel %vm538_vm0, %v1774_v12, 0.0  ;;  %v2034_v51 = vsel %vm538_vm0, %v1775_v42, 0.0 }
 0x1c3   :  { %v1776_v38 = vmul.f32 %v10944_v62, %v10944_v62 }
 0x1c4   :  { %v1594_v60 = vadd.f32 %v1593_v32, %v1592_v25  ;;  %v2029_v29 = vadd.f32 %v2028_v33, %v2027_v54  ;;  %v10945_v54 = vld [vmem:[#allocation86_spill] sm:$0xff]  ;;  %v1599_v32 = vsel %vm538_vm0, %v10944_v62, 0.0 }
 0x1c5   :  { %v1777_v63 = vmul.f32 %v10945_v54, %v10945_v54  ;;  %v2036_v42 = vsel %vm538_vm0, %v1776_v38, 0.0  ;;  %v10948_v38 = vld [vmem:[#allocation100_spill] sm:$0xff] }
 0x1c6   :  { %v2031_v50 = vadd.f32 %v2030_v17, %v2029_v29  ;;  %v1596_v31 = vadd.f32 %v1595_v10, %v1594_v60  ;;  %v1601_v60 = vsel %vm538_vm0, %v10945_v54, 0.0  ;;  %v10946_v29 = vld [vmem:[#allocation90_spill] sm:$0xff]  ;;  %v10947_v17 = vld [vmem:[#allocation96_spill] sm:$0xff]  ;;  %v1780_v62 = vmul.f32 %v10948_v38, %v10948_v38 }
 0x1c7   :  { %v1778_v12 = vmul.f32 %v10946_v29, %v10946_v29  ;;  %v1779_v10 = vmul.f32 %v10947_v17, %v10947_v17 }
 0x1c8   :  { %v1598_v28 = vadd.f32 %v1597_v57, %v1596_v31  ;;  %v2033_v25 = vadd.f32 %v2032_v6, %v2031_v50  ;;  %v2038_v31 = vsel %vm538_vm0, %v1777_v63, 0.0  ;;  %v1603_v6 = vsel %vm538_vm0, %v10946_v29, 0.0 }
 0x1c9   :  { %v2042_v54 = vsel %vm538_vm0, %v1779_v10, 0.0  ;;  %v2044_v10 = vsel %vm538_vm0, %v1780_v62, 0.0  ;;  %v10952_v62 = vld [vmem:[#allocation108_spill] sm:$0xff] }
 0x1ca   :  { %v2035_v33 = vadd.f32 %v2034_v51, %v2033_v25  ;;  %v1600_v22 = vadd.f32 %v1599_v32, %v1598_v28  ;;  %v1605_v28 = vsel %vm538_vm0, %v10947_v17, 0.0  ;;  %v2040_v32 = vsel %vm538_vm0, %v1778_v12, 0.0 }
 0x1cc   :  { %v1602_v57 = vadd.f32 %v1601_v60, %v1600_v22  ;;  %v2037_v50 = vadd.f32 %v2036_v42, %v2035_v33  ;;  %v10949_v33 = vld [vmem:[#allocation94_spill] sm:$0xff]  ;;  %v1607_v60 = vsel %vm538_vm0, %v10948_v38, 0.0  ;;  %v1784_v38 = vmul.f32 %v10952_v62, %v10952_v62 }
 0x1cd   :  { %v1781_v63 = vmul.f32 %v10949_v33, %v10949_v33 }
 0x1ce   :  { %v2039_v51 = vadd.f32 %v2038_v31, %v2037_v50  ;;  %v1604_v25 = vadd.f32 %v1603_v6, %v1602_v57  ;;  %v1609_v57 = vsel %vm538_vm0, %v10949_v33, 0.0  ;;  %v10950_v50 = vld [vmem:[#allocation98_spill] sm:$0xff]  ;;  %v10951_v31 = vld [vmem:[#allocation104_spill] sm:$0xff] }
 0x1cf   :  { %v1782_v12 = vmul.f32 %v10950_v50, %v10950_v50  ;;  %v1783_v6 = vmul.f32 %v10951_v31, %v10951_v31 }
 0x1d0   :  { %v1606_v26 = vadd.f32 %v1605_v28, %v1604_v25  ;;  %v2041_v22 = vadd.f32 %v2040_v32, %v2039_v51  ;;  %v2046_v25 = vsel %vm538_vm0, %v1781_v63, 0.0  ;;  %v1611_v32 = vsel %vm538_vm0, %v10950_v50, 0.0 }
 0x1d1   :  { %v2050_v33 = vsel %vm538_vm0, %v1783_v6, 0.0  ;;  %v2052_v6 = vsel %vm538_vm0, %v1784_v38, 0.0  ;;  %v1788_v38 = vmul.f32 %v5389_v13, %v5389_v13 }
 0x1d2   :  { %v2043_v42 = vadd.f32 %v2042_v54, %v2041_v22  ;;  %v1608_v29 = vadd.f32 %v1607_v60, %v1606_v26  ;;  %v1613_v26 = vsel %vm538_vm0, %v10951_v31, 0.0  ;;  %v2048_v60 = vsel %vm538_vm0, %v1782_v12, 0.0 }
 0x1d4   :  { %v1610_v28 = vadd.f32 %v1609_v57, %v1608_v29  ;;  %v2045_v51 = vadd.f32 %v2044_v10, %v2043_v42  ;;  %v10953_v42 = vld [vmem:[#allocation102_spill] sm:$0xff]  ;;  %v1615_v57 = vsel %vm538_vm0, %v10952_v62, 0.0 }
 0x1d5   :  { %v1785_v63 = vmul.f32 %v10953_v42, %v10953_v42 }
 0x1d6   :  { %v2047_v54 = vadd.f32 %v2046_v25, %v2045_v51  ;;  %v1612_v22 = vadd.f32 %v1611_v32, %v1610_v28  ;;  %v1617_v28 = vsel %vm538_vm0, %v10953_v42, 0.0  ;;  %v10954_v51 = vld [vmem:[#allocation106_spill] sm:$0xff]  ;;  %v1787_v25 = vmul.f32 %v5381_v11, %v5381_v11 }
 0x1d7   :  { %v1786_v12 = vmul.f32 %v10954_v51, %v10954_v51 }
 0x1d8   :  { %v1614_v17 = vadd.f32 %v1613_v26, %v1612_v22  ;;  %v2049_v29 = vadd.f32 %v2048_v60, %v2047_v54  ;;  %v2054_v54 = vsel %vm538_vm0, %v1785_v63, 0.0  ;;  %v1619_v22 = vsel %vm538_vm0, %v10954_v51, 0.0 }
 0x1d9   :  { %v1789_v63 = vmul.f32 %v5374_v23, %v5374_v23 }
 0x1da   :  { %v2051_v10 = vadd.f32 %v2050_v33, %v2049_v29  ;;  %v1616_v50 = vadd.f32 %v1615_v57, %v1614_v17  ;;  %v1621_v17 = vsel %vm538_vm0, %v5381_v11, 0.0  ;;  %v2056_v29 = vsel %vm538_vm0, %v1786_v12, 0.0 }
 0x1db   :  { %v2058_v57 = vsel %vm538_vm0, %v1787_v25, 0.0  ;;  %v1790_v12 = vmul.f32 %v5383_v59, %v5383_v59  ;;  %v2060_v25 = vsel %vm538_vm0, %v1788_v38, 0.0  ;;  %v1792_v38 = vmul.f32 %v5417_v46, %v5417_v46 }
 0x1dc   :  { %v1618_v32 = vadd.f32 %v1617_v28, %v1616_v50  ;;  %v2053_v26 = vadd.f32 %v2052_v6, %v2051_v10  ;;  %v1623_v10 = vsel %vm538_vm0, %v5389_v13, 0.0 }
 0x1de   :  { %v2055_v33 = vadd.f32 %v2054_v54, %v2053_v26  ;;  %v1620_v60 = vadd.f32 %v1619_v22, %v1618_v32  ;;  %v1625_v32 = vsel %vm538_vm0, %v5374_v23, 0.0  ;;  %v1791_v26 = vmul.f32 %v5409_v53, %v5409_v53 }
 0x1e0   :  { %v1622_v42 = vadd.f32 %v1621_v17, %v1620_v60  ;;  %v2057_v50 = vadd.f32 %v2056_v29, %v2055_v33  ;;  %v2062_v17 = vsel %vm538_vm0, %v1789_v63, 0.0  ;;  %v1627_v33 = vsel %vm538_vm0, %v5383_v59, 0.0 }
 0x1e1   :  { %v1793_v63 = vmul.f32 %v5402_v34, %v5402_v34 }
 0x1e2   :  { %v2059_v28 = vadd.f32 %v2058_v57, %v2057_v50  ;;  %v1624_v6 = vadd.f32 %v1623_v10, %v1622_v42  ;;  %v1629_v42 = vsel %vm538_vm0, %v5409_v53, 0.0  ;;  %v2064_v57 = vsel %vm538_vm0, %v1790_v12, 0.0 }
 0x1e3   :  { %v2066_v50 = vsel %vm538_vm0, %v1791_v26, 0.0  ;;  %v1794_v12 = vmul.f32 %v5411_v56, %v5411_v56  ;;  %v2068_v26 = vsel %vm538_vm0, %v1792_v38, 0.0  ;;  %v1796_v38 = vmul.f32 %v5445_v20, %v5445_v20 }
 0x1e4   :  { %v1626_v54 = vadd.f32 %v1625_v32, %v1624_v6  ;;  %v2061_v22 = vadd.f32 %v2060_v25, %v2059_v28  ;;  %v1631_v28 = vsel %vm538_vm0, %v5417_v46, 0.0 }
 0x1e6   :  { %v2063_v60 = vadd.f32 %v2062_v17, %v2061_v22  ;;  %v1628_v29 = vadd.f32 %v1627_v33, %v1626_v54  ;;  %v1633_v54 = vsel %vm538_vm0, %v5402_v34, 0.0  ;;  %v1795_v22 = vmul.f32 %v5437_v14, %v5437_v14 }
 0x1e8   :  { %v1630_v10 = vadd.f32 %v1629_v42, %v1628_v29  ;;  %v2065_v6 = vadd.f32 %v2064_v57, %v2063_v60  ;;  %v2070_v42 = vsel %vm538_vm0, %v1793_v63, 0.0  ;;  %v1635_v60 = vsel %vm538_vm0, %v5411_v56, 0.0 }
 0x1e9   :  { %v1637_v29 = vsel %vm538_vm0, %v5437_v14, 0.0  ;;  %v1797_v63 = vmul.f32 %v5430_v19, %v5430_v19 }
 0x1ea   :  { %v2067_v32 = vadd.f32 %v2066_v50, %v2065_v6  ;;  %v1632_v25 = vadd.f32 %v1631_v28, %v1630_v10  ;;  %v2072_v10 = vsel %vm538_vm0, %v1794_v12, 0.0  ;;  %v2074_v6 = vsel %vm538_vm0, %v1795_v22, 0.0 }
 0x1eb   :  { %v1798_v12 = vmul.f32 %v5439_v35, %v5439_v35  ;;  %v2076_v22 = vsel %vm538_vm0, %v1796_v38, 0.0  ;;  %v1800_v38 = vmul.f32 %v5473_v2, %v5473_v2 }
 0x1ec   :  { %v1634_v17 = vadd.f32 %v1633_v54, %v1632_v25  ;;  %v2069_v33 = vadd.f32 %v2068_v26, %v2067_v32  ;;  %v1639_v32 = vsel %vm538_vm0, %v5445_v20, 0.0 }
 0x1ee   :  { %v2071_v57 = vadd.f32 %v2070_v42, %v2069_v33  ;;  %v1636_v50 = vadd.f32 %v1635_v60, %v1634_v17  ;;  %v1641_v17 = vsel %vm538_vm0, %v5430_v19, 0.0  ;;  %v1799_v33 = vmul.f32 %v5465_v55, %v5465_v55 }
 0x1f0   :  { %v1638_v28 = vadd.f32 %v1637_v29, %v1636_v50  ;;  %v2073_v25 = vadd.f32 %v2072_v10, %v2071_v57  ;;  %v2078_v29 = vsel %vm538_vm0, %v1797_v63, 0.0  ;;  %v1643_v57 = vsel %vm538_vm0, %v5439_v35, 0.0 }
 0x1f1   :  { %v1645_v50 = vsel %vm538_vm0, %v5465_v55, 0.0  ;;  %v1801_v63 = vmul.f32 %v5458_v48, %v5458_v48 }
 0x1f2   :  { %v2075_v54 = vadd.f32 %v2074_v6, %v2073_v25  ;;  %v1640_v26 = vadd.f32 %v1639_v32, %v1638_v28  ;;  %v2080_v28 = vsel %vm538_vm0, %v1798_v12, 0.0  ;;  %v2082_v25 = vsel %vm538_vm0, %v1799_v33, 0.0 }
 0x1f3   :  { %v1802_v12 = vmul.f32 %v5467_v41, %v5467_v41  ;;  %v2084_v33 = vsel %vm538_vm0, %v1800_v38, 0.0 }
 0x1f4   :  { %v1642_v42 = vadd.f32 %v1641_v17, %v1640_v26  ;;  %v2077_v60 = vadd.f32 %v2076_v22, %v2075_v54  ;;  %v1647_v54 = vsel %vm538_vm0, %v5473_v2, 0.0 }
 0x1f6   :  { %v2079_v10 = vadd.f32 %v2078_v29, %v2077_v60  ;;  %v1644_v6 = vadd.f32 %v1643_v57, %v1642_v42  ;;  %v1649_v42 = vsel %vm538_vm0, %v5458_v48, 0.0  ;;  %v2086_v57 = vsel %vm538_vm0, %v1801_v63, 0.0 }
 0x1f8   :  { %v1646_v32 = vadd.f32 %v1645_v50, %v1644_v6  ;;  %v2081_v26 = vadd.f32 %v2080_v28, %v2079_v10  ;;  %v1651_v50 = vsel %vm538_vm0, %v5467_v41, 0.0  ;;  %v2088_v28 = vsel %vm538_vm0, %v1802_v12, 0.0 }
 0x1fa   :  { %v2083_v17 = vadd.f32 %v2082_v25, %v2081_v26  ;;  %v1648_v22 = vadd.f32 %v1647_v54, %v1646_v32 }
 0x1fc   :  { %v1650_v60 = vadd.f32 %v1649_v42, %v1648_v22  ;;  %v2085_v29 = vadd.f32 %v2084_v33, %v2083_v17 }
 0x1fe   :  { %v1652_v10 = vadd.f32 %v1651_v50, %v1650_v60  ;;  %v2087_v6 = vadd.f32 %v2086_v57, %v2085_v29  ;;  %v10955_v60 = vld [vmem:[#allocation3_spill] sm:$0xff]  ;;  %v10956_v57 = vld [vmem:[#allocation5_spill] sm:$0xff]  ;;  %v10957_v50 = vld [vmem:[#allocation2_spill] sm:$0xff] }
 0x1ff   :  { %v11037_v29 = vld [vmem:[#allocation34_spill] sm:$0xff] }
 0x200   :  { %v1653_v25 = vrot.slane %v1652_v10, 4  ;;  %v2089_v32 = vadd.f32 %v2088_v28, %v2087_v6  ;;  %v10960_v28 = vld [vmem:[#allocation9_spill] sm:$0xff]  ;;  %v11035_v6 = vld [vmem:[#allocation36_spill] sm:$0xff] }
 0x202   :  { %v1654_v26 = vadd.f32 %v1653_v25, %v1652_v10  ;;  %v2090_v54 = vrot.slane %v2089_v32, 4  ;;  %v10959_v10 = vld [vmem:[#allocation7_spill] sm:$0xff]  ;;  %v11036_v25 = vld [vmem:[#allocation40_spill] sm:$0xff] }
 0x204   :  { %v1655_v48 = vrot.slane %v1654_v26, 2  ;;  %v2091_v2 = vadd.f32 %v2090_v54, %v2089_v32  ;;  %v11038_v54 = vld [vmem:[#allocation38_spill] sm:$0xff]  ;;  %v11045_v32 = vld [vmem:[#allocation92_spill] sm:$0xff] }
 0x206   :  { %v1656_v55 = vadd.f32 %v1655_v48, %v1654_v26  ;;  %v2092_v35 = vrot.slane %v2091_v2, 2  ;;  %v11046_v26 = vld [vmem:[#allocation86_spill] sm:$0xff] }
 0x208   :  { %v1657_v38 = vrot.slane %v1656_v55, 1  ;;  %v2093_v22 = vadd.f32 %v2092_v35, %v2091_v2  ;;  %v11041_v2 = vld [vmem:[#allocation42_spill] sm:$0xff]  ;;  %v11057_v35 = vld [vmem:[#allocation119_spill] sm:$0xff] }
 0x20a   :  { %v1658_v17 = vadd.f32 %v1657_v38, %v1656_v55  ;;  %v2094_v42 = vrot.slane %v2093_v22, 1  ;;  %v10958_v55 = vld [vmem:[#allocation4_spill] sm:$0xff]  ;;  %v11054_v38 = vld [vmem:[#allocation118_spill] sm:$0xff] }
 0x20c   :  { %v2095_v63 = vadd.f32 %v2094_v42, %v2093_v22  ;;  %v5768_v33 = vmul.f32 0.00086805556, %v1658_v17  ;;  %v11039_v22 = vld [vmem:[#allocation44_spill] sm:$0xff]  ;;  %v11040_v42 = vld [vmem:[#allocation47_spill] sm:$0xff] }
 0x20d   :  { %v11048_v17 = vld [vmem:[#allocation96_spill] sm:$0xff] }
 0x20e   :  { %v5770_v41 = vmul.f32 0.00086805556, %v2095_v63  ;;  %v5774_v12 = vmul.f32 %v5768_v33, %v5768_v33  ;;  %v11056_v63 = vld [vmem:[#allocation117_spill] sm:$0xff]  ;;  %v11059_v53 = vsub.f32 %v10955_v60, %v5768_v33  ;;  %v11060_v34 = vsub.f32 %v10956_v57, %v5768_v33 }
 0x20f   :  { %v11061_v14 = vsub.f32 %v10957_v50, %v5768_v33 }
 0x210   :  { %v11058_v48 = vsub.f32 %v5770_v41, %v5774_v12 }
 0x212   :  { %v2244_v20 = vadd.f32 1e-05, %v11058_v48 }
 0x214   :  { %4439 = vrsqrt.f32 %v2244_v20  ;;  %v11062_v20 = vsub.f32 %v10958_v55, %v5768_v33  ;;  %v11070_v55 = vld [vmem:[#allocation8_spill] sm:$0xff] }
 0x21e   :  { %v6069_v52 = vpop.eup %4439 }
 0x21f   :  { %v6075_v46 = vmul.f32 %v6069_v52, %v11059_v53  ;;  %v6081_v56 = vmul.f32 %v6069_v52, %v11060_v34  ;;  %v6087_v41 = vmul.f32 %v6069_v52, %v11061_v14  ;;  %v6093_v12 = vmul.f32 %v6069_v52, %v11062_v20  ;;  %v11067_v14 = vld [vmem:[#allocation6_spill] sm:$0xff] }
 0x220   :  { %v11063_v53 = vsub.f32 %v10959_v10, %v5768_v33  ;;  %v11065_v34 = vsub.f32 %v10960_v28, %v5768_v33  ;;  %v11068_v48 = vsub.f32 %v11067_v14, %v5768_v33  ;;  %v11071_v20 = vsub.f32 %v11070_v55, %v5768_v33 }
 0x222   :  { %v6099_v60 = vmul.f32 %v6069_v52, %v11063_v53  ;;  %v6105_v57 = vmul.f32 %v6069_v52, %v11065_v34  ;;  %v6111_v50 = vmul.f32 %v6069_v52, %v11068_v48  ;;  %v6117_v10 = vmul.f32 %v6069_v52, %v11071_v20  ;;  %v11073_v53 = vld [vmem:[#allocation11_spill] sm:$0xff]  ;;  %v11076_v34 = vld [vmem:[#allocation13_spill] sm:$0xff]  ;;  %v11079_v48 = vld [vmem:[#allocation10_spill] sm:$0xff] }
 0x223   :  { %v11082_v20 = vld [vmem:[#allocation12_spill] sm:$0xff] }
 0x224   :  { %11064 = vst [vmem:[#allocation104_spill] sm:$0xff] %v6099_v60  ;;  %11066 = vst [vmem:[#allocation108_spill] sm:$0xff] %v6105_v57  ;;  %v11074_v60 = vsub.f32 %v11073_v53, %v5768_v33  ;;  %v11077_v57 = vsub.f32 %v11076_v34, %v5768_v33 }
 0x225   :  { %11069 = vst [vmem:[#allocation106_spill] sm:$0xff] %v6111_v50  ;;  %11072 = vst [vmem:[#allocation3_spill] sm:$0xff] %v6117_v10  ;;  %v11080_v50 = vsub.f32 %v11079_v48, %v5768_v33  ;;  %v11083_v10 = vsub.f32 %v11082_v20, %v5768_v33 }
 0x226   :  { %v6123_v28 = vmul.f32 %v6069_v52, %v11074_v60  ;;  %v6129_v14 = vmul.f32 %v6069_v52, %v11077_v57  ;;  %v11085_v60 = vld [vmem:[#allocation15_spill] sm:$0xff]  ;;  %v11088_v57 = vld [vmem:[#allocation17_spill] sm:$0xff] }
 0x227   :  { %v6135_v55 = vmul.f32 %v6069_v52, %v11080_v50  ;;  %v6141_v53 = vmul.f32 %v6069_v52, %v11083_v10  ;;  %v11091_v50 = vld [vmem:[#allocation14_spill] sm:$0xff]  ;;  %v11094_v10 = vld [vmem:[#allocation16_spill] sm:$0xff] }
 0x228   :  { %11075 = vst [vmem:[#allocation5_spill] sm:$0xff] %v6123_v28  ;;  %11078 = vst [vmem:[#allocation2_spill] sm:$0xff] %v6129_v14  ;;  %v11086_v28 = vsub.f32 %v11085_v60, %v5768_v33  ;;  %v11089_v14 = vsub.f32 %v11088_v57, %v5768_v33 }
 0x229   :  { %11081 = vst [vmem:[#allocation4_spill] sm:$0xff] %v6135_v55  ;;  %11084 = vst [vmem:[#allocation7_spill] sm:$0xff] %v6141_v53  ;;  %v11092_v55 = vsub.f32 %v11091_v50, %v5768_v33  ;;  %v11095_v53 = vsub.f32 %v11094_v10, %v5768_v33 }
 0x22a   :  { %v6147_v34 = vmul.f32 %v6069_v52, %v11086_v28  ;;  %v6153_v48 = vmul.f32 %v6069_v52, %v11089_v14  ;;  %v11097_v28 = vld [vmem:[#allocation21_spill] sm:$0xff] }
 0x22b   :  { %v6159_v20 = vmul.f32 %v6069_v52, %v11092_v55  ;;  %v6165_v60 = vmul.f32 %v6069_v52, %v11095_v53  ;;  %v11100_v14 = vld [vmem:[#allocation25_spill] sm:$0xff]  ;;  %v11103_v55 = vld [vmem:[#allocation19_spill] sm:$0xff] }
 0x22c   :  { %11087 = vst [vmem:[#allocation9_spill] sm:$0xff] %v6147_v34  ;;  %11090 = vst [vmem:[#allocation36_spill] sm:$0xff] %v6153_v48  ;;  %v11098_v34 = vsub.f32 %v11097_v28, %v5768_v33  ;;  %v11101_v48 = vsub.f32 %v11100_v14, %v5768_v33  ;;  %v11106_v53 = vld [vmem:[#allocation23_spill] sm:$0xff] }
 0x22d   :  { %11093 = vst [vmem:[#allocation40_spill] sm:$0xff] %v6159_v20  ;;  %11096 = vst [vmem:[#allocation34_spill] sm:$0xff] %v6165_v60  ;;  %v11104_v20 = vsub.f32 %v11103_v55, %v5768_v33  ;;  %v11107_v60 = vsub.f32 %v11106_v53, %v5768_v33 }
 0x22e   :  { %v6171_v57 = vmul.f32 %v6069_v52, %v11098_v34  ;;  %v6177_v50 = vmul.f32 %v6069_v52, %v11101_v48  ;;  %v11109_v34 = vld [vmem:[#allocation29_spill] sm:$0xff] }
 0x22f   :  { %v6183_v10 = vmul.f32 %v6069_v52, %v11104_v20  ;;  %v6189_v28 = vmul.f32 %v6069_v52, %v11107_v60  ;;  %v11112_v48 = vld [vmem:[#allocation33_spill] sm:$0xff]  ;;  %v11115_v20 = vld [vmem:[#allocation27_spill] sm:$0xff] }
 0x230   :  { %11099 = vst [vmem:[#allocation38_spill] sm:$0xff] %v6171_v57  ;;  %11102 = vst [vmem:[#allocation44_spill] sm:$0xff] %v6177_v50  ;;  %v11110_v57 = vsub.f32 %v11109_v34, %v5768_v33  ;;  %v11113_v50 = vsub.f32 %v11112_v48, %v5768_v33  ;;  %v11118_v60 = vld [vmem:[#allocation31_spill] sm:$0xff] }
 0x231   :  { %11105 = vst [vmem:[#allocation47_spill] sm:$0xff] %v6183_v10  ;;  %11108 = vst [vmem:[#allocation42_spill] sm:$0xff] %v6189_v28  ;;  %v11116_v10 = vsub.f32 %v11115_v20, %v5768_v33  ;;  %v11119_v28 = vsub.f32 %v11118_v60, %v5768_v33 }
 0x232   :  { %v6195_v14 = vmul.f32 %v6069_v52, %v11110_v57  ;;  %v6201_v55 = vmul.f32 %v6069_v52, %v11113_v50  ;;  %v11121_v57 = vld [vmem:[#allocation37_spill] sm:$0xff] }
 0x233   :  { %v6207_v53 = vmul.f32 %v6069_v52, %v11116_v10  ;;  %v6213_v34 = vmul.f32 %v6069_v52, %v11119_v28  ;;  %v11124_v50 = vld [vmem:[#allocation41_spill] sm:$0xff]  ;;  %v11127_v10 = vld [vmem:[#allocation35_spill] sm:$0xff] }
 0x234   :  { %11111 = vst [vmem:[#allocation92_spill] sm:$0xff] %v6195_v14  ;;  %11114 = vst [vmem:[#allocation86_spill] sm:$0xff] %v6201_v55  ;;  %v11122_v14 = vsub.f32 %v11121_v57, %v5768_v33  ;;  %v11125_v55 = vsub.f32 %v11124_v50, %v5768_v33  ;;  %v11130_v28 = vld [vmem:[#allocation39_spill] sm:$0xff] }
 0x235   :  { %11117 = vst [vmem:[#allocation96_spill] sm:$0xff] %v6207_v53  ;;  %11120 = vst [vmem:[#allocation100_spill] sm:$0xff] %v6213_v34  ;;  %v11128_v53 = vsub.f32 %v11127_v10, %v5768_v33  ;;  %v11131_v34 = vsub.f32 %v11130_v28, %v5768_v33 }
 0x236   :  { %v6219_v48 = vmul.f32 %v6069_v52, %v11122_v14  ;;  %v6225_v20 = vmul.f32 %v6069_v52, %v11125_v55  ;;  %v11133_v14 = vld [vmem:[#allocation45_spill] sm:$0xff]  ;;  %v11136_v55 = vld [vmem:[#allocation48_spill] sm:$0xff] }
 0x237   :  { %v6231_v60 = vmul.f32 %v6069_v52, %v11128_v53  ;;  %v6237_v57 = vmul.f32 %v6069_v52, %v11131_v34  ;;  %v11139_v53 = vld [vmem:[#allocation43_spill] sm:$0xff]  ;;  %v11142_v34 = vld [vmem:[#allocation46_spill] sm:$0xff] }
 0x238   :  { %11123 = vst [vmem:[#allocation94_spill] sm:$0xff] %v6219_v48  ;;  %11126 = vst [vmem:[#allocation98_spill] sm:$0xff] %v6225_v20  ;;  %v11134_v48 = vsub.f32 %v11133_v14, %v5768_v33  ;;  %v11137_v20 = vsub.f32 %v11136_v55, %v5768_v33 }
 0x239   :  { %11129 = vst [vmem:[#allocation102_spill] sm:$0xff] %v6231_v60  ;;  %11132 = vst [vmem:[#allocation115_spill] sm:$0xff] %v6237_v57  ;;  %v11140_v60 = vsub.f32 %v11139_v53, %v5768_v33  ;;  %v11143_v57 = vsub.f32 %v11142_v34, %v5768_v33 }
 0x23a   :  { %v6243_v50 = vmul.f32 %v6069_v52, %v11134_v48  ;;  %v6249_v10 = vmul.f32 %v6069_v52, %v11137_v20  ;;  %v11145_v48 = vld [vmem:[#allocation50_spill] sm:$0xff]  ;;  %v11148_v20 = vld [vmem:[#allocation52_spill] sm:$0xff] }
 0x23b   :  { %v6255_v28 = vmul.f32 %v6069_v52, %v11140_v60  ;;  %v6261_v14 = vmul.f32 %v6069_v52, %v11143_v57  ;;  %v11151_v60 = vld [vmem:[#allocation49_spill] sm:$0xff]  ;;  %v11154_v57 = vld [vmem:[#allocation51_spill] sm:$0xff] }
 0x23c   :  { %11135 = vst [vmem:[#allocation118_spill] sm:$0xff] %v6243_v50  ;;  %11138 = vst [vmem:[#allocation120_spill] sm:$0xff] %v6249_v10  ;;  %v11146_v50 = vsub.f32 %v11145_v48, %v5768_v33  ;;  %v11149_v10 = vsub.f32 %v11148_v20, %v5768_v33 }
 0x23d   :  { %11141 = vst [vmem:[#allocation117_spill] sm:$0xff] %v6255_v28  ;;  %11144 = vst [vmem:[#allocation119_spill] sm:$0xff] %v6261_v14  ;;  %v11152_v28 = vsub.f32 %v11151_v60, %v5768_v33  ;;  %v11155_v14 = vsub.f32 %v11154_v57, %v5768_v33 }
 0x23e   :  { %v6267_v55 = vmul.f32 %v6069_v52, %v11146_v50  ;;  %v6273_v53 = vmul.f32 %v6069_v52, %v11149_v10  ;;  %v11157_v50 = vld [vmem:[#allocation54_spill] sm:$0xff]  ;;  %v11160_v10 = vld [vmem:[#allocation56_spill] sm:$0xff] }
 0x23f   :  { %v6279_v34 = vmul.f32 %v6069_v52, %v11152_v28  ;;  %v6285_v48 = vmul.f32 %v6069_v52, %v11155_v14  ;;  %v11163_v28 = vld [vmem:[#allocation53_spill] sm:$0xff]  ;;  %v11166_v14 = vld [vmem:[#allocation55_spill] sm:$0xff] }
 0x240   :  { %11147 = vst [vmem:[#allocation6_spill] sm:$0xff] %v6267_v55  ;;  %11150 = vst [vmem:[#allocation8_spill] sm:$0xff] %v6273_v53  ;;  %v11158_v55 = vsub.f32 %v11157_v50, %v5768_v33  ;;  %v11161_v53 = vsub.f32 %v11160_v10, %v5768_v33 }
 0x241   :  { %11153 = vst [vmem:[#allocation11_spill] sm:$0xff] %v6279_v34  ;;  %11156 = vst [vmem:[#allocation13_spill] sm:$0xff] %v6285_v48  ;;  %v11164_v34 = vsub.f32 %v11163_v28, %v5768_v33  ;;  %v11167_v48 = vsub.f32 %v11166_v14, %v5768_v33 }
 0x242   :  { %v6291_v20 = vmul.f32 %v6069_v52, %v11158_v55  ;;  %v6297_v60 = vmul.f32 %v6069_v52, %v11161_v53  ;;  %v11169_v55 = vld [vmem:[#allocation58_spill] sm:$0xff]  ;;  %v11172_v53 = vld [vmem:[#allocation60_spill] sm:$0xff] }
 0x243   :  { %v6303_v57 = vmul.f32 %v6069_v52, %v11164_v34  ;;  %v6309_v50 = vmul.f32 %v6069_v52, %v11167_v48  ;;  %v11175_v34 = vld [vmem:[#allocation57_spill] sm:$0xff]  ;;  %v11178_v48 = vld [vmem:[#allocation59_spill] sm:$0xff] }
 0x244   :  { %11159 = vst [vmem:[#allocation10_spill] sm:$0xff] %v6291_v20  ;;  %11162 = vst [vmem:[#allocation12_spill] sm:$0xff] %v6297_v60  ;;  %v11170_v20 = vsub.f32 %v11169_v55, %v5768_v33  ;;  %v11173_v60 = vsub.f32 %v11172_v53, %v5768_v33 }
 0x245   :  { %11165 = vst [vmem:[#allocation15_spill] sm:$0xff] %v6303_v57  ;;  %11168 = vst [vmem:[#allocation17_spill] sm:$0xff] %v6309_v50  ;;  %v11176_v57 = vsub.f32 %v11175_v34, %v5768_v33  ;;  %v11179_v50 = vsub.f32 %v11178_v48, %v5768_v33 }
 0x246   :  { %v6315_v10 = vmul.f32 %v6069_v52, %v11170_v20  ;;  %v6321_v28 = vmul.f32 %v6069_v52, %v11173_v60  ;;  %v11181_v20 = vld [vmem:[#allocation62_spill] sm:$0xff]  ;;  %v11184_v60 = vld [vmem:[#allocation64_spill] sm:$0xff] }
 0x247   :  { %v6327_v14 = vmul.f32 %v6069_v52, %v11176_v57  ;;  %v6333_v55 = vmul.f32 %v6069_v52, %v11179_v50  ;;  %v11187_v57 = vld [vmem:[#allocation61_spill] sm:$0xff]  ;;  %v11190_v50 = vld [vmem:[#allocation63_spill] sm:$0xff] }
 0x248   :  { %11171 = vst [vmem:[#allocation14_spill] sm:$0xff] %v6315_v10  ;;  %11174 = vst [vmem:[#allocation16_spill] sm:$0xff] %v6321_v28  ;;  %v11182_v10 = vsub.f32 %v11181_v20, %v5768_v33  ;;  %v11185_v28 = vsub.f32 %v11184_v60, %v5768_v33 }
 0x249   :  { %11177 = vst [vmem:[#allocation21_spill] sm:$0xff] %v6327_v14  ;;  %11180 = vst [vmem:[#allocation25_spill] sm:$0xff] %v6333_v55  ;;  %v11188_v14 = vsub.f32 %v11187_v57, %v5768_v33  ;;  %v11191_v55 = vsub.f32 %v11190_v50, %v5768_v33 }
 0x24a   :  { %v6339_v53 = vmul.f32 %v6069_v52, %v11182_v10  ;;  %v6345_v34 = vmul.f32 %v6069_v52, %v11185_v28  ;;  %v11193_v10 = vld [vmem:[#allocation66_spill] sm:$0xff]  ;;  %v11196_v28 = vld [vmem:[#allocation69_spill] sm:$0xff] }
 0x24b   :  { %v6351_v48 = vmul.f32 %v6069_v52, %v11188_v14  ;;  %v6357_v20 = vmul.f32 %v6069_v52, %v11191_v55  ;;  %v11199_v14 = vld [vmem:[#allocation65_spill] sm:$0xff]  ;;  %v11202_v55 = vld [vmem:[#allocation68_spill] sm:$0xff] }
 0x24c   :  { %11183 = vst [vmem:[#allocation19_spill] sm:$0xff] %v6339_v53  ;;  %11186 = vst [vmem:[#allocation23_spill] sm:$0xff] %v6345_v34  ;;  %v11194_v53 = vsub.f32 %v11193_v10, %v5768_v33  ;;  %v11197_v34 = vsub.f32 %v11196_v28, %v5768_v33 }
 0x24d   :  { %11189 = vst [vmem:[#allocation29_spill] sm:$0xff] %v6351_v48  ;;  %11192 = vst [vmem:[#allocation33_spill] sm:$0xff] %v6357_v20  ;;  %v11200_v48 = vsub.f32 %v11199_v14, %v5768_v33  ;;  %v11203_v20 = vsub.f32 %v11202_v55, %v5768_v33 }
 0x24e   :  { %v6363_v60 = vmul.f32 %v6069_v52, %v11194_v53  ;;  %v6369_v57 = vmul.f32 %v6069_v52, %v11197_v34  ;;  %v11205_v53 = vld [vmem:[#allocation73_spill] sm:$0xff] }
 0x24f   :  { %v6375_v50 = vmul.f32 %v6069_v52, %v11200_v48  ;;  %v6381_v10 = vmul.f32 %v6069_v52, %v11203_v20  ;;  %v11208_v34 = vld [vmem:[#allocation77_spill] sm:$0xff]  ;;  %v11211_v48 = vld [vmem:[#allocation71_spill] sm:$0xff] }
 0x250   :  { %11195 = vst [vmem:[#allocation27_spill] sm:$0xff] %v6363_v60  ;;  %11198 = vst [vmem:[#allocation31_spill] sm:$0xff] %v6369_v57  ;;  %v11206_v60 = vsub.f32 %v11205_v53, %v5768_v33  ;;  %v11209_v57 = vsub.f32 %v11208_v34, %v5768_v33  ;;  %v11214_v20 = vld [vmem:[#allocation75_spill] sm:$0xff] }
 0x251   :  { %11201 = vst [vmem:[#allocation37_spill] sm:$0xff] %v6375_v50  ;;  %11204 = vst [vmem:[#allocation41_spill] sm:$0xff] %v6381_v10  ;;  %v11212_v50 = vsub.f32 %v11211_v48, %v5768_v33  ;;  %v11215_v10 = vsub.f32 %v11214_v20, %v5768_v33 }
 0x252   :  { %v6387_v28 = vmul.f32 %v6069_v52, %v11206_v60  ;;  %v6393_v14 = vmul.f32 %v6069_v52, %v11209_v57  ;;  %v11217_v60 = vld [vmem:[#allocation81_spill] sm:$0xff] }
 0x253   :  { %v6399_v55 = vmul.f32 %v6069_v52, %v11212_v50  ;;  %v6405_v53 = vmul.f32 %v6069_v52, %v11215_v10  ;;  %v11220_v57 = vld [vmem:[#allocation85_spill] sm:$0xff]  ;;  %v11223_v50 = vld [vmem:[#allocation79_spill] sm:$0xff] }
 0x254   :  { %11207 = vst [vmem:[#allocation35_spill] sm:$0xff] %v6387_v28  ;;  %11210 = vst [vmem:[#allocation39_spill] sm:$0xff] %v6393_v14  ;;  %v11218_v28 = vsub.f32 %v11217_v60, %v5768_v33  ;;  %v11221_v14 = vsub.f32 %v11220_v57, %v5768_v33  ;;  %v11226_v10 = vld [vmem:[#allocation83_spill] sm:$0xff] }
 0x255   :  { %11213 = vst [vmem:[#allocation45_spill] sm:$0xff] %v6399_v55  ;;  %11216 = vst [vmem:[#allocation48_spill] sm:$0xff] %v6405_v53  ;;  %v11224_v55 = vsub.f32 %v11223_v50, %v5768_v33  ;;  %v11227_v53 = vsub.f32 %v11226_v10, %v5768_v33 }
 0x256   :  { %v6411_v34 = vmul.f32 %v6069_v52, %v11218_v28  ;;  %v6417_v48 = vmul.f32 %v6069_v52, %v11221_v14  ;;  %v11229_v28 = vld [vmem:[#allocation89_spill] sm:$0xff] }
 0x257   :  { %v6423_v20 = vmul.f32 %v6069_v52, %v11224_v55  ;;  %v6429_v60 = vmul.f32 %v6069_v52, %v11227_v53  ;;  %v11232_v14 = vld [vmem:[#allocation93_spill] sm:$0xff]  ;;  %v11235_v55 = vld [vmem:[#allocation87_spill] sm:$0xff] }
 0x258   :  { %11219 = vst [vmem:[#allocation43_spill] sm:$0xff] %v6411_v34  ;;  %11222 = vst [vmem:[#allocation46_spill] sm:$0xff] %v6417_v48  ;;  %v11230_v34 = vsub.f32 %v11229_v28, %v5768_v33  ;;  %v11233_v48 = vsub.f32 %v11232_v14, %v5768_v33  ;;  %v11238_v53 = vld [vmem:[#allocation91_spill] sm:$0xff] }
 0x259   :  { %11225 = vst [vmem:[#allocation50_spill] sm:$0xff] %v6423_v20  ;;  %11228 = vst [vmem:[#allocation52_spill] sm:$0xff] %v6429_v60  ;;  %v11236_v20 = vsub.f32 %v11235_v55, %v5768_v33  ;;  %v11239_v60 = vsub.f32 %v11238_v53, %v5768_v33 }
 0x25a   :  { %v6435_v57 = vmul.f32 %v6069_v52, %v11230_v34  ;;  %v6441_v50 = vmul.f32 %v6069_v52, %v11233_v48  ;;  %v11241_v34 = vld [vmem:[#allocation97_spill] sm:$0xff] }
 0x25b   :  { %v6447_v10 = vmul.f32 %v6069_v52, %v11236_v20  ;;  %v6453_v28 = vmul.f32 %v6069_v52, %v11239_v60  ;;  %v11244_v48 = vld [vmem:[#allocation101_spill] sm:$0xff]  ;;  %v11247_v20 = vld [vmem:[#allocation95_spill] sm:$0xff] }
 0x25c   :  { %11231 = vst [vmem:[#allocation49_spill] sm:$0xff] %v6435_v57  ;;  %11234 = vst [vmem:[#allocation51_spill] sm:$0xff] %v6441_v50  ;;  %v11242_v57 = vsub.f32 %v11241_v34, %v5768_v33  ;;  %v11245_v50 = vsub.f32 %v11244_v48, %v5768_v33  ;;  %v11250_v60 = vld [vmem:[#allocation99_spill] sm:$0xff] }
 0x25d   :  { %11237 = vst [vmem:[#allocation54_spill] sm:$0xff] %v6447_v10  ;;  %11240 = vst [vmem:[#allocation56_spill] sm:$0xff] %v6453_v28  ;;  %v11248_v10 = vsub.f32 %v11247_v20, %v5768_v33  ;;  %v11251_v28 = vsub.f32 %v11250_v60, %v5768_v33 }
 0x25e   :  { %v6459_v14 = vmul.f32 %v6069_v52, %v11242_v57  ;;  %v6465_v55 = vmul.f32 %v6069_v52, %v11245_v50  ;;  %v11253_v57 = vld [vmem:[#allocation105_spill] sm:$0xff] }
 0x25f   :  { %v6471_v53 = vmul.f32 %v6069_v52, %v11248_v10  ;;  %v6477_v34 = vmul.f32 %v6069_v52, %v11251_v28  ;;  %v11256_v50 = vld [vmem:[#allocation109_spill] sm:$0xff]  ;;  %v11259_v10 = vld [vmem:[#allocation103_spill] sm:$0xff] }
 0x260   :  { %11243 = vst [vmem:[#allocation53_spill] sm:$0xff] %v6459_v14  ;;  %11246 = vst [vmem:[#allocation55_spill] sm:$0xff] %v6465_v55  ;;  %v11254_v14 = vsub.f32 %v11253_v57, %v5768_v33  ;;  %v11257_v55 = vsub.f32 %v11256_v50, %v5768_v33  ;;  %v11262_v28 = vld [vmem:[#allocation107_spill] sm:$0xff] }
 0x261   :  { %11249 = vst [vmem:[#allocation58_spill] sm:$0xff] %v6471_v53  ;;  %11252 = vst [vmem:[#allocation60_spill] sm:$0xff] %v6477_v34  ;;  %v11260_v53 = vsub.f32 %v11259_v10, %v5768_v33  ;;  %v11263_v34 = vsub.f32 %v11262_v28, %v5768_v33 }
 0x262   :  { %v6483_v48 = vmul.f32 %v6069_v52, %v11254_v14  ;;  %v6489_v20 = vmul.f32 %v6069_v52, %v11257_v55  ;;  %v11265_v14 = vld [vmem:[#allocation20_spill] sm:$0xff] }
 0x263   :  { %v6495_v60 = vmul.f32 %v6069_v52, %v11260_v53  ;;  %v6501_v57 = vmul.f32 %v6069_v52, %v11263_v34  ;;  %v11268_v55 = vld [vmem:[#allocation24_spill] sm:$0xff]  ;;  %v11271_v53 = vld [vmem:[#allocation18_spill] sm:$0xff] }
 0x264   :  { %11255 = vst [vmem:[#allocation57_spill] sm:$0xff] %v6483_v48  ;;  %11258 = vst [vmem:[#allocation59_spill] sm:$0xff] %v6489_v20  ;;  %v11266_v48 = vsub.f32 %v11265_v14, %v5768_v33  ;;  %v11269_v20 = vsub.f32 %v11268_v55, %v5768_v33  ;;  %v11274_v34 = vld [vmem:[#allocation22_spill] sm:$0xff] }
 0x265   :  { %11261 = vst [vmem:[#allocation62_spill] sm:$0xff] %v6495_v60  ;;  %11264 = vst [vmem:[#allocation64_spill] sm:$0xff] %v6501_v57  ;;  %v11272_v60 = vsub.f32 %v11271_v53, %v5768_v33  ;;  %v11275_v57 = vsub.f32 %v11274_v34, %v5768_v33 }
 0x266   :  { %v6507_v50 = vmul.f32 %v6069_v52, %v11266_v48  ;;  %v6513_v10 = vmul.f32 %v6069_v52, %v11269_v20  ;;  %v11277_v48 = vld [vmem:[#allocation28_spill] sm:$0xff] }
 0x267   :  { %v6519_v28 = vmul.f32 %v6069_v52, %v11272_v60  ;;  %v6525_v14 = vmul.f32 %v6069_v52, %v11275_v57  ;;  %v11279_v20 = vld [vmem:[#allocation32_spill] sm:$0xff]  ;;  %v11281_v60 = vld [vmem:[#allocation26_spill] sm:$0xff] }
 0x268   :  { %11267 = vst [vmem:[#allocation61_spill] sm:$0xff] %v6507_v50  ;;  %11270 = vst [vmem:[#allocation63_spill] sm:$0xff] %v6513_v10  ;;  %v11278_v50 = vsub.f32 %v11277_v48, %v5768_v33  ;;  %v11280_v10 = vsub.f32 %v11279_v20, %v5768_v33  ;;  %v11283_v57 = vld [vmem:[#allocation30_spill] sm:$0xff] }
 0x269   :  { %11273 = vst [vmem:[#allocation66_spill] sm:$0xff] %v6519_v28  ;;  %11276 = vst [vmem:[#allocation69_spill] sm:$0xff] %v6525_v14  ;;  %v11282_v28 = vsub.f32 %v11281_v60, %v5768_v33  ;;  %v11284_v14 = vsub.f32 %v11283_v57, %v5768_v33 }
 0x26a   :  { %v6531_v55 = vmul.f32 %v6069_v52, %v11278_v50  ;;  %v6537_v53 = vmul.f32 %v6069_v52, %v11280_v10  ;;  %v11285_v50 = vsub.f32 %v11035_v6, %v5768_v33  ;;  %v11286_v10 = vsub.f32 %v11036_v25, %v5768_v33 }
 0x26b   :  { %v6543_v34 = vmul.f32 %v6069_v52, %v11282_v28  ;;  %v6549_v48 = vmul.f32 %v6069_v52, %v11284_v14  ;;  %v11287_v28 = vsub.f32 %v11037_v29, %v5768_v33  ;;  %v11288_v14 = vsub.f32 %v11038_v54, %v5768_v33 }
 0x26c   :  { %v6555_v20 = vmul.f32 %v6069_v52, %v11285_v50  ;;  %v6561_v60 = vmul.f32 %v6069_v52, %v11286_v10  ;;  %v11289_v50 = vsub.f32 %v11039_v22, %v5768_v33  ;;  %v11290_v10 = vsub.f32 %v11040_v42, %v5768_v33 }
 0x26d   :  { %v6567_v57 = vmul.f32 %v6069_v52, %v11287_v28  ;;  %v6573_v6 = vmul.f32 %v6069_v52, %v11288_v14  ;;  %v11291_v28 = vsub.f32 %v11041_v2, %v5768_v33  ;;  %v11292_v14 = vsub.f32 %v4987_v7, %v5768_v33 }
 0x26e   :  { %v6579_v25 = vmul.f32 %v6069_v52, %v11289_v50  ;;  %v6585_v29 = vmul.f32 %v6069_v52, %v11290_v10  ;;  %v11293_v50 = vsub.f32 %v5019_v30, %v5768_v33  ;;  %v11294_v10 = vsub.f32 %v5032_v49, %v5768_v33 }
 0x26f   :  { %v6591_v54 = vmul.f32 %v6069_v52, %v11291_v28  ;;  %v6597_v22 = vmul.f32 %v6069_v52, %v11292_v14  ;;  %v11295_v28 = vsub.f32 %v5012_v8, %v5768_v33  ;;  %v11296_v14 = vsub.f32 %v5023_v58, %v5768_v33 }
 0x270   :  { %v6603_v42 = vmul.f32 %v6069_v52, %v11293_v50  ;;  %v6609_v2 = vmul.f32 %v6069_v52, %v11294_v10  ;;  %v11297_v50 = vsub.f32 %v5055_v24, %v5768_v33  ;;  %v11298_v10 = vsub.f32 %v5068_v21, %v5768_v33 }
 0x271   :  { %v6615_v7 = vmul.f32 %v6069_v52, %v11295_v28  ;;  %v6621_v30 = vmul.f32 %v6069_v52, %v11296_v14  ;;  %v11299_v28 = vsub.f32 %v5048_v1, %v5768_v33  ;;  %v11300_v14 = vsub.f32 %v5059_v36, %v5768_v33 }
 0x272   :  { %v6627_v49 = vmul.f32 %v6069_v52, %v11297_v50  ;;  %v6633_v8 = vmul.f32 %v6069_v52, %v11298_v10  ;;  %v11301_v50 = vsub.f32 %v5091_v47, %v5768_v33  ;;  %v11302_v10 = vsub.f32 %v5104_v39, %v5768_v33 }
 0x273   :  { %v6639_v58 = vmul.f32 %v6069_v52, %v11299_v28  ;;  %v6645_v24 = vmul.f32 %v6069_v52, %v11300_v14  ;;  %v11303_v28 = vsub.f32 %v5084_v18, %v5768_v33  ;;  %v11304_v14 = vsub.f32 %v5095_v5, %v5768_v33 }
 0x274   :  { %v6651_v21 = vmul.f32 %v6069_v52, %v11301_v50  ;;  %v6657_v1 = vmul.f32 %v6069_v52, %v11302_v10  ;;  %v11305_v50 = vsub.f32 %v5127_v0, %v5768_v33  ;;  %v11306_v10 = vsub.f32 %v5140_v40, %v5768_v33 }
 0x275   :  { %v6663_v36 = vmul.f32 %v6069_v52, %v11303_v28  ;;  %v6669_v47 = vmul.f32 %v6069_v52, %v11304_v14  ;;  %v11307_v28 = vsub.f32 %v5120_v45, %v5768_v33  ;;  %v11308_v14 = vsub.f32 %v5131_v44, %v5768_v33 }
 0x276   :  { %v6675_v39 = vmul.f32 %v6069_v52, %v11305_v50  ;;  %v6681_v18 = vmul.f32 %v6069_v52, %v11306_v10  ;;  %v11310_v50 = vsub.f32 %v5163_v27, %v5768_v33  ;;  %v11312_v10 = vsub.f32 %v5176_v9, %v5768_v33 }
 0x277   :  { %v6687_v5 = vmul.f32 %v6069_v52, %v11307_v28  ;;  %v6693_v0 = vmul.f32 %v6069_v52, %v11308_v14  ;;  %v11314_v28 = vsub.f32 %v5156_v16, %v5768_v33  ;;  %v11316_v14 = vld [vmem:[#allocation67_spill] sm:$0xff] }
 0x278   :  { %v6699_v40 = vmul.f32 %v6069_v52, %v11310_v50  ;;  %v6705_v45 = vmul.f32 %v6069_v52, %v11312_v10  ;;  %v11319_v50 = vld [vmem:[#allocation72_spill] sm:$0xff] }
 0x279   :  { %11309 = vst [vmem:[#allocation65_spill] sm:$0xff] %v6693_v0  ;;  %v6711_v44 = vmul.f32 %v6069_v52, %v11314_v28  ;;  %v11317_v0 = vsub.f32 %v11316_v14, %v5768_v33  ;;  %v11322_v10 = vld [vmem:[#allocation76_spill] sm:$0xff]  ;;  %v11325_v28 = vld [vmem:[#allocation70_spill] sm:$0xff] }
 0x27a   :  { %11311 = vst [vmem:[#allocation68_spill] sm:$0xff] %v6699_v40  ;;  %11313 = vst [vmem:[#allocation73_spill] sm:$0xff] %v6705_v45  ;;  %v11320_v40 = vsub.f32 %v11319_v50, %v5768_v33  ;;  %v11323_v45 = vsub.f32 %v11322_v10, %v5768_v33 }
 0x27b   :  { %11315 = vst [vmem:[#allocation77_spill] sm:$0xff] %v6711_v44  ;;  %v6717_v27 = vmul.f32 %v6069_v52, %v11317_v0  ;;  %v11326_v44 = vsub.f32 %v11325_v28, %v5768_v33  ;;  %v11328_v0 = vld [vmem:[#allocation74_spill] sm:$0xff] }
 0x27c   :  { %v6723_v9 = vmul.f32 %v6069_v52, %v11320_v40  ;;  %v6729_v16 = vmul.f32 %v6069_v52, %v11323_v45  ;;  %v11331_v40 = vld [vmem:[#allocation80_spill] sm:$0xff] }
 0x27d   :  { %11318 = vst [vmem:[#allocation71_spill] sm:$0xff] %v6717_v27  ;;  %v6735_v14 = vmul.f32 %v6069_v52, %v11326_v44  ;;  %v11329_v27 = vsub.f32 %v11328_v0, %v5768_v33  ;;  %v11334_v45 = vld [vmem:[#allocation84_spill] sm:$0xff]  ;;  %v11336_v44 = vld [vmem:[#allocation78_spill] sm:$0xff] }
 0x27e   :  { %11321 = vst [vmem:[#allocation75_spill] sm:$0xff] %v6723_v9  ;;  %11324 = vst [vmem:[#allocation81_spill] sm:$0xff] %v6729_v16  ;;  %v11332_v9 = vsub.f32 %v11331_v40, %v5768_v33  ;;  %v11335_v16 = vsub.f32 %v11334_v45, %v5768_v33 }
 0x27f   :  { %11327 = vst [vmem:[#allocation85_spill] sm:$0xff] %v6735_v14  ;;  %v6741_v50 = vmul.f32 %v6069_v52, %v11329_v27  ;;  %v11337_v14 = vsub.f32 %v11336_v44, %v5768_v33  ;;  %v11338_v27 = vld [vmem:[#allocation82_spill] sm:$0xff] }
 0x280   :  { %v6747_v10 = vmul.f32 %v6069_v52, %v11332_v9  ;;  %v6753_v28 = vmul.f32 %v6069_v52, %v11335_v16  ;;  %v11341_v9 = vld [vmem:[#allocation88_spill] sm:$0xff]  ;;  %v11343_v16 = vsub.f32 %v11045_v32, %v5768_v33 }
 0x281   :  { %11330 = vst [vmem:[#allocation79_spill] sm:$0xff] %v6741_v50  ;;  %v6759_v0 = vmul.f32 %v6069_v52, %v11337_v14  ;;  %v11339_v50 = vsub.f32 %v11338_v27, %v5768_v33  ;;  %v11344_v14 = vsub.f32 %v11046_v26, %v5768_v33 }
 0x282   :  { %11333 = vst [vmem:[#allocation83_spill] sm:$0xff] %v6747_v10  ;;  %v11342_v10 = vsub.f32 %v11341_v9, %v5768_v33  ;;  %v6777_v44 = vmul.f32 %v6069_v52, %v11343_v16  ;;  %v11348_v16 = vsub.f32 %v11049_v3, %v5768_v33 }
 0x283   :  { %v6765_v40 = vmul.f32 %v6069_v52, %v11339_v50  ;;  %v6783_v27 = vmul.f32 %v6069_v52, %v11344_v14  ;;  %v11345_v50 = vld [vmem:[#allocation90_spill] sm:$0xff]  ;;  %v11349_v14 = vsub.f32 %v11050_v37, %v5768_v33 }
 0x284   :  { %v6771_v45 = vmul.f32 %v6069_v52, %v11342_v10  ;;  %v11347_v10 = vsub.f32 %v11048_v17, %v5768_v33  ;;  %v6801_v26 = vmul.f32 %v6069_v52, %v11348_v16  ;;  %v11352_v16 = vsub.f32 %v10952_v62, %v5768_v33 }
 0x285   :  { %11340 = vst [vmem:[#allocation89_spill] sm:$0xff] %v6765_v40  ;;  %v11346_v40 = vsub.f32 %v11345_v50, %v5768_v33  ;;  %v6807_v50 = vmul.f32 %v6069_v52, %v11349_v14  ;;  %v11353_v14 = vsub.f32 %v11052_v61, %v5768_v33 }
 0x286   :  { %v6795_v32 = vmul.f32 %v6069_v52, %v11347_v10  ;;  %v11351_v10 = vsub.f32 %v10951_v31, %v5768_v33  ;;  %v6825_v37 = vmul.f32 %v6069_v52, %v11352_v16  ;;  %v11358_v16 = vsub.f32 %v5389_v13, %v5768_v33  ;;  %v11364_v13 = vld [vmem:[#allocation111_spill] sm:$0xff] }
 0x287   :  { %v6789_v9 = vmul.f32 %v6069_v52, %v11346_v40  ;;  %v11350_v40 = vsub.f32 %v11051_v43, %v5768_v33  ;;  %v6831_v43 = vmul.f32 %v6069_v52, %v11353_v14  ;;  %v11360_v14 = vsub.f32 %v5374_v23, %v5768_v33  ;;  %v11367_v23 = vld [vmem:[#allocation113_spill] sm:$0xff] }
 0x288   :  { %v6819_v3 = vmul.f32 %v6069_v52, %v11351_v10  ;;  %v11356_v10 = vsub.f32 %v5381_v11, %v5768_v33  ;;  %v6849_v61 = vmul.f32 %v6069_v52, %v11358_v16  ;;  %v11365_v16 = vsub.f32 %v11364_v13, %v5768_v33 }
 0x289   :  { %v6813_v17 = vmul.f32 %v6069_v52, %v11350_v40  ;;  %v11354_v40 = vsub.f32 %v10954_v51, %v5768_v33  ;;  %v6855_v51 = vmul.f32 %v6069_v52, %v11360_v14  ;;  %v11368_v14 = vsub.f32 %v11367_v23, %v5768_v33 }
 0x28a   :  { %v6843_v62 = vmul.f32 %v6069_v52, %v11356_v10  ;;  %11359 = vst [vmem:[#allocation91_spill] sm:$0xff] %v6849_v61  ;;  %v6866_v10 = vld [vmem:[%s10343_s2] ss:$0 sm:$0xff]  ;;  %v6872_v61 = vmul.f32 %v6069_v52, %v11365_v16 }
 0x28b   :  { %v6837_v31 = vmul.f32 %v6069_v52, %v11354_v40  ;;  %11361 = vst [vmem:[#allocation97_spill] sm:$0xff] %v6855_v51  ;;  %v11362_v40 = vsub.f32 %v5383_v59, %v5768_v33  ;;  %v6878_v51 = vmul.f32 %v6069_v52, %v11368_v14  ;;  %v11370_v59 = vld [vmem:[#allocation110_spill] sm:$0xff]  ;;  %v11376_v14 = vld [vmem:[#allocation116_spill] sm:$0xff] }
 0x28c   :  { %11357 = vst [vmem:[#allocation87_spill] sm:$0xff] %v6843_v62  ;;  %11366 = vst [vmem:[#allocation95_spill] sm:$0xff] %v6872_v61  ;;  %v11372_v62 = vld [vmem:[#allocation112_spill] sm:$0xff]  ;;  %v11374_v16 = vld [vmem:[#allocation114_spill] sm:$0xff] }
 0x28d   :  { %11355 = vst [vmem:[#allocation93_spill] sm:$0xff] %v6837_v31  ;;  %v6861_v11 = vmul.f32 %v6069_v52, %v11362_v40  ;;  %11369 = vst [vmem:[#allocation99_spill] sm:$0xff] %v6878_v51  ;;  %v11371_v40 = vsub.f32 %v11370_v59, %v5768_v33  ;;  %v11373_v31 = vsub.f32 %v11372_v62, %v5768_v33 }
 0x28e   :  { %v11375_v61 = vsub.f32 %v11374_v16, %v5768_v33  ;;  %v11377_v51 = vsub.f32 %v11376_v14, %v5768_v33 }
 0x28f   :  { %11363 = vst [vmem:[#allocation101_spill] sm:$0xff] %v6861_v11  ;;  %v6884_v11 = vmul.f32 %v6069_v52, %v11371_v40  ;;  %v6890_v13 = vmul.f32 %v6069_v52, %v11373_v31  ;;  %v11378_v40 = vsub.f32 %v5430_v19, %v5768_v33  ;;  %v11379_v31 = vsub.f32 %v11053_v4, %v5768_v33 }
 0x290   :  { %v6896_v23 = vmul.f32 %v6069_v52, %v11375_v61  ;;  %v6902_v59 = vmul.f32 %v6069_v52, %v11377_v51  ;;  %v11380_v61 = vsub.f32 %v11054_v38, %v5768_v33  ;;  %v11381_v51 = vsub.f32 %v11055_v15, %v5768_v33 }
 0x291   :  { %v6908_v62 = vmul.f32 %v6069_v52, %v11378_v40  ;;  %v6914_v16 = vmul.f32 %v6069_v52, %v11379_v31  ;;  %v11382_v40 = vsub.f32 %v11056_v63, %v5768_v33  ;;  %v11383_v31 = vsub.f32 %v11057_v35, %v5768_v33  ;;  %v11386_v33 = vld [vmem:[#allocation104_spill] sm:$0xff] }
 0x292   :  { %v6920_v14 = vmul.f32 %v6069_v52, %v11380_v61  ;;  %v6926_v19 = vmul.f32 %v6069_v52, %v11381_v51  ;;  %v6942_v61 = vmul.f32 %v6866_v10, %v6075_v46  ;;  %v6946_v15 = vmul.f32 %v6866_v10, %v6081_v56  ;;  %v11388_v35 = vld [vmem:[#allocation108_spill] sm:$0xff] }
 0x293   :  { %v6932_v4 = vmul.f32 %v6069_v52, %v11382_v40  ;;  %v6938_v38 = vmul.f32 %v6069_v52, %v11383_v31  ;;  %v6950_v63 = vmul.f32 %v6866_v10, %v6087_v41  ;;  %v6954_v51 = vmul.f32 %v6866_v10, %v6093_v12  ;;  %v11390_v40 = vld [vmem:[#allocation106_spill] sm:$0xff]  ;;  %v11392_v31 = vld [vmem:[#allocation3_spill] sm:$0xff] }
 0x294   :  { %v6958_v52 = vmul.f32 %v6866_v10, %v11386_v33  ;;  %v6962_v46 = vmul.f32 %v6866_v10, %v11388_v35  ;;  %v6966_v56 = vmul.f32 %v6866_v10, %v11390_v40  ;;  %v6970_v41 = vmul.f32 %v6866_v10, %v11392_v31 }
 0x295   :  { %11384 = vst [vmem:[#allocation105_spill] sm:$0xff] %v6950_v63  ;;  %11385 = vst [vmem:[#allocation109_spill] sm:$0xff] %v6954_v51  ;;  %v11394_v63 = vld [vmem:[#allocation5_spill] sm:$0xff]  ;;  %v11396_v51 = vld [vmem:[#allocation2_spill] sm:$0xff] }
 0x296   :  { %11387 = vst [vmem:[#allocation103_spill] sm:$0xff] %v6958_v52  ;;  %11389 = vst [vmem:[#allocation107_spill] sm:$0xff] %v6962_v46  ;;  %v6974_v12 = vmul.f32 %v6866_v10, %v11394_v63  ;;  %v6978_v33 = vmul.f32 %v6866_v10, %v11396_v51  ;;  %v11398_v52 = vld [vmem:[#allocation4_spill] sm:$0xff]  ;;  %v11400_v46 = vld [vmem:[#allocation7_spill] sm:$0xff] }
 0x297   :  { %11391 = vst [vmem:[#allocation20_spill] sm:$0xff] %v6966_v56  ;;  %11393 = vst [vmem:[#allocation24_spill] sm:$0xff] %v6970_v41  ;;  %v6982_v35 = vmul.f32 %v6866_v10, %v11398_v52  ;;  %v6986_v40 = vmul.f32 %v6866_v10, %v11400_v46  ;;  %v11402_v56 = vld [vmem:[#allocation9_spill] sm:$0xff]  ;;  %v11404_v41 = vld [vmem:[#allocation36_spill] sm:$0xff] }
 0x298   :  { %11395 = vst [vmem:[#allocation18_spill] sm:$0xff] %v6974_v12  ;;  %11397 = vst [vmem:[#allocation22_spill] sm:$0xff] %v6978_v33  ;;  %v6990_v31 = vmul.f32 %v6866_v10, %v11402_v56  ;;  %v6994_v63 = vmul.f32 %v6866_v10, %v11404_v41  ;;  %v11406_v12 = vld [vmem:[#allocation40_spill] sm:$0xff]  ;;  %v11408_v33 = vld [vmem:[#allocation34_spill] sm:$0xff] }
 0x299   :  { %11399 = vst [vmem:[#allocation28_spill] sm:$0xff] %v6982_v35  ;;  %11401 = vst [vmem:[#allocation32_spill] sm:$0xff] %v6986_v40  ;;  %v6998_v51 = vmul.f32 %v6866_v10, %v11406_v12  ;;  %v7002_v52 = vmul.f32 %v6866_v10, %v11408_v33  ;;  %v11410_v35 = vld [vmem:[#allocation38_spill] sm:$0xff]  ;;  %v11412_v40 = vld [vmem:[#allocation44_spill] sm:$0xff] }
 0x29a   :  { %11403 = vst [vmem:[#allocation26_spill] sm:$0xff] %v6990_v31  ;;  %11405 = vst [vmem:[#allocation30_spill] sm:$0xff] %v6994_v63  ;;  %v7006_v46 = vmul.f32 %v6866_v10, %v11410_v35  ;;  %v7010_v56 = vmul.f32 %v6866_v10, %v11412_v40  ;;  %v11414_v31 = vld [vmem:[#allocation47_spill] sm:$0xff]  ;;  %v11416_v63 = vld [vmem:[#allocation42_spill] sm:$0xff] }
 0x29b   :  { %11407 = vst [vmem:[#allocation67_spill] sm:$0xff] %v6998_v51  ;;  %11409 = vst [vmem:[#allocation72_spill] sm:$0xff] %v7002_v52  ;;  %v7014_v41 = vmul.f32 %v6866_v10, %v11414_v31  ;;  %v7018_v12 = vmul.f32 %v6866_v10, %v11416_v63  ;;  %v11418_v51 = vld [vmem:[#allocation92_spill] sm:$0xff]  ;;  %v11420_v52 = vld [vmem:[#allocation86_spill] sm:$0xff] }
 0x29c   :  { %11411 = vst [vmem:[#allocation76_spill] sm:$0xff] %v7006_v46  ;;  %11413 = vst [vmem:[#allocation70_spill] sm:$0xff] %v7010_v56  ;;  %v7022_v33 = vmul.f32 %v6866_v10, %v11418_v51  ;;  %v7026_v35 = vmul.f32 %v6866_v10, %v11420_v52  ;;  %v11422_v46 = vld [vmem:[#allocation96_spill] sm:$0xff] }
 0x29d   :  { %11415 = vst [vmem:[#allocation74_spill] sm:$0xff] %v7014_v41  ;;  %11417 = vst [vmem:[#allocation80_spill] sm:$0xff] %v7018_v12  ;;  %v7030_v40 = vmul.f32 %v6866_v10, %v11422_v46  ;;  %v11424_v56 = vld [vmem:[#allocation100_spill] sm:$0xff]  ;;  %v11426_v41 = vld [vmem:[#allocation94_spill] sm:$0xff] }
 0x29e   :  { %11419 = vst [vmem:[#allocation84_spill] sm:$0xff] %v7022_v33  ;;  %11421 = vst [vmem:[#allocation78_spill] sm:$0xff] %v7026_v35  ;;  %v7034_v31 = vmul.f32 %v6866_v10, %v11424_v56  ;;  %v7038_v63 = vmul.f32 %v6866_v10, %v11426_v41  ;;  %v11428_v12 = vld [vmem:[#allocation98_spill] sm:$0xff]  ;;  %v11432_v35 = vld [vmem:[#allocation115_spill] sm:$0xff] }
 0x29f   :  { %11423 = vst [vmem:[#allocation82_spill] sm:$0xff] %v7030_v40  ;;  %v7042_v51 = vmul.f32 %v6866_v10, %v11428_v12  ;;  %v11430_v33 = vld [vmem:[#allocation102_spill] sm:$0xff]  ;;  %v7050_v46 = vmul.f32 %v6866_v10, %v11432_v35 }
 0x2a0   :  { %11425 = vst [vmem:[#allocation88_spill] sm:$0xff] %v7034_v31  ;;  %11427 = vst [vmem:[#allocation90_spill] sm:$0xff] %v7038_v63  ;;  %v7046_v52 = vmul.f32 %v6866_v10, %v11430_v33  ;;  %v11434_v40 = vld [vmem:[#allocation118_spill] sm:$0xff]  ;;  %v11436_v31 = vld [vmem:[#allocation120_spill] sm:$0xff] }
 0x2a1   :  { %11429 = vst [vmem:[#allocation111_spill] sm:$0xff] %v7042_v51  ;;  %11433 = vst [vmem:[#allocation110_spill] sm:$0xff] %v7050_v46  ;;  %v7054_v56 = vmul.f32 %v6866_v10, %v11434_v40  ;;  %v7058_v41 = vmul.f32 %v6866_v10, %v11436_v31  ;;  %v11438_v63 = vld [vmem:[#allocation117_spill] sm:$0xff]  ;;  %v11440_v51 = vld [vmem:[#allocation119_spill] sm:$0xff] }
 0x2a2   :  { %11431 = vst [vmem:[#allocation113_spill] sm:$0xff] %v7046_v52  ;;  %v7062_v12 = vmul.f32 %v6866_v10, %v11438_v63  ;;  %v7066_v33 = vmul.f32 %v6866_v10, %v11440_v51  ;;  %v11442_v52 = vld [vmem:[#allocation6_spill] sm:$0xff]  ;;  %v11444_v46 = vld [vmem:[#allocation8_spill] sm:$0xff] }
 0x2a3   :  { %11435 = vst [vmem:[#allocation112_spill] sm:$0xff] %v7054_v56  ;;  %11437 = vst [vmem:[#allocation114_spill] sm:$0xff] %v7058_v41  ;;  %v7070_v35 = vmul.f32 %v6866_v10, %v11442_v52  ;;  %v7074_v40 = vmul.f32 %v6866_v10, %v11444_v46  ;;  %v11446_v56 = vld [vmem:[#allocation11_spill] sm:$0xff]  ;;  %v11448_v41 = vld [vmem:[#allocation13_spill] sm:$0xff] }
 0x2a4   :  { %11439 = vst [vmem:[#allocation116_spill] sm:$0xff] %v7062_v12  ;;  %11441 = vst [vmem:[#allocation104_spill] sm:$0xff] %v7066_v33  ;;  %v7078_v31 = vmul.f32 %v6866_v10, %v11446_v56  ;;  %v7082_v63 = vmul.f32 %v6866_v10, %v11448_v41  ;;  %v11450_v12 = vld [vmem:[#allocation10_spill] sm:$0xff]  ;;  %v11452_v33 = vld [vmem:[#allocation12_spill] sm:$0xff] }
 0x2a5   :  { %11443 = vst [vmem:[#allocation108_spill] sm:$0xff] %v7070_v35  ;;  %11445 = vst [vmem:[#allocation106_spill] sm:$0xff] %v7074_v40  ;;  %v7086_v51 = vmul.f32 %v6866_v10, %v11450_v12  ;;  %v7090_v52 = vmul.f32 %v6866_v10, %v11452_v33  ;;  %v11454_v35 = vld [vmem:[#allocation15_spill] sm:$0xff]  ;;  %v11456_v40 = vld [vmem:[#allocation17_spill] sm:$0xff] }
 0x2a6   :  { %11447 = vst [vmem:[#allocation3_spill] sm:$0xff] %v7078_v31  ;;  %11449 = vst [vmem:[#allocation5_spill] sm:$0xff] %v7082_v63  ;;  %v7094_v46 = vmul.f32 %v6866_v10, %v11454_v35  ;;  %v7098_v56 = vmul.f32 %v6866_v10, %v11456_v40  ;;  %v11458_v31 = vld [vmem:[#allocation14_spill] sm:$0xff]  ;;  %v11460_v63 = vld [vmem:[#allocation16_spill] sm:$0xff] }
 0x2a7   :  { %11451 = vst [vmem:[#allocation2_spill] sm:$0xff] %v7086_v51  ;;  %11453 = vst [vmem:[#allocation4_spill] sm:$0xff] %v7090_v52  ;;  %v7102_v41 = vmul.f32 %v6866_v10, %v11458_v31  ;;  %v7106_v12 = vmul.f32 %v6866_v10, %v11460_v63  ;;  %v11462_v51 = vld [vmem:[#allocation21_spill] sm:$0xff] }
 0x2a8   :  { %11455 = vst [vmem:[#allocation7_spill] sm:$0xff] %v7094_v46  ;;  %11457 = vst [vmem:[#allocation9_spill] sm:$0xff] %v7098_v56  ;;  %v7110_v33 = vmul.f32 %v6866_v10, %v11462_v51  ;;  %v11464_v52 = vld [vmem:[#allocation25_spill] sm:$0xff]  ;;  %v11466_v46 = vld [vmem:[#allocation19_spill] sm:$0xff] }
 0x2a9   :  { %11459 = vst [vmem:[#allocation36_spill] sm:$0xff] %v7102_v41  ;;  %11461 = vst [vmem:[#allocation40_spill] sm:$0xff] %v7106_v12  ;;  %v7114_v35 = vmul.f32 %v6866_v10, %v11464_v52  ;;  %v7118_v40 = vmul.f32 %v6866_v10, %v11466_v46  ;;  %v11468_v56 = vld [vmem:[#allocation23_spill] sm:$0xff]  ;;  %v11470_v41 = vld [vmem:[#allocation29_spill] sm:$0xff] }
 0x2aa   :  { %11463 = vst [vmem:[#allocation34_spill] sm:$0xff] %v7110_v33  ;;  %v7122_v31 = vmul.f32 %v6866_v10, %v11468_v56  ;;  %v7126_v63 = vmul.f32 %v6866_v10, %v11470_v41  ;;  %v11472_v12 = vld [vmem:[#allocation33_spill] sm:$0xff]  ;;  %v11474_v33 = vld [vmem:[#allocation27_spill] sm:$0xff] }
 0x2ab   :  { %11465 = vst [vmem:[#allocation38_spill] sm:$0xff] %v7114_v35  ;;  %11467 = vst [vmem:[#allocation44_spill] sm:$0xff] %v7118_v40  ;;  %v7130_v51 = vmul.f32 %v6866_v10, %v11472_v12  ;;  %v7134_v52 = vmul.f32 %v6866_v10, %v11474_v33  ;;  %v11476_v35 = vld [vmem:[#allocation31_spill] sm:$0xff]  ;;  %v11478_v40 = vld [vmem:[#allocation37_spill] sm:$0xff] }
 0x2ac   :  { %11469 = vst [vmem:[#allocation47_spill] sm:$0xff] %v7122_v31  ;;  %11471 = vst [vmem:[#allocation42_spill] sm:$0xff] %v7126_v63  ;;  %v7138_v46 = vmul.f32 %v6866_v10, %v11476_v35  ;;  %v7142_v56 = vmul.f32 %v6866_v10, %v11478_v40  ;;  %v11480_v31 = vld [vmem:[#allocation41_spill] sm:$0xff]  ;;  %v11482_v63 = vld [vmem:[#allocation35_spill] sm:$0xff] }
 0x2ad   :  { %11473 = vst [vmem:[#allocation92_spill] sm:$0xff] %v7130_v51  ;;  %11475 = vst [vmem:[#allocation86_spill] sm:$0xff] %v7134_v52  ;;  %v7146_v41 = vmul.f32 %v6866_v10, %v11480_v31  ;;  %v7150_v12 = vmul.f32 %v6866_v10, %v11482_v63  ;;  %v11484_v51 = vld [vmem:[#allocation39_spill] sm:$0xff]  ;;  %v11486_v52 = vld [vmem:[#allocation45_spill] sm:$0xff] }
 0x2ae   :  { %11477 = vst [vmem:[#allocation96_spill] sm:$0xff] %v7138_v46  ;;  %11479 = vst [vmem:[#allocation100_spill] sm:$0xff] %v7142_v56  ;;  %v7154_v33 = vmul.f32 %v6866_v10, %v11484_v51  ;;  %v7158_v35 = vmul.f32 %v6866_v10, %v11486_v52  ;;  %v11488_v46 = vld [vmem:[#allocation48_spill] sm:$0xff]  ;;  %v11490_v56 = vld [vmem:[#allocation43_spill] sm:$0xff] }
 0x2af   :  { %11481 = vst [vmem:[#allocation94_spill] sm:$0xff] %v7146_v41  ;;  %11483 = vst [vmem:[#allocation98_spill] sm:$0xff] %v7150_v12  ;;  %v7162_v40 = vmul.f32 %v6866_v10, %v11488_v46  ;;  %v7166_v31 = vmul.f32 %v6866_v10, %v11490_v56  ;;  %v11492_v41 = vld [vmem:[#allocation46_spill] sm:$0xff] }
 0x2b0   :  { %11485 = vst [vmem:[#allocation102_spill] sm:$0xff] %v7154_v33  ;;  %11487 = vst [vmem:[#allocation115_spill] sm:$0xff] %v7158_v35  ;;  %v7170_v63 = vmul.f32 %v6866_v10, %v11492_v41  ;;  %v11494_v12 = vld [vmem:[#allocation50_spill] sm:$0xff]  ;;  %v11496_v33 = vld [vmem:[#allocation52_spill] sm:$0xff] }
 0x2b1   :  { %11489 = vst [vmem:[#allocation118_spill] sm:$0xff] %v7162_v40  ;;  %11491 = vst [vmem:[#allocation120_spill] sm:$0xff] %v7166_v31  ;;  %v7174_v51 = vmul.f32 %v6866_v10, %v11494_v12  ;;  %v7178_v52 = vmul.f32 %v6866_v10, %v11496_v33  ;;  %v11498_v35 = vld [vmem:[#allocation49_spill] sm:$0xff]  ;;  %v11500_v40 = vld [vmem:[#allocation51_spill] sm:$0xff] }
 0x2b2   :  { %11493 = vst [vmem:[#allocation117_spill] sm:$0xff] %v7170_v63  ;;  %v7182_v46 = vmul.f32 %v6866_v10, %v11498_v35  ;;  %v7186_v56 = vmul.f32 %v6866_v10, %v11500_v40  ;;  %v11502_v31 = vld [vmem:[#allocation54_spill] sm:$0xff]  ;;  %v11504_v63 = vld [vmem:[#allocation56_spill] sm:$0xff] }
 0x2b3   :  { %11495 = vst [vmem:[#allocation119_spill] sm:$0xff] %v7174_v51  ;;  %11497 = vst [vmem:[#allocation6_spill] sm:$0xff] %v7178_v52  ;;  %v7190_v41 = vmul.f32 %v6866_v10, %v11502_v31  ;;  %v7194_v12 = vmul.f32 %v6866_v10, %v11504_v63  ;;  %v11506_v51 = vld [vmem:[#allocation53_spill] sm:$0xff]  ;;  %v11508_v52 = vld [vmem:[#allocation55_spill] sm:$0xff] }
 0x2b4   :  { %11499 = vst [vmem:[#allocation8_spill] sm:$0xff] %v7182_v46  ;;  %11501 = vst [vmem:[#allocation11_spill] sm:$0xff] %v7186_v56  ;;  %v7198_v33 = vmul.f32 %v6866_v10, %v11506_v51  ;;  %v7202_v35 = vmul.f32 %v6866_v10, %v11508_v52  ;;  %v11510_v46 = vld [vmem:[#allocation58_spill] sm:$0xff]  ;;  %v11512_v56 = vld [vmem:[#allocation60_spill] sm:$0xff] }
 0x2b5   :  { %11503 = vst [vmem:[#allocation13_spill] sm:$0xff] %v7190_v41  ;;  %11505 = vst [vmem:[#allocation10_spill] sm:$0xff] %v7194_v12  ;;  %v7206_v40 = vmul.f32 %v6866_v10, %v11510_v46  ;;  %v7210_v31 = vmul.f32 %v6866_v10, %v11512_v56  ;;  %v11514_v41 = vld [vmem:[#allocation57_spill] sm:$0xff]  ;;  %v11516_v12 = vld [vmem:[#allocation59_spill] sm:$0xff] }
 0x2b6   :  { %11507 = vst [vmem:[#allocation12_spill] sm:$0xff] %v7198_v33  ;;  %11509 = vst [vmem:[#allocation15_spill] sm:$0xff] %v7202_v35  ;;  %v7214_v63 = vmul.f32 %v6866_v10, %v11514_v41  ;;  %v7218_v51 = vmul.f32 %v6866_v10, %v11516_v12  ;;  %v11518_v33 = vld [vmem:[#allocation62_spill] sm:$0xff]  ;;  %v11519_v35 = vld [vmem:[#allocation64_spill] sm:$0xff] }
 0x2b7   :  { %11511 = vst [vmem:[#allocation17_spill] sm:$0xff] %v7206_v40  ;;  %11513 = vst [vmem:[#allocation14_spill] sm:$0xff] %v7210_v31  ;;  %v7222_v52 = vmul.f32 %v6866_v10, %v11518_v33  ;;  %v7226_v46 = vmul.f32 %v6866_v10, %v11519_v35  ;;  %v11520_v40 = vld [vmem:[#allocation61_spill] sm:$0xff]  ;;  %v11521_v31 = vld [vmem:[#allocation63_spill] sm:$0xff]  ;;  %v7246_v35 = vmul.f32 %v6866_v10, %v6531_v55 }
 0x2b8   :  { %11515 = vst [vmem:[#allocation16_spill] sm:$0xff] %v7214_v63  ;;  %11517 = vst [vmem:[#allocation21_spill] sm:$0xff] %v7218_v51  ;;  %v7230_v56 = vmul.f32 %v6866_v10, %v11520_v40  ;;  %v7234_v41 = vmul.f32 %v6866_v10, %v11521_v31  ;;  %v11522_v63 = vld [vmem:[#allocation66_spill] sm:$0xff]  ;;  %v11523_v51 = vld [vmem:[#allocation69_spill] sm:$0xff]  ;;  %v7250_v40 = vmul.f32 %v6866_v10, %v6537_v53 }
 0x2b9   :  { %v7238_v12 = vmul.f32 %v6866_v10, %v11522_v63  ;;  %v7242_v33 = vmul.f32 %v6866_v10, %v11523_v51  ;;  %v7254_v31 = vmul.f32 %v6866_v10, %v6543_v34  ;;  %v7258_v63 = vmul.f32 %v6866_v10, %v6549_v48 }
 0x2ba   :  { %v7262_v51 = vmul.f32 %v6866_v10, %v6555_v20  ;;  %v7266_v55 = vmul.f32 %v6866_v10, %v6561_v60  ;;  %v7270_v53 = vmul.f32 %v6866_v10, %v6567_v57  ;;  %v7274_v34 = vmul.f32 %v6866_v10, %v6573_v6 }
 0x2bb   :  { %v7278_v48 = vmul.f32 %v6866_v10, %v6579_v25  ;;  %v7282_v20 = vmul.f32 %v6866_v10, %v6585_v29  ;;  %v7286_v60 = vmul.f32 %v6866_v10, %v6591_v54  ;;  %v7290_v57 = vmul.f32 %v6866_v10, %v6597_v22 }
 0x2bc   :  { %v7294_v6 = vmul.f32 %v6866_v10, %v6603_v42  ;;  %v7298_v25 = vmul.f32 %v6866_v10, %v6609_v2  ;;  %v7302_v29 = vmul.f32 %v6866_v10, %v6615_v7  ;;  %v7306_v54 = vmul.f32 %v6866_v10, %v6621_v30 }
 0x2bd   :  { %v7310_v22 = vmul.f32 %v6866_v10, %v6627_v49  ;;  %v7314_v42 = vmul.f32 %v6866_v10, %v6633_v8  ;;  %v7318_v2 = vmul.f32 %v6866_v10, %v6639_v58  ;;  %v7322_v7 = vmul.f32 %v6866_v10, %v6645_v24 }
 0x2be   :  { %v7326_v30 = vmul.f32 %v6866_v10, %v6651_v21  ;;  %v7330_v49 = vmul.f32 %v6866_v10, %v6657_v1  ;;  %v7334_v8 = vmul.f32 %v6866_v10, %v6663_v36  ;;  %v7338_v58 = vmul.f32 %v6866_v10, %v6669_v47 }
 0x2bf   :  { %v7342_v24 = vmul.f32 %v6866_v10, %v6675_v39  ;;  %v7346_v21 = vmul.f32 %v6866_v10, %v6681_v18  ;;  %v7350_v1 = vmul.f32 %v6866_v10, %v6687_v5 }
 0x2c0   :  { %11524 = vst [vmem:[#allocation25_spill] sm:$0xff] %v7330_v49  ;;  %11525 = vst [vmem:[#allocation19_spill] sm:$0xff] %v7334_v8  ;;  %v11530_v49 = vld [vmem:[#allocation65_spill] sm:$0xff]  ;;  %v11532_v8 = vld [vmem:[#allocation68_spill] sm:$0xff] }
 0x2c1   :  { %11526 = vst [vmem:[#allocation23_spill] sm:$0xff] %v7338_v58  ;;  %11527 = vst [vmem:[#allocation29_spill] sm:$0xff] %v7342_v24  ;;  %v7354_v36 = vmul.f32 %v6866_v10, %v11530_v49  ;;  %v7358_v47 = vmul.f32 %v6866_v10, %v11532_v8  ;;  %v11534_v58 = vld [vmem:[#allocation73_spill] sm:$0xff] }
 0x2c2   :  { %11528 = vst [vmem:[#allocation33_spill] sm:$0xff] %v7346_v21  ;;  %11529 = vst [vmem:[#allocation27_spill] sm:$0xff] %v7350_v1  ;;  %v7362_v39 = vmul.f32 %v6866_v10, %v11534_v58  ;;  %v11536_v24 = vld [vmem:[#allocation77_spill] sm:$0xff]  ;;  %v11538_v21 = vld [vmem:[#allocation71_spill] sm:$0xff] }
 0x2c3   :  { %11531 = vst [vmem:[#allocation31_spill] sm:$0xff] %v7354_v36  ;;  %11533 = vst [vmem:[#allocation37_spill] sm:$0xff] %v7358_v47  ;;  %v7366_v18 = vmul.f32 %v6866_v10, %v11536_v24  ;;  %v7370_v5 = vmul.f32 %v6866_v10, %v11538_v21  ;;  %v11539_v1 = vld [vmem:[#allocation75_spill] sm:$0xff]  ;;  %v11540_v36 = vld [vmem:[#allocation81_spill] sm:$0xff] }
 0x2c4   :  { %11535 = vst [vmem:[#allocation41_spill] sm:$0xff] %v7362_v39  ;;  %v7374_v49 = vmul.f32 %v6866_v10, %v11539_v1  ;;  %v7378_v8 = vmul.f32 %v6866_v10, %v11540_v36  ;;  %v11542_v47 = vld [vmem:[#allocation85_spill] sm:$0xff]  ;;  %v11543_v39 = vld [vmem:[#allocation79_spill] sm:$0xff]  ;;  %v7394_v1 = vmul.f32 %v6866_v10, %v6753_v28  ;;  %v7398_v36 = vmul.f32 %v6866_v10, %v6759_v0 }
 0x2c5   :  { %11537 = vst [vmem:[#allocation35_spill] sm:$0xff] %v7366_v18  ;;  %v7382_v58 = vmul.f32 %v6866_v10, %v11542_v47  ;;  %v7386_v24 = vmul.f32 %v6866_v10, %v11543_v39  ;;  %v11544_v18 = vld [vmem:[#allocation83_spill] sm:$0xff]  ;;  %v7406_v39 = vmul.f32 %v6866_v10, %v6771_v45  ;;  %v7414_v28 = vmul.f32 %v6866_v10, %v6783_v27 }
 0x2c6   :  { %11541 = vst [vmem:[#allocation39_spill] sm:$0xff] %v7378_v8  ;;  %v7390_v21 = vmul.f32 %v6866_v10, %v11544_v18  ;;  %v11545_v8 = vld [vmem:[#allocation89_spill] sm:$0xff]  ;;  %v7410_v18 = vmul.f32 %v6866_v10, %v6777_v44  ;;  %v7418_v0 = vmul.f32 %v6866_v10, %v6789_v9  ;;  %v7426_v45 = vmul.f32 %v6866_v10, %v6801_v26 }
 0x2c7   :  { %v7402_v47 = vmul.f32 %v6866_v10, %v11545_v8  ;;  %v7422_v8 = vmul.f32 %v6866_v10, %v6795_v32  ;;  %v7430_v44 = vmul.f32 %v6866_v10, %v6807_v50  ;;  %v7434_v27 = vmul.f32 %v6866_v10, %v6813_v17 }
 0x2c8   :  { %11546 = vst [vmem:[#allocation45_spill] sm:$0xff] %v7426_v45  ;;  %v7438_v9 = vmul.f32 %v6866_v10, %v6819_v3  ;;  %v7442_v32 = vmul.f32 %v6866_v10, %v6825_v37  ;;  %v7446_v26 = vmul.f32 %v6866_v10, %v6831_v43  ;;  %v11551_v45 = vld [vmem:[#allocation93_spill] sm:$0xff]  ;;  %v7463_v37 = vld [vmem:[%s10344_s3] ss:$0 sm:$0xff] }
 0x2c9   :  { %11547 = vst [vmem:[#allocation48_spill] sm:$0xff] %v7430_v44  ;;  %11548 = vst [vmem:[#allocation43_spill] sm:$0xff] %v7434_v27  ;;  %v7450_v50 = vmul.f32 %v6866_v10, %v11551_v45  ;;  %v11553_v44 = vld [vmem:[#allocation87_spill] sm:$0xff] }
 0x2ca   :  { %11549 = vst [vmem:[#allocation46_spill] sm:$0xff] %v7442_v32  ;;  %11550 = vst [vmem:[#allocation50_spill] sm:$0xff] %v7446_v26  ;;  %v7454_v17 = vmul.f32 %v6866_v10, %v11553_v44  ;;  %v11555_v27 = vld [vmem:[#allocation91_spill] sm:$0xff]  ;;  %v11557_v32 = vld [vmem:[#allocation97_spill] sm:$0xff] }
 0x2cb   :  { %11552 = vst [vmem:[#allocation52_spill] sm:$0xff] %v7450_v50  ;;  %v7458_v3 = vmul.f32 %v6866_v10, %v11555_v27  ;;  %v7467_v43 = vmul.f32 %v6866_v10, %v11557_v32  ;;  %v11558_v26 = vld [vmem:[#allocation101_spill] sm:$0xff]  ;;  %v11559_v50 = vld [vmem:[#allocation95_spill] sm:$0xff]  ;;  %v7487_v32 = vmul.f32 %v6866_v10, %v6890_v13  ;;  %v7507_v13 = vmul.f32 %v6866_v10, %v6920_v14 }
 0x2cc   :  { %11554 = vst [vmem:[#allocation49_spill] sm:$0xff] %v7454_v17  ;;  %v7471_v45 = vmul.f32 %v6866_v10, %v11558_v26  ;;  %v7475_v44 = vmul.f32 %v6866_v10, %v11559_v50  ;;  %v11560_v17 = vld [vmem:[#allocation99_spill] sm:$0xff]  ;;  %v7491_v26 = vmul.f32 %v6866_v10, %v6896_v23  ;;  %v7495_v50 = vmul.f32 %v6866_v10, %v6902_v59 }
 0x2cd   :  { %11556 = vst [vmem:[#allocation51_spill] sm:$0xff] %v7458_v3  ;;  %v7479_v27 = vmul.f32 %v6866_v10, %v11560_v17  ;;  %v7483_v3 = vmul.f32 %v6866_v10, %v6884_v11  ;;  %v7499_v17 = vmul.f32 %v6866_v10, %v6908_v62  ;;  %v7503_v11 = vmul.f32 %v6866_v10, %v6914_v16 }
 0x2ce   :  { %11561 = vst [vmem:[#allocation54_spill] sm:$0xff] %v7507_v13  ;;  %v7511_v23 = vmul.f32 %v6866_v10, %v6926_v19  ;;  %v7515_v59 = vmul.f32 %v6866_v10, %v6932_v4  ;;  %v7519_v62 = vmul.f32 %v6866_v10, %v6938_v38  ;;  %v7523_v16 = vadd.f32 %v7463_v37, %v6942_v61  ;;  %v11566_v13 = vld [vmem:[#allocation105_spill] sm:$0xff]  ;;  %v11572_v38 = vld [vmem:[#allocation107_spill] sm:$0xff] }
 0x2cf   :  { %v7527_v14 = vadd.f32 %v7463_v37, %v6946_v15  ;;  %v7531_v19 = vadd.f32 %v7463_v37, %v11566_v13  ;;  %v7543_v61 = vadd.f32 %v7463_v37, %v11572_v38 }
 0x2d0   :  { %11562 = vst [vmem:[#allocation56_spill] sm:$0xff] %v7511_v23  ;;  %11563 = vst [vmem:[#allocation53_spill] sm:$0xff] %v7515_v59  ;;  %v11568_v23 = vld [vmem:[#allocation109_spill] sm:$0xff]  ;;  %v11570_v59 = vld [vmem:[#allocation103_spill] sm:$0xff] }
 0x2d1   :  { %11564 = vst [vmem:[#allocation55_spill] sm:$0xff] %v7519_v62  ;;  %11565 = vst [vmem:[#allocation58_spill] sm:$0xff] %v7527_v14  ;;  %v7535_v4 = vadd.f32 %v7463_v37, %v11568_v23  ;;  %v7539_v10 = vadd.f32 %v7463_v37, %v11570_v59  ;;  %v11574_v62 = vld [vmem:[#allocation20_spill] sm:$0xff] }
 0x2d2   :  { %11567 = vst [vmem:[#allocation60_spill] sm:$0xff] %v7531_v19  ;;  %11573 = vst [vmem:[#allocation62_spill] sm:$0xff] %v7543_v61  ;;  %v7547_v15 = vadd.f32 %v7463_v37, %v11574_v62  ;;  %v11576_v14 = vld [vmem:[#allocation24_spill] sm:$0xff]  ;;  %v11578_v19 = vld [vmem:[#allocation18_spill] sm:$0xff] }
 0x2d3   :  { %11569 = vst [vmem:[#allocation57_spill] sm:$0xff] %v7535_v4  ;;  %11571 = vst [vmem:[#allocation59_spill] sm:$0xff] %v7539_v10  ;;  %v7551_v13 = vadd.f32 %v7463_v37, %v11576_v14  ;;  %v7555_v23 = vadd.f32 %v7463_v37, %v11578_v19  ;;  %v11580_v4 = vld [vmem:[#allocation22_spill] sm:$0xff]  ;;  %v11582_v10 = vld [vmem:[#allocation28_spill] sm:$0xff] }
 0x2d4   :  { %11575 = vst [vmem:[#allocation64_spill] sm:$0xff] %v7547_v15  ;;  %v7559_v59 = vadd.f32 %v7463_v37, %v11580_v4  ;;  %v7563_v38 = vadd.f32 %v7463_v37, %v11582_v10  ;;  %v11584_v61 = vld [vmem:[#allocation32_spill] sm:$0xff]  ;;  %v11586_v15 = vld [vmem:[#allocation26_spill] sm:$0xff] }
 0x2d5   :  { %11577 = vst [vmem:[#allocation61_spill] sm:$0xff] %v7551_v13  ;;  %11579 = vst [vmem:[#allocation63_spill] sm:$0xff] %v7555_v23  ;;  %v7567_v62 = vadd.f32 %v7463_v37, %v11584_v61  ;;  %v7571_v14 = vadd.f32 %v7463_v37, %v11586_v15  ;;  %v11588_v13 = vld [vmem:[#allocation30_spill] sm:$0xff]  ;;  %v11590_v23 = vld [vmem:[#allocation67_spill] sm:$0xff] }
 0x2d6   :  { %11581 = vst [vmem:[#allocation66_spill] sm:$0xff] %v7559_v59  ;;  %11583 = vst [vmem:[#allocation69_spill] sm:$0xff] %v7563_v38  ;;  %v7575_v19 = vadd.f32 %v7463_v37, %v11588_v13  ;;  %v7579_v4 = vadd.f32 %v7463_v37, %v11590_v23  ;;  %v11592_v59 = vld [vmem:[#allocation72_spill] sm:$0xff] }
 0x2d7   :  { %11585 = vst [vmem:[#allocation65_spill] sm:$0xff] %v7567_v62  ;;  %11587 = vst [vmem:[#allocation68_spill] sm:$0xff] %v7571_v14  ;;  %v7583_v10 = vadd.f32 %v7463_v37, %v11592_v59  ;;  %v11594_v38 = vld [vmem:[#allocation76_spill] sm:$0xff]  ;;  %v11596_v62 = vld [vmem:[#allocation70_spill] sm:$0xff] }
 0x2d8   :  { %11589 = vst [vmem:[#allocation73_spill] sm:$0xff] %v7575_v19  ;;  %11591 = vst [vmem:[#allocation77_spill] sm:$0xff] %v7579_v4  ;;  %v7587_v61 = vadd.f32 %v7463_v37, %v11594_v38  ;;  %v7591_v15 = vadd.f32 %v7463_v37, %v11596_v62  ;;  %v11598_v14 = vld [vmem:[#allocation74_spill] sm:$0xff]  ;;  %v11600_v19 = vld [vmem:[#allocation80_spill] sm:$0xff] }
 0x2d9   :  { %11593 = vst [vmem:[#allocation71_spill] sm:$0xff] %v7583_v10  ;;  %v7595_v13 = vadd.f32 %v7463_v37, %v11598_v14  ;;  %v7599_v23 = vadd.f32 %v7463_v37, %v11600_v19  ;;  %v11602_v4 = vld [vmem:[#allocation84_spill] sm:$0xff]  ;;  %v11604_v10 = vld [vmem:[#allocation78_spill] sm:$0xff] }
 0x2da   :  { %11595 = vst [vmem:[#allocation75_spill] sm:$0xff] %v7587_v61  ;;  %11597 = vst [vmem:[#allocation81_spill] sm:$0xff] %v7591_v15  ;;  %v7603_v59 = vadd.f32 %v7463_v37, %v11602_v4  ;;  %v7607_v38 = vadd.f32 %v7463_v37, %v11604_v10  ;;  %v11606_v61 = vld [vmem:[#allocation82_spill] sm:$0xff]  ;;  %v11608_v15 = vld [vmem:[#allocation88_spill] sm:$0xff] }
 0x2db   :  { %11599 = vst [vmem:[#allocation85_spill] sm:$0xff] %v7595_v13  ;;  %11601 = vst [vmem:[#allocation79_spill] sm:$0xff] %v7599_v23  ;;  %v7611_v62 = vadd.f32 %v7463_v37, %v11606_v61  ;;  %v7615_v14 = vadd.f32 %v7463_v37, %v11608_v15  ;;  %v11610_v13 = vld [vmem:[#allocation90_spill] sm:$0xff]  ;;  %v11612_v23 = vld [vmem:[#allocation111_spill] sm:$0xff] }
 0x2dc   :  { %11603 = vst [vmem:[#allocation83_spill] sm:$0xff] %v7603_v59  ;;  %11605 = vst [vmem:[#allocation89_spill] sm:$0xff] %v7607_v38  ;;  %v7619_v19 = vadd.f32 %v7463_v37, %v11610_v13  ;;  %v7623_v4 = vadd.f32 %v7463_v37, %v11612_v23  ;;  %v11614_v59 = vld [vmem:[#allocation113_spill] sm:$0xff]  ;;  %v11616_v38 = vld [vmem:[#allocation110_spill] sm:$0xff] }
 0x2dd   :  { %11607 = vst [vmem:[#allocation93_spill] sm:$0xff] %v7611_v62  ;;  %11609 = vst [vmem:[#allocation87_spill] sm:$0xff] %v7615_v14  ;;  %v7627_v10 = vadd.f32 %v7463_v37, %v11614_v59  ;;  %v7631_v61 = vadd.f32 %v7463_v37, %v11616_v38  ;;  %v11618_v62 = vld [vmem:[#allocation112_spill] sm:$0xff]  ;;  %v11620_v14 = vld [vmem:[#allocation114_spill] sm:$0xff] }
 0x2de   :  { %11611 = vst [vmem:[#allocation91_spill] sm:$0xff] %v7619_v19  ;;  %11613 = vst [vmem:[#allocation97_spill] sm:$0xff] %v7623_v4  ;;  %v7635_v15 = vadd.f32 %v7463_v37, %v11618_v62  ;;  %v7639_v13 = vadd.f32 %v7463_v37, %v11620_v14  ;;  %v11622_v19 = vld [vmem:[#allocation116_spill] sm:$0xff] }
 0x2df   :  { %11615 = vst [vmem:[#allocation101_spill] sm:$0xff] %v7627_v10  ;;  %11617 = vst [vmem:[#allocation95_spill] sm:$0xff] %v7631_v61  ;;  %v7643_v23 = vadd.f32 %v7463_v37, %v11622_v19  ;;  %v11624_v4 = vld [vmem:[#allocation104_spill] sm:$0xff]  ;;  %v11628_v61 = vld [vmem:[#allocation106_spill] sm:$0xff] }
 0x2e0   :  { %11619 = vst [vmem:[#allocation99_spill] sm:$0xff] %v7635_v15  ;;  %11621 = vst [vmem:[#allocation105_spill] sm:$0xff] %v7639_v13  ;;  %v7647_v59 = vadd.f32 %v7463_v37, %v11624_v4  ;;  %v11626_v10 = vld [vmem:[#allocation108_spill] sm:$0xff]  ;;  %v7655_v62 = vadd.f32 %v7463_v37, %v11628_v61  ;;  %v11630_v15 = vld [vmem:[#allocation3_spill] sm:$0xff] }
 0x2e1   :  { %11623 = vst [vmem:[#allocation109_spill] sm:$0xff] %v7643_v23  ;;  %v7651_v38 = vadd.f32 %v7463_v37, %v11626_v10  ;;  %v7659_v14 = vadd.f32 %v7463_v37, %v11630_v15  ;;  %v11632_v13 = vld [vmem:[#allocation5_spill] sm:$0xff]  ;;  %v11634_v23 = vld [vmem:[#allocation2_spill] sm:$0xff] }
 0x2e2   :  { %11625 = vst [vmem:[#allocation103_spill] sm:$0xff] %v7647_v59  ;;  %11629 = vst [vmem:[#allocation20_spill] sm:$0xff] %v7655_v62  ;;  %v7663_v19 = vadd.f32 %v7463_v37, %v11632_v13  ;;  %v7667_v4 = vadd.f32 %v7463_v37, %v11634_v23  ;;  %v11636_v59 = vld [vmem:[#allocation4_spill] sm:$0xff]  ;;  %v11640_v62 = vld [vmem:[#allocation9_spill] sm:$0xff] }
 0x2e3   :  { %11627 = vst [vmem:[#allocation107_spill] sm:$0xff] %v7651_v38  ;;  %11631 = vst [vmem:[#allocation24_spill] sm:$0xff] %v7659_v14  ;;  %v7671_v10 = vadd.f32 %v7463_v37, %v11636_v59  ;;  %v11638_v38 = vld [vmem:[#allocation7_spill] sm:$0xff]  ;;  %v7679_v15 = vadd.f32 %v7463_v37, %v11640_v62  ;;  %v11642_v14 = vld [vmem:[#allocation36_spill] sm:$0xff] }
 0x2e4   :  { %11633 = vst [vmem:[#allocation18_spill] sm:$0xff] %v7663_v19  ;;  %11635 = vst [vmem:[#allocation22_spill] sm:$0xff] %v7667_v4  ;;  %v7675_v61 = vadd.f32 %v7463_v37, %v11638_v38  ;;  %v7683_v13 = vadd.f32 %v7463_v37, %v11642_v14  ;;  %v11644_v19 = vld [vmem:[#allocation40_spill] sm:$0xff]  ;;  %v11646_v4 = vld [vmem:[#allocation34_spill] sm:$0xff] }
 0x2e5   :  { %11637 = vst [vmem:[#allocation28_spill] sm:$0xff] %v7671_v10  ;;  %11641 = vst [vmem:[#allocation26_spill] sm:$0xff] %v7679_v15  ;;  %v7687_v23 = vadd.f32 %v7463_v37, %v11644_v19  ;;  %v7691_v59 = vadd.f32 %v7463_v37, %v11646_v4  ;;  %v11648_v10 = vld [vmem:[#allocation38_spill] sm:$0xff]  ;;  %v11652_v15 = vld [vmem:[#allocation47_spill] sm:$0xff] }
 0x2e6   :  { %11639 = vst [vmem:[#allocation32_spill] sm:$0xff] %v7675_v61  ;;  %11643 = vst [vmem:[#allocation30_spill] sm:$0xff] %v7683_v13  ;;  %v7695_v38 = vadd.f32 %v7463_v37, %v11648_v10  ;;  %v11650_v61 = vld [vmem:[#allocation44_spill] sm:$0xff]  ;;  %v7703_v14 = vadd.f32 %v7463_v37, %v11652_v15  ;;  %v11654_v13 = vld [vmem:[#allocation42_spill] sm:$0xff] }
 0x2e7   :  { %11645 = vst [vmem:[#allocation67_spill] sm:$0xff] %v7687_v23  ;;  %11647 = vst [vmem:[#allocation72_spill] sm:$0xff] %v7691_v59  ;;  %v7699_v62 = vadd.f32 %v7463_v37, %v11650_v61  ;;  %v7707_v19 = vadd.f32 %v7463_v37, %v11654_v13  ;;  %v11656_v23 = vld [vmem:[#allocation92_spill] sm:$0xff]  ;;  %v11658_v59 = vld [vmem:[#allocation86_spill] sm:$0xff] }
 0x2e8   :  { %11649 = vst [vmem:[#allocation76_spill] sm:$0xff] %v7695_v38  ;;  %11653 = vst [vmem:[#allocation74_spill] sm:$0xff] %v7703_v14  ;;  %v7711_v4 = vadd.f32 %v7463_v37, %v11656_v23  ;;  %v7715_v10 = vadd.f32 %v7463_v37, %v11658_v59  ;;  %v11660_v38 = vld [vmem:[#allocation96_spill] sm:$0xff]  ;;  %v11664_v14 = vld [vmem:[#allocation94_spill] sm:$0xff] }
 0x2e9   :  { %11651 = vst [vmem:[#allocation70_spill] sm:$0xff] %v7699_v62  ;;  %11655 = vst [vmem:[#allocation80_spill] sm:$0xff] %v7707_v19  ;;  %v7719_v61 = vadd.f32 %v7463_v37, %v11660_v38  ;;  %v11662_v62 = vld [vmem:[#allocation100_spill] sm:$0xff]  ;;  %v7727_v13 = vadd.f32 %v7463_v37, %v11664_v14  ;;  %v11666_v19 = vld [vmem:[#allocation98_spill] sm:$0xff] }
 0x2ea   :  { %11657 = vst [vmem:[#allocation84_spill] sm:$0xff] %v7711_v4  ;;  %11659 = vst [vmem:[#allocation78_spill] sm:$0xff] %v7715_v10  ;;  %v7723_v15 = vadd.f32 %v7463_v37, %v11662_v62  ;;  %v7731_v23 = vadd.f32 %v7463_v37, %v11666_v19  ;;  %v11668_v4 = vld [vmem:[#allocation102_spill] sm:$0xff]  ;;  %v11670_v10 = vld [vmem:[#allocation115_spill] sm:$0xff] }
 0x2eb   :  { %11661 = vst [vmem:[#allocation82_spill] sm:$0xff] %v7719_v61  ;;  %11665 = vst [vmem:[#allocation90_spill] sm:$0xff] %v7727_v13  ;;  %v7735_v59 = vadd.f32 %v7463_v37, %v11668_v4  ;;  %v7739_v38 = vadd.f32 %v7463_v37, %v11670_v10  ;;  %v11672_v61 = vld [vmem:[#allocation118_spill] sm:$0xff]  ;;  %v11676_v13 = vld [vmem:[#allocation117_spill] sm:$0xff] }
 0x2ec   :  { %11663 = vst [vmem:[#allocation88_spill] sm:$0xff] %v7723_v15  ;;  %11667 = vst [vmem:[#allocation111_spill] sm:$0xff] %v7731_v23  ;;  %v7743_v62 = vadd.f32 %v7463_v37, %v11672_v61  ;;  %v11674_v15 = vld [vmem:[#allocation120_spill] sm:$0xff]  ;;  %v7751_v19 = vadd.f32 %v7463_v37, %v11676_v13  ;;  %v11678_v23 = vld [vmem:[#allocation119_spill] sm:$0xff] }
 0x2ed   :  { %11669 = vst [vmem:[#allocation113_spill] sm:$0xff] %v7735_v59  ;;  %11671 = vst [vmem:[#allocation110_spill] sm:$0xff] %v7739_v38  ;;  %v7747_v14 = vadd.f32 %v7463_v37, %v11674_v15  ;;  %v7755_v4 = vadd.f32 %v7463_v37, %v11678_v23  ;;  %v11680_v59 = vld [vmem:[#allocation6_spill] sm:$0xff]  ;;  %v11682_v38 = vld [vmem:[#allocation8_spill] sm:$0xff] }
 0x2ee   :  { %11673 = vst [vmem:[#allocation112_spill] sm:$0xff] %v7743_v62  ;;  %11677 = vst [vmem:[#allocation116_spill] sm:$0xff] %v7751_v19  ;;  %v7759_v10 = vadd.f32 %v7463_v37, %v11680_v59  ;;  %v7763_v61 = vadd.f32 %v7463_v37, %v11682_v38  ;;  %v11684_v62 = vld [vmem:[#allocation11_spill] sm:$0xff]  ;;  %v11688_v19 = vld [vmem:[#allocation10_spill] sm:$0xff] }
 0x2ef   :  { %11675 = vst [vmem:[#allocation114_spill] sm:$0xff] %v7747_v14  ;;  %11679 = vst [vmem:[#allocation104_spill] sm:$0xff] %v7755_v4  ;;  %v7767_v15 = vadd.f32 %v7463_v37, %v11684_v62  ;;  %v11686_v14 = vld [vmem:[#allocation13_spill] sm:$0xff]  ;;  %v7775_v23 = vadd.f32 %v7463_v37, %v11688_v19  ;;  %v11690_v4 = vld [vmem:[#allocation12_spill] sm:$0xff] }
 0x2f0   :  { %11681 = vst [vmem:[#allocation108_spill] sm:$0xff] %v7759_v10  ;;  %11683 = vst [vmem:[#allocation106_spill] sm:$0xff] %v7763_v61  ;;  %v7771_v13 = vadd.f32 %v7463_v37, %v11686_v14  ;;  %v7779_v59 = vadd.f32 %v7463_v37, %v11690_v4  ;;  %v11691_v10 = vld [vmem:[#allocation15_spill] sm:$0xff]  ;;  %v11693_v61 = vld [vmem:[#allocation17_spill] sm:$0xff] }
 0x2f1   :  { %11685 = vst [vmem:[#allocation3_spill] sm:$0xff] %v7767_v15  ;;  %11689 = vst [vmem:[#allocation2_spill] sm:$0xff] %v7775_v23  ;;  %v7783_v38 = vadd.f32 %v7463_v37, %v11691_v10  ;;  %v7787_v62 = vadd.f32 %v7463_v37, %v11693_v61  ;;  %v11694_v15 = vld [vmem:[#allocation14_spill] sm:$0xff]  ;;  %v11697_v23 = vld [vmem:[#allocation21_spill] sm:$0xff]  ;;  %v7803_v10 = vadd.f32 %v7463_v37, %v7222_v52 }
 0x2f2   :  { %11687 = vst [vmem:[#allocation5_spill] sm:$0xff] %v7771_v13  ;;  %v7791_v14 = vadd.f32 %v7463_v37, %v11694_v15  ;;  %v11695_v13 = vld [vmem:[#allocation16_spill] sm:$0xff]  ;;  %v7799_v4 = vadd.f32 %v7463_v37, %v11697_v23  ;;  %v7807_v61 = vadd.f32 %v7463_v37, %v7226_v46  ;;  %v7811_v15 = vadd.f32 %v7463_v37, %v7230_v56 }
 0x2f3   :  { %11692 = vst [vmem:[#allocation4_spill] sm:$0xff] %v7783_v38  ;;  %v7795_v19 = vadd.f32 %v7463_v37, %v11695_v13  ;;  %v7815_v13 = vadd.f32 %v7463_v37, %v7234_v41  ;;  %v7819_v23 = vadd.f32 %v7463_v37, %v7238_v12  ;;  %v7823_v52 = vadd.f32 %v7463_v37, %v7242_v33 }
 0x2f4   :  { %11698 = vst [vmem:[#allocation9_spill] sm:$0xff] %v7807_v61  ;;  %v7827_v46 = vadd.f32 %v7463_v37, %v7246_v35  ;;  %v7831_v56 = vadd.f32 %v7463_v37, %v7250_v40  ;;  %v7835_v41 = vadd.f32 %v7463_v37, %v7254_v31  ;;  %v7839_v12 = vadd.f32 %v7463_v37, %v7258_v63 }
 0x2f5   :  { %11696 = vst [vmem:[#allocation7_spill] sm:$0xff] %v7795_v19  ;;  %11699 = vst [vmem:[#allocation36_spill] sm:$0xff] %v7815_v13  ;;  %v7843_v33 = vadd.f32 %v7463_v37, %v7262_v51  ;;  %v7847_v35 = vadd.f32 %v7463_v37, %v7266_v55  ;;  %v7851_v40 = vadd.f32 %v7463_v37, %v7270_v53 }
 0x2f6   :  { %11700 = vst [vmem:[#allocation40_spill] sm:$0xff] %v7819_v23  ;;  %11701 = vst [vmem:[#allocation34_spill] sm:$0xff] %v7827_v46  ;;  %v7855_v31 = vadd.f32 %v7463_v37, %v7274_v34  ;;  %v7859_v63 = vadd.f32 %v7463_v37, %v7278_v48  ;;  %v7863_v51 = vadd.f32 %v7463_v37, %v7282_v20 }
 0x2f7   :  { %11702 = vst [vmem:[#allocation38_spill] sm:$0xff] %v7831_v56  ;;  %11703 = vst [vmem:[#allocation44_spill] sm:$0xff] %v7835_v41  ;;  %v7867_v55 = vadd.f32 %v7463_v37, %v7286_v60  ;;  %v7871_v53 = vadd.f32 %v7463_v37, %v7290_v57  ;;  %v7875_v34 = vadd.f32 %v7463_v37, %v7294_v6 }
 0x2f8   :  { %11704 = vst [vmem:[#allocation47_spill] sm:$0xff] %v7839_v12  ;;  %11705 = vst [vmem:[#allocation42_spill] sm:$0xff] %v7843_v33  ;;  %v7879_v48 = vadd.f32 %v7463_v37, %v7298_v25  ;;  %v7883_v20 = vadd.f32 %v7463_v37, %v7302_v29  ;;  %v7887_v60 = vadd.f32 %v7463_v37, %v7306_v54  ;;  %v11828_v12 = vld [vmem:[#allocation99_spill] sm:$0xff] }
 0x2f9   :  { %11706 = vst [vmem:[#allocation92_spill] sm:$0xff] %v7847_v35  ;;  %11707 = vst [vmem:[#allocation86_spill] sm:$0xff] %v7851_v40  ;;  %v7891_v57 = vadd.f32 %v7463_v37, %v7310_v22  ;;  %v7895_v6 = vadd.f32 %v7463_v37, %v7314_v42  ;;  %v7899_v25 = vadd.f32 %v7463_v37, %v7318_v2  ;;  %v11827_v35 = vld [vmem:[#allocation95_spill] sm:$0xff]  ;;  %v8163_v41 = vmul.f32 0.01, %v11828_v12  ;;  %v11839_v12 = vld [vmem:[#allocation20_spill] sm:$0xff] }
 0x2fa   :  { %11708 = vst [vmem:[#allocation96_spill] sm:$0xff] %v7855_v31  ;;  %11709 = vst [vmem:[#allocation100_spill] sm:$0xff] %v7859_v63  ;;  %v7903_v29 = vadd.f32 %v7463_v37, %v7322_v7  ;;  %v7907_v54 = vadd.f32 %v7463_v37, %v7326_v30  ;;  %v11822_v31 = vld [vmem:[#allocation97_spill] sm:$0xff]  ;;  %v8160_v33 = vmul.f32 0.01, %v11827_v35 }
 0x2fb   :  { %11710 = vst [vmem:[#allocation94_spill] sm:$0xff] %v7863_v51  ;;  %11711 = vst [vmem:[#allocation98_spill] sm:$0xff] %v7867_v55  ;;  %v11819_v51 = vld [vmem:[#allocation87_spill] sm:$0xff]  ;;  %v8151_v40 = vmul.f32 0.01, %v11822_v31  ;;  %v11833_v31 = vld [vmem:[#allocation109_spill] sm:$0xff] }
 0x2fc   :  { %11712 = vst [vmem:[#allocation102_spill] sm:$0xff] %v7871_v53  ;;  %11713 = vst [vmem:[#allocation115_spill] sm:$0xff] %v7875_v34  ;;  %v8142_v63 = vmul.f32 0.01, %v11819_v51 }
 0x2fd   :  { %11714 = vst [vmem:[#allocation118_spill] sm:$0xff] %v7879_v48  ;;  %11715 = vst [vmem:[#allocation120_spill] sm:$0xff] %v7883_v20  ;;  %v11815_v48 = vld [vmem:[#allocation83_spill] sm:$0xff] }
 0x2fe   :  { %11716 = vst [vmem:[#allocation117_spill] sm:$0xff] %v7887_v60  ;;  %11717 = vst [vmem:[#allocation119_spill] sm:$0xff] %v7891_v57  ;;  %v11722_v60 = vld [vmem:[#allocation25_spill] sm:$0xff]  ;;  %v11724_v57 = vld [vmem:[#allocation19_spill] sm:$0xff]  ;;  %v8130_v34 = vmul.f32 0.01, %v11815_v48 }
 0x2ff   :  { %11718 = vst [vmem:[#allocation6_spill] sm:$0xff] %v7895_v6  ;;  %11719 = vst [vmem:[#allocation8_spill] sm:$0xff] %v7899_v25  ;;  %v7911_v22 = vadd.f32 %v7463_v37, %v11722_v60  ;;  %v7915_v42 = vadd.f32 %v7463_v37, %v11724_v57  ;;  %v11726_v6 = vld [vmem:[#allocation23_spill] sm:$0xff]  ;;  %v11728_v25 = vld [vmem:[#allocation29_spill] sm:$0xff] }
 0x300   :  { %11720 = vst [vmem:[#allocation11_spill] sm:$0xff] %v7903_v29  ;;  %11721 = vst [vmem:[#allocation13_spill] sm:$0xff] %v7907_v54  ;;  %v7919_v2 = vadd.f32 %v7463_v37, %v11726_v6  ;;  %v7923_v7 = vadd.f32 %v7463_v37, %v11728_v25  ;;  %v11730_v29 = vld [vmem:[#allocation33_spill] sm:$0xff]  ;;  %v11732_v54 = vld [vmem:[#allocation27_spill] sm:$0xff] }
 0x301   :  { %11723 = vst [vmem:[#allocation10_spill] sm:$0xff] %v7911_v22  ;;  %11725 = vst [vmem:[#allocation12_spill] sm:$0xff] %v7915_v42  ;;  %v7927_v30 = vadd.f32 %v7463_v37, %v11730_v29  ;;  %v7931_v60 = vadd.f32 %v7463_v37, %v11732_v54  ;;  %v11734_v22 = vld [vmem:[#allocation31_spill] sm:$0xff]  ;;  %v11736_v42 = vld [vmem:[#allocation37_spill] sm:$0xff]  ;;  %v7951_v54 = vadd.f32 %v7463_v37, %v7370_v5 }
 0x302   :  { %11727 = vst [vmem:[#allocation15_spill] sm:$0xff] %v7919_v2  ;;  %11729 = vst [vmem:[#allocation17_spill] sm:$0xff] %v7923_v7  ;;  %v7935_v57 = vadd.f32 %v7463_v37, %v11734_v22  ;;  %v7939_v6 = vadd.f32 %v7463_v37, %v11736_v42  ;;  %v11738_v2 = vld [vmem:[#allocation41_spill] sm:$0xff]  ;;  %v11740_v7 = vld [vmem:[#allocation35_spill] sm:$0xff]  ;;  %v7955_v22 = vadd.f32 %v7463_v37, %v7374_v49 }
 0x303   :  { %11731 = vst [vmem:[#allocation14_spill] sm:$0xff] %v7927_v30  ;;  %11733 = vst [vmem:[#allocation16_spill] sm:$0xff] %v7931_v60  ;;  %v7943_v25 = vadd.f32 %v7463_v37, %v11738_v2  ;;  %v7947_v29 = vadd.f32 %v7463_v37, %v11740_v7  ;;  %v7963_v2 = vadd.f32 %v7463_v37, %v7382_v58 }
 0x304   :  { %11735 = vst [vmem:[#allocation21_spill] sm:$0xff] %v7935_v57  ;;  %11737 = vst [vmem:[#allocation25_spill] sm:$0xff] %v7939_v6  ;;  %v11744_v57 = vld [vmem:[#allocation39_spill] sm:$0xff]  ;;  %v7967_v7 = vadd.f32 %v7463_v37, %v7386_v24  ;;  %v7971_v5 = vadd.f32 %v7463_v37, %v7390_v21  ;;  %v7975_v49 = vadd.f32 %v7463_v37, %v7394_v1  ;;  %v11811_v6 = vld [vmem:[#allocation81_spill] sm:$0xff] }
 0x305   :  { %11739 = vst [vmem:[#allocation19_spill] sm:$0xff] %v7943_v25  ;;  %11741 = vst [vmem:[#allocation23_spill] sm:$0xff] %v7947_v29  ;;  %v7959_v42 = vadd.f32 %v7463_v37, %v11744_v57  ;;  %v7979_v57 = vadd.f32 %v7463_v37, %v7398_v36  ;;  %v7983_v58 = vadd.f32 %v7463_v37, %v7402_v47  ;;  %v2707_v60 = vmul.f32 0.01, %v11811_v6 }
 0x306   :  { %11742 = vst [vmem:[#allocation29_spill] sm:$0xff] %v7951_v54  ;;  %11743 = vst [vmem:[#allocation33_spill] sm:$0xff] %v7955_v22  ;;  %v7987_v24 = vadd.f32 %v7463_v37, %v7406_v39  ;;  %v7991_v21 = vadd.f32 %v7463_v37, %v7410_v18  ;;  %v7995_v1 = vadd.f32 %v7463_v37, %v7414_v28  ;;  %v11807_v22 = vld [vmem:[#allocation77_spill] sm:$0xff] }
 0x307   :  { %11745 = vst [vmem:[#allocation27_spill] sm:$0xff] %v7959_v42  ;;  %11746 = vst [vmem:[#allocation31_spill] sm:$0xff] %v7963_v2  ;;  %v7999_v36 = vadd.f32 %v7463_v37, %v7418_v0  ;;  %v8003_v47 = vadd.f32 %v7463_v37, %v7422_v8  ;;  %v8019_v0 = vadd.f32 %v7463_v37, %v7438_v9  ;;  %v11806_v2 = vld [vmem:[#allocation73_spill] sm:$0xff]  ;;  %v2704_v54 = vmul.f32 0.01, %v11807_v22 }
 0x308   :  { %11747 = vst [vmem:[#allocation37_spill] sm:$0xff] %v7967_v7  ;;  %11748 = vst [vmem:[#allocation41_spill] sm:$0xff] %v7971_v5  ;;  %v11805_v5 = vld [vmem:[#allocation68_spill] sm:$0xff]  ;;  %v2703_v42 = vmul.f32 0.01, %v11806_v2 }
 0x309   :  { %11749 = vst [vmem:[#allocation35_spill] sm:$0xff] %v7975_v49  ;;  %11750 = vst [vmem:[#allocation39_spill] sm:$0xff] %v7979_v57  ;;  %v11802_v57 = vld [vmem:[#allocation69_spill] sm:$0xff]  ;;  %v2702_v7 = vmul.f32 0.01, %v11805_v5 }
 0x30a   :  { %11751 = vst [vmem:[#allocation121_spill] sm:$0xff] %v7983_v58  ;;  %11752 = vst [vmem:[#allocation122_spill] sm:$0xff] %v7987_v24  ;;  %v11757_v58 = vld [vmem:[#allocation45_spill] sm:$0xff]  ;;  %v11759_v24 = vld [vmem:[#allocation48_spill] sm:$0xff] }
 0x30b   :  { %11753 = vst [vmem:[#allocation123_spill] sm:$0xff] %v7991_v21  ;;  %11754 = vst [vmem:[#allocation124_spill] sm:$0xff] %v7995_v1  ;;  %v8007_v39 = vadd.f32 %v7463_v37, %v11757_v58  ;;  %v8011_v18 = vadd.f32 %v7463_v37, %v11759_v24  ;;  %v11761_v21 = vld [vmem:[#allocation43_spill] sm:$0xff] }
 0x30c   :  { %11755 = vst [vmem:[#allocation125_spill] sm:$0xff] %v7999_v36  ;;  %11756 = vst [vmem:[#allocation126_spill] sm:$0xff] %v8003_v47  ;;  %v8015_v28 = vadd.f32 %v7463_v37, %v11761_v21  ;;  %v11764_v36 = vld [vmem:[#allocation46_spill] sm:$0xff] }
 0x30d   :  { %11758 = vst [vmem:[#allocation45_spill] sm:$0xff] %v8007_v39  ;;  %11760 = vst [vmem:[#allocation48_spill] sm:$0xff] %v8011_v18  ;;  %v8023_v8 = vadd.f32 %v7463_v37, %v11764_v36  ;;  %v11766_v47 = vld [vmem:[#allocation50_spill] sm:$0xff]  ;;  %v11768_v39 = vld [vmem:[#allocation52_spill] sm:$0xff]  ;;  %v8043_v36 = vadd.f32 %v7463_v37, %v7467_v43  ;;  %v8063_v43 = vadd.f32 %v7463_v37, %v7487_v32 }
 0x30e   :  { %11762 = vst [vmem:[#allocation43_spill] sm:$0xff] %v8015_v28  ;;  %11763 = vst [vmem:[#allocation127_spill] sm:$0xff] %v8019_v0  ;;  %v8027_v58 = vadd.f32 %v7463_v37, %v11766_v47  ;;  %v8031_v24 = vadd.f32 %v7463_v37, %v11768_v39  ;;  %v11770_v18 = vld [vmem:[#allocation49_spill] sm:$0xff]  ;;  %v11772_v28 = vld [vmem:[#allocation51_spill] sm:$0xff]  ;;  %v8047_v47 = vadd.f32 %v7463_v37, %v7471_v45 }
 0x30f   :  { %11765 = vst [vmem:[#allocation46_spill] sm:$0xff] %v8023_v8  ;;  %v8035_v21 = vadd.f32 %v7463_v37, %v11770_v18  ;;  %v8039_v9 = vadd.f32 %v7463_v37, %v11772_v28  ;;  %11774 = vst [vmem:[#allocation128_spill] sm:$0xff] %v8043_v36  ;;  %v8051_v39 = vadd.f32 %v7463_v37, %v7475_v44  ;;  %v11801_v0 = vld [vmem:[#allocation66_spill] sm:$0xff] }
 0x310   :  { %11767 = vst [vmem:[#allocation50_spill] sm:$0xff] %v8027_v58  ;;  %11769 = vst [vmem:[#allocation52_spill] sm:$0xff] %v8031_v24  ;;  %v8055_v18 = vadd.f32 %v7463_v37, %v7479_v27  ;;  %v8059_v28 = vadd.f32 %v7463_v37, %v7483_v3  ;;  %v8067_v45 = vadd.f32 %v7463_v37, %v7491_v26  ;;  %v11799_v24 = vld [vmem:[#allocation63_spill] sm:$0xff]  ;;  %v2699_v1 = vmul.f32 0.01, %v11801_v0 }
 0x311   :  { %11771 = vst [vmem:[#allocation49_spill] sm:$0xff] %v8035_v21  ;;  %11773 = vst [vmem:[#allocation51_spill] sm:$0xff] %v8039_v9  ;;  %v8071_v44 = vadd.f32 %v7463_v37, %v7495_v50  ;;  %v8075_v27 = vadd.f32 %v7463_v37, %v7499_v17  ;;  %v8079_v3 = vadd.f32 %v7463_v37, %v7503_v11  ;;  %v11790_v17 = vld [vmem:[#allocation58_spill] sm:$0xff]  ;;  %v11792_v11 = vld [vmem:[#allocation55_spill] sm:$0xff]  ;;  %v2698_v58 = vmul.f32 0.01, %v11799_v24 }
 0x312   :  { %11775 = vst [vmem:[#allocation129_spill] sm:$0xff] %v8047_v47  ;;  %11776 = vst [vmem:[#allocation130_spill] sm:$0xff] %v8051_v39  ;;  %v11795_v47 = vld [vmem:[#allocation59_spill] sm:$0xff]  ;;  %v11797_v9 = vld [vmem:[#allocation64_spill] sm:$0xff] }
 0x313   :  { %11777 = vst [vmem:[#allocation131_spill] sm:$0xff] %v8055_v18  ;;  %11778 = vst [vmem:[#allocation132_spill] sm:$0xff] %v8059_v28  ;;  %v11784_v28 = vld [vmem:[#allocation54_spill] sm:$0xff]  ;;  %v11791_v18 = vld [vmem:[#allocation60_spill] sm:$0xff]  ;;  %v2694_v36 = vmul.f32 0.01, %v11795_v47 }
 0x314   :  { %11779 = vst [vmem:[#allocation133_spill] sm:$0xff] %v8063_v43  ;;  %11780 = vst [vmem:[#allocation134_spill] sm:$0xff] %v8067_v45  ;;  %v8083_v32 = vadd.f32 %v7463_v37, %v11784_v28  ;;  %v11786_v43 = vld [vmem:[#allocation56_spill] sm:$0xff]  ;;  %v11788_v45 = vld [vmem:[#allocation53_spill] sm:$0xff]  ;;  %v2692_v39 = vmul.f32 0.01, %v11791_v18 }
 0x315   :  { %11781 = vst [vmem:[#allocation135_spill] sm:$0xff] %v8071_v44  ;;  %11782 = vst [vmem:[#allocation136_spill] sm:$0xff] %v8075_v27  ;;  %v8087_v26 = vadd.f32 %v7463_v37, %v11786_v43  ;;  %v8091_v50 = vadd.f32 %v7463_v37, %v11788_v45  ;;  %v2690_v44 = vmul.f32 0.01, %v7523_v16  ;;  %v2691_v27 = vmul.f32 0.01, %v11790_v17 }
 0x316   :  { %11783 = vst [vmem:[#allocation137_spill] sm:$0xff] %v8079_v3  ;;  %11785 = vst [vmem:[#allocation54_spill] sm:$0xff] %v8083_v32  ;;  %v8098_v3 = vadd.f32 %v7463_v37, %v11792_v11  ;;  %v11794_v28 = vld [vmem:[#allocation57_spill] sm:$0xff]  ;;  %v11796_v43 = vld [vmem:[#allocation62_spill] sm:$0xff]  ;;  %v2696_v21 = vmul.f32 0.01, %v11797_v9  ;;  %v8119_v29 = vmax.f32 %v11791_v18, %v2692_v39  ;;  %v8133_v53 = vmax.f32 %v11795_v47, %v2694_v36 }
 0x317   :  { %11787 = vst [vmem:[#allocation56_spill] sm:$0xff] %v8087_v26  ;;  %11789 = vst [vmem:[#allocation53_spill] sm:$0xff] %v8091_v50  ;;  %v2693_v32 = vmul.f32 0.01, %v11794_v28  ;;  %v2695_v26 = vmul.f32 0.01, %v11796_v43  ;;  %v8107_v8 = vmax.f32 %v7523_v16, %v2690_v44  ;;  %v8113_v49 = vmax.f32 %v11790_v17, %v2691_v27 }
 0x318   :  { %11793 = vst [vmem:[#allocation58_spill] sm:$0xff] %v8098_v3  ;;  %v11798_v45 = vld [vmem:[#allocation61_spill] sm:$0xff]  ;;  %v2700_v37 = vmul.f32 0.01, %v11802_v57  ;;  %11808 = vst [vmem:[#allocation57_spill] sm:$0xff] %v8119_v29  ;;  %v11809_v16 = vld [vmem:[#allocation71_spill] sm:$0xff] }
 0x319   :  { %v2697_v50 = vmul.f32 0.01, %v11798_v45  ;;  %11800 = vst [vmem:[#allocation60_spill] sm:$0xff] %v8107_v8  ;;  %v11803_v11 = vld [vmem:[#allocation65_spill] sm:$0xff]  ;;  %11804 = vst [vmem:[#allocation55_spill] sm:$0xff] %v8113_v49  ;;  %v11810_v8 = vld [vmem:[#allocation75_spill] sm:$0xff]  ;;  %v8125_v30 = vmax.f32 %v11794_v28, %v2693_v32  ;;  %v8145_v32 = vmax.f32 %v11796_v43, %v2695_v26 }
 0x31a   :  { %v2701_v3 = vmul.f32 0.01, %v11803_v11  ;;  %v2705_v44 = vmul.f32 0.01, %v11809_v16  ;;  %v2706_v25 = vmul.f32 0.01, %v11810_v8 }
 0x31b   :  { %11812 = vst [vmem:[#allocation59_spill] sm:$0xff] %v8125_v30  ;;  %v11813_v27 = vld [vmem:[#allocation85_spill] sm:$0xff]  ;;  %v11814_v49 = vld [vmem:[#allocation79_spill] sm:$0xff]  ;;  %11816 = vst [vmem:[#allocation62_spill] sm:$0xff] %v8133_v53  ;;  %v8157_v53 = vmax.f32 %v11797_v9, %v2696_v21 }
 0x31c   :  { %v2708_v17 = vmul.f32 0.01, %v11813_v27  ;;  %v2709_v20 = vmul.f32 0.01, %v11814_v49  ;;  %v11817_v39 = vld [vmem:[#allocation89_spill] sm:$0xff]  ;;  %11820 = vst [vmem:[#allocation64_spill] sm:$0xff] %v8145_v32  ;;  %v8169_v32 = vmax.f32 %v11798_v45, %v2697_v50 }
 0x31d   :  { %v8136_v18 = vmul.f32 0.01, %v11817_v39  ;;  %v11818_v29 = vld [vmem:[#allocation93_spill] sm:$0xff]  ;;  %v11821_v28 = vld [vmem:[#allocation91_spill] sm:$0xff]  ;;  %11823 = vst [vmem:[#allocation61_spill] sm:$0xff] %v8151_v40  ;;  %11826 = vst [vmem:[#allocation66_spill] sm:$0xff] %v8157_v53  ;;  %v8181_v53 = vmax.f32 %v11799_v24, %v2698_v58 }
 0x31e   :  { %v8139_v55 = vmul.f32 0.01, %v11818_v29  ;;  %v8148_v30 = vmul.f32 0.01, %v11821_v28  ;;  %v11824_v36 = vld [vmem:[#allocation101_spill] sm:$0xff]  ;;  %11829 = vst [vmem:[#allocation69_spill] sm:$0xff] %v8163_v41 }
 0x31f   :  { %v8154_v47 = vmul.f32 0.01, %v11824_v36  ;;  %v11830_v26 = vld [vmem:[#allocation105_spill] sm:$0xff]  ;;  %11832 = vst [vmem:[#allocation68_spill] sm:$0xff] %v8169_v32  ;;  %v8172_v40 = vmul.f32 0.01, %v11833_v31  ;;  %v8193_v32 = vmax.f32 %v11801_v0, %v2699_v1 }
 0x320   :  { %v8166_v43 = vmul.f32 0.01, %v11830_v26  ;;  %v11834_v36 = vld [vmem:[#allocation103_spill] sm:$0xff]  ;;  %11838 = vst [vmem:[#allocation71_spill] sm:$0xff] %v8181_v53  ;;  %v8184_v41 = vmul.f32 0.01, %v11839_v12  ;;  %v8205_v53 = vmax.f32 %v11802_v57, %v2700_v37 }
 0x321   :  { %11825 = vst [vmem:[#allocation63_spill] sm:$0xff] %v8154_v47  ;;  %v8175_v47 = vmul.f32 0.01, %v11834_v36  ;;  %v11836_v21 = vld [vmem:[#allocation107_spill] sm:$0xff]  ;;  %v11840_v26 = vld [vmem:[#allocation24_spill] sm:$0xff]  ;;  %v11842_v50 = vld [vmem:[#allocation18_spill] sm:$0xff] }
 0x322   :  { %11831 = vst [vmem:[#allocation65_spill] sm:$0xff] %v8166_v43  ;;  %v8178_v9 = vmul.f32 0.01, %v11836_v21  ;;  %v8187_v43 = vmul.f32 0.01, %v11840_v26  ;;  %11844 = vst [vmem:[#allocation85_spill] sm:$0xff] %v8193_v32  ;;  %v8217_v32 = vmax.f32 %v11803_v11, %v2701_v3 }
 0x323   :  { %11835 = vst [vmem:[#allocation73_spill] sm:$0xff] %v8175_v47  ;;  %v8190_v45 = vmul.f32 0.01, %v11842_v50  ;;  %v11845_v36 = vld [vmem:[#allocation22_spill] sm:$0xff]  ;;  %v11846_v21 = vld [vmem:[#allocation28_spill] sm:$0xff]  ;;  %11850 = vst [vmem:[#allocation89_spill] sm:$0xff] %v8205_v53  ;;  %v8229_v53 = vmax.f32 %v11805_v5, %v2702_v7 }
 0x324   :  { %11837 = vst [vmem:[#allocation77_spill] sm:$0xff] %v8178_v9  ;;  %11841 = vst [vmem:[#allocation75_spill] sm:$0xff] %v8187_v43  ;;  %v8196_v47 = vmul.f32 0.01, %v11845_v36  ;;  %v8199_v9 = vmul.f32 0.01, %v11846_v21 }
 0x325   :  { %11843 = vst [vmem:[#allocation81_spill] sm:$0xff] %v8190_v45  ;;  %v11848_v58 = vld [vmem:[#allocation32_spill] sm:$0xff]  ;;  %v11851_v26 = vld [vmem:[#allocation26_spill] sm:$0xff]  ;;  %v11854_v1 = vld [vmem:[#allocation67_spill] sm:$0xff] }
 0x326   :  { %11847 = vst [vmem:[#allocation79_spill] sm:$0xff] %v8199_v9  ;;  %v8202_v24 = vmul.f32 0.01, %v11848_v58  ;;  %v8208_v43 = vmul.f32 0.01, %v11851_v26  ;;  %v11852_v50 = vld [vmem:[#allocation30_spill] sm:$0xff] }
 0x327   :  { %v8211_v45 = vmul.f32 0.01, %v11852_v50  ;;  %v8214_v0 = vmul.f32 0.01, %v11854_v1  ;;  %11856 = vst [vmem:[#allocation91_spill] sm:$0xff] %v8217_v32  ;;  %v11857_v21 = vld [vmem:[#allocation72_spill] sm:$0xff]  ;;  %v8241_v32 = vmax.f32 %v11806_v2, %v2703_v42 }
 0x328   :  { %11849 = vst [vmem:[#allocation83_spill] sm:$0xff] %v8202_v24  ;;  %v8220_v9 = vmul.f32 0.01, %v11857_v21  ;;  %v11858_v58 = vld [vmem:[#allocation76_spill] sm:$0xff]  ;;  %v11860_v57 = vld [vmem:[#allocation70_spill] sm:$0xff]  ;;  %11862 = vst [vmem:[#allocation20_spill] sm:$0xff] %v8229_v53  ;;  %v8253_v53 = vmax.f32 %v11807_v22, %v2704_v54 }
 0x329   :  { %11853 = vst [vmem:[#allocation93_spill] sm:$0xff] %v8211_v45  ;;  %11855 = vst [vmem:[#allocation87_spill] sm:$0xff] %v8214_v0  ;;  %v8223_v24 = vmul.f32 0.01, %v11858_v58  ;;  %v8226_v37 = vmul.f32 0.01, %v11860_v57 }
 0x32a   :  { %v11863_v50 = vld [vmem:[#allocation74_spill] sm:$0xff]  ;;  %v11864_v1 = vld [vmem:[#allocation80_spill] sm:$0xff]  ;;  %11868 = vst [vmem:[#allocation72_spill] sm:$0xff] %v8241_v32  ;;  %11874 = vst [vmem:[#allocation138_spill] sm:$0xff] %v8253_v53  ;;  %v8265_v32 = vmax.f32 %v11809_v16, %v2705_v44  ;;  %v8277_v53 = vmax.f32 %v11810_v8, %v2706_v25 }
 0x32b   :  { %11859 = vst [vmem:[#allocation95_spill] sm:$0xff] %v8223_v24  ;;  %11861 = vst [vmem:[#allocation109_spill] sm:$0xff] %v8226_v37  ;;  %v8232_v45 = vmul.f32 0.01, %v11863_v50  ;;  %v8235_v0 = vmul.f32 0.01, %v11864_v1 }
 0x32c   :  { %v11866_v3 = vld [vmem:[#allocation84_spill] sm:$0xff]  ;;  %v11869_v58 = vld [vmem:[#allocation78_spill] sm:$0xff]  ;;  %v11878_v42 = vld [vmem:[#allocation113_spill] sm:$0xff]  ;;  %11880 = vst [vmem:[#allocation140_spill] sm:$0xff] %v8265_v32  ;;  %v8289_v32 = vmax.f32 %v11811_v6, %v2707_v60  ;;  %v8310_v60 = vmul.f32 0.01, %v7783_v38  ;;  %v8313_v6 = vmax.f32 %v11814_v49, %v2709_v20  ;;  %v8339_v49 = vmax.f32 %v11817_v39, %v8136_v18 }
 0x32d   :  { %11865 = vst [vmem:[#allocation22_spill] sm:$0xff] %v8235_v0  ;;  %v8238_v11 = vmul.f32 0.01, %v11866_v3  ;;  %v8244_v24 = vmul.f32 0.01, %v11869_v58  ;;  %v11870_v57 = vld [vmem:[#allocation82_spill] sm:$0xff]  ;;  %v8365_v18 = vmax.f32 %v11819_v51, %v8142_v63 }
 0x32e   :  { %v8247_v37 = vmul.f32 0.01, %v11870_v57  ;;  %v11872_v7 = vld [vmem:[#allocation88_spill] sm:$0xff]  ;;  %v11875_v1 = vld [vmem:[#allocation90_spill] sm:$0xff]  ;;  %v11876_v3 = vld [vmem:[#allocation111_spill] sm:$0xff]  ;;  %11886 = vst [vmem:[#allocation142_spill] sm:$0xff] %v8277_v53  ;;  %v8301_v53 = vmax.f32 %v11813_v27, %v2708_v17  ;;  %v8326_v17 = vmax.f32 %v11815_v48, %v8130_v34  ;;  %v8352_v48 = vmax.f32 %v11818_v29, %v8139_v55 }
 0x32f   :  { %11867 = vst [vmem:[#allocation26_spill] sm:$0xff] %v8238_v11  ;;  %v8250_v5 = vmul.f32 0.01, %v11872_v7  ;;  %v8256_v0 = vmul.f32 0.01, %v11875_v1  ;;  %v11881_v57 = vld [vmem:[#allocation110_spill] sm:$0xff] }
 0x330   :  { %11871 = vst [vmem:[#allocation74_spill] sm:$0xff] %v8247_v37  ;;  %v8259_v11 = vmul.f32 0.01, %v11876_v3  ;;  %v8262_v2 = vmul.f32 0.01, %v11878_v42  ;;  %v11882_v7 = vld [vmem:[#allocation112_spill] sm:$0xff] }
 0x331   :  { %11873 = vst [vmem:[#allocation78_spill] sm:$0xff] %v8250_v5  ;;  %v8268_v37 = vmul.f32 0.01, %v11881_v57  ;;  %v8271_v5 = vmul.f32 0.01, %v11882_v7  ;;  %v11884_v54 = vld [vmem:[#allocation114_spill] sm:$0xff] }
 0x332   :  { %11877 = vst [vmem:[#allocation90_spill] sm:$0xff] %v8259_v11  ;;  %11879 = vst [vmem:[#allocation139_spill] sm:$0xff] %v8262_v2  ;;  %v8274_v22 = vmul.f32 0.01, %v11884_v54  ;;  %v11887_v3 = vld [vmem:[#allocation116_spill] sm:$0xff]  ;;  %v11892_v7 = vld [vmem:[#allocation106_spill] sm:$0xff] }
 0x333   :  { %11883 = vst [vmem:[#allocation110_spill] sm:$0xff] %v8271_v5  ;;  %v8280_v11 = vmul.f32 0.01, %v11887_v3  ;;  %v11888_v42 = vld [vmem:[#allocation104_spill] sm:$0xff]  ;;  %11891 = vst [vmem:[#allocation143_spill] sm:$0xff] %v8289_v32  ;;  %v11893_v54 = vld [vmem:[#allocation3_spill] sm:$0xff] }
 0x334   :  { %11885 = vst [vmem:[#allocation141_spill] sm:$0xff] %v8274_v22  ;;  %v8283_v2 = vmul.f32 0.01, %v11888_v42  ;;  %v11890_v16 = vld [vmem:[#allocation108_spill] sm:$0xff]  ;;  %v8292_v5 = vmul.f32 0.01, %v11892_v7 }
 0x335   :  { %v8286_v44 = vmul.f32 0.01, %v11890_v16  ;;  %v8295_v22 = vmul.f32 0.01, %v11893_v54  ;;  %v11894_v25 = vld [vmem:[#allocation5_spill] sm:$0xff]  ;;  %11895 = vst [vmem:[#allocation106_spill] sm:$0xff] %v8301_v53 }
 0x336   :  { %11889 = vst [vmem:[#allocation116_spill] sm:$0xff] %v8283_v2  ;;  %v8298_v8 = vmul.f32 0.01, %v11894_v25  ;;  %v11896_v42 = vld [vmem:[#allocation2_spill] sm:$0xff]  ;;  %v8307_v16 = vmul.f32 0.01, %v7779_v59 }
 0x337   :  { %v8304_v2 = vmul.f32 0.01, %v11896_v42  ;;  %11897 = vst [vmem:[#allocation3_spill] sm:$0xff] %v8313_v6  ;;  %v8316_v32 = vmul.f32 0.01, %v7787_v62  ;;  %11898 = vst [vmem:[#allocation2_spill] sm:$0xff] %v8326_v17 }
 0x338   :  { %v8319_v25 = vmul.f32 0.01, %v7791_v14  ;;  %v8322_v27 = vmul.f32 0.01, %v7795_v19  ;;  %v8329_v53 = vmul.f32 0.01, %v7799_v4 }
 0x339   :  { %v8332_v38 = vmul.f32 0.01, %v7803_v10  ;;  %v8335_v20 = vmul.f32 0.01, %v7807_v61  ;;  %11899 = vst [vmem:[#allocation144_spill] sm:$0xff] %v8339_v49  ;;  %11901 = vst [vmem:[#allocation146_spill] sm:$0xff] %v8352_v48  ;;  %v8378_v48 = vmax.f32 %v11821_v28, %v8148_v30 }
 0x33a   :  { %v8342_v6 = vmul.f32 0.01, %v7811_v15  ;;  %v8345_v19 = vmul.f32 0.01, %v7815_v13  ;;  %v8348_v34 = vmul.f32 0.01, %v7819_v23 }
 0x33b   :  { %v8355_v17 = vmul.f32 0.01, %v7823_v52  ;;  %v8358_v61 = vmul.f32 0.01, %v7827_v46  ;;  %v8361_v39 = vmul.f32 0.01, %v7831_v56 }
 0x33c   :  { %11900 = vst [vmem:[#allocation145_spill] sm:$0xff] %v8348_v34  ;;  %11904 = vst [vmem:[#allocation149_spill] sm:$0xff] %v8365_v18  ;;  %v11905_v49 = vld [vmem:[#allocation44_spill] sm:$0xff]  ;;  %v11907_v34 = vld [vmem:[#allocation47_spill] sm:$0xff] }
 0x33d   :  { %11902 = vst [vmem:[#allocation147_spill] sm:$0xff] %v8358_v61  ;;  %11903 = vst [vmem:[#allocation148_spill] sm:$0xff] %v8361_v39  ;;  %v8368_v23 = vmul.f32 0.01, %v11905_v49  ;;  %v8371_v13 = vmul.f32 0.01, %v11907_v34 }
 0x33e   :  { %v11909_v55 = vld [vmem:[#allocation42_spill] sm:$0xff]  ;;  %11911 = vst [vmem:[#allocation153_spill] sm:$0xff] %v8378_v48  ;;  %v11912_v46 = vld [vmem:[#allocation92_spill] sm:$0xff]  ;;  %v11918_v18 = vld [vmem:[#allocation61_spill] sm:$0xff] }
 0x33f   :  { %11906 = vst [vmem:[#allocation150_spill] sm:$0xff] %v8368_v23  ;;  %11908 = vst [vmem:[#allocation151_spill] sm:$0xff] %v8371_v13  ;;  %v8374_v29 = vmul.f32 0.01, %v11909_v55  ;;  %v8381_v56 = vmul.f32 0.01, %v11912_v46 }
 0x340   :  { %v11914_v39 = vld [vmem:[#allocation86_spill] sm:$0xff]  ;;  %v11916_v63 = vld [vmem:[#allocation96_spill] sm:$0xff]  ;;  %v11919_v49 = vld [vmem:[#allocation97_spill] sm:$0xff] }
 0x341   :  { %11910 = vst [vmem:[#allocation152_spill] sm:$0xff] %v8374_v29  ;;  %11913 = vst [vmem:[#allocation154_spill] sm:$0xff] %v8381_v56  ;;  %v8384_v61 = vmul.f32 0.01, %v11914_v39  ;;  %v8387_v51 = vmul.f32 0.01, %v11916_v63  ;;  %v8391_v34 = vmax.f32 %v11919_v49, %v11918_v18 }
 0x342   :  { %v11921_v13 = vld [vmem:[#allocation100_spill] sm:$0xff]  ;;  %v11922_v29 = vld [vmem:[#allocation94_spill] sm:$0xff]  ;;  %v11926_v48 = vld [vmem:[#allocation63_spill] sm:$0xff] }
 0x343   :  { %11915 = vst [vmem:[#allocation155_spill] sm:$0xff] %v8384_v61  ;;  %11917 = vst [vmem:[#allocation156_spill] sm:$0xff] %v8387_v51  ;;  %v8394_v55 = vmul.f32 0.01, %v11921_v13  ;;  %v8397_v23 = vmul.f32 0.01, %v11922_v29 }
 0x344   :  { %11920 = vst [vmem:[#allocation61_spill] sm:$0xff] %v8391_v34  ;;  %v11924_v30 = vld [vmem:[#allocation98_spill] sm:$0xff]  ;;  %v11927_v46 = vld [vmem:[#allocation101_spill] sm:$0xff]  ;;  %v11931_v51 = vld [vmem:[#allocation115_spill] sm:$0xff]  ;;  %v8417_v34 = vmax.f32 %v11827_v35, %v8160_v33 }
 0x345   :  { %11923 = vst [vmem:[#allocation97_spill] sm:$0xff] %v8397_v23  ;;  %v8400_v28 = vmul.f32 0.01, %v11924_v30  ;;  %v8404_v39 = vmax.f32 %v11927_v46, %v11926_v48  ;;  %v11929_v61 = vld [vmem:[#allocation102_spill] sm:$0xff]  ;;  %v8410_v56 = vmul.f32 0.01, %v11931_v51 }
 0x346   :  { %v8407_v63 = vmul.f32 0.01, %v11929_v61  ;;  %v11933_v49 = vld [vmem:[#allocation118_spill] sm:$0xff]  ;;  %11935 = vst [vmem:[#allocation159_spill] sm:$0xff] %v8417_v34  ;;  %v11936_v29 = vld [vmem:[#allocation120_spill] sm:$0xff]  ;;  %v11940_v46 = vld [vmem:[#allocation119_spill] sm:$0xff] }
 0x347   :  { %11925 = vst [vmem:[#allocation100_spill] sm:$0xff] %v8400_v28  ;;  %11928 = vst [vmem:[#allocation63_spill] sm:$0xff] %v8404_v39  ;;  %v8413_v18 = vmul.f32 0.01, %v11933_v49  ;;  %v8420_v30 = vmul.f32 0.01, %v11936_v29 }
 0x348   :  { %11930 = vst [vmem:[#allocation101_spill] sm:$0xff] %v8407_v63  ;;  %11932 = vst [vmem:[#allocation157_spill] sm:$0xff] %v8410_v56  ;;  %v11938_v28 = vld [vmem:[#allocation117_spill] sm:$0xff]  ;;  %v8426_v48 = vmul.f32 0.01, %v11940_v46  ;;  %v11943_v61 = vld [vmem:[#allocation99_spill] sm:$0xff] }
 0x349   :  { %11934 = vst [vmem:[#allocation158_spill] sm:$0xff] %v8413_v18  ;;  %11937 = vst [vmem:[#allocation160_spill] sm:$0xff] %v8420_v30  ;;  %v8423_v23 = vmul.f32 0.01, %v11938_v28  ;;  %v11942_v39 = vld [vmem:[#allocation69_spill] sm:$0xff]  ;;  %v11945_v56 = vld [vmem:[#allocation6_spill] sm:$0xff] }
 0x34a   :  { %11941 = vst [vmem:[#allocation162_spill] sm:$0xff] %v8426_v48  ;;  %v8430_v51 = vmax.f32 %v11943_v61, %v11942_v39  ;;  %v8433_v49 = vmul.f32 0.01, %v11945_v56  ;;  %v11946_v18 = vld [vmem:[#allocation8_spill] sm:$0xff]  ;;  %v11948_v33 = vld [vmem:[#allocation11_spill] sm:$0xff]  ;;  %v11950_v34 = vld [vmem:[#allocation65_spill] sm:$0xff] }
 0x34b   :  { %11939 = vst [vmem:[#allocation161_spill] sm:$0xff] %v8423_v23  ;;  %v8436_v63 = vmul.f32 0.01, %v11946_v18  ;;  %v8439_v35 = vmul.f32 0.01, %v11948_v33  ;;  %v11951_v29 = vld [vmem:[#allocation105_spill] sm:$0xff] }
 0x34c   :  { %11944 = vst [vmem:[#allocation69_spill] sm:$0xff] %v8430_v51  ;;  %v8443_v28 = vmax.f32 %v11951_v29, %v11950_v34  ;;  %v11953_v23 = vld [vmem:[#allocation13_spill] sm:$0xff]  ;;  %v11955_v48 = vld [vmem:[#allocation10_spill] sm:$0xff]  ;;  %v11957_v61 = vld [vmem:[#allocation12_spill] sm:$0xff]  ;;  %v8456_v51 = vmax.f32 %v11833_v31, %v8172_v40 }
 0x34d   :  { %11947 = vst [vmem:[#allocation99_spill] sm:$0xff] %v8436_v63  ;;  %11949 = vst [vmem:[#allocation6_spill] sm:$0xff] %v8439_v35  ;;  %v8446_v46 = vmul.f32 0.01, %v11953_v23  ;;  %v8449_v30 = vmul.f32 0.01, %v11955_v48 }
 0x34e   :  { %11952 = vst [vmem:[#allocation65_spill] sm:$0xff] %v8443_v28  ;;  %v8452_v39 = vmul.f32 0.01, %v11957_v61  ;;  %11959 = vst [vmem:[#allocation165_spill] sm:$0xff] %v8456_v51  ;;  %v11960_v18 = vld [vmem:[#allocation15_spill] sm:$0xff]  ;;  %v11962_v35 = vld [vmem:[#allocation17_spill] sm:$0xff] }
 0x34f   :  { %11954 = vst [vmem:[#allocation105_spill] sm:$0xff] %v8446_v46  ;;  %11956 = vst [vmem:[#allocation163_spill] sm:$0xff] %v8449_v30  ;;  %v8459_v33 = vmul.f32 0.01, %v11960_v18  ;;  %v8462_v63 = vmul.f32 0.01, %v11962_v35 }
 0x350   :  { %11958 = vst [vmem:[#allocation164_spill] sm:$0xff] %v8452_v39  ;;  %v11964_v34 = vld [vmem:[#allocation14_spill] sm:$0xff]  ;;  %v11966_v28 = vld [vmem:[#allocation73_spill] sm:$0xff]  ;;  %v11967_v23 = vld [vmem:[#allocation103_spill] sm:$0xff] }
 0x351   :  { %11961 = vst [vmem:[#allocation166_spill] sm:$0xff] %v8459_v33  ;;  %11963 = vst [vmem:[#allocation167_spill] sm:$0xff] %v8462_v63  ;;  %v8465_v29 = vmul.f32 0.01, %v11964_v34  ;;  %v8469_v48 = vmax.f32 %v11967_v23, %v11966_v28  ;;  %v11969_v30 = vld [vmem:[#allocation16_spill] sm:$0xff]  ;;  %v11970_v39 = vld [vmem:[#allocation21_spill] sm:$0xff] }
 0x352   :  { %v8472_v61 = vmul.f32 0.01, %v11969_v30  ;;  %v8475_v46 = vmul.f32 0.01, %v11970_v39  ;;  %v11972_v40 = vld [vmem:[#allocation25_spill] sm:$0xff]  ;;  %v11975_v18 = vld [vmem:[#allocation107_spill] sm:$0xff] }
 0x353   :  { %11965 = vst [vmem:[#allocation168_spill] sm:$0xff] %v8465_v29  ;;  %11968 = vst [vmem:[#allocation73_spill] sm:$0xff] %v8469_v48  ;;  %v8478_v31 = vmul.f32 0.01, %v11972_v40  ;;  %v11974_v51 = vld [vmem:[#allocation77_spill] sm:$0xff]  ;;  %v11977_v63 = vld [vmem:[#allocation19_spill] sm:$0xff]  ;;  %v8495_v48 = vmax.f32 %v11839_v12, %v8184_v41 }
 0x354   :  { %11971 = vst [vmem:[#allocation103_spill] sm:$0xff] %v8475_v46  ;;  %v8482_v35 = vmax.f32 %v11975_v18, %v11974_v51  ;;  %v8485_v34 = vmul.f32 0.01, %v11977_v63  ;;  %v11979_v29 = vld [vmem:[#allocation23_spill] sm:$0xff]  ;;  %v11981_v23 = vld [vmem:[#allocation29_spill] sm:$0xff]  ;;  %v11991_v63 = vld [vmem:[#allocation24_spill] sm:$0xff] }
 0x355   :  { %11973 = vst [vmem:[#allocation16_spill] sm:$0xff] %v8478_v31  ;;  %v8488_v33 = vmul.f32 0.01, %v11979_v29  ;;  %v8491_v28 = vmul.f32 0.01, %v11981_v23  ;;  %11983 = vst [vmem:[#allocation171_spill] sm:$0xff] %v8495_v48 }
 0x356   :  { %11976 = vst [vmem:[#allocation77_spill] sm:$0xff] %v8482_v35  ;;  %11978 = vst [vmem:[#allocation107_spill] sm:$0xff] %v8485_v34  ;;  %v11984_v39 = vld [vmem:[#allocation33_spill] sm:$0xff]  ;;  %v11986_v31 = vld [vmem:[#allocation27_spill] sm:$0xff] }
 0x357   :  { %11980 = vst [vmem:[#allocation169_spill] sm:$0xff] %v8488_v33  ;;  %11982 = vst [vmem:[#allocation170_spill] sm:$0xff] %v8491_v28  ;;  %v8498_v40 = vmul.f32 0.01, %v11984_v39  ;;  %v8501_v46 = vmul.f32 0.01, %v11986_v31 }
 0x358   :  { %v11988_v51 = vld [vmem:[#allocation31_spill] sm:$0xff]  ;;  %v11993_v33 = vld [vmem:[#allocation37_spill] sm:$0xff]  ;;  %v11999_v39 = vld [vmem:[#allocation18_spill] sm:$0xff] }
 0x359   :  { %11985 = vst [vmem:[#allocation172_spill] sm:$0xff] %v8498_v40  ;;  %11987 = vst [vmem:[#allocation173_spill] sm:$0xff] %v8501_v46  ;;  %v8504_v18 = vmul.f32 0.01, %v11988_v51  ;;  %v11990_v35 = vld [vmem:[#allocation75_spill] sm:$0xff]  ;;  %v11994_v28 = vld [vmem:[#allocation41_spill] sm:$0xff] }
 0x35a   :  { %v8508_v29 = vmax.f32 %v11991_v63, %v11990_v35  ;;  %v8511_v23 = vmul.f32 0.01, %v11993_v33  ;;  %v8514_v34 = vmul.f32 0.01, %v11994_v28  ;;  %v11996_v41 = vld [vmem:[#allocation35_spill] sm:$0xff]  ;;  %v11998_v48 = vld [vmem:[#allocation81_spill] sm:$0xff] }
 0x35b   :  { %11989 = vst [vmem:[#allocation174_spill] sm:$0xff] %v8504_v18  ;;  %v8517_v12 = vmul.f32 0.01, %v11996_v41  ;;  %v8521_v31 = vmax.f32 %v11999_v39, %v11998_v48  ;;  %v12001_v46 = vld [vmem:[#allocation39_spill] sm:$0xff]  ;;  %v12003_v18 = vld [vmem:[#allocation121_spill] sm:$0xff]  ;;  %v12005_v63 = vld [vmem:[#allocation122_spill] sm:$0xff] }
 0x35c   :  { %11992 = vst [vmem:[#allocation75_spill] sm:$0xff] %v8508_v29  ;;  %11995 = vst [vmem:[#allocation24_spill] sm:$0xff] %v8514_v34  ;;  %v8524_v51 = vmul.f32 0.01, %v12001_v46  ;;  %v8527_v40 = vmul.f32 0.01, %v12003_v18  ;;  %v8534_v29 = vmax.f32 %v11845_v36, %v8196_v47 }
 0x35d   :  { %11997 = vst [vmem:[#allocation37_spill] sm:$0xff] %v8517_v12  ;;  %12000 = vst [vmem:[#allocation81_spill] sm:$0xff] %v8521_v31  ;;  %v8530_v35 = vmul.f32 0.01, %v12005_v63  ;;  %v12008_v28 = vld [vmem:[#allocation123_spill] sm:$0xff]  ;;  %v12010_v12 = vld [vmem:[#allocation124_spill] sm:$0xff] }
 0x35e   :  { %12002 = vst [vmem:[#allocation18_spill] sm:$0xff] %v8524_v51  ;;  %12004 = vst [vmem:[#allocation175_spill] sm:$0xff] %v8527_v40  ;;  %v8537_v41 = vmul.f32 0.01, %v12008_v28  ;;  %v8540_v34 = vmul.f32 0.01, %v12010_v12 }
 0x35f   :  { %12006 = vst [vmem:[#allocation176_spill] sm:$0xff] %v8530_v35  ;;  %12007 = vst [vmem:[#allocation177_spill] sm:$0xff] %v8534_v29  ;;  %v12012_v48 = vld [vmem:[#allocation125_spill] sm:$0xff]  ;;  %v12014_v31 = vld [vmem:[#allocation79_spill] sm:$0xff] }
 0x360   :  { %12009 = vst [vmem:[#allocation178_spill] sm:$0xff] %v8537_v41  ;;  %12011 = vst [vmem:[#allocation179_spill] sm:$0xff] %v8540_v34  ;;  %v8543_v39 = vmul.f32 0.01, %v12012_v48  ;;  %v12015_v46 = vld [vmem:[#allocation28_spill] sm:$0xff]  ;;  %v12017_v40 = vld [vmem:[#allocation126_spill] sm:$0xff] }
 0x361   :  { %v8547_v18 = vmax.f32 %v12015_v46, %v12014_v31  ;;  %v8550_v63 = vmul.f32 0.01, %v12017_v40  ;;  %v12018_v35 = vld [vmem:[#allocation45_spill] sm:$0xff]  ;;  %v12020_v36 = vld [vmem:[#allocation48_spill] sm:$0xff]  ;;  %v12022_v29 = vld [vmem:[#allocation83_spill] sm:$0xff] }
 0x362   :  { %12013 = vst [vmem:[#allocation180_spill] sm:$0xff] %v8543_v39  ;;  %v8553_v51 = vmul.f32 0.01, %v12018_v35  ;;  %v8556_v47 = vmul.f32 0.01, %v12020_v36  ;;  %v12023_v28 = vld [vmem:[#allocation32_spill] sm:$0xff] }
 0x363   :  { %12016 = vst [vmem:[#allocation79_spill] sm:$0xff] %v8547_v18  ;;  %v8560_v12 = vmax.f32 %v12023_v28, %v12022_v29  ;;  %v12025_v34 = vld [vmem:[#allocation43_spill] sm:$0xff]  ;;  %v12029_v46 = vld [vmem:[#allocation46_spill] sm:$0xff]  ;;  %v8573_v18 = vmax.f32 %v11851_v26, %v8208_v43  ;;  %v12036_v29 = vld [vmem:[#allocation49_spill] sm:$0xff] }
 0x364   :  { %12019 = vst [vmem:[#allocation28_spill] sm:$0xff] %v8553_v51  ;;  %12021 = vst [vmem:[#allocation126_spill] sm:$0xff] %v8556_v47  ;;  %v8563_v48 = vmul.f32 0.01, %v12025_v34  ;;  %v12027_v39 = vld [vmem:[#allocation127_spill] sm:$0xff]  ;;  %v12032_v35 = vld [vmem:[#allocation50_spill] sm:$0xff] }
 0x365   :  { %12024 = vst [vmem:[#allocation83_spill] sm:$0xff] %v8560_v12  ;;  %v8566_v41 = vmul.f32 0.01, %v12027_v39  ;;  %v8569_v31 = vmul.f32 0.01, %v12029_v46  ;;  %12031 = vst [vmem:[#allocation183_spill] sm:$0xff] %v8573_v18 }
 0x366   :  { %12026 = vst [vmem:[#allocation32_spill] sm:$0xff] %v8563_v48  ;;  %v8576_v36 = vmul.f32 0.01, %v12032_v35  ;;  %v12034_v47 = vld [vmem:[#allocation52_spill] sm:$0xff]  ;;  %v8582_v28 = vmul.f32 0.01, %v12036_v29 }
 0x367   :  { %12028 = vst [vmem:[#allocation181_spill] sm:$0xff] %v8566_v41  ;;  %12030 = vst [vmem:[#allocation182_spill] sm:$0xff] %v8569_v31  ;;  %v8579_v51 = vmul.f32 0.01, %v12034_v47  ;;  %v12038_v12 = vld [vmem:[#allocation93_spill] sm:$0xff]  ;;  %v12039_v34 = vld [vmem:[#allocation30_spill] sm:$0xff] }
 0x368   :  { %12033 = vst [vmem:[#allocation184_spill] sm:$0xff] %v8576_v36  ;;  %12037 = vst [vmem:[#allocation186_spill] sm:$0xff] %v8582_v28  ;;  %v8586_v39 = vmax.f32 %v12039_v34, %v12038_v12  ;;  %v12041_v41 = vld [vmem:[#allocation51_spill] sm:$0xff]  ;;  %v12042_v31 = vld [vmem:[#allocation128_spill] sm:$0xff] }
 0x369   :  { %12035 = vst [vmem:[#allocation185_spill] sm:$0xff] %v8579_v51  ;;  %v8589_v46 = vmul.f32 0.01, %v12041_v41  ;;  %v8592_v48 = vmul.f32 0.01, %v12042_v31  ;;  %v12044_v26 = vld [vmem:[#allocation129_spill] sm:$0xff] }
 0x36a   :  { %12040 = vst [vmem:[#allocation93_spill] sm:$0xff] %v8586_v39  ;;  %v8595_v43 = vmul.f32 0.01, %v12044_v26  ;;  %v12046_v18 = vld [vmem:[#allocation87_spill] sm:$0xff]  ;;  %v12049_v51 = vld [vmem:[#allocation130_spill] sm:$0xff]  ;;  %v12053_v34 = vld [vmem:[#allocation132_spill] sm:$0xff]  ;;  %v8612_v39 = vmax.f32 %v11857_v21, %v8220_v9 }
 0x36b   :  { %12043 = vst [vmem:[#allocation30_spill] sm:$0xff] %v8592_v48  ;;  %v12047_v35 = vld [vmem:[#allocation67_spill] sm:$0xff]  ;;  %v8602_v29 = vmul.f32 0.01, %v12049_v51  ;;  %v8608_v12 = vmul.f32 0.01, %v12053_v34 }
 0x36c   :  { %12045 = vst [vmem:[#allocation51_spill] sm:$0xff] %v8595_v43  ;;  %v8599_v47 = vmax.f32 %v12047_v35, %v12046_v18  ;;  %v12051_v28 = vld [vmem:[#allocation131_spill] sm:$0xff]  ;;  %12055 = vst [vmem:[#allocation189_spill] sm:$0xff] %v8612_v39  ;;  %v12056_v31 = vld [vmem:[#allocation133_spill] sm:$0xff] }
 0x36d   :  { %12050 = vst [vmem:[#allocation67_spill] sm:$0xff] %v8602_v29  ;;  %v8605_v36 = vmul.f32 0.01, %v12051_v28  ;;  %12054 = vst [vmem:[#allocation188_spill] sm:$0xff] %v8608_v12  ;;  %v8615_v26 = vmul.f32 0.01, %v12056_v31 }
 0x36e   :  { %12048 = vst [vmem:[#allocation87_spill] sm:$0xff] %v8599_v47  ;;  %v12058_v43 = vld [vmem:[#allocation134_spill] sm:$0xff]  ;;  %v12060_v18 = vld [vmem:[#allocation135_spill] sm:$0xff]  ;;  %v12063_v51 = vld [vmem:[#allocation76_spill] sm:$0xff] }
 0x36f   :  { %12052 = vst [vmem:[#allocation187_spill] sm:$0xff] %v8605_v36  ;;  %12057 = vst [vmem:[#allocation190_spill] sm:$0xff] %v8615_v26  ;;  %v8618_v48 = vmul.f32 0.01, %v12058_v43  ;;  %v8621_v35 = vmul.f32 0.01, %v12060_v18 }
 0x370   :  { %v12062_v47 = vld [vmem:[#allocation95_spill] sm:$0xff]  ;;  %v12065_v36 = vld [vmem:[#allocation136_spill] sm:$0xff]  ;;  %v12066_v12 = vld [vmem:[#allocation137_spill] sm:$0xff] }
 0x371   :  { %12059 = vst [vmem:[#allocation191_spill] sm:$0xff] %v8618_v48  ;;  %12061 = vst [vmem:[#allocation192_spill] sm:$0xff] %v8621_v35  ;;  %v8625_v28 = vmax.f32 %v12063_v51, %v12062_v47  ;;  %v8628_v34 = vmul.f32 0.01, %v12065_v36  ;;  %v8631_v29 = vmul.f32 0.01, %v12066_v12 }
 0x372   :  { %v12068_v21 = vld [vmem:[#allocation54_spill] sm:$0xff]  ;;  %v12070_v39 = vld [vmem:[#allocation109_spill] sm:$0xff]  ;;  %v12073_v48 = vld [vmem:[#allocation56_spill] sm:$0xff] }
 0x373   :  { %12064 = vst [vmem:[#allocation95_spill] sm:$0xff] %v8625_v28  ;;  %12067 = vst [vmem:[#allocation76_spill] sm:$0xff] %v8631_v29  ;;  %v8634_v9 = vmul.f32 0.01, %v12068_v21  ;;  %v12071_v31 = vld [vmem:[#allocation70_spill] sm:$0xff]  ;;  %v12074_v35 = vld [vmem:[#allocation53_spill] sm:$0xff]  ;;  %v8651_v28 = vmax.f32 %v11863_v50, %v8232_v45  ;;  %v8675_v45 = vmax.f32 %v11875_v1, %v8256_v0  ;;  %v8699_v0 = vmax.f32 %v11887_v3, %v8280_v11 }
 0x374   :  { %v8638_v43 = vmax.f32 %v12071_v31, %v12070_v39  ;;  %v8641_v18 = vmul.f32 0.01, %v12073_v48  ;;  %v8644_v26 = vmul.f32 0.01, %v12074_v35  ;;  %v12076_v51 = vld [vmem:[#allocation58_spill] sm:$0xff]  ;;  %v12079_v21 = vld [vmem:[#allocation80_spill] sm:$0xff]  ;;  %v8723_v11 = vmax.f32 %v11896_v42, %v8304_v2 }
 0x375   :  { %12069 = vst [vmem:[#allocation136_spill] sm:$0xff] %v8634_v9  ;;  %v8647_v47 = vmul.f32 0.01, %v12076_v51  ;;  %v12078_v12 = vld [vmem:[#allocation22_spill] sm:$0xff]  ;;  %v12081_v39 = vld [vmem:[#allocation84_spill] sm:$0xff]  ;;  %v8751_v2 = vmax.f32 %v7803_v10, %v8332_v38  ;;  %v8771_v38 = vmax.f32 %v7823_v52, %v8355_v17  ;;  %v12109_v10 = vld [vmem:[#allocation147_spill] sm:$0xff] }
 0x376   :  { %12072 = vst [vmem:[#allocation109_spill] sm:$0xff] %v8638_v43  ;;  %12075 = vst [vmem:[#allocation70_spill] sm:$0xff] %v8644_v26  ;;  %v8655_v9 = vmax.f32 %v12079_v21, %v12078_v12  ;;  %v12080_v29 = vld [vmem:[#allocation26_spill] sm:$0xff]  ;;  %v8663_v43 = vmax.f32 %v11869_v58, %v8244_v24  ;;  %v12086_v48 = vld [vmem:[#allocation88_spill] sm:$0xff]  ;;  %v8687_v24 = vmax.f32 %v11881_v57, %v8268_v37 }
 0x377   :  { %12077 = vst [vmem:[#allocation193_spill] sm:$0xff] %v8647_v47  ;;  %v8659_v31 = vmax.f32 %v12081_v39, %v12080_v29  ;;  %v12083_v35 = vld [vmem:[#allocation74_spill] sm:$0xff]  ;;  %v12089_v21 = vld [vmem:[#allocation111_spill] sm:$0xff]  ;;  %v8711_v37 = vmax.f32 %v11892_v7, %v8292_v5  ;;  %v8735_v5 = vmax.f32 %v7787_v62, %v8316_v32  ;;  %v12103_v32 = vld [vmem:[#allocation36_spill] sm:$0xff] }
 0x378   :  { %v12084_v26 = vld [vmem:[#allocation82_spill] sm:$0xff]  ;;  %v12090_v39 = vld [vmem:[#allocation139_spill] sm:$0xff]  ;;  %12108 = vst [vmem:[#allocation74_spill] sm:$0xff] %v8771_v38 }
 0x379   :  { %12082 = vst [vmem:[#allocation22_spill] sm:$0xff] %v8659_v31  ;;  %v8667_v51 = vmax.f32 %v12084_v26, %v12083_v35  ;;  %v12085_v47 = vld [vmem:[#allocation78_spill] sm:$0xff]  ;;  %v12091_v31 = vld [vmem:[#allocation113_spill] sm:$0xff]  ;;  %v12093_v35 = vld [vmem:[#allocation112_spill] sm:$0xff] }
 0x37a   :  { %v8671_v50 = vmax.f32 %v12086_v48, %v12085_v47  ;;  %v12088_v12 = vld [vmem:[#allocation90_spill] sm:$0xff]  ;;  %v8683_v58 = vmax.f32 %v12091_v31, %v12090_v39  ;;  %v12094_v47 = vld [vmem:[#allocation141_spill] sm:$0xff]  ;;  %v12098_v39 = vld [vmem:[#allocation108_spill] sm:$0xff] }
 0x37b   :  { %v8679_v29 = vmax.f32 %v12089_v21, %v12088_v12  ;;  %v12092_v26 = vld [vmem:[#allocation110_spill] sm:$0xff]  ;;  %v12096_v12 = vld [vmem:[#allocation116_spill] sm:$0xff]  ;;  %v8707_v57 = vmax.f32 %v12098_v39, %v8286_v44  ;;  %v8727_v44 = vmax.f32 %v7779_v59, %v8307_v16  ;;  %v8747_v59 = vmax.f32 %v7799_v4, %v8329_v53  ;;  %v12102_v16 = vld [vmem:[#allocation9_spill] sm:$0xff] }
 0x37c   :  { %12087 = vst [vmem:[#allocation80_spill] sm:$0xff] %v8671_v50  ;;  %v8691_v48 = vmax.f32 %v12093_v35, %v12092_v26  ;;  %v12095_v50 = vld [vmem:[#allocation114_spill] sm:$0xff]  ;;  %v12097_v21 = vld [vmem:[#allocation104_spill] sm:$0xff]  ;;  %v12099_v26 = vld [vmem:[#allocation5_spill] sm:$0xff]  ;;  %v8755_v62 = vmax.f32 %v12102_v16, %v8335_v20 }
 0x37d   :  { %v8695_v1 = vmax.f32 %v12095_v50, %v12094_v47  ;;  %v8703_v31 = vmax.f32 %v12097_v21, %v12096_v12  ;;  %v8715_v50 = vmax.f32 %v11893_v54, %v8295_v22  ;;  %v8719_v3 = vmax.f32 %v12099_v26, %v8298_v8  ;;  %v12100_v35 = vld [vmem:[#allocation4_spill] sm:$0xff]  ;;  %v12101_v22 = vld [vmem:[#allocation7_spill] sm:$0xff]  ;;  %v12105_v8 = vld [vmem:[#allocation145_spill] sm:$0xff] }
 0x37e   :  { %v8731_v7 = vmax.f32 %v12100_v35, %v8310_v60  ;;  %v8739_v54 = vmax.f32 %v7791_v14, %v8319_v25  ;;  %v8743_v42 = vmax.f32 %v12101_v22, %v8322_v27  ;;  %v8759_v14 = vmax.f32 %v7811_v15, %v8342_v6  ;;  %v12106_v60 = vld [vmem:[#allocation40_spill] sm:$0xff]  ;;  %v12110_v53 = vld [vmem:[#allocation34_spill] sm:$0xff]  ;;  %v12118_v21 = vld [vmem:[#allocation151_spill] sm:$0xff] }
 0x37f   :  { %v8763_v25 = vmax.f32 %v12103_v32, %v8345_v19  ;;  %v8767_v4 = vmax.f32 %v12106_v60, %v12105_v8  ;;  %v8775_v27 = vmax.f32 %v12110_v53, %v12109_v10  ;;  %v12112_v20 = vld [vmem:[#allocation148_spill] sm:$0xff]  ;;  %v12113_v47 = vld [vmem:[#allocation38_spill] sm:$0xff]  ;;  %v12119_v39 = vld [vmem:[#allocation47_spill] sm:$0xff] }
 0x380   :  { %v8779_v15 = vmax.f32 %v12113_v47, %v12112_v20  ;;  %v12115_v6 = vld [vmem:[#allocation150_spill] sm:$0xff]  ;;  %v12116_v12 = vld [vmem:[#allocation44_spill] sm:$0xff]  ;;  %v8787_v26 = vmax.f32 %v12119_v39, %v12118_v21  ;;  %v12125_v8 = vld [vmem:[#allocation155_spill] sm:$0xff] }
 0x381   :  { %12104 = vst [vmem:[#allocation26_spill] sm:$0xff] %v8763_v25  ;;  %12107 = vst [vmem:[#allocation84_spill] sm:$0xff] %v8767_v4  ;;  %v8783_v19 = vmax.f32 %v12116_v12, %v12115_v6  ;;  %v12120_v35 = vld [vmem:[#allocation152_spill] sm:$0xff]  ;;  %v12121_v22 = vld [vmem:[#allocation42_spill] sm:$0xff]  ;;  %v8807_v6 = vmax.f32 %v11921_v13, %v8394_v55 }
 0x382   :  { %12111 = vst [vmem:[#allocation82_spill] sm:$0xff] %v8775_v27  ;;  %12114 = vst [vmem:[#allocation78_spill] sm:$0xff] %v8779_v15  ;;  %v8791_v52 = vmax.f32 %v12121_v22, %v12120_v35  ;;  %v12122_v17 = vld [vmem:[#allocation154_spill] sm:$0xff]  ;;  %v12123_v16 = vld [vmem:[#allocation92_spill] sm:$0xff] }
 0x383   :  { %12117 = vst [vmem:[#allocation88_spill] sm:$0xff] %v8783_v19  ;;  %v8795_v32 = vmax.f32 %v12123_v16, %v12122_v17  ;;  %v12126_v60 = vld [vmem:[#allocation86_spill] sm:$0xff]  ;;  %v12128_v53 = vld [vmem:[#allocation156_spill] sm:$0xff]  ;;  %12131 = vst [vmem:[#allocation113_spill] sm:$0xff] %v8807_v6 }
 0x384   :  { %v8799_v10 = vmax.f32 %v12126_v60, %v12125_v8  ;;  %v12129_v20 = vld [vmem:[#allocation96_spill] sm:$0xff]  ;;  %v12132_v12 = vld [vmem:[#allocation97_spill] sm:$0xff]  ;;  %v12133_v21 = vld [vmem:[#allocation94_spill] sm:$0xff] }
 0x385   :  { %12124 = vst [vmem:[#allocation90_spill] sm:$0xff] %v8795_v32  ;;  %v8803_v47 = vmax.f32 %v12129_v20, %v12128_v53  ;;  %v8811_v39 = vmax.f32 %v12133_v21, %v12132_v12  ;;  %v12135_v35 = vld [vmem:[#allocation100_spill] sm:$0xff]  ;;  %v12136_v22 = vld [vmem:[#allocation98_spill] sm:$0xff]  ;;  %v12138_v16 = vld [vmem:[#allocation101_spill] sm:$0xff] }
 0x386   :  { %12127 = vst [vmem:[#allocation111_spill] sm:$0xff] %v8799_v10  ;;  %v8815_v17 = vmax.f32 %v12136_v22, %v12135_v35  ;;  %v12139_v32 = vld [vmem:[#allocation102_spill] sm:$0xff]  ;;  %v12141_v60 = vld [vmem:[#allocation157_spill] sm:$0xff]  ;;  %v12142_v10 = vld [vmem:[#allocation115_spill] sm:$0xff] }
 0x387   :  { %12130 = vst [vmem:[#allocation139_spill] sm:$0xff] %v8803_v47  ;;  %12134 = vst [vmem:[#allocation110_spill] sm:$0xff] %v8811_v39  ;;  %v8819_v8 = vmax.f32 %v12139_v32, %v12138_v16  ;;  %v8823_v53 = vmax.f32 %v12142_v10, %v12141_v60  ;;  %v12143_v20 = vld [vmem:[#allocation158_spill] sm:$0xff]  ;;  %v12146_v55 = vld [vmem:[#allocation160_spill] sm:$0xff]  ;;  %v8843_v10 = vmax.f32 %v11945_v56, %v8433_v49 }
 0x388   :  { %12137 = vst [vmem:[#allocation112_spill] sm:$0xff] %v8815_v17  ;;  %v12144_v47 = vld [vmem:[#allocation118_spill] sm:$0xff]  ;;  %v12147_v6 = vld [vmem:[#allocation120_spill] sm:$0xff]  ;;  %v12149_v21 = vld [vmem:[#allocation161_spill] sm:$0xff] }
 0x389   :  { %12140 = vst [vmem:[#allocation141_spill] sm:$0xff] %v8819_v8  ;;  %v8827_v13 = vmax.f32 %v12144_v47, %v12143_v20  ;;  %v8831_v12 = vmax.f32 %v12147_v6, %v12146_v55  ;;  %v12150_v39 = vld [vmem:[#allocation117_spill] sm:$0xff]  ;;  %v12152_v22 = vld [vmem:[#allocation162_spill] sm:$0xff]  ;;  %v12153_v17 = vld [vmem:[#allocation119_spill] sm:$0xff] }
 0x38a   :  { %v8835_v35 = vmax.f32 %v12150_v39, %v12149_v21  ;;  %v8839_v32 = vmax.f32 %v12153_v17, %v12152_v22  ;;  %12155 = vst [vmem:[#allocation5_spill] sm:$0xff] %v8843_v10  ;;  %v12156_v16 = vld [vmem:[#allocation99_spill] sm:$0xff]  ;;  %v12157_v60 = vld [vmem:[#allocation8_spill] sm:$0xff]  ;;  %v12159_v20 = vld [vmem:[#allocation6_spill] sm:$0xff] }
 0x38b   :  { %12145 = vst [vmem:[#allocation114_spill] sm:$0xff] %v8827_v13  ;;  %12148 = vst [vmem:[#allocation116_spill] sm:$0xff] %v8831_v12  ;;  %v8847_v47 = vmax.f32 %v12157_v60, %v12156_v16  ;;  %v12160_v13 = vld [vmem:[#allocation11_spill] sm:$0xff]  ;;  %v12162_v55 = vld [vmem:[#allocation105_spill] sm:$0xff] }
 0x38c   :  { %12151 = vst [vmem:[#allocation104_spill] sm:$0xff] %v8835_v35  ;;  %12154 = vst [vmem:[#allocation108_spill] sm:$0xff] %v8839_v32  ;;  %v8851_v6 = vmax.f32 %v12160_v13, %v12159_v20  ;;  %v12163_v12 = vld [vmem:[#allocation13_spill] sm:$0xff]  ;;  %v12165_v21 = vld [vmem:[#allocation163_spill] sm:$0xff] }
 0x38d   :  { %12158 = vst [vmem:[#allocation4_spill] sm:$0xff] %v8847_v47  ;;  %v8855_v39 = vmax.f32 %v12163_v12, %v12162_v55  ;;  %v12166_v35 = vld [vmem:[#allocation10_spill] sm:$0xff]  ;;  %v12167_v22 = vld [vmem:[#allocation164_spill] sm:$0xff]  ;;  %v12171_v10 = vld [vmem:[#allocation15_spill] sm:$0xff] }
 0x38e   :  { %12161 = vst [vmem:[#allocation7_spill] sm:$0xff] %v8851_v6  ;;  %v8859_v17 = vmax.f32 %v12166_v35, %v12165_v21  ;;  %v12168_v32 = vld [vmem:[#allocation12_spill] sm:$0xff]  ;;  %v12170_v49 = vld [vmem:[#allocation166_spill] sm:$0xff]  ;;  %v12173_v60 = vld [vmem:[#allocation167_spill] sm:$0xff]  ;;  %v8879_v35 = vmax.f32 %v11969_v30, %v8472_v61 }
 0x38f   :  { %12164 = vst [vmem:[#allocation9_spill] sm:$0xff] %v8855_v39  ;;  %v8863_v56 = vmax.f32 %v12168_v32, %v12167_v22  ;;  %v8867_v16 = vmax.f32 %v12171_v10, %v12170_v49  ;;  %v12174_v47 = vld [vmem:[#allocation17_spill] sm:$0xff]  ;;  %v12176_v20 = vld [vmem:[#allocation168_spill] sm:$0xff]  ;;  %v12177_v6 = vld [vmem:[#allocation14_spill] sm:$0xff] }
 0x390   :  { %v8871_v13 = vmax.f32 %v12174_v47, %v12173_v60  ;;  %v8875_v12 = vmax.f32 %v12177_v6, %v12176_v20  ;;  %12179 = vst [vmem:[#allocation34_spill] sm:$0xff] %v8879_v35  ;;  %v12180_v55 = vld [vmem:[#allocation103_spill] sm:$0xff]  ;;  %v12181_v21 = vld [vmem:[#allocation21_spill] sm:$0xff]  ;;  %v12183_v22 = vld [vmem:[#allocation16_spill] sm:$0xff] }
 0x391   :  { %12169 = vst [vmem:[#allocation36_spill] sm:$0xff] %v8863_v56  ;;  %12172 = vst [vmem:[#allocation145_spill] sm:$0xff] %v8867_v16  ;;  %v8883_v32 = vmax.f32 %v12181_v21, %v12180_v55  ;;  %v12184_v56 = vld [vmem:[#allocation25_spill] sm:$0xff]  ;;  %v12186_v49 = vld [vmem:[#allocation107_spill] sm:$0xff] }
 0x392   :  { %12175 = vst [vmem:[#allocation40_spill] sm:$0xff] %v8871_v13  ;;  %12178 = vst [vmem:[#allocation147_spill] sm:$0xff] %v8875_v12  ;;  %v8887_v10 = vmax.f32 %v12184_v56, %v12183_v22  ;;  %v12187_v16 = vld [vmem:[#allocation19_spill] sm:$0xff]  ;;  %v12189_v60 = vld [vmem:[#allocation169_spill] sm:$0xff] }
 0x393   :  { %12182 = vst [vmem:[#allocation148_spill] sm:$0xff] %v8883_v32  ;;  %v8891_v47 = vmax.f32 %v12187_v16, %v12186_v49  ;;  %v12190_v13 = vld [vmem:[#allocation23_spill] sm:$0xff]  ;;  %v12191_v20 = vld [vmem:[#allocation170_spill] sm:$0xff]  ;;  %v12192_v12 = vld [vmem:[#allocation29_spill] sm:$0xff] }
 0x394   :  { %12185 = vst [vmem:[#allocation38_spill] sm:$0xff] %v8887_v10  ;;  %v8895_v6 = vmax.f32 %v12190_v13, %v12189_v60  ;;  %v8899_v30 = vmax.f32 %v12192_v12, %v12191_v20  ;;  %v12194_v61 = vld [vmem:[#allocation172_spill] sm:$0xff]  ;;  %v12195_v35 = vld [vmem:[#allocation33_spill] sm:$0xff]  ;;  %v12198_v32 = vld [vmem:[#allocation27_spill] sm:$0xff]  ;;  %v8915_v13 = vmax.f32 %v11993_v33, %v8511_v23 }
 0x395   :  { %12188 = vst [vmem:[#allocation150_spill] sm:$0xff] %v8891_v47  ;;  %v8903_v55 = vmax.f32 %v12195_v35, %v12194_v61  ;;  %v12197_v21 = vld [vmem:[#allocation173_spill] sm:$0xff]  ;;  %v12200_v22 = vld [vmem:[#allocation174_spill] sm:$0xff]  ;;  %v12201_v10 = vld [vmem:[#allocation31_spill] sm:$0xff] }
 0x396   :  { %12193 = vst [vmem:[#allocation44_spill] sm:$0xff] %v8899_v30  ;;  %v8907_v56 = vmax.f32 %v12198_v32, %v12197_v21  ;;  %v8911_v16 = vmax.f32 %v12201_v10, %v12200_v22  ;;  %12203 = vst [vmem:[#allocation42_spill] sm:$0xff] %v8915_v13  ;;  %v12204_v49 = vld [vmem:[#allocation24_spill] sm:$0xff]  ;;  %v12205_v60 = vld [vmem:[#allocation41_spill] sm:$0xff] }
 0x397   :  { %12196 = vst [vmem:[#allocation151_spill] sm:$0xff] %v8903_v55  ;;  %v8919_v12 = vmax.f32 %v12205_v60, %v12204_v49  ;;  %v12207_v20 = vld [vmem:[#allocation37_spill] sm:$0xff]  ;;  %v12208_v30 = vld [vmem:[#allocation35_spill] sm:$0xff]  ;;  %v12210_v61 = vld [vmem:[#allocation18_spill] sm:$0xff] }
 0x398   :  { %12199 = vst [vmem:[#allocation47_spill] sm:$0xff] %v8907_v56  ;;  %12202 = vst [vmem:[#allocation152_spill] sm:$0xff] %v8911_v16  ;;  %v8923_v35 = vmax.f32 %v12208_v30, %v12207_v20  ;;  %v12211_v55 = vld [vmem:[#allocation39_spill] sm:$0xff]  ;;  %v12214_v56 = vld [vmem:[#allocation121_spill] sm:$0xff] }
 0x399   :  { %12206 = vst [vmem:[#allocation154_spill] sm:$0xff] %v8919_v12  ;;  %v8927_v32 = vmax.f32 %v12211_v55, %v12210_v61  ;;  %v12213_v21 = vld [vmem:[#allocation175_spill] sm:$0xff]  ;;  %v12215_v22 = vld [vmem:[#allocation176_spill] sm:$0xff]  ;;  %v12216_v16 = vld [vmem:[#allocation122_spill] sm:$0xff] }
 0x39a   :  { %12209 = vst [vmem:[#allocation92_spill] sm:$0xff] %v8923_v35  ;;  %v8931_v10 = vmax.f32 %v12214_v56, %v12213_v21  ;;  %v8935_v33 = vmax.f32 %v12216_v16, %v12215_v22  ;;  %v12218_v23 = vld [vmem:[#allocation178_spill] sm:$0xff]  ;;  %v12219_v13 = vld [vmem:[#allocation123_spill] sm:$0xff]  ;;  %v12222_v12 = vld [vmem:[#allocation124_spill] sm:$0xff]  ;;  %v8951_v56 = vmax.f32 %v12017_v40, %v8550_v63 }
 0x39b   :  { %12212 = vst [vmem:[#allocation155_spill] sm:$0xff] %v8927_v32  ;;  %v8939_v49 = vmax.f32 %v12219_v13, %v12218_v23  ;;  %v12221_v60 = vld [vmem:[#allocation179_spill] sm:$0xff]  ;;  %v12224_v20 = vld [vmem:[#allocation180_spill] sm:$0xff]  ;;  %v12225_v35 = vld [vmem:[#allocation125_spill] sm:$0xff] }
 0x39c   :  { %12217 = vst [vmem:[#allocation86_spill] sm:$0xff] %v8935_v33  ;;  %v8943_v30 = vmax.f32 %v12222_v12, %v12221_v60  ;;  %v8947_v55 = vmax.f32 %v12225_v35, %v12224_v20  ;;  %12227 = vst [vmem:[#allocation94_spill] sm:$0xff] %v8951_v56  ;;  %v12228_v61 = vld [vmem:[#allocation28_spill] sm:$0xff]  ;;  %v12229_v21 = vld [vmem:[#allocation45_spill] sm:$0xff] }
 0x39d   :  { %12220 = vst [vmem:[#allocation156_spill] sm:$0xff] %v8939_v49  ;;  %v8955_v16 = vmax.f32 %v12229_v21, %v12228_v61  ;;  %v12231_v22 = vld [vmem:[#allocation126_spill] sm:$0xff]  ;;  %v12232_v33 = vld [vmem:[#allocation48_spill] sm:$0xff]  ;;  %v12235_v49 = vld [vmem:[#allocation43_spill] sm:$0xff] }
 0x39e   :  { %12223 = vst [vmem:[#allocation96_spill] sm:$0xff] %v8943_v30  ;;  %12226 = vst [vmem:[#allocation97_spill] sm:$0xff] %v8947_v55  ;;  %v8959_v13 = vmax.f32 %v12232_v33, %v12231_v22  ;;  %v12234_v23 = vld [vmem:[#allocation32_spill] sm:$0xff]  ;;  %v12237_v60 = vld [vmem:[#allocation181_spill] sm:$0xff] }
 0x39f   :  { %12230 = vst [vmem:[#allocation100_spill] sm:$0xff] %v8955_v16  ;;  %v8963_v12 = vmax.f32 %v12235_v49, %v12234_v23  ;;  %v12238_v30 = vld [vmem:[#allocation127_spill] sm:$0xff]  ;;  %v12239_v20 = vld [vmem:[#allocation182_spill] sm:$0xff]  ;;  %v12242_v63 = vld [vmem:[#allocation184_spill] sm:$0xff] }
 0x3a0   :  { %12233 = vst [vmem:[#allocation98_spill] sm:$0xff] %v8959_v13  ;;  %v8967_v35 = vmax.f32 %v12238_v30, %v12237_v60  ;;  %v12240_v55 = vld [vmem:[#allocation46_spill] sm:$0xff]  ;;  %v12245_v21 = vld [vmem:[#allocation185_spill] sm:$0xff]  ;;  %v12246_v16 = vld [vmem:[#allocation52_spill] sm:$0xff]  ;;  %v8987_v30 = vmax.f32 %v12041_v41, %v8589_v46 }
 0x3a1   :  { %12236 = vst [vmem:[#allocation101_spill] sm:$0xff] %v8963_v12  ;;  %v8971_v40 = vmax.f32 %v12240_v55, %v12239_v20  ;;  %v12243_v56 = vld [vmem:[#allocation50_spill] sm:$0xff]  ;;  %v8979_v33 = vmax.f32 %v12246_v16, %v12245_v21  ;;  %v12249_v13 = vld [vmem:[#allocation49_spill] sm:$0xff]  ;;  %v12253_v60 = vld [vmem:[#allocation128_spill] sm:$0xff] }
 0x3a2   :  { %v8975_v61 = vmax.f32 %v12243_v56, %v12242_v63  ;;  %v12248_v22 = vld [vmem:[#allocation186_spill] sm:$0xff]  ;;  %12251 = vst [vmem:[#allocation118_spill] sm:$0xff] %v8987_v30  ;;  %v12255_v20 = vld [vmem:[#allocation51_spill] sm:$0xff]  ;;  %v12267_v30 = vld [vmem:[#allocation133_spill] sm:$0xff] }
 0x3a3   :  { %12241 = vst [vmem:[#allocation102_spill] sm:$0xff] %v8971_v40  ;;  %12247 = vst [vmem:[#allocation115_spill] sm:$0xff] %v8979_v33  ;;  %v8983_v49 = vmax.f32 %v12249_v13, %v12248_v22  ;;  %v12252_v23 = vld [vmem:[#allocation30_spill] sm:$0xff]  ;;  %v12256_v40 = vld [vmem:[#allocation129_spill] sm:$0xff] }
 0x3a4   :  { %12244 = vst [vmem:[#allocation157_spill] sm:$0xff] %v8975_v61  ;;  %v8991_v55 = vmax.f32 %v12253_v60, %v12252_v23  ;;  %v8995_v56 = vmax.f32 %v12256_v40, %v12255_v20  ;;  %v12258_v63 = vld [vmem:[#allocation67_spill] sm:$0xff]  ;;  %v12259_v61 = vld [vmem:[#allocation130_spill] sm:$0xff]  ;;  %v12263_v22 = vld [vmem:[#allocation188_spill] sm:$0xff] }
 0x3a5   :  { %12250 = vst [vmem:[#allocation158_spill] sm:$0xff] %v8983_v49  ;;  %v8999_v16 = vmax.f32 %v12259_v61, %v12258_v63  ;;  %v12261_v21 = vld [vmem:[#allocation187_spill] sm:$0xff]  ;;  %v12264_v49 = vld [vmem:[#allocation132_spill] sm:$0xff]  ;;  %v12266_v46 = vld [vmem:[#allocation190_spill] sm:$0xff] }
 0x3a6   :  { %12254 = vst [vmem:[#allocation160_spill] sm:$0xff] %v8991_v55  ;;  %12257 = vst [vmem:[#allocation120_spill] sm:$0xff] %v8995_v56  ;;  %v12262_v33 = vld [vmem:[#allocation131_spill] sm:$0xff]  ;;  %v9007_v41 = vmax.f32 %v12264_v49, %v12263_v22  ;;  %v9011_v23 = vmax.f32 %v12267_v30, %v12266_v46  ;;  %v12270_v55 = vld [vmem:[#allocation134_spill] sm:$0xff] }
 0x3a7   :  { %12260 = vst [vmem:[#allocation161_spill] sm:$0xff] %v8999_v16  ;;  %v9003_v13 = vmax.f32 %v12262_v33, %v12261_v21  ;;  %v12269_v60 = vld [vmem:[#allocation191_spill] sm:$0xff]  ;;  %v12272_v20 = vld [vmem:[#allocation192_spill] sm:$0xff]  ;;  %v9023_v33 = vmax.f32 %v12065_v36, %v8628_v34  ;;  %v12276_v21 = vld [vmem:[#allocation137_spill] sm:$0xff] }
 0x3a8   :  { %12265 = vst [vmem:[#allocation117_spill] sm:$0xff] %v9007_v41  ;;  %12268 = vst [vmem:[#allocation162_spill] sm:$0xff] %v9011_v23  ;;  %v9015_v40 = vmax.f32 %v12270_v55, %v12269_v60  ;;  %v12273_v56 = vld [vmem:[#allocation135_spill] sm:$0xff]  ;;  %v12275_v63 = vld [vmem:[#allocation76_spill] sm:$0xff] }
 0x3a9   :  { %v9019_v61 = vmax.f32 %v12273_v56, %v12272_v20  ;;  %v9027_v49 = vmax.f32 %v12276_v21, %v12275_v63  ;;  %v12278_v22 = vld [vmem:[#allocation136_spill] sm:$0xff]  ;;  %v12279_v41 = vld [vmem:[#allocation54_spill] sm:$0xff]  ;;  %v12285_v20 = vld [vmem:[#allocation193_spill] sm:$0xff] }
 0x3aa   :  { %12271 = vst [vmem:[#allocation119_spill] sm:$0xff] %v9015_v40  ;;  %v9031_v30 = vmax.f32 %v12279_v41, %v12278_v22  ;;  %v12281_v46 = vld [vmem:[#allocation56_spill] sm:$0xff]  ;;  %v12282_v60 = vld [vmem:[#allocation70_spill] sm:$0xff]  ;;  %v12283_v40 = vld [vmem:[#allocation53_spill] sm:$0xff] }
 0x3ab   :  { %12274 = vst [vmem:[#allocation99_spill] sm:$0xff] %v9019_v61  ;;  %12277 = vst [vmem:[#allocation8_spill] sm:$0xff] %v9027_v49  ;;  %v9035_v55 = vmax.f32 %v12281_v46, %v8641_v18  ;;  %v9039_v56 = vmax.f32 %v12283_v40, %v12282_v60  ;;  %v12286_v61 = vld [vmem:[#allocation58_spill] sm:$0xff]  ;;  %v12325_v60 = vld [vmem:[#allocation79_spill] sm:$0xff]  ;;  %v12379_v12 = vmov %v9027_v49 }
 0x3ac   :  { %12280 = vst [vmem:[#allocation6_spill] sm:$0xff] %v9031_v30  ;;  %v9043_v36 = vmax.f32 %v12286_v61, %v12285_v20  ;;  %v12326_v61 = vld [vmem:[#allocation83_spill] sm:$0xff]  ;;  %v12328_v34 = vld [vmem:[#allocation93_spill] sm:$0xff]  ;;  %v12334_v41 = vld [vmem:[#allocation80_spill] sm:$0xff] }
 0x3ad   :  { %12284 = vst [vmem:[#allocation11_spill] sm:$0xff] %v9039_v56  ;;  %v12329_v21 = vld [vmem:[#allocation87_spill] sm:$0xff]  ;;  %v12332_v46 = vld [vmem:[#allocation109_spill] sm:$0xff]  ;;  %v12341_v25 = vld [vmem:[#allocation114_spill] sm:$0xff]  ;;  %v4133_v56 = vpack.c.bf16 %v9023_v33, %v9023_v33  ;;  %v12611_v33 = vpack.c.bf16 %v9035_v55, %v9035_v55 }
 0x3ae   :  { %12287 = vst [vmem:[#allocation105_spill] sm:$0xff] %v9043_v36  ;;  %v12331_v30 = vld [vmem:[#allocation95_spill] sm:$0xff]  ;;  %v12333_v36 = vld [vmem:[#allocation22_spill] sm:$0xff]  ;;  %v12348_v4 = vld [vmem:[#allocation36_spill] sm:$0xff] }
 0x3af   :  { %v12355_v38 = vld [vmem:[#allocation44_spill] sm:$0xff]  ;;  %v12362_v27 = vld [vmem:[#allocation86_spill] sm:$0xff]  ;;  %v12371_v8 = vld [vmem:[#allocation115_spill] sm:$0xff]  ;;  %3693 = vst.msk [vmem:[%s10345_s4 + $0x228] sm:$0xf] %vm3554_vm1, %v4133_v56 }
 0x3b0   :  { %v12369_v15 = vld [vmem:[#allocation102_spill] sm:$0xff]  ;;  %v12374_v32 = vld [vmem:[#allocation160_spill] sm:$0xff]  ;;  %v12385_v20 = vld [vmem:[#allocation55_spill] sm:$0xff]  ;;  %3696 = vst.msk [vmem:[%s10345_s4 + $0x234] sm:$0xf] %vm3554_vm1, %v12611_v33 }
 0x3b1   :  { %v12377_v39 = vld [vmem:[#allocation119_spill] sm:$0xff]  ;;  %v12383_v40 = vld [vmem:[#allocation60_spill] sm:$0xff]  ;;  %v12386_v63 = vpack.c.bf16 %v12385_v20, %v12385_v20  ;;  %v12387_v22 = vld [vmem:[#allocation57_spill] sm:$0xff] }
 0x3b2   :  { %v12384_v47 = vpack.c.bf16 %v12383_v40, %v12383_v40  ;;  %v12388_v18 = vpack.c.bf16 %v12387_v22, %v12387_v22  ;;  %v12389_v40 = vld [vmem:[#allocation59_spill] sm:$0xff] }
 0x3b3   :  { %v12380_v16 = vld [vmem:[#allocation6_spill] sm:$0xff]  ;;  %3556 = vst.msk [vmem:[%s10345_s4 + $0x4] sm:$0xf] %vm3554_vm1, %v12386_v63  ;;  %v12390_v49 = vpack.c.bf16 %v12389_v40, %v12389_v40  ;;  %v12393_v63 = vld [vmem:[#allocation64_spill] sm:$0xff] }
 0x3b4   :  { %v12381_v19 = vld [vmem:[#allocation11_spill] sm:$0xff]  ;;  %3555 = vst.msk [vmem:[%s10345_s4] sm:$0xf] %vm3554_vm1, %v12384_v47  ;;  %3557 = vst.msk [vmem:[%s10345_s4 + $0x8] sm:$0xf] %vm3554_vm1, %v12388_v18  ;;  %v12391_v47 = vld [vmem:[#allocation62_spill] sm:$0xff]  ;;  %v12394_v22 = vpack.c.bf16 %v12393_v63, %v12393_v63 }
 0x3b5   :  { %v12382_v23 = vld [vmem:[#allocation105_spill] sm:$0xff]  ;;  %3558 = vst.msk [vmem:[%s10345_s4 + $0xc] sm:$0xf] %vm3554_vm1, %v12390_v49  ;;  %v12392_v20 = vpack.c.bf16 %v12391_v47, %v12391_v47  ;;  %v12395_v18 = vld [vmem:[#allocation66_spill] sm:$0xff]  ;;  %v12397_v49 = vld [vmem:[#allocation68_spill] sm:$0xff] }
 0x3b6   :  { %3560 = vst.msk [vmem:[%s10345_s4 + $0x14] sm:$0xf] %vm3554_vm1, %v12394_v22  ;;  %v12396_v40 = vpack.c.bf16 %v12395_v18, %v12395_v18  ;;  %v12398_v47 = vpack.c.bf16 %v12397_v49, %v12397_v49  ;;  %v12401_v22 = vld [vmem:[#allocation85_spill] sm:$0xff] }
 0x3b7   :  { %3559 = vst.msk [vmem:[%s10345_s4 + $0x10] sm:$0xf] %vm3554_vm1, %v12392_v20  ;;  %v12399_v20 = vld [vmem:[#allocation71_spill] sm:$0xff]  ;;  %v12402_v18 = vpack.c.bf16 %v12401_v22, %v12401_v22 }
 0x3b8   :  { %3561 = vst.msk [vmem:[%s10345_s4 + $0x18] sm:$0xf] %vm3554_vm1, %v12396_v40  ;;  %3562 = vst.msk [vmem:[%s10345_s4 + $0x1c] sm:$0xf] %vm3554_vm1, %v12398_v47  ;;  %v12400_v63 = vpack.c.bf16 %v12399_v20, %v12399_v20  ;;  %v12403_v40 = vld [vmem:[#allocation89_spill] sm:$0xff]  ;;  %v12405_v47 = vld [vmem:[#allocation91_spill] sm:$0xff] }
 0x3b9   :  { %3564 = vst.msk [vmem:[%s10345_s4 + $0x24] sm:$0xf] %vm3554_vm1, %v12402_v18  ;;  %v12404_v49 = vpack.c.bf16 %v12403_v40, %v12403_v40  ;;  %v12406_v20 = vpack.c.bf16 %v12405_v47, %v12405_v47  ;;  %v12409_v18 = vld [vmem:[#allocation72_spill] sm:$0xff] }
 0x3ba   :  { %3563 = vst.msk [vmem:[%s10345_s4 + $0x20] sm:$0xf] %vm3554_vm1, %v12400_v63  ;;  %v12407_v63 = vld [vmem:[#allocation20_spill] sm:$0xff]  ;;  %v12410_v40 = vpack.c.bf16 %v12409_v18, %v12409_v18 }
 0x3bb   :  { %3565 = vst.msk [vmem:[%s10345_s4 + $0x28] sm:$0xf] %vm3554_vm1, %v12404_v49  ;;  %3566 = vst.msk [vmem:[%s10345_s4 + $0x2c] sm:$0xf] %vm3554_vm1, %v12406_v20  ;;  %v12408_v22 = vpack.c.bf16 %v12407_v63, %v12407_v63  ;;  %v12411_v49 = vld [vmem:[#allocation138_spill] sm:$0xff]  ;;  %v12413_v20 = vld [vmem:[#allocation140_spill] sm:$0xff] }
 0x3bc   :  { %3568 = vst.msk [vmem:[%s10345_s4 + $0x34] sm:$0xf] %vm3554_vm1, %v12410_v40  ;;  %v12412_v47 = vpack.c.bf16 %v12411_v49, %v12411_v49  ;;  %v12414_v63 = vpack.c.bf16 %v12413_v20, %v12413_v20  ;;  %v12417_v40 = vld [vmem:[#allocation143_spill] sm:$0xff] }
 0x3bd   :  { %3567 = vst.msk [vmem:[%s10345_s4 + $0x30] sm:$0xf] %vm3554_vm1, %v12408_v22  ;;  %v12415_v22 = vld [vmem:[#allocation142_spill] sm:$0xff]  ;;  %v12418_v49 = vpack.c.bf16 %v12417_v40, %v12417_v40 }
 0x3be   :  { %3569 = vst.msk [vmem:[%s10345_s4 + $0x38] sm:$0xf] %vm3554_vm1, %v12412_v47  ;;  %3570 = vst.msk [vmem:[%s10345_s4 + $0x3c] sm:$0xf] %vm3554_vm1, %v12414_v63  ;;  %v12416_v18 = vpack.c.bf16 %v12415_v22, %v12415_v22  ;;  %v12419_v47 = vld [vmem:[#allocation106_spill] sm:$0xff]  ;;  %v12421_v63 = vld [vmem:[#allocation3_spill] sm:$0xff] }
 0x3bf   :  { %3572 = vst.msk [vmem:[%s10345_s4 + $0x44] sm:$0xf] %vm3554_vm1, %v12418_v49  ;;  %v12420_v20 = vpack.c.bf16 %v12419_v47, %v12419_v47  ;;  %v12422_v22 = vpack.c.bf16 %v12421_v63, %v12421_v63  ;;  %v12425_v49 = vld [vmem:[#allocation144_spill] sm:$0xff] }
 0x3c0   :  { %3571 = vst.msk [vmem:[%s10345_s4 + $0x40] sm:$0xf] %vm3554_vm1, %v12416_v18  ;;  %v12423_v18 = vld [vmem:[#allocation2_spill] sm:$0xff]  ;;  %v12426_v47 = vpack.c.bf16 %v12425_v49, %v12425_v49 }
 0x3c1   :  { %3573 = vst.msk [vmem:[%s10345_s4 + $0x48] sm:$0xf] %vm3554_vm1, %v12420_v20  ;;  %3574 = vst.msk [vmem:[%s10345_s4 + $0x4c] sm:$0xf] %vm3554_vm1, %v12422_v22  ;;  %v12424_v40 = vpack.c.bf16 %v12423_v18, %v12423_v18  ;;  %v12427_v20 = vld [vmem:[#allocation146_spill] sm:$0xff]  ;;  %v12429_v22 = vld [vmem:[#allocation149_spill] sm:$0xff] }
 0x3c2   :  { %3576 = vst.msk [vmem:[%s10345_s4 + $0x54] sm:$0xf] %vm3554_vm1, %v12426_v47  ;;  %v12428_v63 = vpack.c.bf16 %v12427_v20, %v12427_v20  ;;  %v12430_v18 = vpack.c.bf16 %v12429_v22, %v12429_v22  ;;  %v12433_v47 = vld [vmem:[#allocation61_spill] sm:$0xff] }
 0x3c3   :  { %3575 = vst.msk [vmem:[%s10345_s4 + $0x50] sm:$0xf] %vm3554_vm1, %v12424_v40  ;;  %v12431_v40 = vld [vmem:[#allocation153_spill] sm:$0xff]  ;;  %v12434_v20 = vpack.c.bf16 %v12433_v47, %v12433_v47 }
 0x3c4   :  { %3577 = vst.msk [vmem:[%s10345_s4 + $0x58] sm:$0xf] %vm3554_vm1, %v12428_v63  ;;  %3578 = vst.msk [vmem:[%s10345_s4 + $0x5c] sm:$0xf] %vm3554_vm1, %v12430_v18  ;;  %v12432_v49 = vpack.c.bf16 %v12431_v40, %v12431_v40  ;;  %v12435_v63 = vld [vmem:[#allocation63_spill] sm:$0xff] }
 0x3c5   :  { %3580 = vst.msk [vmem:[%s10345_s4 + $0x64] sm:$0xf] %vm3554_vm1, %v12434_v20  ;;  %v12436_v22 = vpack.c.bf16 %v12435_v63, %v12435_v63  ;;  %v12437_v18 = vld [vmem:[#allocation159_spill] sm:$0xff]  ;;  %v12441_v20 = vld [vmem:[#allocation65_spill] sm:$0xff] }
 0x3c6   :  { %3579 = vst.msk [vmem:[%s10345_s4 + $0x60] sm:$0xf] %vm3554_vm1, %v12432_v49  ;;  %v12438_v40 = vpack.c.bf16 %v12437_v18, %v12437_v18  ;;  %v12439_v49 = vld [vmem:[#allocation69_spill] sm:$0xff]  ;;  %v12442_v63 = vpack.c.bf16 %v12441_v20, %v12441_v20 }
 0x3c7   :  { %3581 = vst.msk [vmem:[%s10345_s4 + $0x68] sm:$0xf] %vm3554_vm1, %v12436_v22  ;;  %v12440_v47 = vpack.c.bf16 %v12439_v49, %v12439_v49  ;;  %v12443_v22 = vld [vmem:[#allocation165_spill] sm:$0xff] }
 0x3c8   :  { %3582 = vst.msk [vmem:[%s10345_s4 + $0x6c] sm:$0xf] %vm3554_vm1, %v12438_v40  ;;  %3584 = vst.msk [vmem:[%s10345_s4 + $0x74] sm:$0xf] %vm3554_vm1, %v12442_v63  ;;  %v12444_v18 = vpack.c.bf16 %v12443_v22, %v12443_v22  ;;  %v12445_v40 = vld [vmem:[#allocation73_spill] sm:$0xff]  ;;  %v12449_v63 = vld [vmem:[#allocation171_spill] sm:$0xff] }
 0x3c9   :  { %3583 = vst.msk [vmem:[%s10345_s4 + $0x70] sm:$0xf] %vm3554_vm1, %v12440_v47  ;;  %v12446_v49 = vpack.c.bf16 %v12445_v40, %v12445_v40  ;;  %v12447_v47 = vld [vmem:[#allocation77_spill] sm:$0xff]  ;;  %v12450_v22 = vpack.c.bf16 %v12449_v63, %v12449_v63 }
 0x3ca   :  { %3585 = vst.msk [vmem:[%s10345_s4 + $0x78] sm:$0xf] %vm3554_vm1, %v12444_v18  ;;  %v12448_v20 = vpack.c.bf16 %v12447_v47, %v12447_v47  ;;  %v12451_v18 = vld [vmem:[#allocation75_spill] sm:$0xff] }
 0x3cb   :  { %3586 = vst.msk [vmem:[%s10345_s4 + $0x7c] sm:$0xf] %vm3554_vm1, %v12446_v49  ;;  %3588 = vst.msk [vmem:[%s10345_s4 + $0x84] sm:$0xf] %vm3554_vm1, %v12450_v22  ;;  %v12452_v40 = vpack.c.bf16 %v12451_v18, %v12451_v18  ;;  %v12453_v49 = vld [vmem:[#allocation81_spill] sm:$0xff]  ;;  %v12457_v22 = vpack.c.bf16 %v12325_v60, %v12325_v60  ;;  %v12458_v18 = vpack.c.bf16 %v12326_v61, %v12326_v61 }
 0x3cc   :  { %3587 = vst.msk [vmem:[%s10345_s4 + $0x80] sm:$0xf] %vm3554_vm1, %v12448_v20  ;;  %v12454_v47 = vpack.c.bf16 %v12453_v49, %v12453_v49  ;;  %v12455_v20 = vld [vmem:[#allocation177_spill] sm:$0xff]  ;;  %v12461_v60 = vpack.c.bf16 %v12328_v34, %v12328_v34  ;;  %v12462_v61 = vpack.c.bf16 %v12329_v21, %v12329_v21  ;;  %v12465_v34 = vpack.c.bf16 %v12331_v30, %v12331_v30 }
 0x3cd   :  { %3589 = vst.msk [vmem:[%s10345_s4 + $0x88] sm:$0xf] %vm3554_vm1, %v12452_v40  ;;  %v12456_v63 = vpack.c.bf16 %v12455_v20, %v12455_v20  ;;  %3592 = vst.msk [vmem:[%s10345_s4 + $0x94] sm:$0xf] %vm3554_vm1, %v12457_v22  ;;  %v12459_v40 = vld [vmem:[#allocation183_spill] sm:$0xff]  ;;  %v12466_v21 = vpack.c.bf16 %v12332_v46, %v12332_v46  ;;  %v12468_v30 = vpack.c.bf16 %v8655_v9, %v8655_v9 }
 0x3ce   :  { %3590 = vst.msk [vmem:[%s10345_s4 + $0x8c] sm:$0xf] %vm3554_vm1, %v12454_v47  ;;  %3593 = vst.msk [vmem:[%s10345_s4 + $0x98] sm:$0xf] %vm3554_vm1, %v12458_v18  ;;  %v12460_v49 = vpack.c.bf16 %v12459_v40, %v12459_v40  ;;  %v12463_v47 = vld [vmem:[#allocation189_spill] sm:$0xff]  ;;  %v12469_v46 = vpack.c.bf16 %v12333_v36, %v12333_v36  ;;  %v12471_v9 = vpack.c.bf16 %v8667_v51, %v8667_v51 }
 0x3cf   :  { %3591 = vst.msk [vmem:[%s10345_s4 + $0x90] sm:$0xf] %vm3554_vm1, %v12456_v63  ;;  %3595 = vst.msk [vmem:[%s10345_s4 + $0xa0] sm:$0xf] %vm3554_vm1, %v12461_v60  ;;  %v12464_v20 = vpack.c.bf16 %v12463_v47, %v12463_v47  ;;  %v12467_v63 = vpack.c.bf16 %v8651_v28, %v8651_v28  ;;  %v12470_v28 = vpack.c.bf16 %v8663_v43, %v8663_v43 }
 0x3d0   :  { %3594 = vst.msk [vmem:[%s10345_s4 + $0x9c] sm:$0xf] %vm3554_vm1, %v12460_v49  ;;  %3596 = vst.msk [vmem:[%s10345_s4 + $0xa4] sm:$0xf] %vm3554_vm1, %v12462_v61  ;;  %v12472_v36 = vpack.c.bf16 %v12334_v41, %v12334_v41  ;;  %v12473_v43 = vpack.c.bf16 %v8675_v45, %v8675_v45  ;;  %v12474_v51 = vpack.c.bf16 %v8679_v29, %v8679_v29  ;;  %v12501_v49 = vld [vmem:[#allocation82_spill] sm:$0xff] }
 0x3d1   :  { %3597 = vst.msk [vmem:[%s10345_s4 + $0xa8] sm:$0xf] %vm3554_vm1, %v12464_v20  ;;  %3598 = vst.msk [vmem:[%s10345_s4 + $0xac] sm:$0xf] %vm3554_vm1, %v12465_v34  ;;  %v12475_v41 = vpack.c.bf16 %v8683_v58, %v8683_v58  ;;  %v12476_v45 = vpack.c.bf16 %v8687_v24, %v8687_v24  ;;  %v12477_v29 = vpack.c.bf16 %v8691_v48, %v8691_v48  ;;  %v12503_v61 = vld [vmem:[#allocation78_spill] sm:$0xff]  ;;  %v12505_v20 = vld [vmem:[#allocation88_spill] sm:$0xff] }
 0x3d2   :  { %3599 = vst.msk [vmem:[%s10345_s4 + $0xb0] sm:$0xf] %vm3554_vm1, %v12466_v21  ;;  %3600 = vst.msk [vmem:[%s10345_s4 + $0xb4] sm:$0xf] %vm3554_vm1, %v12467_v63  ;;  %v12478_v58 = vpack.c.bf16 %v8695_v1, %v8695_v1  ;;  %v12479_v24 = vpack.c.bf16 %v8699_v0, %v8699_v0  ;;  %v12480_v48 = vpack.c.bf16 %v8703_v31, %v8703_v31 }
 0x3d3   :  { %3601 = vst.msk [vmem:[%s10345_s4 + $0xb8] sm:$0xf] %vm3554_vm1, %v12468_v30  ;;  %3602 = vst.msk [vmem:[%s10345_s4 + $0xbc] sm:$0xf] %vm3554_vm1, %v12469_v46  ;;  %v12481_v1 = vpack.c.bf16 %v8707_v57, %v8707_v57  ;;  %v12482_v0 = vpack.c.bf16 %v8711_v37, %v8711_v37  ;;  %v12483_v31 = vpack.c.bf16 %v8715_v50, %v8715_v50  ;;  %v12509_v30 = vld [vmem:[#allocation90_spill] sm:$0xff] }
 0x3d4   :  { %3603 = vst.msk [vmem:[%s10345_s4 + $0xc0] sm:$0xf] %vm3554_vm1, %v12470_v28  ;;  %3604 = vst.msk [vmem:[%s10345_s4 + $0xc4] sm:$0xf] %vm3554_vm1, %v12471_v9  ;;  %v12484_v57 = vpack.c.bf16 %v8719_v3, %v8719_v3  ;;  %v12485_v37 = vpack.c.bf16 %v8723_v11, %v8723_v11  ;;  %v12486_v50 = vpack.c.bf16 %v8727_v44, %v8727_v44 }
 0x3d5   :  { %3605 = vst.msk [vmem:[%s10345_s4 + $0xc8] sm:$0xf] %vm3554_vm1, %v12472_v36  ;;  %3606 = vst.msk [vmem:[%s10345_s4 + $0xcc] sm:$0xf] %vm3554_vm1, %v12473_v43  ;;  %v12487_v3 = vpack.c.bf16 %v8731_v7, %v8731_v7  ;;  %v12488_v11 = vpack.c.bf16 %v8735_v5, %v8735_v5  ;;  %v12489_v44 = vpack.c.bf16 %v8739_v54, %v8739_v54  ;;  %v12515_v36 = vld [vmem:[#allocation113_spill] sm:$0xff] }
 0x3d6   :  { %3607 = vst.msk [vmem:[%s10345_s4 + $0xd0] sm:$0xf] %vm3554_vm1, %v12474_v51  ;;  %3608 = vst.msk [vmem:[%s10345_s4 + $0xd4] sm:$0xf] %vm3554_vm1, %v12475_v41  ;;  %v12490_v7 = vpack.c.bf16 %v8743_v42, %v8743_v42  ;;  %v12491_v5 = vpack.c.bf16 %v8747_v59, %v8747_v59  ;;  %v12492_v54 = vpack.c.bf16 %v8751_v2, %v8751_v2  ;;  %v12495_v2 = vld [vmem:[#allocation26_spill] sm:$0xff] }
 0x3d7   :  { %3609 = vst.msk [vmem:[%s10345_s4 + $0xd8] sm:$0xf] %vm3554_vm1, %v12476_v45  ;;  %3610 = vst.msk [vmem:[%s10345_s4 + $0xdc] sm:$0xf] %vm3554_vm1, %v12477_v29  ;;  %v12493_v42 = vpack.c.bf16 %v8755_v62, %v8755_v62  ;;  %v12494_v59 = vpack.c.bf16 %v8759_v14, %v8759_v14  ;;  %v12496_v22 = vpack.c.bf16 %v12495_v2, %v12495_v2  ;;  %v12497_v62 = vld [vmem:[#allocation84_spill] sm:$0xff]  ;;  %v12499_v14 = vld [vmem:[#allocation74_spill] sm:$0xff] }
 0x3d8   :  { %3611 = vst.msk [vmem:[%s10345_s4 + $0xe0] sm:$0xf] %vm3554_vm1, %v12478_v58  ;;  %3612 = vst.msk [vmem:[%s10345_s4 + $0xe4] sm:$0xf] %vm3554_vm1, %v12479_v24  ;;  %v12498_v18 = vpack.c.bf16 %v12497_v62, %v12497_v62  ;;  %v12500_v40 = vpack.c.bf16 %v12499_v14, %v12499_v14  ;;  %v12502_v60 = vpack.c.bf16 %v12501_v49, %v12501_v49  ;;  %v12517_v51 = vld [vmem:[#allocation110_spill] sm:$0xff]  ;;  %v12519_v45 = vld [vmem:[#allocation112_spill] sm:$0xff] }
 0x3d9   :  { %3613 = vst.msk [vmem:[%s10345_s4 + $0xe8] sm:$0xf] %vm3554_vm1, %v12480_v48  ;;  %3614 = vst.msk [vmem:[%s10345_s4 + $0xec] sm:$0xf] %vm3554_vm1, %v12481_v1  ;;  %v12504_v47 = vpack.c.bf16 %v12503_v61, %v12503_v61  ;;  %v12506_v34 = vpack.c.bf16 %v12505_v20, %v12505_v20  ;;  %v12507_v21 = vpack.c.bf16 %v8787_v26, %v8787_v26  ;;  %v12511_v26 = vld [vmem:[#allocation111_spill] sm:$0xff]  ;;  %v12521_v58 = vld [vmem:[#allocation141_spill] sm:$0xff] }
 0x3da   :  { %3615 = vst.msk [vmem:[%s10345_s4 + $0xf0] sm:$0xf] %vm3554_vm1, %v12482_v0  ;;  %3616 = vst.msk [vmem:[%s10345_s4 + $0xf4] sm:$0xf] %vm3554_vm1, %v12483_v31  ;;  %v12508_v63 = vpack.c.bf16 %v8791_v52, %v8791_v52  ;;  %v12510_v46 = vpack.c.bf16 %v12509_v30, %v12509_v30  ;;  %v12512_v28 = vpack.c.bf16 %v12511_v26, %v12511_v26  ;;  %v12513_v52 = vld [vmem:[#allocation139_spill] sm:$0xff]  ;;  %v12525_v0 = vld [vmem:[#allocation116_spill] sm:$0xff] }
 0x3db   :  { %3617 = vst.msk [vmem:[%s10345_s4 + $0xf8] sm:$0xf] %vm3554_vm1, %v12484_v57  ;;  %3618 = vst.msk [vmem:[%s10345_s4 + $0xfc] sm:$0xf] %vm3554_vm1, %v12485_v37  ;;  %v12514_v9 = vpack.c.bf16 %v12513_v52, %v12513_v52  ;;  %v12516_v43 = vpack.c.bf16 %v12515_v36, %v12515_v36  ;;  %v12518_v41 = vpack.c.bf16 %v12517_v51, %v12517_v51 }
 0x3dc   :  { %3619 = vst.msk [vmem:[%s10345_s4 + $0x100] sm:$0xf] %vm3554_vm1, %v12486_v50  ;;  %3620 = vst.msk [vmem:[%s10345_s4 + $0x104] sm:$0xf] %vm3554_vm1, %v12487_v3  ;;  %v12520_v29 = vpack.c.bf16 %v12519_v45, %v12519_v45  ;;  %v12522_v24 = vpack.c.bf16 %v12521_v58, %v12521_v58  ;;  %v12523_v48 = vpack.c.bf16 %v8823_v53, %v8823_v53  ;;  %v12527_v53 = vld [vmem:[#allocation104_spill] sm:$0xff]  ;;  %v12531_v50 = vld [vmem:[#allocation5_spill] sm:$0xff] }
 0x3dd   :  { %3621 = vst.msk [vmem:[%s10345_s4 + $0x108] sm:$0xf] %vm3554_vm1, %v12488_v11  ;;  %3622 = vst.msk [vmem:[%s10345_s4 + $0x10c] sm:$0xf] %vm3554_vm1, %v12489_v44  ;;  %v12524_v1 = vpack.c.bf16 %v12341_v25, %v12341_v25  ;;  %v12526_v31 = vpack.c.bf16 %v12525_v0, %v12525_v0  ;;  %v12528_v57 = vpack.c.bf16 %v12527_v53, %v12527_v53  ;;  %v12529_v25 = vld [vmem:[#allocation108_spill] sm:$0xff] }
 0x3de   :  { %3623 = vst.msk [vmem:[%s10345_s4 + $0x110] sm:$0xf] %vm3554_vm1, %v12490_v7  ;;  %3624 = vst.msk [vmem:[%s10345_s4 + $0x114] sm:$0xf] %vm3554_vm1, %v12491_v5  ;;  %v12530_v37 = vpack.c.bf16 %v12529_v25, %v12529_v25  ;;  %v12532_v3 = vpack.c.bf16 %v12531_v50, %v12531_v50  ;;  %v12533_v11 = vld [vmem:[#allocation4_spill] sm:$0xff]  ;;  %v12535_v7 = vld [vmem:[#allocation7_spill] sm:$0xff]  ;;  %v12540_v2 = vpack.c.bf16 %v12348_v4, %v12348_v4 }
 0x3df   :  { %3625 = vst.msk [vmem:[%s10345_s4 + $0x118] sm:$0xf] %vm3554_vm1, %v12492_v54  ;;  %3626 = vst.msk [vmem:[%s10345_s4 + $0x11c] sm:$0xf] %vm3554_vm1, %v12493_v42  ;;  %v12534_v44 = vpack.c.bf16 %v12533_v11, %v12533_v11  ;;  %v12536_v5 = vpack.c.bf16 %v12535_v7, %v12535_v7  ;;  %v12537_v54 = vld [vmem:[#allocation9_spill] sm:$0xff]  ;;  %v12545_v4 = vld [vmem:[#allocation147_spill] sm:$0xff]  ;;  %v12556_v30 = vpack.c.bf16 %v12355_v38, %v12355_v38 }
 0x3e0   :  { %3627 = vst.msk [vmem:[%s10345_s4 + $0x120] sm:$0xf] %vm3554_vm1, %v12494_v59  ;;  %3628 = vst.msk [vmem:[%s10345_s4 + $0x124] sm:$0xf] %vm3554_vm1, %v12496_v22  ;;  %v12538_v42 = vpack.c.bf16 %v12537_v54, %v12537_v54  ;;  %v12539_v59 = vpack.c.bf16 %v8859_v17, %v8859_v17  ;;  %v12541_v22 = vld [vmem:[#allocation145_spill] sm:$0xff]  ;;  %v12543_v17 = vld [vmem:[#allocation40_spill] sm:$0xff]  ;;  %v12546_v14 = vpack.c.bf16 %v12545_v4, %v12545_v4 }
 0x3e1   :  { %3629 = vst.msk [vmem:[%s10345_s4 + $0x128] sm:$0xf] %vm3554_vm1, %v12498_v18  ;;  %3630 = vst.msk [vmem:[%s10345_s4 + $0x12c] sm:$0xf] %vm3554_vm1, %v12500_v40  ;;  %v12542_v62 = vpack.c.bf16 %v12541_v22, %v12541_v22  ;;  %v12544_v18 = vpack.c.bf16 %v12543_v17, %v12543_v17  ;;  %v12547_v40 = vld [vmem:[#allocation34_spill] sm:$0xff]  ;;  %v12561_v38 = vld [vmem:[#allocation152_spill] sm:$0xff]  ;;  %v12588_v54 = vpack.c.bf16 %v12369_v15, %v12369_v15 }
 0x3e2   :  { %3631 = vst.msk [vmem:[%s10345_s4 + $0x130] sm:$0xf] %vm3554_vm1, %v12502_v60  ;;  %3632 = vst.msk [vmem:[%s10345_s4 + $0x134] sm:$0xf] %vm3554_vm1, %v12504_v47  ;;  %v12548_v49 = vpack.c.bf16 %v12547_v40, %v12547_v40  ;;  %v12549_v60 = vld [vmem:[#allocation148_spill] sm:$0xff]  ;;  %v12551_v47 = vld [vmem:[#allocation38_spill] sm:$0xff]  ;;  %v12562_v52 = vpack.c.bf16 %v12561_v38, %v12561_v38 }
 0x3e3   :  { %3633 = vst.msk [vmem:[%s10345_s4 + $0x138] sm:$0xf] %vm3554_vm1, %v12506_v34  ;;  %3634 = vst.msk [vmem:[%s10345_s4 + $0x13c] sm:$0xf] %vm3554_vm1, %v12507_v21  ;;  %v12550_v61 = vpack.c.bf16 %v12549_v60, %v12549_v60  ;;  %v12552_v20 = vpack.c.bf16 %v12551_v47, %v12551_v47  ;;  %v12553_v34 = vld [vmem:[#allocation150_spill] sm:$0xff]  ;;  %v12597_v17 = vld [vmem:[#allocation120_spill] sm:$0xff] }
 0x3e4   :  { %3635 = vst.msk [vmem:[%s10345_s4 + $0x140] sm:$0xf] %vm3554_vm1, %v12508_v63  ;;  %3636 = vst.msk [vmem:[%s10345_s4 + $0x144] sm:$0xf] %vm3554_vm1, %v12510_v46  ;;  %v12554_v21 = vpack.c.bf16 %v12553_v34, %v12553_v34  ;;  %v12555_v63 = vpack.c.bf16 %v8895_v6, %v8895_v6  ;;  %v12557_v46 = vld [vmem:[#allocation151_spill] sm:$0xff]  ;;  %v12592_v15 = vld [vmem:[#allocation158_spill] sm:$0xff]  ;;  %v12610_v34 = vpack.c.bf16 %v12380_v16, %v12380_v16 }
 0x3e5   :  { %3637 = vst.msk [vmem:[%s10345_s4 + $0x148] sm:$0xf] %vm3554_vm1, %v12512_v28  ;;  %3638 = vst.msk [vmem:[%s10345_s4 + $0x14c] sm:$0xf] %vm3554_vm1, %v12514_v9  ;;  %v12558_v26 = vpack.c.bf16 %v12557_v46, %v12557_v46  ;;  %v12559_v6 = vld [vmem:[#allocation47_spill] sm:$0xff]  ;;  %v12563_v9 = vld [vmem:[#allocation42_spill] sm:$0xff]  ;;  %v12613_v16 = vpack.c.bf16 %v12382_v23, %v12382_v23 }
 0x3e6   :  { %3639 = vst.msk [vmem:[%s10345_s4 + $0x150] sm:$0xf] %vm3554_vm1, %v12516_v43  ;;  %3640 = vst.msk [vmem:[%s10345_s4 + $0x154] sm:$0xf] %vm3554_vm1, %v12518_v41  ;;  %v12560_v28 = vpack.c.bf16 %v12559_v6, %v12559_v6  ;;  %v12564_v36 = vpack.c.bf16 %v12563_v9, %v12563_v9  ;;  %v12565_v43 = vld [vmem:[#allocation154_spill] sm:$0xff]  ;;  %v12567_v41 = vld [vmem:[#allocation92_spill] sm:$0xff] }
 0x3e7   :  { %3641 = vst.msk [vmem:[%s10345_s4 + $0x158] sm:$0xf] %vm3554_vm1, %v12520_v29  ;;  %3642 = vst.msk [vmem:[%s10345_s4 + $0x15c] sm:$0xf] %vm3554_vm1, %v12522_v24  ;;  %v12566_v51 = vpack.c.bf16 %v12565_v43, %v12565_v43  ;;  %v12568_v45 = vpack.c.bf16 %v12567_v41, %v12567_v41  ;;  %v12569_v29 = vld [vmem:[#allocation155_spill] sm:$0xff]  ;;  %v12571_v24 = vpack.c.bf16 %v8931_v10, %v8931_v10  ;;  %v12575_v10 = vld [vmem:[#allocation96_spill] sm:$0xff] }
 0x3e8   :  { %3643 = vst.msk [vmem:[%s10345_s4 + $0x160] sm:$0xf] %vm3554_vm1, %v12523_v48  ;;  %3644 = vst.msk [vmem:[%s10345_s4 + $0x164] sm:$0xf] %vm3554_vm1, %v12524_v1  ;;  %v12570_v58 = vpack.c.bf16 %v12569_v29, %v12569_v29  ;;  %v12572_v48 = vpack.c.bf16 %v12362_v27, %v12362_v27  ;;  %v12573_v1 = vld [vmem:[#allocation156_spill] sm:$0xff]  ;;  %v12577_v27 = vld [vmem:[#allocation97_spill] sm:$0xff] }
 0x3e9   :  { %3645 = vst.msk [vmem:[%s10345_s4 + $0x168] sm:$0xf] %vm3554_vm1, %v12526_v31  ;;  %3646 = vst.msk [vmem:[%s10345_s4 + $0x16c] sm:$0xf] %vm3554_vm1, %v12528_v57  ;;  %v12574_v0 = vpack.c.bf16 %v12573_v1, %v12573_v1  ;;  %v12576_v31 = vpack.c.bf16 %v12575_v10, %v12575_v10  ;;  %v12578_v53 = vpack.c.bf16 %v12577_v27, %v12577_v27  ;;  %v12579_v57 = vld [vmem:[#allocation94_spill] sm:$0xff]  ;;  %v12599_v4 = vld [vmem:[#allocation161_spill] sm:$0xff] }
 0x3ea   :  { %3647 = vst.msk [vmem:[%s10345_s4 + $0x170] sm:$0xf] %vm3554_vm1, %v12530_v37  ;;  %3648 = vst.msk [vmem:[%s10345_s4 + $0x174] sm:$0xf] %vm3554_vm1, %v12532_v3  ;;  %v12580_v25 = vpack.c.bf16 %v12579_v57, %v12579_v57  ;;  %v12581_v37 = vld [vmem:[#allocation100_spill] sm:$0xff]  ;;  %v12583_v3 = vld [vmem:[#allocation98_spill] sm:$0xff] }
 0x3eb   :  { %3649 = vst.msk [vmem:[%s10345_s4 + $0x178] sm:$0xf] %vm3554_vm1, %v12534_v44  ;;  %3650 = vst.msk [vmem:[%s10345_s4 + $0x17c] sm:$0xf] %vm3554_vm1, %v12536_v5  ;;  %v12582_v50 = vpack.c.bf16 %v12581_v37, %v12581_v37  ;;  %v12584_v11 = vpack.c.bf16 %v12583_v3, %v12583_v3  ;;  %v12585_v44 = vld [vmem:[#allocation101_spill] sm:$0xff]  ;;  %v12587_v5 = vpack.c.bf16 %v8967_v35, %v8967_v35  ;;  %v12594_v22 = vld [vmem:[#allocation118_spill] sm:$0xff] }
 0x3ec   :  { %3651 = vst.msk [vmem:[%s10345_s4 + $0x180] sm:$0xf] %vm3554_vm1, %v12538_v42  ;;  %3652 = vst.msk [vmem:[%s10345_s4 + $0x184] sm:$0xf] %vm3554_vm1, %v12539_v59  ;;  %v12586_v7 = vpack.c.bf16 %v12585_v44, %v12585_v44  ;;  %v12589_v42 = vld [vmem:[#allocation157_spill] sm:$0xff]  ;;  %v12591_v35 = vpack.c.bf16 %v12371_v8, %v12371_v8  ;;  %v12596_v8 = vpack.c.bf16 %v12374_v32, %v12374_v32  ;;  %v12604_v60 = vld [vmem:[#allocation162_spill] sm:$0xff] }
 0x3ed   :  { %3653 = vst.msk [vmem:[%s10345_s4 + $0x188] sm:$0xf] %vm3554_vm1, %v12540_v2  ;;  %3654 = vst.msk [vmem:[%s10345_s4 + $0x18c] sm:$0xf] %vm3554_vm1, %v12542_v62  ;;  %v12590_v59 = vpack.c.bf16 %v12589_v42, %v12589_v42  ;;  %v12593_v2 = vpack.c.bf16 %v12592_v15, %v12592_v15  ;;  %v12595_v62 = vpack.c.bf16 %v12594_v22, %v12594_v22  ;;  %v12602_v40 = vld [vmem:[#allocation117_spill] sm:$0xff]  ;;  %v12607_v47 = vld [vmem:[#allocation99_spill] sm:$0xff] }
 0x3ee   :  { %3655 = vst.msk [vmem:[%s10345_s4 + $0x190] sm:$0xf] %vm3554_vm1, %v12544_v18  ;;  %3656 = vst.msk [vmem:[%s10345_s4 + $0x194] sm:$0xf] %vm3554_vm1, %v12546_v14  ;;  %v12598_v18 = vpack.c.bf16 %v12597_v17, %v12597_v17  ;;  %v12600_v14 = vpack.c.bf16 %v12599_v4, %v12599_v4  ;;  %v12601_v32 = vpack.c.bf16 %v9003_v13, %v9003_v13 }
 0x3ef   :  { %3657 = vst.msk [vmem:[%s10345_s4 + $0x198] sm:$0xf] %vm3554_vm1, %v12548_v49  ;;  %3658 = vst.msk [vmem:[%s10345_s4 + $0x19c] sm:$0xf] %vm3554_vm1, %v12550_v61  ;;  %v12603_v49 = vpack.c.bf16 %v12602_v40, %v12602_v40  ;;  %v12605_v61 = vpack.c.bf16 %v12604_v60, %v12604_v60  ;;  %v12606_v13 = vpack.c.bf16 %v12377_v39, %v12377_v39 }
 0x3f0   :  { %3659 = vst.msk [vmem:[%s10345_s4 + $0x1a0] sm:$0xf] %vm3554_vm1, %v12552_v20  ;;  %3660 = vst.msk [vmem:[%s10345_s4 + $0x1a4] sm:$0xf] %vm3554_vm1, %v12554_v21  ;;  %v12608_v20 = vpack.c.bf16 %v12607_v47, %v12607_v47  ;;  %v12609_v39 = vpack.c.bf16 %v12379_v12, %v12379_v12  ;;  %v12612_v12 = vpack.c.bf16 %v12381_v19, %v12381_v19 }
 0x3f1   :  { %3661 = vst.msk [vmem:[%s10345_s4 + $0x1a8] sm:$0xf] %vm3554_vm1, %v12555_v63  ;;  %3662 = vst.msk [vmem:[%s10345_s4 + $0x1ac] sm:$0xf] %vm3554_vm1, %v12556_v30 }
 0x3f2   :  { %3663 = vst.msk [vmem:[%s10345_s4 + $0x1b0] sm:$0xf] %vm3554_vm1, %v12558_v26  ;;  %3664 = vst.msk [vmem:[%s10345_s4 + $0x1b4] sm:$0xf] %vm3554_vm1, %v12560_v28 }
 0x3f3   :  { %3665 = vst.msk [vmem:[%s10345_s4 + $0x1b8] sm:$0xf] %vm3554_vm1, %v12562_v52  ;;  %3666 = vst.msk [vmem:[%s10345_s4 + $0x1bc] sm:$0xf] %vm3554_vm1, %v12564_v36 }
 0x3f4   :  { %3667 = vst.msk [vmem:[%s10345_s4 + $0x1c0] sm:$0xf] %vm3554_vm1, %v12566_v51  ;;  %3668 = vst.msk [vmem:[%s10345_s4 + $0x1c4] sm:$0xf] %vm3554_vm1, %v12568_v45 }
 0x3f5   :  { %3669 = vst.msk [vmem:[%s10345_s4 + $0x1c8] sm:$0xf] %vm3554_vm1, %v12570_v58  ;;  %3670 = vst.msk [vmem:[%s10345_s4 + $0x1cc] sm:$0xf] %vm3554_vm1, %v12571_v24 }
 0x3f6   :  { %3671 = vst.msk [vmem:[%s10345_s4 + $0x1d0] sm:$0xf] %vm3554_vm1, %v12572_v48  ;;  %3672 = vst.msk [vmem:[%s10345_s4 + $0x1d4] sm:$0xf] %vm3554_vm1, %v12574_v0 }
 0x3f7   :  { %3673 = vst.msk [vmem:[%s10345_s4 + $0x1d8] sm:$0xf] %vm3554_vm1, %v12576_v31  ;;  %3674 = vst.msk [vmem:[%s10345_s4 + $0x1dc] sm:$0xf] %vm3554_vm1, %v12578_v53 }
 0x3f8   :  { %3675 = vst.msk [vmem:[%s10345_s4 + $0x1e0] sm:$0xf] %vm3554_vm1, %v12580_v25  ;;  %3676 = vst.msk [vmem:[%s10345_s4 + $0x1e4] sm:$0xf] %vm3554_vm1, %v12582_v50 }
 0x3f9   :  { %3677 = vst.msk [vmem:[%s10345_s4 + $0x1e8] sm:$0xf] %vm3554_vm1, %v12584_v11  ;;  %3678 = vst.msk [vmem:[%s10345_s4 + $0x1ec] sm:$0xf] %vm3554_vm1, %v12586_v7 }
 0x3fa   :  { %3679 = vst.msk [vmem:[%s10345_s4 + $0x1f0] sm:$0xf] %vm3554_vm1, %v12587_v5  ;;  %3680 = vst.msk [vmem:[%s10345_s4 + $0x1f4] sm:$0xf] %vm3554_vm1, %v12588_v54 }
 0x3fb   :  { %3681 = vst.msk [vmem:[%s10345_s4 + $0x1f8] sm:$0xf] %vm3554_vm1, %v12590_v59  ;;  %3682 = vst.msk [vmem:[%s10345_s4 + $0x1fc] sm:$0xf] %vm3554_vm1, %v12591_v35 }
 0x3fc   :  { %3683 = vst.msk [vmem:[%s10345_s4 + $0x200] sm:$0xf] %vm3554_vm1, %v12593_v2  ;;  %3684 = vst.msk [vmem:[%s10345_s4 + $0x204] sm:$0xf] %vm3554_vm1, %v12595_v62 }
 0x3fd   :  { %3685 = vst.msk [vmem:[%s10345_s4 + $0x208] sm:$0xf] %vm3554_vm1, %v12596_v8  ;;  %3686 = vst.msk [vmem:[%s10345_s4 + $0x20c] sm:$0xf] %vm3554_vm1, %v12598_v18 }
 0x3fe   :  { %3687 = vst.msk [vmem:[%s10345_s4 + $0x210] sm:$0xf] %vm3554_vm1, %v12600_v14  ;;  %3688 = vst.msk [vmem:[%s10345_s4 + $0x214] sm:$0xf] %vm3554_vm1, %v12601_v32 }
 0x3ff   :  { %3689 = vst.msk [vmem:[%s10345_s4 + $0x218] sm:$0xf] %vm3554_vm1, %v12603_v49  ;;  %3690 = vst.msk [vmem:[%s10345_s4 + $0x21c] sm:$0xf] %vm3554_vm1, %v12605_v61 }
 0x400   :  { %3691 = vst.msk [vmem:[%s10345_s4 + $0x220] sm:$0xf] %vm3554_vm1, %v12606_v13  ;;  %3692 = vst.msk [vmem:[%s10345_s4 + $0x224] sm:$0xf] %vm3554_vm1, %v12608_v20 }
 0x401   :  { %3694 = vst.msk [vmem:[%s10345_s4 + $0x22c] sm:$0xf] %vm3554_vm1, %v12609_v39  ;;  %3695 = vst.msk [vmem:[%s10345_s4 + $0x230] sm:$0xf] %vm3554_vm1, %v12610_v34 }
 0x402   :  { %3697 = vst.msk [vmem:[%s10345_s4 + $0x238] sm:$0xf] %vm3554_vm1, %v12612_v12  ;;  %3698 = vst.msk [vmem:[%s10345_s4 + $0x23c] sm:$0xf] %vm3554_vm1, %v12613_v16 }

// kernel: encoder_forward.4
= control target key start
LH: loop header
LB: loop body
LE: loop exit
PB: predicated region body
PF: predicated region fallthrough
CT: control target
= control target key end

     0   :  { %vm982_vm0 = vcmask 523264   ;;  %vm1491_vm1 = vcmask 519168   ;;  %s2955_s1 = inlined_call_operand.vmem [shape: bf16[512,64], index: 1, kind: input, shape index: {}]   ;;  %s2956_s0 = inlined_call_operand.vmem [shape: bf16[256,512], index: 0, kind: input, shape index: {}]   ;;  %s2957_s2 = inlined_call_operand.vmem [shape: f32[1,64], index: 2, kind: input, shape index: {}]   ;;  %s2958_s3 = inlined_call_operand.vmem [shape: f32[1,64], index: 3, kind: input, shape index: {}]   ;;  %s2959_s4 = inlined_call_operand.vmem [shape: bf16[256,64], index: 4, kind: output, shape index: {}]  }
   0x1   :  { %v1914_v0 = vld [vmem:[%s2955_s1 + $0x40] sm:$0xff]   ;;  %v1918_v4 = vld [vmem:[%s2955_s1 + $0x48] sm:$0xff]   ;;  %v1922_v8 = vld [vmem:[%s2955_s1 + $0x50] sm:$0xff]  }
   0x2   :  { %v1915_v1 = vld [vmem:[%s2955_s1 + $0xc0] sm:$0xff]   ;;  %1690 = vmatprep.subr.bf16.mxu0 %v1914_v0  ;;  %v1919_v5 = vld [vmem:[%s2955_s1 + $0xc8] sm:$0xff]   ;;  %v1923_v9 = vld [vmem:[%s2955_s1 + $0xd0] sm:$0xff]  }
   0x3   :  { %v1916_v2 = vld [vmem:[%s2955_s1] sm:$0xff]   ;;  %1802 = vmatprep.subr.bf16.mxu1 %v1915_v1  ;;  %v1920_v6 = vld [vmem:[%s2955_s1 + $0x8] sm:$0xff]   ;;  %v1924_v10 = vld [vmem:[%s2955_s1 + $0x10] sm:$0xff]  }
   0x4   :  { %v1917_v3 = vld [vmem:[%s2955_s1 + $0x80] sm:$0xff]   ;;  %1691 = vmatpush3.bf16.msra.mxu0 %v1916_v2  ;;  %v1921_v7 = vld [vmem:[%s2955_s1 + $0x88] sm:$0xff]   ;;  %v1925_v11 = vld [vmem:[%s2955_s1 + $0x90] sm:$0xff]  }
   0x5   :  { %1803 = vmatpush3.bf16.msra.mxu1 %v1917_v3  ;;  %1692 = vmatprep.subr.bf16.mxu0 %v1918_v4  ;;  %v1926_v12 = vld [vmem:[%s2955_s1 + $0x58] sm:$0xff]   ;;  %v1930_v16 = vld [vmem:[%s2955_s1 + $0x60] sm:$0xff]   ;;  %v1934_v20 = vld [vmem:[%s2955_s1 + $0x68] sm:$0xff]  }
   0x6   :  { %1804 = vmatprep.subr.bf16.mxu1 %v1919_v5  ;;  %v1927_v13 = vld [vmem:[%s2955_s1 + $0xd8] sm:$0xff]   ;;  %v1931_v17 = vld [vmem:[%s2955_s1 + $0xe0] sm:$0xff]   ;;  %v1935_v21 = vld [vmem:[%s2955_s1 + $0xe8] sm:$0xff]  }
   0x7   :  { %v1928_v14 = vld [vmem:[%s2955_s1 + $0x18] sm:$0xff]   ;;  %v1932_v18 = vld [vmem:[%s2955_s1 + $0x20] sm:$0xff]   ;;  %v1936_v22 = vld [vmem:[%s2955_s1 + $0x28] sm:$0xff]  }
   0x8   :  { %1693 = vmatpush3.bf16.msra.mxu0 %v1920_v6  ;;  %v1929_v15 = vld [vmem:[%s2955_s1 + $0x98] sm:$0xff]   ;;  %v1933_v19 = vld [vmem:[%s2955_s1 + $0xa0] sm:$0xff]   ;;  %v1937_v23 = vld [vmem:[%s2955_s1 + $0xa8] sm:$0xff]  }
   0x9   :  { %1805 = vmatpush3.bf16.msra.mxu1 %v1921_v7  ;;  %1694 = vmatprep.subr.bf16.mxu0 %v1922_v8  ;;  %v1938_v24 = vld [vmem:[%s2955_s1 + $0x70] sm:$0xff]   ;;  %v1942_v28 = vld [vmem:[%s2955_s1 + $0x78] sm:$0xff]  }
   0xa   :  { %1806 = vmatprep.subr.bf16.mxu1 %v1923_v9  ;;  %v1939_v25 = vld [vmem:[%s2955_s1 + $0xf0] sm:$0xff]   ;;  %v1943_v29 = vld [vmem:[%s2955_s1 + $0xf8] sm:$0xff]  }
   0xb   :  { %v1940_v26 = vld [vmem:[%s2955_s1 + $0x30] sm:$0xff]   ;;  %v1944_v30 = vld [vmem:[%s2955_s1 + $0x38] sm:$0xff]  }
   0xc   :  { %1695 = vmatpush3.bf16.msra.mxu0 %v1924_v10  ;;  %v1941_v27 = vld [vmem:[%s2955_s1 + $0xb0] sm:$0xff]   ;;  %v1945_v31 = vld [vmem:[%s2955_s1 + $0xb8] sm:$0xff]  }
   0xd   :  { %1807 = vmatpush3.bf16.msra.mxu1 %v1925_v11  ;;  %1696 = vmatprep.subr.bf16.mxu0 %v1926_v12  ;;  %v1946_v32 = vld [vmem:[%s2956_s0] ss:$16 sps:$4 sm:$0xff]   ;;  %v1948_v33 = vld [vmem:[%s2956_s0 + $0x4] ss:$16 sps:$4 sm:$0xff]   ;;  %v1949_v34 = vld [vmem:[%s2956_s0 + $0x8] ss:$16 sps:$4 sm:$0xff]  }
   0xe   :  { %1808 = vmatprep.subr.bf16.mxu1 %v1927_v13  ;;  %v1951_v35 = vld [vmem:[%s2956_s0 + $0xc] ss:$16 sps:$4 sm:$0xff]   ;;  %690 = vmatprep.mubr.bf16.mxu0 %v1948_v33  ;;  %v1952_v36 = vld [vmem:[%s2956_s0 + $0x24] ss:$16 sps:$4 sm:$0xff]   ;;  %v1956_v38 = vld [vmem:[%s2956_s0 + $0x20] ss:$16 sps:$4 sm:$0xff]  }
   0xf   :  { %851 = vmatprep.mubr.bf16.mxu1 %v1951_v35  ;;  %v1954_v37 = vld [vmem:[%s2956_s0 + $0x2c] ss:$16 sps:$4 sm:$0xff]   ;;  %v1957_v39 = vld [vmem:[%s2956_s0 + $0x28] ss:$16 sps:$4 sm:$0xff]   ;;  %v1958_v40 = vld [vmem:[%s2956_s0 + $0x44] ss:$16 sps:$4 sm:$0xff]  }
  0x10   :  { %1697 = vmatpush3.bf16.msra.mxu0 %v1928_v14  ;;  %v1960_v41 = vld [vmem:[%s2956_s0 + $0x4c] ss:$16 sps:$4 sm:$0xff]   ;;  %v1962_v42 = vld [vmem:[%s2956_s0 + $0x40] ss:$16 sps:$4 sm:$0xff]   ;;  %v1963_v43 = vld [vmem:[%s2956_s0 + $0x48] ss:$16 sps:$4 sm:$0xff]  }
  0x11   :  { %1809 = vmatpush3.bf16.msra.mxu1 %v1929_v15  ;;  %1698 = vmatprep.subr.bf16.mxu0 %v1930_v16  ;;  %v1964_v44 = vld [vmem:[%s2956_s0 + $0x64] ss:$16 sps:$4 sm:$0xff]   ;;  %v1966_v45 = vld [vmem:[%s2956_s0 + $0x6c] ss:$16 sps:$4 sm:$0xff]   ;;  %v1968_v46 = vld [vmem:[%s2956_s0 + $0x60] ss:$16 sps:$4 sm:$0xff]  }
  0x12   :  { %1810 = vmatprep.subr.bf16.mxu1 %v1931_v17  ;;  %v1969_v47 = vld [vmem:[%s2956_s0 + $0x68] ss:$16 sps:$4 sm:$0xff]   ;;  %v1970_v48 = vld [vmem:[%s2956_s0 + $0x84] ss:$16 sps:$4 sm:$0xff]   ;;  %v1972_v49 = vld [vmem:[%s2956_s0 + $0x8c] ss:$16 sps:$4 sm:$0xff]  }
  0x13   :  { %v1974_v50 = vld [vmem:[%s2956_s0 + $0x80] ss:$16 sps:$4 sm:$0xff]   ;;  %v1975_v51 = vld [vmem:[%s2956_s0 + $0x88] ss:$16 sps:$4 sm:$0xff]   ;;  %v1976_v52 = vld [vmem:[%s2956_s0 + $0xa4] ss:$16 sps:$4 sm:$0xff]  }
  0x14   :  { %1699 = vmatpush3.bf16.msra.mxu0 %v1932_v18  ;;  %v1978_v53 = vld [vmem:[%s2956_s0 + $0xac] ss:$16 sps:$4 sm:$0xff]   ;;  %v1980_v54 = vld [vmem:[%s2956_s0 + $0xa0] ss:$16 sps:$4 sm:$0xff]   ;;  %v1981_v55 = vld [vmem:[%s2956_s0 + $0xa8] ss:$16 sps:$4 sm:$0xff]  }
  0x15   :  { %1811 = vmatpush3.bf16.msra.mxu1 %v1933_v19  ;;  %1700 = vmatprep.subr.bf16.mxu0 %v1934_v20  ;;  %v1982_v56 = vld [vmem:[%s2956_s0 + $0xc4] ss:$16 sps:$4 sm:$0xff]   ;;  %v1984_v57 = vld [vmem:[%s2956_s0 + $0xcc] ss:$16 sps:$4 sm:$0xff]   ;;  %v1986_v58 = vld [vmem:[%s2956_s0 + $0xc0] ss:$16 sps:$4 sm:$0xff]  }
  0x16   :  { %1812 = vmatprep.subr.bf16.mxu1 %v1935_v21  ;;  %v1987_v59 = vld [vmem:[%s2956_s0 + $0xc8] ss:$16 sps:$4 sm:$0xff]   ;;  %v1988_v60 = vld [vmem:[%s2956_s0 + $0xe4] ss:$16 sps:$4 sm:$0xff]   ;;  %v1990_v61 = vld [vmem:[%s2956_s0 + $0xec] ss:$16 sps:$4 sm:$0xff]  }
  0x17   :  { %v1992_v62 = vld [vmem:[%s2956_s0 + $0xe0] ss:$16 sps:$4 sm:$0xff]   ;;  %v1993_v63 = vld [vmem:[%s2956_s0 + $0xe8] ss:$16 sps:$4 sm:$0xff]   ;;  %v1994_v0 = vld [vmem:[%s2956_s0 + $0x104] ss:$16 sps:$4 sm:$0xff]  }
  0x18   :  { %1701 = vmatpush3.bf16.msra.mxu0 %v1936_v22  ;;  %v1996_v1 = vld [vmem:[%s2956_s0 + $0x10c] ss:$16 sps:$4 sm:$0xff]   ;;  %v1998_v2 = vld [vmem:[%s2956_s0 + $0x100] ss:$16 sps:$4 sm:$0xff]   ;;  %v1999_v3 = vld [vmem:[%s2956_s0 + $0x108] ss:$16 sps:$4 sm:$0xff]  }
  0x19   :  { %1813 = vmatpush3.bf16.msra.mxu1 %v1937_v23  ;;  %1702 = vmatprep.subr.bf16.mxu0 %v1938_v24  ;;  %v2000_v4 = vld [vmem:[%s2956_s0 + $0x124] ss:$16 sps:$4 sm:$0xff]   ;;  %v2002_v5 = vld [vmem:[%s2956_s0 + $0x12c] ss:$16 sps:$4 sm:$0xff]   ;;  %v2004_v6 = vld [vmem:[%s2956_s0 + $0x120] ss:$16 sps:$4 sm:$0xff]  }
  0x1a   :  { %1814 = vmatprep.subr.bf16.mxu1 %v1939_v25  ;;  %v2005_v7 = vld [vmem:[%s2956_s0 + $0x128] ss:$16 sps:$4 sm:$0xff]   ;;  %v2006_v8 = vld [vmem:[%s2956_s0 + $0x144] ss:$16 sps:$4 sm:$0xff]   ;;  %v2008_v9 = vld [vmem:[%s2956_s0 + $0x14c] ss:$16 sps:$4 sm:$0xff]  }
  0x1b   :  { %v2010_v10 = vld [vmem:[%s2956_s0 + $0x140] ss:$16 sps:$4 sm:$0xff]   ;;  %v2011_v11 = vld [vmem:[%s2956_s0 + $0x148] ss:$16 sps:$4 sm:$0xff]   ;;  %v2012_v12 = vld [vmem:[%s2956_s0 + $0x164] ss:$16 sps:$4 sm:$0xff]  }
  0x1c   :  { %1703 = vmatpush3.bf16.msra.mxu0 %v1940_v26  ;;  %v2014_v13 = vld [vmem:[%s2956_s0 + $0x16c] ss:$16 sps:$4 sm:$0xff]   ;;  %v2016_v14 = vld [vmem:[%s2956_s0 + $0x160] ss:$16 sps:$4 sm:$0xff]   ;;  %v2017_v15 = vld [vmem:[%s2956_s0 + $0x168] ss:$16 sps:$4 sm:$0xff]  }
  0x1d   :  { %1815 = vmatpush3.bf16.msra.mxu1 %v1941_v27  ;;  %1704 = vmatprep.subr.bf16.mxu0 %v1942_v28  ;;  %v2018_v16 = vld [vmem:[%s2956_s0 + $0x184] ss:$16 sps:$4 sm:$0xff]   ;;  %v2020_v17 = vld [vmem:[%s2956_s0 + $0x18c] ss:$16 sps:$4 sm:$0xff]   ;;  %v2022_v18 = vld [vmem:[%s2956_s0 + $0x180] ss:$16 sps:$4 sm:$0xff]  }
  0x1e   :  { %1816 = vmatprep.subr.bf16.mxu1 %v1943_v29  ;;  %v2023_v19 = vld [vmem:[%s2956_s0 + $0x188] ss:$16 sps:$4 sm:$0xff]   ;;  %v2024_v20 = vld [vmem:[%s2956_s0 + $0x1a4] ss:$16 sps:$4 sm:$0xff]   ;;  %v2026_v21 = vld [vmem:[%s2956_s0 + $0x1ac] ss:$16 sps:$4 sm:$0xff]  }
  0x1f   :  { %v2028_v22 = vld [vmem:[%s2956_s0 + $0x1a0] ss:$16 sps:$4 sm:$0xff]   ;;  %v2029_v23 = vld [vmem:[%s2956_s0 + $0x1a8] ss:$16 sps:$4 sm:$0xff]   ;;  %v2030_v24 = vld [vmem:[%s2956_s0 + $0x1c4] ss:$16 sps:$4 sm:$0xff]  }
  0x20   :  { %1705 = vmatpush3.bf16.msra.mxu0 %v1944_v30  ;;  %v2032_v25 = vld [vmem:[%s2956_s0 + $0x1cc] ss:$16 sps:$4 sm:$0xff]   ;;  %v2034_v26 = vld [vmem:[%s2956_s0 + $0x1c0] ss:$16 sps:$4 sm:$0xff]   ;;  %v2035_v27 = vld [vmem:[%s2956_s0 + $0x1c8] ss:$16 sps:$4 sm:$0xff]  }
  0x21   :  { %1817 = vmatpush3.bf16.msra.mxu1 %v1945_v31  ;;  %v2036_v28 = vld [vmem:[%s2956_s0 + $0x1e4] ss:$16 sps:$4 sm:$0xff]   ;;  %v2038_v29 = vld [vmem:[%s2956_s0 + $0x1ec] ss:$16 sps:$4 sm:$0xff]   ;;  %v2040_v30 = vld [vmem:[%s2956_s0 + $0x1e0] ss:$16 sps:$4 sm:$0xff]  }
  0x22   :  { %v2041_v31 = vld [vmem:[%s2956_s0 + $0x1e8] ss:$16 sps:$4 sm:$0xff]  }
  0x23   :  { %691 = vmatmul.mubr.bf16.vlgmr.msra.gmra.mrb[0].mxu0 %v1946_v32 }
  0x24   :  { %852 = vmatmul.mubr.bf16.vlgmr.msra.gmra.mrb[0].mxu1 %v1949_v34  ;;  %698 = vmatprep.mubr.bf16.mxu0 %v1952_v36 }
  0x25   :  { %859 = vmatprep.mubr.bf16.mxu1 %v1954_v37 }
  0x2b   :  { %699 = vmatmul.mubr.bf16.gmra.mrb[4].mxu0 %v1956_v38 }
  0x2c   :  { %860 = vmatmul.mubr.bf16.gmra.mrb[4].mxu1 %v1957_v39  ;;  %706 = vmatprep.mubr.bf16.mxu0 %v1958_v40 }
  0x2d   :  { %867 = vmatprep.mubr.bf16.mxu1 %v1960_v41 }
  0x33   :  { %707 = vmatmul.mubr.bf16.gmra.mrb[8].mxu0 %v1962_v42 }
  0x34   :  { %868 = vmatmul.mubr.bf16.gmra.mrb[8].mxu1 %v1963_v43  ;;  %714 = vmatprep.mubr.bf16.mxu0 %v1964_v44 }
  0x35   :  { %875 = vmatprep.mubr.bf16.mxu1 %v1966_v45 }
  0x3b   :  { %715 = vmatmul.mubr.bf16.gmra.mrb[12].mxu0 %v1968_v46 }
  0x3c   :  { %876 = vmatmul.mubr.bf16.gmra.mrb[12].mxu1 %v1969_v47  ;;  %722 = vmatprep.mubr.bf16.mxu0 %v1970_v48 }
  0x3d   :  { %883 = vmatprep.mubr.bf16.mxu1 %v1972_v49 }
  0x43   :  { %723 = vmatmul.mubr.bf16.gmra.mrb[16].mxu0 %v1974_v50 }
  0x44   :  { %884 = vmatmul.mubr.bf16.gmra.mrb[16].mxu1 %v1975_v51  ;;  %730 = vmatprep.mubr.bf16.mxu0 %v1976_v52 }
  0x45   :  { %891 = vmatprep.mubr.bf16.mxu1 %v1978_v53 }
  0x4b   :  { %731 = vmatmul.mubr.bf16.gmra.mrb[20].mxu0 %v1980_v54 }
  0x4c   :  { %892 = vmatmul.mubr.bf16.gmra.mrb[20].mxu1 %v1981_v55  ;;  %738 = vmatprep.mubr.bf16.mxu0 %v1982_v56 }
  0x4d   :  { %899 = vmatprep.mubr.bf16.mxu1 %v1984_v57 }
  0x53   :  { %739 = vmatmul.mubr.bf16.gmra.mrb[24].mxu0 %v1986_v58 }
  0x54   :  { %900 = vmatmul.mubr.bf16.gmra.mrb[24].mxu1 %v1987_v59  ;;  %746 = vmatprep.mubr.bf16.mxu0 %v1988_v60 }
  0x55   :  { %907 = vmatprep.mubr.bf16.mxu1 %v1990_v61 }
  0x5b   :  { %747 = vmatmul.mubr.bf16.gmra.mrb[28].mxu0 %v1992_v62 }
  0x5c   :  { %908 = vmatmul.mubr.bf16.gmra.mrb[28].mxu1 %v1993_v63  ;;  %754 = vmatprep.mubr.bf16.mxu0 %v1994_v0 }
  0x5d   :  { %915 = vmatprep.mubr.bf16.mxu1 %v1996_v1 }
  0x63   :  { %755 = vmatmul.mubr.bf16.gmra.mrb[32].mxu0 %v1998_v2 }
  0x64   :  { %916 = vmatmul.mubr.bf16.gmra.mrb[32].mxu1 %v1999_v3  ;;  %762 = vmatprep.mubr.bf16.mxu0 %v2000_v4 }
  0x65   :  { %923 = vmatprep.mubr.bf16.mxu1 %v2002_v5 }
  0x6b   :  { %763 = vmatmul.mubr.bf16.gmra.mrb[36].mxu0 %v2004_v6 }
  0x6c   :  { %924 = vmatmul.mubr.bf16.gmra.mrb[36].mxu1 %v2005_v7  ;;  %770 = vmatprep.mubr.bf16.mxu0 %v2006_v8 }
  0x6d   :  { %931 = vmatprep.mubr.bf16.mxu1 %v2008_v9 }
  0x73   :  { %771 = vmatmul.mubr.bf16.gmra.mrb[40].mxu0 %v2010_v10 }
  0x74   :  { %932 = vmatmul.mubr.bf16.gmra.mrb[40].mxu1 %v2011_v11  ;;  %778 = vmatprep.mubr.bf16.mxu0 %v2012_v12 }
  0x75   :  { %939 = vmatprep.mubr.bf16.mxu1 %v2014_v13 }
  0x7b   :  { %779 = vmatmul.mubr.bf16.gmra.mrb[44].mxu0 %v2016_v14 }
  0x7c   :  { %940 = vmatmul.mubr.bf16.gmra.mrb[44].mxu1 %v2017_v15  ;;  %786 = vmatprep.mubr.bf16.mxu0 %v2018_v16 }
  0x7d   :  { %947 = vmatprep.mubr.bf16.mxu1 %v2020_v17 }
  0x83   :  { %787 = vmatmul.mubr.bf16.gmra.mrb[48].mxu0 %v2022_v18 }
  0x84   :  { %948 = vmatmul.mubr.bf16.gmra.mrb[48].mxu1 %v2023_v19  ;;  %794 = vmatprep.mubr.bf16.mxu0 %v2024_v20 }
  0x85   :  { %955 = vmatprep.mubr.bf16.mxu1 %v2026_v21 }
  0x8b   :  { %795 = vmatmul.mubr.bf16.gmra.mrb[52].mxu0 %v2028_v22 }
  0x8c   :  { %956 = vmatmul.mubr.bf16.gmra.mrb[52].mxu1 %v2029_v23  ;;  %802 = vmatprep.mubr.bf16.mxu0 %v2030_v24 }
  0x8d   :  { %963 = vmatprep.mubr.bf16.mxu1 %v2032_v25 }
  0x93   :  { %803 = vmatmul.mubr.bf16.gmra.mrb[56].mxu0 %v2034_v26 }
  0x94   :  { %964 = vmatmul.mubr.bf16.gmra.mrb[56].mxu1 %v2035_v27  ;;  %810 = vmatprep.mubr.bf16.mxu0 %v2036_v28 }
  0x95   :  { %971 = vmatprep.mubr.bf16.mxu1 %v2038_v29 }
  0x9b   :  { %811 = vmatmul.mubr.bf16.gmra.mrb[60].mxu0 %v2040_v30 }
  0x9c   :  { %972 = vmatmul.mubr.bf16.gmra.mrb[60].mxu1 %v2041_v31 }
  0xf6   :  { %v1706_v32 = vpop.f32.mrb[0].mxu0 }
  0xf7   :  { %v1818_v33 = vpop.f32.mrb[0].mxu1  ;;  %v1707_v34 = vpop.f32.mrb[1].mxu0 }
  0xf8   :  { %v1708_v35 = vadd.f32 %v1707_v34, %v1706_v32  ;;  %v1819_v36 = vpop.f32.mrb[1].mxu1  ;;  %v1709_v37 = vpop.f32.mrb[2].mxu0 }
  0xf9   :  { %v1820_v38 = vadd.f32 %v1819_v36, %v1818_v33  ;;  %v1821_v39 = vpop.f32.mrb[2].mxu1  ;;  %v1710_v40 = vpop.f32.mrb[3].mxu0 }
  0xfa   :  { %v1711_v41 = vadd.f32 %v1710_v40, %v1709_v37  ;;  %v1822_v42 = vpop.f32.mrb[3].mxu1 }
  0xfb   :  { %v2357_v43 = vadd.f32 %v1820_v38, %v1708_v35  ;;  %v1823_v44 = vadd.f32 %v1822_v42, %v1821_v39 }
  0xfd   :  { %v2359_v45 = vadd.f32 %v1823_v44, %v1711_v41  ;;  %v1052_v17 = vmul.f32 %v2357_v43, %v2357_v43  ;;  %v983_v23 = vsel %vm982_vm0, %v2357_v43, 0.0 }
  0xfe   :  { %v1712_v46 = vpop.f32.mrb[4].mxu0 }
  0xff   :  { %v1824_v47 = vpop.f32.mrb[4].mxu1  ;;  %v1713_v48 = vpop.f32.mrb[5].mxu0  ;;  %v1053_v11 = vmul.f32 %v2359_v45, %v2359_v45  ;;  %v984_v18 = vsel %vm982_vm0, %v2359_v45, 0.0  ;;  %v1084_v31 = vsel %vm982_vm0, %v1052_v17, 0.0 }
 0x100   :  { %v1714_v49 = vadd.f32 %v1713_v48, %v1712_v46  ;;  %v1825_v50 = vpop.f32.mrb[5].mxu1  ;;  %v1715_v51 = vpop.f32.mrb[6].mxu0  ;;  %v985_v30 = vadd.f32 %v984_v18, %v983_v23 }
 0x101   :  { %v1826_v52 = vadd.f32 %v1825_v50, %v1824_v47  ;;  %v1827_v53 = vpop.f32.mrb[6].mxu1  ;;  %v1716_v54 = vpop.f32.mrb[7].mxu0  ;;  %v1085_v26 = vsel %vm982_vm0, %v1053_v11, 0.0 }
 0x102   :  { %v1717_v55 = vadd.f32 %v1716_v54, %v1715_v51  ;;  %v1828_v56 = vpop.f32.mrb[7].mxu1  ;;  %v1086_v35 = vadd.f32 %v1085_v26, %v1084_v31 }
 0x103   :  { %v2361_v57 = vadd.f32 %v1826_v52, %v1714_v49  ;;  %v1829_v58 = vadd.f32 %v1828_v56, %v1827_v53 }
 0x105   :  { %v2363_v59 = vadd.f32 %v1829_v58, %v1717_v55  ;;  %v1054_v19 = vmul.f32 %v2361_v57, %v2361_v57  ;;  %v986_v27 = vsel %vm982_vm0, %v2361_v57, 0.0 }
 0x106   :  { %v1718_v60 = vpop.f32.mrb[8].mxu0  ;;  %v987_v36 = vadd.f32 %v986_v27, %v985_v30 }
 0x107   :  { %v1830_v61 = vpop.f32.mrb[8].mxu1  ;;  %v1719_v62 = vpop.f32.mrb[9].mxu0  ;;  %v1087_v32 = vsel %vm982_vm0, %v1054_v19, 0.0  ;;  %v1055_v33 = vmul.f32 %v2363_v59, %v2363_v59  ;;  %v988_v38 = vsel %vm982_vm0, %v2363_v59, 0.0 }
 0x108   :  { %v1720_v63 = vadd.f32 %v1719_v62, %v1718_v60  ;;  %v1831_v0 = vpop.f32.mrb[9].mxu1  ;;  %v1721_v1 = vpop.f32.mrb[10].mxu0  ;;  %v1088_v42 = vadd.f32 %v1087_v32, %v1086_v35  ;;  %v989_v53 = vadd.f32 %v988_v38, %v987_v36 }
 0x109   :  { %v1832_v2 = vadd.f32 %v1831_v0, %v1830_v61  ;;  %v1833_v3 = vpop.f32.mrb[10].mxu1  ;;  %v1722_v4 = vpop.f32.mrb[11].mxu0  ;;  %v1089_v48 = vsel %vm982_vm0, %v1055_v33, 0.0 }
 0x10a   :  { %v1723_v5 = vadd.f32 %v1722_v4, %v1721_v1  ;;  %v1834_v6 = vpop.f32.mrb[11].mxu1  ;;  %v1090_v62 = vadd.f32 %v1089_v48, %v1088_v42 }
 0x10b   :  { %v2365_v7 = vadd.f32 %v1832_v2, %v1720_v63  ;;  %v1835_v8 = vadd.f32 %v1834_v6, %v1833_v3 }
 0x10d   :  { %v2367_v9 = vadd.f32 %v1835_v8, %v1723_v5  ;;  %v1056_v39 = vmul.f32 %v2365_v7, %v2365_v7  ;;  %v990_v49 = vsel %vm982_vm0, %v2365_v7, 0.0 }
 0x10e   :  { %v1724_v10 = vpop.f32.mrb[12].mxu0  ;;  %v991_v63 = vadd.f32 %v990_v49, %v989_v53 }
 0x10f   :  { %v1836_v12 = vpop.f32.mrb[12].mxu1  ;;  %v1725_v13 = vpop.f32.mrb[13].mxu0  ;;  %v1091_v56 = vsel %vm982_vm0, %v1056_v39, 0.0  ;;  %v1057_v58 = vmul.f32 %v2367_v9, %v2367_v9  ;;  %v992_v0 = vsel %vm982_vm0, %v2367_v9, 0.0 }
 0x110   :  { %v1726_v14 = vadd.f32 %v1725_v13, %v1724_v10  ;;  %v1837_v15 = vpop.f32.mrb[13].mxu1  ;;  %v1727_v16 = vpop.f32.mrb[14].mxu0  ;;  %v1092_v3 = vadd.f32 %v1091_v56, %v1090_v62  ;;  %v993_v11 = vadd.f32 %v992_v0, %v991_v63 }
 0x111   :  { %v1838_v20 = vadd.f32 %v1837_v15, %v1836_v12  ;;  %v1839_v21 = vpop.f32.mrb[14].mxu1  ;;  %v1728_v22 = vpop.f32.mrb[15].mxu0  ;;  %v1093_v5 = vsel %vm982_vm0, %v1057_v58, 0.0 }
 0x112   :  { %v1729_v24 = vadd.f32 %v1728_v22, %v1727_v16  ;;  %v1840_v25 = vpop.f32.mrb[15].mxu1 }
 0x113   :  { %v2382_v28 = vadd.f32 %v1838_v20, %v1726_v14  ;;  %v1841_v29 = vadd.f32 %v1840_v25, %v1839_v21  ;;  %v1094_v20 = vadd.f32 %v1093_v5, %v1092_v3 }
 0x115   :  { %v2388_v34 = vadd.f32 %v1841_v29, %v1729_v24  ;;  %v1058_v1 = vmul.f32 %v2382_v28, %v2382_v28  ;;  %v994_v6 = vsel %vm982_vm0, %v2382_v28, 0.0 }
 0x116   :  { %v1730_v37 = vpop.f32.mrb[16].mxu0  ;;  %v995_v21 = vadd.f32 %v994_v6, %v993_v11 }
 0x117   :  { %v1842_v40 = vpop.f32.mrb[16].mxu1  ;;  %v1731_v41 = vpop.f32.mrb[17].mxu0  ;;  %v1095_v15 = vsel %vm982_vm0, %v1058_v1, 0.0  ;;  %v1059_v16 = vmul.f32 %v2388_v34, %v2388_v34  ;;  %v996_v24 = vsel %vm982_vm0, %v2388_v34, 0.0 }
 0x118   :  { %v1732_v44 = vadd.f32 %v1731_v41, %v1730_v37  ;;  %v1843_v46 = vpop.f32.mrb[17].mxu1  ;;  %v1733_v47 = vpop.f32.mrb[18].mxu0  ;;  %v1096_v29 = vadd.f32 %v1095_v15, %v1094_v20  ;;  %v997_v33 = vadd.f32 %v996_v24, %v995_v21 }
 0x119   :  { %v1844_v50 = vadd.f32 %v1843_v46, %v1842_v40  ;;  %v1845_v51 = vpop.f32.mrb[18].mxu1  ;;  %v1734_v52 = vpop.f32.mrb[19].mxu0  ;;  %v1097_v30 = vsel %vm982_vm0, %v1059_v16, 0.0 }
 0x11a   :  { %v1735_v54 = vadd.f32 %v1734_v52, %v1733_v47  ;;  %v1846_v55 = vpop.f32.mrb[19].mxu1  ;;  %v1098_v40 = vadd.f32 %v1097_v30, %v1096_v29 }
 0x11b   :  { %v2400_v60 = vadd.f32 %v1844_v50, %v1732_v44  ;;  %v1847_v61 = vadd.f32 %v1846_v55, %v1845_v51 }
 0x11d   :  { %v2406_v2 = vadd.f32 %v1847_v61, %v1735_v54  ;;  %v1060_v25 = vmul.f32 %v2400_v60, %v2400_v60  ;;  %v998_v31 = vsel %vm982_vm0, %v2400_v60, 0.0 }
 0x11e   :  { %v1736_v4 = vpop.f32.mrb[20].mxu0  ;;  %v999_v41 = vadd.f32 %v998_v31, %v997_v33 }
 0x11f   :  { %v1848_v8 = vpop.f32.mrb[20].mxu1  ;;  %v1737_v10 = vpop.f32.mrb[21].mxu0  ;;  %v1099_v36 = vsel %vm982_vm0, %v1060_v25, 0.0  ;;  %v1061_v37 = vmul.f32 %v2406_v2, %v2406_v2  ;;  %v1000_v47 = vsel %vm982_vm0, %v2406_v2, 0.0 }
 0x120   :  { %v1738_v12 = vadd.f32 %v1737_v10, %v1736_v4  ;;  %v1849_v13 = vpop.f32.mrb[21].mxu1  ;;  %v1739_v14 = vpop.f32.mrb[22].mxu0  ;;  %v1100_v52 = vadd.f32 %v1099_v36, %v1098_v40  ;;  %v1001_v62 = vadd.f32 %v1000_v47, %v999_v41 }
 0x121   :  { %v1850_v17 = vadd.f32 %v1849_v13, %v1848_v8  ;;  %v1851_v18 = vpop.f32.mrb[22].mxu1  ;;  %v1740_v19 = vpop.f32.mrb[23].mxu0  ;;  %v1101_v55 = vsel %vm982_vm0, %v1061_v37, 0.0 }
 0x122   :  { %v1741_v22 = vadd.f32 %v1740_v19, %v1739_v14  ;;  %v1852_v23 = vpop.f32.mrb[23].mxu1  ;;  %v1102_v3 = vadd.f32 %v1101_v55, %v1100_v52 }
 0x123   :  { %v2418_v26 = vadd.f32 %v1850_v17, %v1738_v12  ;;  %v1853_v27 = vadd.f32 %v1852_v23, %v1851_v18 }
 0x125   :  { %v2423_v32 = vadd.f32 %v1853_v27, %v1741_v22  ;;  %v1062_v48 = vmul.f32 %v2418_v26, %v2418_v26  ;;  %v1002_v56 = vsel %vm982_vm0, %v2418_v26, 0.0 }
 0x126   :  { %v1742_v35 = vpop.f32.mrb[24].mxu0  ;;  %v1003_v4 = vadd.f32 %v1002_v56, %v1001_v62 }
 0x127   :  { %v1854_v38 = vpop.f32.mrb[24].mxu1  ;;  %v1743_v39 = vpop.f32.mrb[25].mxu0  ;;  %v1103_v63 = vsel %vm982_vm0, %v1062_v48, 0.0  ;;  %v1063_v0 = vmul.f32 %v2423_v32, %v2423_v32  ;;  %v1004_v6 = vsel %vm982_vm0, %v2423_v32, 0.0 }
 0x128   :  { %v1744_v42 = vadd.f32 %v1743_v39, %v1742_v35  ;;  %v1855_v44 = vpop.f32.mrb[25].mxu1  ;;  %v1745_v46 = vpop.f32.mrb[26].mxu0  ;;  %v1104_v12 = vadd.f32 %v1103_v63, %v1102_v3  ;;  %v1005_v21 = vadd.f32 %v1004_v6, %v1003_v4 }
 0x129   :  { %v1856_v49 = vadd.f32 %v1855_v44, %v1854_v38  ;;  %v1857_v50 = vpop.f32.mrb[26].mxu1  ;;  %v1746_v51 = vpop.f32.mrb[27].mxu0  ;;  %v1105_v16 = vsel %vm982_vm0, %v1063_v0, 0.0 }
 0x12a   :  { %v1747_v53 = vadd.f32 %v1746_v51, %v1745_v46  ;;  %v1858_v54 = vpop.f32.mrb[27].mxu1  ;;  %v1106_v30 = vadd.f32 %v1105_v16, %v1104_v12 }
 0x12b   :  { %v2435_v58 = vadd.f32 %v1856_v49, %v1744_v42  ;;  %v1859_v61 = vadd.f32 %v1858_v54, %v1857_v50 }
 0x12d   :  { %v2440_v1 = vadd.f32 %v1859_v61, %v1747_v53  ;;  %v1064_v8 = vmul.f32 %v2435_v58, %v2435_v58  ;;  %v1006_v17 = vsel %vm982_vm0, %v2435_v58, 0.0 }
 0x12e   :  { %v1748_v5 = vpop.f32.mrb[28].mxu0  ;;  %v1007_v31 = vadd.f32 %v1006_v17, %v1005_v21 }
 0x12f   :  { %v1860_v10 = vpop.f32.mrb[28].mxu1  ;;  %v1749_v11 = vpop.f32.mrb[29].mxu0  ;;  %v1107_v24 = vsel %vm982_vm0, %v1064_v8, 0.0  ;;  %v1065_v25 = vmul.f32 %v2440_v1, %v2440_v1  ;;  %v1008_v33 = vsel %vm982_vm0, %v2440_v1, 0.0 }
 0x130   :  { %v1750_v13 = vadd.f32 %v1749_v11, %v1748_v5  ;;  %v1861_v14 = vpop.f32.mrb[29].mxu1  ;;  %v1751_v15 = vpop.f32.mrb[30].mxu0  ;;  %v1108_v37 = vadd.f32 %v1107_v24, %v1106_v30  ;;  %v1009_v44 = vadd.f32 %v1008_v33, %v1007_v31 }
 0x131   :  { %v1862_v18 = vadd.f32 %v1861_v14, %v1860_v10  ;;  %v1863_v19 = vpop.f32.mrb[30].mxu1  ;;  %v1752_v20 = vpop.f32.mrb[31].mxu0  ;;  %v1109_v39 = vsel %vm982_vm0, %v1065_v25, 0.0 }
 0x132   :  { %v1753_v22 = vadd.f32 %v1752_v20, %v1751_v15  ;;  %v1864_v23 = vpop.f32.mrb[31].mxu1  ;;  %v1110_v54 = vadd.f32 %v1109_v39, %v1108_v37 }
 0x133   :  { %v2452_v27 = vadd.f32 %v1862_v18, %v1750_v13  ;;  %v1865_v29 = vadd.f32 %v1864_v23, %v1863_v19 }
 0x135   :  { %v1066_v35 = vmul.f32 %v2452_v27, %v2452_v27  ;;  %v2458_v36 = vadd.f32 %v1865_v29, %v1753_v22  ;;  %v1010_v40 = vsel %vm982_vm0, %v2452_v27, 0.0 }
 0x136   :  { %v1754_v38 = vpop.f32.mrb[32].mxu0  ;;  %v1011_v55 = vadd.f32 %v1010_v40, %v1009_v44 }
 0x137   :  { %v1866_v41 = vpop.f32.mrb[32].mxu1  ;;  %v1755_v42 = vpop.f32.mrb[33].mxu0  ;;  %v1111_v49 = vsel %vm982_vm0, %v1066_v35, 0.0  ;;  %v1067_v50 = vmul.f32 %v2458_v36, %v2458_v36  ;;  %v1012_v62 = vsel %vm982_vm0, %v2458_v36, 0.0 }
 0x138   :  { %v1756_v46 = vadd.f32 %v1755_v42, %v1754_v38  ;;  %v1867_v47 = vpop.f32.mrb[33].mxu1  ;;  %v1757_v48 = vpop.f32.mrb[34].mxu0  ;;  %v1112_v3 = vadd.f32 %v1111_v49, %v1110_v54  ;;  %v1013_v10 = vadd.f32 %v1012_v62, %v1011_v55 }
 0x139   :  { %v1868_v51 = vadd.f32 %v1867_v47, %v1866_v41  ;;  %v1869_v52 = vpop.f32.mrb[34].mxu1  ;;  %v1758_v53 = vpop.f32.mrb[35].mxu0  ;;  %v1113_v4 = vsel %vm982_vm0, %v1067_v50, 0.0 }
 0x13a   :  { %v1759_v56 = vadd.f32 %v1758_v53, %v1757_v48  ;;  %v1870_v61 = vpop.f32.mrb[35].mxu1  ;;  %v1114_v16 = vadd.f32 %v1113_v4, %v1112_v3 }
 0x13b   :  { %v2468_v63 = vadd.f32 %v1868_v51, %v1756_v46  ;;  %v1871_v0 = vadd.f32 %v1870_v61, %v1869_v52 }
 0x13d   :  { %v1014_v5 = vsel %vm982_vm0, %v2468_v63, 0.0  ;;  %v1068_v6 = vmul.f32 %v2468_v63, %v2468_v63  ;;  %v2475_v8 = vadd.f32 %v1871_v0, %v1759_v56 }
 0x13e   :  { %v1760_v11 = vpop.f32.mrb[36].mxu0  ;;  %v1015_v17 = vadd.f32 %v1014_v5, %v1013_v10 }
 0x13f   :  { %v1115_v12 = vsel %vm982_vm0, %v1068_v6, 0.0  ;;  %v1069_v13 = vmul.f32 %v2475_v8, %v2475_v8  ;;  %v1872_v14 = vpop.f32.mrb[36].mxu1  ;;  %v1761_v15 = vpop.f32.mrb[37].mxu0  ;;  %v1016_v21 = vsel %vm982_vm0, %v2475_v8, 0.0 }
 0x140   :  { %v1762_v18 = vadd.f32 %v1761_v15, %v1760_v11  ;;  %v1873_v19 = vpop.f32.mrb[37].mxu1  ;;  %v1763_v20 = vpop.f32.mrb[38].mxu0  ;;  %v1116_v25 = vadd.f32 %v1115_v12, %v1114_v16  ;;  %v1017_v37 = vadd.f32 %v1016_v21, %v1015_v17 }
 0x141   :  { %v1874_v22 = vadd.f32 %v1873_v19, %v1872_v14  ;;  %v1875_v23 = vpop.f32.mrb[38].mxu1  ;;  %v1764_v24 = vpop.f32.mrb[39].mxu0  ;;  %v1117_v31 = vsel %vm982_vm0, %v1069_v13, 0.0 }
 0x142   :  { %v1765_v29 = vadd.f32 %v1764_v24, %v1763_v20  ;;  %v1876_v30 = vpop.f32.mrb[39].mxu1  ;;  %v1118_v41 = vadd.f32 %v1117_v31, %v1116_v25 }
 0x143   :  { %v2483_v33 = vadd.f32 %v1874_v22, %v1762_v18  ;;  %v1877_v35 = vadd.f32 %v1876_v30, %v1875_v23 }
 0x145   :  { %v1018_v38 = vsel %vm982_vm0, %v2483_v33, 0.0  ;;  %v1070_v39 = vmul.f32 %v2483_v33, %v2483_v33  ;;  %v2489_v40 = vadd.f32 %v1877_v35, %v1765_v29 }
 0x146   :  { %v1019_v42 = vadd.f32 %v1018_v38, %v1017_v37  ;;  %v1766_v44 = vpop.f32.mrb[40].mxu0 }
 0x147   :  { %v1119_v46 = vsel %vm982_vm0, %v1070_v39, 0.0  ;;  %v1020_v47 = vsel %vm982_vm0, %v2489_v40, 0.0  ;;  %v1071_v48 = vmul.f32 %v2489_v40, %v2489_v40  ;;  %v1878_v49 = vpop.f32.mrb[40].mxu1  ;;  %v1767_v50 = vpop.f32.mrb[41].mxu0 }
 0x148   :  { %v1120_v51 = vadd.f32 %v1119_v46, %v1118_v41  ;;  %v1021_v52 = vadd.f32 %v1020_v47, %v1019_v42  ;;  %v1768_v53 = vadd.f32 %v1767_v50, %v1766_v44  ;;  %v1879_v54 = vpop.f32.mrb[41].mxu1  ;;  %v1769_v55 = vpop.f32.mrb[42].mxu0 }
 0x149   :  { %v1121_v56 = vsel %vm982_vm0, %v1071_v48, 0.0  ;;  %v1880_v61 = vadd.f32 %v1879_v54, %v1878_v49  ;;  %v1881_v62 = vpop.f32.mrb[42].mxu1  ;;  %v1770_v0 = vpop.f32.mrb[43].mxu0 }
 0x14a   :  { %v1122_v3 = vadd.f32 %v1121_v56, %v1120_v51  ;;  %v1771_v4 = vadd.f32 %v1770_v0, %v1769_v55  ;;  %v1882_v5 = vpop.f32.mrb[43].mxu1 }
 0x14b   :  { %v2497_v6 = vadd.f32 %v1880_v61, %v1768_v53  ;;  %v1883_v10 = vadd.f32 %v1882_v5, %v1881_v62 }
 0x14d   :  { %v1022_v11 = vsel %vm982_vm0, %v2497_v6, 0.0  ;;  %v1072_v12 = vmul.f32 %v2497_v6, %v2497_v6  ;;  %v2503_v13 = vadd.f32 %v1883_v10, %v1771_v4 }
 0x14e   :  { %v1023_v14 = vadd.f32 %v1022_v11, %v1021_v52  ;;  %v1772_v15 = vpop.f32.mrb[44].mxu0 }
 0x14f   :  { %v1123_v16 = vsel %vm982_vm0, %v1072_v12, 0.0  ;;  %v1024_v17 = vsel %vm982_vm0, %v2503_v13, 0.0  ;;  %v1073_v18 = vmul.f32 %v2503_v13, %v2503_v13  ;;  %v1884_v19 = vpop.f32.mrb[44].mxu1  ;;  %v1773_v20 = vpop.f32.mrb[45].mxu0 }
 0x150   :  { %v1124_v21 = vadd.f32 %v1123_v16, %v1122_v3  ;;  %v1025_v22 = vadd.f32 %v1024_v17, %v1023_v14  ;;  %v1774_v23 = vadd.f32 %v1773_v20, %v1772_v15  ;;  %v1885_v24 = vpop.f32.mrb[45].mxu1  ;;  %v1775_v25 = vpop.f32.mrb[46].mxu0 }
 0x151   :  { %v1125_v29 = vsel %vm982_vm0, %v1073_v18, 0.0  ;;  %v1886_v30 = vadd.f32 %v1885_v24, %v1884_v19  ;;  %v1887_v31 = vpop.f32.mrb[46].mxu1  ;;  %v1776_v35 = vpop.f32.mrb[47].mxu0 }
 0x152   :  { %v1126_v37 = vadd.f32 %v1125_v29, %v1124_v21  ;;  %v1777_v38 = vadd.f32 %v1776_v35, %v1775_v25  ;;  %v1888_v39 = vpop.f32.mrb[47].mxu1 }
 0x153   :  { %v2511_v41 = vadd.f32 %v1886_v30, %v1774_v23  ;;  %v1889_v42 = vadd.f32 %v1888_v39, %v1887_v31 }
 0x155   :  { %v1026_v44 = vsel %vm982_vm0, %v2511_v41, 0.0  ;;  %v1074_v46 = vmul.f32 %v2511_v41, %v2511_v41  ;;  %v2517_v47 = vadd.f32 %v1889_v42, %v1777_v38 }
 0x156   :  { %v1027_v48 = vadd.f32 %v1026_v44, %v1025_v22  ;;  %v1778_v49 = vpop.f32.mrb[48].mxu0 }
 0x157   :  { %v1127_v50 = vsel %vm982_vm0, %v1074_v46, 0.0  ;;  %v1028_v51 = vsel %vm982_vm0, %v2517_v47, 0.0  ;;  %v1075_v52 = vmul.f32 %v2517_v47, %v2517_v47  ;;  %v1890_v53 = vpop.f32.mrb[48].mxu1  ;;  %v1779_v54 = vpop.f32.mrb[49].mxu0 }
 0x158   :  { %v1128_v55 = vadd.f32 %v1127_v50, %v1126_v37  ;;  %v1029_v56 = vadd.f32 %v1028_v51, %v1027_v48  ;;  %v1780_v61 = vadd.f32 %v1779_v54, %v1778_v49  ;;  %v1891_v62 = vpop.f32.mrb[49].mxu1  ;;  %v1781_v0 = vpop.f32.mrb[50].mxu0 }
 0x159   :  { %v1129_v3 = vsel %vm982_vm0, %v1075_v52, 0.0  ;;  %v1892_v4 = vadd.f32 %v1891_v62, %v1890_v53  ;;  %v1893_v5 = vpop.f32.mrb[50].mxu1  ;;  %v1782_v10 = vpop.f32.mrb[51].mxu0 }
 0x15a   :  { %v1130_v11 = vadd.f32 %v1129_v3, %v1128_v55  ;;  %v1783_v12 = vadd.f32 %v1782_v10, %v1781_v0  ;;  %v1894_v14 = vpop.f32.mrb[51].mxu1 }
 0x15b   :  { %v2525_v15 = vadd.f32 %v1892_v4, %v1780_v61  ;;  %v1895_v16 = vadd.f32 %v1894_v14, %v1893_v5 }
 0x15d   :  { %v1030_v17 = vsel %vm982_vm0, %v2525_v15, 0.0  ;;  %v1076_v18 = vmul.f32 %v2525_v15, %v2525_v15  ;;  %v2531_v19 = vadd.f32 %v1895_v16, %v1783_v12 }
 0x15e   :  { %v1031_v20 = vadd.f32 %v1030_v17, %v1029_v56  ;;  %v1784_v21 = vpop.f32.mrb[52].mxu0 }
 0x15f   :  { %v1131_v22 = vsel %vm982_vm0, %v1076_v18, 0.0  ;;  %v1032_v23 = vsel %vm982_vm0, %v2531_v19, 0.0  ;;  %v1077_v24 = vmul.f32 %v2531_v19, %v2531_v19  ;;  %v1896_v25 = vpop.f32.mrb[52].mxu1  ;;  %v1785_v29 = vpop.f32.mrb[53].mxu0 }
 0x160   :  { %v1132_v30 = vadd.f32 %v1131_v22, %v1130_v11  ;;  %v1033_v31 = vadd.f32 %v1032_v23, %v1031_v20  ;;  %v1786_v35 = vadd.f32 %v1785_v29, %v1784_v21  ;;  %v1897_v37 = vpop.f32.mrb[53].mxu1  ;;  %v1787_v38 = vpop.f32.mrb[54].mxu0 }
 0x161   :  { %v1133_v39 = vsel %vm982_vm0, %v1077_v24, 0.0  ;;  %v1898_v42 = vadd.f32 %v1897_v37, %v1896_v25  ;;  %v1899_v44 = vpop.f32.mrb[54].mxu1  ;;  %v1788_v46 = vpop.f32.mrb[55].mxu0 }
 0x162   :  { %v1134_v48 = vadd.f32 %v1133_v39, %v1132_v30  ;;  %v1789_v49 = vadd.f32 %v1788_v46, %v1787_v38  ;;  %v1900_v50 = vpop.f32.mrb[55].mxu1 }
 0x163   :  { %v2539_v51 = vadd.f32 %v1898_v42, %v1786_v35  ;;  %v1901_v52 = vadd.f32 %v1900_v50, %v1899_v44 }
 0x165   :  { %v1034_v53 = vsel %vm982_vm0, %v2539_v51, 0.0  ;;  %v1078_v54 = vmul.f32 %v2539_v51, %v2539_v51  ;;  %v2545_v55 = vadd.f32 %v1901_v52, %v1789_v49 }
 0x166   :  { %v1035_v56 = vadd.f32 %v1034_v53, %v1033_v31  ;;  %v1790_v61 = vpop.f32.mrb[56].mxu0 }
 0x167   :  { %v1135_v62 = vsel %vm982_vm0, %v1078_v54, 0.0  ;;  %v1036_v0 = vsel %vm982_vm0, %v2545_v55, 0.0  ;;  %v1079_v3 = vmul.f32 %v2545_v55, %v2545_v55  ;;  %v1902_v4 = vpop.f32.mrb[56].mxu1  ;;  %v1791_v5 = vpop.f32.mrb[57].mxu0 }
 0x168   :  { %v1136_v10 = vadd.f32 %v1135_v62, %v1134_v48  ;;  %v1037_v11 = vadd.f32 %v1036_v0, %v1035_v56  ;;  %v1792_v12 = vadd.f32 %v1791_v5, %v1790_v61  ;;  %v1903_v14 = vpop.f32.mrb[57].mxu1  ;;  %v1793_v16 = vpop.f32.mrb[58].mxu0 }
 0x169   :  { %v1137_v17 = vsel %vm982_vm0, %v1079_v3, 0.0  ;;  %v1904_v18 = vadd.f32 %v1903_v14, %v1902_v4  ;;  %v1905_v20 = vpop.f32.mrb[58].mxu1  ;;  %v1794_v21 = vpop.f32.mrb[59].mxu0 }
 0x16a   :  { %v1138_v22 = vadd.f32 %v1137_v17, %v1136_v10  ;;  %v1795_v23 = vadd.f32 %v1794_v21, %v1793_v16  ;;  %v1906_v24 = vpop.f32.mrb[59].mxu1 }
 0x16b   :  { %v2553_v25 = vadd.f32 %v1904_v18, %v1792_v12  ;;  %v1907_v29 = vadd.f32 %v1906_v24, %v1905_v20 }
 0x16d   :  { %v1038_v30 = vsel %vm982_vm0, %v2553_v25, 0.0  ;;  %v1080_v31 = vmul.f32 %v2553_v25, %v2553_v25  ;;  %v2559_v35 = vadd.f32 %v1907_v29, %v1795_v23 }
 0x16e   :  { %v1039_v37 = vadd.f32 %v1038_v30, %v1037_v11  ;;  %v1796_v38 = vpop.f32.mrb[60].mxu0 }
 0x16f   :  { %v1139_v39 = vsel %vm982_vm0, %v1080_v31, 0.0  ;;  %v1040_v42 = vsel %vm982_vm0, %v2559_v35, 0.0  ;;  %v1081_v44 = vmul.f32 %v2559_v35, %v2559_v35  ;;  %v1908_v46 = vpop.f32.mrb[60].mxu1  ;;  %v1797_v48 = vpop.f32.mrb[61].mxu0 }
 0x170   :  { %v1140_v49 = vadd.f32 %v1139_v39, %v1138_v22  ;;  %v1041_v50 = vadd.f32 %v1040_v42, %v1039_v37  ;;  %v1798_v52 = vadd.f32 %v1797_v48, %v1796_v38  ;;  %v1909_v53 = vpop.f32.mrb[61].mxu1  ;;  %v1799_v54 = vpop.f32.mrb[62].mxu0 }
 0x171   :  { %v1141_v56 = vsel %vm982_vm0, %v1081_v44, 0.0  ;;  %v1910_v61 = vadd.f32 %v1909_v53, %v1908_v46  ;;  %v1911_v62 = vpop.f32.mrb[62].mxu1  ;;  %v1800_v0 = vpop.f32.mrb[63].mxu0 }
 0x172   :  { %v1142_v3 = vadd.f32 %v1141_v56, %v1140_v49  ;;  %v1801_v4 = vadd.f32 %v1800_v0, %v1799_v54  ;;  %v1912_v5 = vpop.f32.mrb[63].mxu1 }
 0x173   :  { %v2567_v10 = vadd.f32 %v1910_v61, %v1798_v52  ;;  %v1913_v11 = vadd.f32 %v1912_v5, %v1911_v62 }
 0x175   :  { %v1042_v12 = vsel %vm982_vm0, %v2567_v10, 0.0  ;;  %v1082_v14 = vmul.f32 %v2567_v10, %v2567_v10  ;;  %v2573_v16 = vadd.f32 %v1913_v11, %v1801_v4 }
 0x176   :  { %v1043_v17 = vadd.f32 %v1042_v12, %v1041_v50 }
 0x177   :  { %v1143_v18 = vsel %vm982_vm0, %v1082_v14, 0.0  ;;  %v1044_v20 = vsel %vm982_vm0, %v2573_v16, 0.0  ;;  %v1083_v21 = vmul.f32 %v2573_v16, %v2573_v16 }
 0x178   :  { %v1144_v22 = vadd.f32 %v1143_v18, %v1142_v3  ;;  %v1045_v23 = vadd.f32 %v1044_v20, %v1043_v17 }
 0x179   :  { %v1145_v24 = vsel %vm982_vm0, %v1083_v21, 0.0 }
 0x17a   :  { %v1046_v29 = vrot.slane %v1045_v23, 4  ;;  %v1146_v30 = vadd.f32 %v1145_v24, %v1144_v22 }
 0x17c   :  { %v1047_v31 = vadd.f32 %v1046_v29, %v1045_v23  ;;  %v1147_v37 = vrot.slane %v1146_v30, 4 }
 0x17e   :  { %v1048_v38 = vrot.slane %v1047_v31, 2  ;;  %v1148_v39 = vadd.f32 %v1147_v37, %v1146_v30 }
 0x180   :  { %v1049_v42 = vadd.f32 %v1048_v38, %v1047_v31  ;;  %v1149_v44 = vrot.slane %v1148_v39, 2 }
 0x182   :  { %v1050_v46 = vrot.slane %v1049_v42, 1  ;;  %v1150_v48 = vadd.f32 %v1149_v44, %v1148_v39  ;;  %v1624_v44 = vld [vmem:[%s2957_s2] ss:$0 sm:$0xff] }
 0x184   :  { %v1051_v49 = vadd.f32 %v1050_v46, %v1049_v42  ;;  %v1151_v50 = vrot.slane %v1150_v48, 1 }
 0x186   :  { %v1152_v52 = vadd.f32 %v1151_v50, %v1150_v48  ;;  %v2581_v53 = vmul.f32 0.004132231, %v1051_v49 }
 0x188   :  { %v1154_v54 = vmul.f32 0.004132231, %v1152_v52  ;;  %v1155_v56 = vmul.f32 %v2581_v53, %v2581_v53  ;;  %v1174_v62 = vsub.f32 %v2475_v8, %v2581_v53  ;;  %v1175_v0 = vsub.f32 %v2483_v33, %v2581_v53 }
 0x189   :  { %v1176_v3 = vsub.f32 %v2489_v40, %v2581_v53  ;;  %v1177_v4 = vsub.f32 %v2497_v6, %v2581_v53  ;;  %v1178_v5 = vsub.f32 %v2503_v13, %v2581_v53  ;;  %v1179_v11 = vsub.f32 %v2511_v41, %v2581_v53 }
 0x18a   :  { %v1156_v61 = vsub.f32 %v1154_v54, %v1155_v56  ;;  %v1180_v12 = vsub.f32 %v2517_v47, %v2581_v53  ;;  %v1181_v8 = vsub.f32 %v2525_v15, %v2581_v53  ;;  %v1182_v33 = vsub.f32 %v2531_v19, %v2581_v53 }
 0x18b   :  { %v1183_v40 = vsub.f32 %v2539_v51, %v2581_v53  ;;  %v1184_v6 = vsub.f32 %v2545_v55, %v2581_v53  ;;  %v1185_v13 = vsub.f32 %v2553_v25, %v2581_v53  ;;  %v1186_v41 = vsub.f32 %v2559_v35, %v2581_v53 }
 0x18c   :  { %v1187_v47 = vsub.f32 %v2567_v10, %v2581_v53  ;;  %v1188_v15 = vsub.f32 %v2573_v16, %v2581_v53  ;;  %v1189_v14 = vadd.f32 1e-05, %v1156_v61  ;;  %v1157_v19 = vsub.f32 %v2357_v43, %v2581_v53 }
 0x18d   :  { %v1158_v51 = vsub.f32 %v2359_v45, %v2581_v53  ;;  %v1159_v55 = vsub.f32 %v2361_v57, %v2581_v53  ;;  %v1160_v25 = vsub.f32 %v2363_v59, %v2581_v53  ;;  %v1161_v35 = vsub.f32 %v2365_v7, %v2581_v53 }
 0x18e   :  { %2042 = vrsqrt.f32 %v1189_v14  ;;  %v1162_v10 = vsub.f32 %v2367_v9, %v2581_v53  ;;  %v1163_v16 = vsub.f32 %v2382_v28, %v2581_v53  ;;  %v1164_v43 = vsub.f32 %v2388_v34, %v2581_v53 }
 0x18f   :  { %v1165_v45 = vsub.f32 %v2400_v60, %v2581_v53  ;;  %v1166_v57 = vsub.f32 %v2406_v2, %v2581_v53  ;;  %v1167_v59 = vsub.f32 %v2418_v26, %v2581_v53  ;;  %v1168_v7 = vsub.f32 %v2423_v32, %v2581_v53 }
 0x190   :  { %v1169_v9 = vsub.f32 %v2435_v58, %v2581_v53  ;;  %v1170_v28 = vsub.f32 %v2440_v1, %v2581_v53  ;;  %v1171_v34 = vsub.f32 %v2452_v27, %v2581_v53  ;;  %v1172_v60 = vsub.f32 %v2458_v36, %v2581_v53 }
 0x191   :  { %v1173_v2 = vsub.f32 %v2468_v63, %v2581_v53 }
 0x198   :  { %v2043_v17 = vpop.eup %2042 }
 0x199   :  { %v1191_v26 = vmul.f32 %v2043_v17, %v1157_v19  ;;  %v1192_v18 = vmul.f32 %v2043_v17, %v1158_v51  ;;  %v1193_v20 = vmul.f32 %v2043_v17, %v1159_v55  ;;  %v1194_v32 = vmul.f32 %v2043_v17, %v1160_v25 }
 0x19a   :  { %v1195_v21 = vmul.f32 %v2043_v17, %v1161_v35  ;;  %v1196_v22 = vmul.f32 %v2043_v17, %v1162_v10  ;;  %v1197_v58 = vmul.f32 %v2043_v17, %v1163_v16  ;;  %v1198_v23 = vmul.f32 %v2043_v17, %v1164_v43 }
 0x19b   :  { %v1199_v24 = vmul.f32 %v2043_v17, %v1165_v45  ;;  %v1200_v29 = vmul.f32 %v2043_v17, %v1166_v57  ;;  %v1201_v1 = vmul.f32 %v2043_v17, %v1167_v59  ;;  %v1202_v30 = vmul.f32 %v2043_v17, %v1168_v7 }
 0x19c   :  { %v1203_v31 = vmul.f32 %v2043_v17, %v1169_v9  ;;  %v1204_v27 = vmul.f32 %v2043_v17, %v1170_v28  ;;  %v1205_v37 = vmul.f32 %v2043_v17, %v1171_v34  ;;  %v1206_v38 = vmul.f32 %v2043_v17, %v1172_v60 }
 0x19d   :  { %v1207_v36 = vmul.f32 %v2043_v17, %v1173_v2  ;;  %v1208_v39 = vmul.f32 %v2043_v17, %v1174_v62  ;;  %v1209_v42 = vmul.f32 %v2043_v17, %v1175_v0  ;;  %v1210_v63 = vmul.f32 %v2043_v17, %v1176_v3 }
 0x19e   :  { %v1211_v46 = vmul.f32 %v2043_v17, %v1177_v4  ;;  %v1212_v48 = vmul.f32 %v2043_v17, %v1178_v5  ;;  %v1213_v49 = vmul.f32 %v2043_v17, %v1179_v11  ;;  %v1214_v50 = vmul.f32 %v2043_v17, %v1180_v12 }
 0x19f   :  { %v1215_v52 = vmul.f32 %v2043_v17, %v1181_v8  ;;  %v1216_v53 = vmul.f32 %v2043_v17, %v1182_v33  ;;  %v1217_v54 = vmul.f32 %v2043_v17, %v1183_v40  ;;  %v1218_v56 = vmul.f32 %v2043_v17, %v1184_v6 }
 0x1a0   :  { %v1219_v61 = vmul.f32 %v2043_v17, %v1185_v13  ;;  %v1220_v14 = vmul.f32 %v2043_v17, %v1186_v41  ;;  %v1221_v19 = vmul.f32 %v2043_v17, %v1187_v47  ;;  %v1222_v51 = vmul.f32 %v2043_v17, %v1188_v15  ;;  %v1625_v47 = vld [vmem:[%s2958_s3] ss:$0 sm:$0xff] }
 0x1a1   :  { %v1229_v55 = vmul.f32 %v1624_v44, %v1191_v26  ;;  %v1230_v62 = vmul.f32 %v1624_v44, %v1192_v18  ;;  %v1231_v0 = vmul.f32 %v1624_v44, %v1193_v20  ;;  %v1232_v3 = vmul.f32 %v1624_v44, %v1194_v32 }
 0x1a2   :  { %v1233_v25 = vmul.f32 %v1624_v44, %v1195_v21  ;;  %v1234_v35 = vmul.f32 %v1624_v44, %v1196_v22  ;;  %v1235_v10 = vmul.f32 %v1624_v44, %v1197_v58  ;;  %v1236_v16 = vmul.f32 %v1624_v44, %v1198_v23 }
 0x1a3   :  { %v1237_v4 = vmul.f32 %v1624_v44, %v1199_v24  ;;  %v1238_v5 = vmul.f32 %v1624_v44, %v1200_v29  ;;  %v1239_v11 = vmul.f32 %v1624_v44, %v1201_v1  ;;  %v1240_v12 = vmul.f32 %v1624_v44, %v1202_v30 }
 0x1a4   :  { %v1241_v8 = vmul.f32 %v1624_v44, %v1203_v31  ;;  %v1242_v33 = vmul.f32 %v1624_v44, %v1204_v27  ;;  %v1243_v40 = vmul.f32 %v1624_v44, %v1205_v37  ;;  %v1244_v6 = vmul.f32 %v1624_v44, %v1206_v38 }
 0x1a5   :  { %v1245_v13 = vmul.f32 %v1624_v44, %v1207_v36  ;;  %v1246_v41 = vmul.f32 %v1624_v44, %v1208_v39  ;;  %v1247_v15 = vmul.f32 %v1624_v44, %v1209_v42  ;;  %v1248_v43 = vmul.f32 %v1624_v44, %v1210_v63 }
 0x1a6   :  { %v1249_v45 = vmul.f32 %v1624_v44, %v1211_v46  ;;  %v1250_v57 = vmul.f32 %v1624_v44, %v1212_v48  ;;  %v1251_v59 = vmul.f32 %v1624_v44, %v1213_v49  ;;  %v1252_v7 = vmul.f32 %v1624_v44, %v1214_v50 }
 0x1a7   :  { %v1253_v9 = vmul.f32 %v1624_v44, %v1215_v52  ;;  %v1254_v17 = vmul.f32 %v1624_v44, %v1216_v53  ;;  %v1255_v28 = vmul.f32 %v1624_v44, %v1217_v54  ;;  %v1256_v34 = vmul.f32 %v1624_v44, %v1218_v56 }
 0x1a8   :  { %v1257_v60 = vmul.f32 %v1624_v44, %v1219_v61  ;;  %v1258_v2 = vmul.f32 %v1624_v44, %v1220_v14  ;;  %v1259_v26 = vmul.f32 %v1624_v44, %v1221_v19  ;;  %v1260_v18 = vmul.f32 %v1624_v44, %v1222_v51 }
 0x1a9   :  { %v1267_v20 = vadd.f32 %v1625_v47, %v1229_v55  ;;  %v1268_v32 = vadd.f32 %v1625_v47, %v1230_v62  ;;  %v1269_v21 = vadd.f32 %v1625_v47, %v1231_v0  ;;  %v1270_v22 = vadd.f32 %v1625_v47, %v1232_v3 }
 0x1aa   :  { %v1271_v58 = vadd.f32 %v1625_v47, %v1233_v25  ;;  %v1272_v23 = vadd.f32 %v1625_v47, %v1234_v35  ;;  %v1273_v24 = vadd.f32 %v1625_v47, %v1235_v10  ;;  %v2655_v29 = vadd.f32 %v1625_v47, %v1236_v16 }
 0x1ab   :  { %v2657_v1 = vadd.f32 %v1625_v47, %v1237_v4  ;;  %v2659_v30 = vadd.f32 %v1625_v47, %v1238_v5  ;;  %v2661_v31 = vadd.f32 %v1625_v47, %v1239_v11  ;;  %v2663_v27 = vadd.f32 %v1625_v47, %v1240_v12 }
 0x1ac   :  { %v2665_v37 = vadd.f32 %v1625_v47, %v1241_v8  ;;  %v2667_v38 = vadd.f32 %v1625_v47, %v1242_v33  ;;  %v2669_v36 = vadd.f32 %v1625_v47, %v1243_v40  ;;  %v2671_v39 = vadd.f32 %v1625_v47, %v1244_v6 }
 0x1ad   :  { %v2673_v42 = vadd.f32 %v1625_v47, %v1245_v13  ;;  %v2675_v63 = vadd.f32 %v1625_v47, %v1246_v41  ;;  %v2677_v44 = vadd.f32 %v1625_v47, %v1247_v15  ;;  %v2679_v46 = vadd.f32 %v1625_v47, %v1248_v43 }
 0x1ae   :  { %v2681_v48 = vadd.f32 %v1625_v47, %v1249_v45  ;;  %v2683_v49 = vadd.f32 %v1625_v47, %v1250_v57  ;;  %v2685_v50 = vadd.f32 %v1625_v47, %v1251_v59  ;;  %v2687_v52 = vadd.f32 %v1625_v47, %v1252_v7 }
 0x1af   :  { %v2689_v53 = vadd.f32 %v1625_v47, %v1253_v9  ;;  %v2691_v54 = vadd.f32 %v1625_v47, %v1254_v17  ;;  %v2693_v56 = vadd.f32 %v1625_v47, %v1255_v28  ;;  %v2695_v61 = vadd.f32 %v1625_v47, %v1256_v34 }
 0x1b0   :  { %v2697_v14 = vadd.f32 %v1625_v47, %v1257_v60  ;;  %v2699_v19 = vadd.f32 %v1625_v47, %v1258_v2  ;;  %v2701_v51 = vadd.f32 %v1625_v47, %v1259_v26  ;;  %v1299_v55 = vmul.f32 0.01, %v1267_v20 }
 0x1b1   :  { %v1300_v62 = vmul.f32 0.01, %v1268_v32  ;;  %v1301_v0 = vmul.f32 0.01, %v1269_v21  ;;  %v2703_v3 = vadd.f32 %v1625_v47, %v1260_v18  ;;  %v1302_v25 = vmul.f32 0.01, %v1270_v22 }
 0x1b2   :  { %v1303_v35 = vmul.f32 0.01, %v1271_v58  ;;  %v1304_v10 = vmul.f32 0.01, %v1272_v23  ;;  %v1305_v16 = vmul.f32 0.01, %v1273_v24  ;;  %v2707_v11 = vmax.f32 %v1267_v20, %v1299_v55 }
 0x1b3   :  { %v1306_v4 = vmul.f32 0.01, %v2655_v29  ;;  %v1307_v5 = vmul.f32 0.01, %v2657_v1  ;;  %v1308_v12 = vmul.f32 0.01, %v2659_v30  ;;  %v2712_v40 = vmax.f32 %v1268_v32, %v1300_v62 }
 0x1b4   :  { %v1309_v8 = vmul.f32 0.01, %v2661_v31  ;;  %v1310_v33 = vmul.f32 0.01, %v2663_v27  ;;  %v1311_v6 = vmul.f32 0.01, %v2665_v37  ;;  %v2717_v47 = vmax.f32 %v1269_v21, %v1301_v0 }
 0x1b5   :  { %v1312_v13 = vmul.f32 0.01, %v2667_v38  ;;  %v1313_v41 = vmul.f32 0.01, %v2669_v36  ;;  %v1314_v15 = vmul.f32 0.01, %v2671_v39  ;;  %v2722_v57 = vmax.f32 %v1270_v22, %v1302_v25 }
 0x1b6   :  { %2960 = vst [vmem:[#allocation2_spill] sm:$0xff] %v2717_v47  ;;  %v1315_v43 = vmul.f32 0.01, %v2673_v42  ;;  %v1316_v45 = vmul.f32 0.01, %v2675_v63  ;;  %v1335_v17 = vmax.f32 %v1271_v58, %v1303_v35  ;;  %v1336_v2 = vmax.f32 %v1272_v23, %v1304_v10 }
 0x1b7   :  { %2961 = vst [vmem:[#allocation3_spill] sm:$0xff] %v2722_v57  ;;  %v1317_v59 = vmul.f32 0.01, %v2677_v44  ;;  %v1318_v7 = vmul.f32 0.01, %v2679_v46  ;;  %v1337_v32 = vmax.f32 %v1273_v24, %v1305_v16  ;;  %v1338_v55 = vmax.f32 %v2655_v29, %v1306_v4 }
 0x1b8   :  { %v1319_v9 = vmul.f32 0.01, %v2681_v48  ;;  %v1320_v28 = vmul.f32 0.01, %v2683_v49  ;;  %v1321_v34 = vmul.f32 0.01, %v2685_v50  ;;  %v1339_v0 = vmax.f32 %v2657_v1, %v1307_v5 }
 0x1b9   :  { %v1322_v60 = vmul.f32 0.01, %v2687_v52  ;;  %v1323_v26 = vmul.f32 0.01, %v2689_v53  ;;  %v1324_v18 = vmul.f32 0.01, %v2691_v54  ;;  %v1340_v25 = vmax.f32 %v2659_v30, %v1308_v12 }
 0x1ba   :  { %v1325_v20 = vmul.f32 0.01, %v2693_v56  ;;  %v1326_v21 = vmul.f32 0.01, %v2695_v61  ;;  %v1327_v22 = vmul.f32 0.01, %v2697_v14  ;;  %v1341_v35 = vmax.f32 %v2661_v31, %v1309_v8 }
 0x1bb   :  { %v1328_v58 = vmul.f32 0.01, %v2699_v19  ;;  %v1329_v62 = vmul.f32 0.01, %v2701_v51  ;;  %v1330_v23 = vmul.f32 0.01, %v2703_v3  ;;  %v1342_v24 = vmax.f32 %v2663_v27, %v1310_v33 }
 0x1bc   :  { %v1343_v10 = vmax.f32 %v2665_v37, %v1311_v6  ;;  %v1344_v16 = vmax.f32 %v2667_v38, %v1312_v13  ;;  %v1345_v57 = vmax.f32 %v2669_v36, %v1313_v41  ;;  %v1346_v29 = vmax.f32 %v2671_v39, %v1314_v15 }
 0x1bd   :  { %v1347_v4 = vmax.f32 %v2673_v42, %v1315_v43  ;;  %v1348_v47 = vmax.f32 %v2675_v63, %v1316_v45  ;;  %v2750_v1 = vmax.f32 %v2677_v44, %v1317_v59  ;;  %v2753_v30 = vmax.f32 %v2679_v46, %v1318_v7 }
 0x1be   :  { %v2756_v31 = vmax.f32 %v2681_v48, %v1319_v9  ;;  %v2759_v27 = vmax.f32 %v2683_v49, %v1320_v28  ;;  %v2762_v37 = vmax.f32 %v2685_v50, %v1321_v34  ;;  %v2765_v38 = vmax.f32 %v2687_v52, %v1322_v60 }
 0x1bf   :  { %v2768_v36 = vmax.f32 %v2689_v53, %v1323_v26  ;;  %v2771_v39 = vmax.f32 %v2691_v54, %v1324_v18  ;;  %v2774_v42 = vmax.f32 %v2693_v56, %v1325_v20  ;;  %v2777_v63 = vmax.f32 %v2695_v61, %v1326_v21  ;;  %v2962_v53 = vld [vmem:[#allocation2_spill] sm:$0xff]  ;;  %v2963_v56 = vld [vmem:[#allocation3_spill] sm:$0xff] }
 0x1c0   :  { %v2780_v44 = vmax.f32 %v2697_v14, %v1327_v22  ;;  %v2783_v46 = vmax.f32 %v2699_v19, %v1328_v58  ;;  %v2786_v48 = vmax.f32 %v2701_v51, %v1329_v62  ;;  %v2789_v49 = vmax.f32 %v2703_v3, %v1330_v23 }
 0x1c1   :  { %v1658_v50 = vpack.c.bf16 %v2707_v11, %v2707_v11  ;;  %v1659_v52 = vpack.c.bf16 %v2712_v40, %v2712_v40  ;;  %v1660_v54 = vpack.c.bf16 %v2962_v53, %v2962_v53  ;;  %v1661_v61 = vpack.c.bf16 %v2963_v56, %v2963_v56 }
 0x1c2   :  { %v1662_v14 = vpack.c.bf16 %v1335_v17, %v1335_v17  ;;  %v1663_v19 = vpack.c.bf16 %v1336_v2, %v1336_v2  ;;  %v1664_v5 = vpack.c.bf16 %v1337_v32, %v1337_v32  ;;  %v1665_v51 = vpack.c.bf16 %v1338_v55, %v1338_v55 }
 0x1c3   :  { %v1666_v12 = vpack.c.bf16 %v1339_v0, %v1339_v0  ;;  %v1667_v8 = vpack.c.bf16 %v1340_v25, %v1340_v25  ;;  %1492 = vst.msk [vmem:[%s2959_s4] sm:$0xf] %vm1491_vm1, %v1658_v50  ;;  %1493 = vst.msk [vmem:[%s2959_s4 + $0x4] sm:$0xf] %vm1491_vm1, %v1659_v52  ;;  %v1668_v3 = vpack.c.bf16 %v1341_v35, %v1341_v35 }
 0x1c4   :  { %v1669_v11 = vpack.c.bf16 %v1342_v24, %v1342_v24  ;;  %v1670_v33 = vpack.c.bf16 %v1343_v10, %v1343_v10  ;;  %v1671_v40 = vpack.c.bf16 %v1344_v16, %v1344_v16  ;;  %1494 = vst.msk [vmem:[%s2959_s4 + $0x8] sm:$0xf] %vm1491_vm1, %v1660_v54  ;;  %1495 = vst.msk [vmem:[%s2959_s4 + $0xc] sm:$0xf] %vm1491_vm1, %v1661_v61 }
 0x1c5   :  { %1496 = vst.msk [vmem:[%s2959_s4 + $0x10] sm:$0xf] %vm1491_vm1, %v1662_v14  ;;  %1497 = vst.msk [vmem:[%s2959_s4 + $0x14] sm:$0xf] %vm1491_vm1, %v1663_v19  ;;  %v1672_v6 = vpack.c.bf16 %v1345_v57, %v1345_v57  ;;  %v1673_v13 = vpack.c.bf16 %v1346_v29, %v1346_v29  ;;  %v1674_v41 = vpack.c.bf16 %v1347_v4, %v1347_v4 }
 0x1c6   :  { %v1675_v15 = vpack.c.bf16 %v1348_v47, %v1348_v47  ;;  %1498 = vst.msk [vmem:[%s2959_s4 + $0x18] sm:$0xf] %vm1491_vm1, %v1664_v5  ;;  %1499 = vst.msk [vmem:[%s2959_s4 + $0x1c] sm:$0xf] %vm1491_vm1, %v1665_v51  ;;  %v1676_v47 = vpack.c.bf16 %v2750_v1, %v2750_v1  ;;  %v1677_v43 = vpack.c.bf16 %v2753_v30, %v2753_v30 }
 0x1c7   :  { %1500 = vst.msk [vmem:[%s2959_s4 + $0x20] sm:$0xf] %vm1491_vm1, %v1666_v12  ;;  %1501 = vst.msk [vmem:[%s2959_s4 + $0x24] sm:$0xf] %vm1491_vm1, %v1667_v8  ;;  %v1678_v45 = vpack.c.bf16 %v2756_v31, %v2756_v31  ;;  %v1679_v57 = vpack.c.bf16 %v2759_v27, %v2759_v27  ;;  %v1680_v59 = vpack.c.bf16 %v2762_v37, %v2762_v37 }
 0x1c8   :  { %1502 = vst.msk [vmem:[%s2959_s4 + $0x28] sm:$0xf] %vm1491_vm1, %v1668_v3  ;;  %1503 = vst.msk [vmem:[%s2959_s4 + $0x2c] sm:$0xf] %vm1491_vm1, %v1669_v11  ;;  %v1681_v7 = vpack.c.bf16 %v2765_v38, %v2765_v38  ;;  %v1682_v9 = vpack.c.bf16 %v2768_v36, %v2768_v36  ;;  %v1683_v17 = vpack.c.bf16 %v2771_v39, %v2771_v39 }
 0x1c9   :  { %1504 = vst.msk [vmem:[%s2959_s4 + $0x30] sm:$0xf] %vm1491_vm1, %v1670_v33  ;;  %1505 = vst.msk [vmem:[%s2959_s4 + $0x34] sm:$0xf] %vm1491_vm1, %v1671_v40  ;;  %v1684_v28 = vpack.c.bf16 %v2774_v42, %v2774_v42  ;;  %v1685_v34 = vpack.c.bf16 %v2777_v63, %v2777_v63  ;;  %v1686_v60 = vpack.c.bf16 %v2780_v44, %v2780_v44 }
 0x1ca   :  { %1506 = vst.msk [vmem:[%s2959_s4 + $0x38] sm:$0xf] %vm1491_vm1, %v1672_v6  ;;  %1507 = vst.msk [vmem:[%s2959_s4 + $0x3c] sm:$0xf] %vm1491_vm1, %v1673_v13  ;;  %v1687_v2 = vpack.c.bf16 %v2783_v46, %v2783_v46  ;;  %v1688_v26 = vpack.c.bf16 %v2786_v48, %v2786_v48  ;;  %v1689_v18 = vpack.c.bf16 %v2789_v49, %v2789_v49 }
 0x1cb   :  { %1508 = vst.msk [vmem:[%s2959_s4 + $0x40] sm:$0xf] %vm1491_vm1, %v1674_v41  ;;  %1509 = vst.msk [vmem:[%s2959_s4 + $0x44] sm:$0xf] %vm1491_vm1, %v1675_v15 }
 0x1cc   :  { %1510 = vst.msk [vmem:[%s2959_s4 + $0x48] sm:$0xf] %vm1491_vm1, %v1676_v47  ;;  %1511 = vst.msk [vmem:[%s2959_s4 + $0x4c] sm:$0xf] %vm1491_vm1, %v1677_v43 }
 0x1cd   :  { %1512 = vst.msk [vmem:[%s2959_s4 + $0x50] sm:$0xf] %vm1491_vm1, %v1678_v45  ;;  %1513 = vst.msk [vmem:[%s2959_s4 + $0x54] sm:$0xf] %vm1491_vm1, %v1679_v57 }
 0x1ce   :  { %1514 = vst.msk [vmem:[%s2959_s4 + $0x58] sm:$0xf] %vm1491_vm1, %v1680_v59  ;;  %1515 = vst.msk [vmem:[%s2959_s4 + $0x5c] sm:$0xf] %vm1491_vm1, %v1681_v7 }
 0x1cf   :  { %1516 = vst.msk [vmem:[%s2959_s4 + $0x60] sm:$0xf] %vm1491_vm1, %v1682_v9  ;;  %1517 = vst.msk [vmem:[%s2959_s4 + $0x64] sm:$0xf] %vm1491_vm1, %v1683_v17 }
 0x1d0   :  { %1518 = vst.msk [vmem:[%s2959_s4 + $0x68] sm:$0xf] %vm1491_vm1, %v1684_v28  ;;  %1519 = vst.msk [vmem:[%s2959_s4 + $0x6c] sm:$0xf] %vm1491_vm1, %v1685_v34 }
 0x1d1   :  { %1520 = vst.msk [vmem:[%s2959_s4 + $0x70] sm:$0xf] %vm1491_vm1, %v1686_v60  ;;  %1521 = vst.msk [vmem:[%s2959_s4 + $0x74] sm:$0xf] %vm1491_vm1, %v1687_v2 }
 0x1d2   :  { %1522 = vst.msk [vmem:[%s2959_s4 + $0x78] sm:$0xf] %vm1491_vm1, %v1688_v26  ;;  %1523 = vst.msk [vmem:[%s2959_s4 + $0x7c] sm:$0xf] %vm1491_vm1, %v1689_v18 }

// kernel: encoder_forward.5
= control target key start
LH: loop header
LB: loop body
LE: loop exit
PB: predicated region body
PF: predicated region fallthrough
CT: control target
= control target key end

     0   :  { %21 = vsyncpa [#allocation3], 0  ;;  %vm1006_vm0 = vcmask 523264   ;;  %s8311_s0 = inlined_call_operand.vmem [shape: bf16[32,1600], index: 0, kind: input, shape index: {}]   ;;  %s8312_s1 = inlined_call_operand.vmem [shape: bf16[1600,128], index: 1, kind: input, shape index: {}]   ;;  %s8313_s2 = inlined_call_operand.vmem [shape: f32[1,128], index: 2, kind: input, shape index: {}]   ;;  %s8314_s3 = inlined_call_operand.vmem [shape: f32[1,128], index: 3, kind: input, shape index: {}]   ;;  %s8315_s4 = inlined_call_operand.vmem [shape: bf16[16,128,256], index: 4, kind: input, shape index: {}]   ;;  %s8316_s5 = inlined_call_operand.vmem [shape: f32[1,256], index: 5, kind: input, shape index: {}]   ;;  %s8317_s6 = inlined_call_operand.vmem [shape: f32[1,256], index: 6, kind: input, shape index: {}]   ;;  %s8318_s7 = inlined_call_operand.vmem [shape: bf16[256,512], index: 7, kind: input, shape index: {}]   ;;  %s8319_s8 = inlined_call_operand.vmem [shape: f32[1,512], index: 8, kind: input, shape index: {}]   ;;  %s8320_s9 = inlined_call_operand.vmem [shape: f32[1,512], index: 9, kind: input, shape index: {}]   ;;  %s8321_s10 = inlined_call_operand.vmem [shape: bf16[512,32], index: 10, kind: input, shape index: {}]   ;;  %s8322_s11 = inlined_call_operand.vmem [shape: f32[1,32], index: 11, kind: input, shape index: {}]   ;;  %s8323_s12 = inlined_call_operand.hbm [shape: f32[2,32], index: 12, kind: output, shape index: {0}]   ;;  %s8324_s13 = inlined_call_operand.hbm [shape: f32[2,512], index: 13, kind: output, shape index: {1}]   ;;  %s8325_s14 = inlined_call_operand.hbm [shape: f32[2,256], index: 14, kind: output, shape index: {2}]   ;;  %s8326_s15 = inlined_call_operand.vmem [shape: f32[32,128], index: 15, kind: output, shape index: {3}]  }
   0x1   :  { %v5838_v0 = vld [vmem:[%s8312_s1 + $0x40] sm:$0xff]   ;;  %v5840_v2 = vld [vmem:[%s8312_s1 + $0x48] sm:$0xff]   ;;  %v5842_v4 = vld [vmem:[%s8312_s1 + $0x50] sm:$0xff]  }
   0x2   :  { %v5839_v1 = vld [vmem:[%s8312_s1] sm:$0xff]   ;;  %5545 = vmatprep.subr.bf16.mxu0 %v5838_v0  ;;  %v5841_v3 = vld [vmem:[%s8312_s1 + $0x8] sm:$0xff]   ;;  %v5843_v5 = vld [vmem:[%s8312_s1 + $0x10] sm:$0xff]  }
   0x3   :  { %5546 = vmatpush3.bf16.msra.mxu0 %v5839_v1  ;;  %v5844_v6 = vld [vmem:[%s8312_s1 + $0x58] sm:$0xff]   ;;  %v5846_v8 = vld [vmem:[%s8312_s1 + $0x60] sm:$0xff]   ;;  %v5848_v10 = vld [vmem:[%s8312_s1 + $0x68] sm:$0xff]  }
   0x4   :  { %5547 = vmatprep.subr.bf16.mxu0 %v5840_v2  ;;  %v5845_v7 = vld [vmem:[%s8312_s1 + $0x18] sm:$0xff]   ;;  %v5847_v9 = vld [vmem:[%s8312_s1 + $0x20] sm:$0xff]   ;;  %v5849_v12 = vld [vmem:[%s8312_s1 + $0x28] sm:$0xff]  }
   0x5   :  { %v5856_v11 = vld [vmem:[%s8311_s0 + $0x4] ss:$52 sps:$4 sm:$0xff]   ;;  %v5850_v13 = vld [vmem:[%s8312_s1 + $0x70] sm:$0xff]   ;;  %v5868_v20 = vld [vmem:[%s8311_s0 + $0x6c] ss:$52 sps:$4 sm:$0xff]  }
   0x6   :  { %1045 = vmatprep.mubr.bf16.mxu0 %v5856_v11  ;;  %v5851_v14 = vld [vmem:[%s8312_s1 + $0x30] sm:$0xff]   ;;  %v5852_v15 = vld [vmem:[%s8312_s1 + $0x78] sm:$0xff]   ;;  %v5857_v17 = vld [vmem:[%s8312_s1 + $0xc0] sm:$0xff]  }
   0x7   :  { %5548 = vmatpush3.bf16.msra.mxu0 %v5841_v3  ;;  %v5853_v16 = vld [vmem:[%s8312_s1 + $0x38] sm:$0xff]   ;;  %v5854_v18 = vld [vmem:[%s8311_s0] ss:$52 sps:$4 sm:$0xff]   ;;  %v5859_v21 = vld [vmem:[%s8312_s1 + $0xc8] sm:$0xff]  }
   0x8   :  { %5549 = vmatprep.subr.bf16.mxu0 %v5842_v4  ;;  %v5858_v19 = vld [vmem:[%s8312_s1 + $0x80] sm:$0xff]   ;;  %v5860_v22 = vld [vmem:[%s8312_s1 + $0x88] sm:$0xff]   ;;  %v5861_v23 = vld [vmem:[%s8312_s1 + $0xd0] sm:$0xff]  }
   0x9   :  { %v5862_v24 = vld [vmem:[%s8312_s1 + $0x90] sm:$0xff]   ;;  %v5871_v25 = vld [vmem:[%s8311_s0 + $0x68] ss:$52 sps:$4 sm:$0xff]   ;;  %v5878_v26 = vld [vmem:[%s8311_s0 + $0xc] ss:$52 sps:$4 sm:$0xff]  }
   0xa   :  { %v5863_v27 = vld [vmem:[%s8312_s1 + $0xd8] sm:$0xff]   ;;  %v5865_v29 = vld [vmem:[%s8312_s1 + $0xe0] sm:$0xff]   ;;  %v5867_v31 = vld [vmem:[%s8312_s1 + $0xe8] sm:$0xff]  }
   0xb   :  { %5550 = vmatpush3.bf16.msra.mxu0 %v5843_v5  ;;  %v5864_v28 = vld [vmem:[%s8312_s1 + $0x98] sm:$0xff]   ;;  %v5866_v30 = vld [vmem:[%s8312_s1 + $0xa0] sm:$0xff]   ;;  %v5870_v32 = vld [vmem:[%s8312_s1 + $0xa8] sm:$0xff]  }
   0xc   :  { %5551 = vmatprep.subr.bf16.mxu0 %v5844_v6  ;;  %v5872_v33 = vld [vmem:[%s8312_s1 + $0xf0] sm:$0xff]   ;;  %v5874_v35 = vld [vmem:[%s8312_s1 + $0xf8] sm:$0xff]   ;;  %v5879_v37 = vld [vmem:[%s8312_s1 + $0x140] sm:$0xff]  }
   0xd   :  { %v5873_v34 = vld [vmem:[%s8312_s1 + $0xb0] sm:$0xff]   ;;  %v5875_v36 = vld [vmem:[%s8312_s1 + $0xb8] sm:$0xff]   ;;  %v5880_v39 = vld [vmem:[%s8312_s1 + $0x100] sm:$0xff]  }
   0xe   :  { %v5876_v38 = vld [vmem:[%s8311_s0 + $0x8] ss:$52 sps:$4 sm:$0xff]   ;;  %v5886_v43 = vld [vmem:[%s8312_s1 + $0x150] sm:$0xff]   ;;  %v5890_v49 = vld [vmem:[%s8312_s1 + $0x160] sm:$0xff]  }
   0xf   :  { %5552 = vmatpush3.bf16.msra.mxu0 %v5845_v7  ;;  %v5883_v40 = vld [vmem:[%s8311_s0 + $0x74] ss:$52 sps:$4 sm:$0xff]   ;;  %v5885_v44 = vld [vmem:[%s8311_s0 + $0x70] ss:$52 sps:$4 sm:$0xff]   ;;  %v5888_v47 = vld [vmem:[%s8312_s1 + $0x158] sm:$0xff]  }
  0x10   :  { %5553 = vmatprep.subr.bf16.mxu0 %v5846_v8  ;;  %v5881_v41 = vld [vmem:[%s8312_s1 + $0x148] sm:$0xff]   ;;  %v5887_v45 = vld [vmem:[%s8312_s1 + $0x110] sm:$0xff]   ;;  %v5889_v48 = vld [vmem:[%s8312_s1 + $0x118] sm:$0xff]  }
  0x11   :  { %v5882_v42 = vld [vmem:[%s8312_s1 + $0x108] sm:$0xff]   ;;  %v5891_v50 = vld [vmem:[%s8312_s1 + $0x120] sm:$0xff]   ;;  %v5894_v53 = vld [vmem:[%s8312_s1 + $0x170] sm:$0xff]  }
  0x12   :  { %v5900_v46 = vld [vmem:[%s8311_s0 + $0x14] ss:$52 sps:$4 sm:$0xff]   ;;  %v5896_v55 = vld [vmem:[%s8312_s1 + $0x178] sm:$0xff]   ;;  %v5901_v57 = vld [vmem:[%s8312_s1 + $0x1c0] sm:$0xff]  }
  0x13   :  { %5554 = vmatpush3.bf16.msra.mxu0 %v5847_v9  ;;  %v5892_v51 = vld [vmem:[%s8312_s1 + $0x168] sm:$0xff]   ;;  %v5895_v54 = vld [vmem:[%s8312_s1 + $0x130] sm:$0xff]   ;;  %v5897_v56 = vld [vmem:[%s8312_s1 + $0x138] sm:$0xff]  }
  0x14   :  { %5555 = vmatprep.subr.bf16.mxu0 %v5848_v10  ;;  %v5893_v52 = vld [vmem:[%s8312_s1 + $0x128] sm:$0xff]   ;;  %v5898_v58 = vld [vmem:[%s8311_s0 + $0x10] ss:$52 sps:$4 sm:$0xff]   ;;  %v5910_v3 = vld [vmem:[%s8312_s1 + $0x1d8] sm:$0xff]  }
  0x15   :  { %v5902_v59 = vld [vmem:[%s8312_s1 + $0x180] sm:$0xff]   ;;  %v5905_v60 = vld [vmem:[%s8311_s0 + $0x7c] ss:$52 sps:$4 sm:$0xff]   ;;  %v5903_v61 = vld [vmem:[%s8312_s1 + $0x1c8] sm:$0xff]  }
  0x16   :  { %v5904_v62 = vld [vmem:[%s8312_s1 + $0x188] sm:$0xff]   ;;  %v5908_v63 = vld [vmem:[%s8312_s1 + $0x1d0] sm:$0xff]   ;;  %v5911_v4 = vld [vmem:[%s8312_s1 + $0x198] sm:$0xff]  }
  0x17   :  { %5556 = vmatpush3.bf16.msra.mxu0 %v5849_v12  ;;  %v5907_v0 = vld [vmem:[%s8311_s0 + $0x78] ss:$52 sps:$4 sm:$0xff]   ;;  %v5909_v1 = vld [vmem:[%s8312_s1 + $0x190] sm:$0xff]   ;;  %v5912_v5 = vld [vmem:[%s8312_s1 + $0x1e0] sm:$0xff]  }
  0x18   :  { %5557 = vmatprep.subr.bf16.mxu0 %v5850_v13  ;;  %v5922_v2 = vld [vmem:[%s8311_s0 + $0x1c] ss:$52 sps:$4 sm:$0xff]   ;;  %v5913_v6 = vld [vmem:[%s8312_s1 + $0x1a0] sm:$0xff]   ;;  %v5914_v7 = vld [vmem:[%s8312_s1 + $0x1e8] sm:$0xff]  }
  0x19   :  { %v5915_v8 = vld [vmem:[%s8312_s1 + $0x1a8] sm:$0xff]   ;;  %v5916_v9 = vld [vmem:[%s8312_s1 + $0x1f0] sm:$0xff]   ;;  %v5918_v11 = vld [vmem:[%s8312_s1 + $0x1f8] sm:$0xff]  }
  0x1a   :  { %v5917_v10 = vld [vmem:[%s8312_s1 + $0x1b0] sm:$0xff]   ;;  %v5919_v12 = vld [vmem:[%s8312_s1 + $0x1b8] sm:$0xff]   ;;  %v5923_v13 = vld [vmem:[%s8312_s1 + $0x240] sm:$0xff]  }
  0x1b   :  { %5558 = vmatpush3.bf16.msra.mxu0 %v5851_v14  ;;  %v5920_v14 = vld [vmem:[%s8311_s0 + $0x18] ss:$52 sps:$4 sm:$0xff]  }
  0x1c   :  { %5559 = vmatprep.subr.bf16.mxu0 %v5852_v15  ;;  %v5924_v15 = vld [vmem:[%s8312_s1 + $0x200] sm:$0xff]  }
  0x1f   :  { %5560 = vmatpush3.bf16.msra.mxu0 %v5853_v16  ;;  %v5927_v16 = vld [vmem:[%s8311_s0 + $0x84] ss:$52 sps:$4 sm:$0xff]  }
  0x20   :  { %5573 = vmatprep.subr.bf16.mxu0 %v5857_v17  ;;  %v5925_v17 = vld [vmem:[%s8312_s1 + $0x248] sm:$0xff]  }
  0x22   :  { %1046 = vmatmul.mubr.bf16.vlgmr.msra.gmra.mrb[0].mxu0 %v5854_v18  ;;  %v5926_v18 = vld [vmem:[%s8312_s1 + $0x208] sm:$0xff]  }
  0x23   :  { %5574 = vmatpush3.bf16.msra.mxu0 %v5858_v19  ;;  %1053 = vmatprep.mubr.bf16.mxu0 %v5868_v20  ;;  %v5930_v19 = vld [vmem:[%s8312_s1 + $0x250] sm:$0xff]  }
  0x24   :  { %5575 = vmatprep.subr.bf16.mxu0 %v5859_v21  ;;  %v5929_v20 = vld [vmem:[%s8311_s0 + $0x80] ss:$52 sps:$4 sm:$0xff]  }
  0x25   :  { %v5931_v21 = vld [vmem:[%s8312_s1 + $0x210] sm:$0xff]  }
  0x27   :  { %5576 = vmatpush3.bf16.msra.mxu0 %v5860_v22  ;;  %v5944_v22 = vld [vmem:[%s8311_s0 + $0x24] ss:$52 sps:$4 sm:$0xff]  }
  0x28   :  { %5577 = vmatprep.subr.bf16.mxu0 %v5861_v23  ;;  %v5932_v23 = vld [vmem:[%s8312_s1 + $0x258] sm:$0xff]  }
  0x2a   :  { %1054 = vmatmul.mubr.bf16.gmra.mrb[4].mxu0 %v5871_v25  ;;  %v5934_v25 = vld [vmem:[%s8312_s1 + $0x260] sm:$0xff]  }
  0x2b   :  { %5578 = vmatpush3.bf16.msra.mxu0 %v5862_v24  ;;  %1094 = vmatprep.mubr.bf16.mxu0 %v5878_v26  ;;  %v5933_v24 = vld [vmem:[%s8312_s1 + $0x218] sm:$0xff]   ;;  %v5935_v26 = vld [vmem:[%s8312_s1 + $0x220] sm:$0xff]  }
  0x2c   :  { %5579 = vmatprep.subr.bf16.mxu0 %v5863_v27  ;;  %v5936_v27 = vld [vmem:[%s8312_s1 + $0x268] sm:$0xff]  }
  0x2f   :  { %5580 = vmatpush3.bf16.msra.mxu0 %v5864_v28  ;;  %v5937_v28 = vld [vmem:[%s8312_s1 + $0x228] sm:$0xff]  }
  0x30   :  { %5581 = vmatprep.subr.bf16.mxu0 %v5865_v29  ;;  %v5938_v29 = vld [vmem:[%s8312_s1 + $0x270] sm:$0xff]  }
  0x33   :  { %5582 = vmatpush3.bf16.msra.mxu0 %v5866_v30  ;;  %v5939_v30 = vld [vmem:[%s8312_s1 + $0x230] sm:$0xff]  }
  0x34   :  { %5583 = vmatprep.subr.bf16.mxu0 %v5867_v31  ;;  %v5940_v31 = vld [vmem:[%s8312_s1 + $0x278] sm:$0xff]  }
  0x37   :  { %5584 = vmatpush3.bf16.msra.mxu0 %v5870_v32  ;;  %v5941_v32 = vld [vmem:[%s8312_s1 + $0x238] sm:$0xff]  }
  0x38   :  { %5585 = vmatprep.subr.bf16.mxu0 %v5872_v33  ;;  %v5945_v33 = vld [vmem:[%s8312_s1 + $0x2c0] sm:$0xff]  }
  0x3b   :  { %5586 = vmatpush3.bf16.msra.mxu0 %v5873_v34  ;;  %v5942_v34 = vld [vmem:[%s8311_s0 + $0x20] ss:$52 sps:$4 sm:$0xff]  }
  0x3c   :  { %5587 = vmatprep.subr.bf16.mxu0 %v5874_v35  ;;  %v5946_v35 = vld [vmem:[%s8312_s1 + $0x280] sm:$0xff]  }
  0x3f   :  { %5588 = vmatpush3.bf16.msra.mxu0 %v5875_v36  ;;  %v5949_v36 = vld [vmem:[%s8311_s0 + $0x8c] ss:$52 sps:$4 sm:$0xff]  }
  0x40   :  { %5601 = vmatprep.subr.bf16.mxu0 %v5879_v37  ;;  %v5947_v37 = vld [vmem:[%s8312_s1 + $0x2c8] sm:$0xff]  }
  0x42   :  { %1095 = vmatmul.mubr.bf16.vlgmr.msra.gmra.mrb[8].mxu0 %v5876_v38  ;;  %v5948_v38 = vld [vmem:[%s8312_s1 + $0x288] sm:$0xff]  }
  0x43   :  { %5602 = vmatpush3.bf16.msra.mxu0 %v5880_v39  ;;  %1102 = vmatprep.mubr.bf16.mxu0 %v5883_v40  ;;  %v5952_v39 = vld [vmem:[%s8312_s1 + $0x2d0] sm:$0xff]   ;;  %v5951_v40 = vld [vmem:[%s8311_s0 + $0x88] ss:$52 sps:$4 sm:$0xff]  }
  0x44   :  { %5603 = vmatprep.subr.bf16.mxu0 %v5881_v41  ;;  %v5953_v41 = vld [vmem:[%s8312_s1 + $0x290] sm:$0xff]  }
  0x47   :  { %5604 = vmatpush3.bf16.msra.mxu0 %v5882_v42  ;;  %v5966_v42 = vld [vmem:[%s8311_s0 + $0x2c] ss:$52 sps:$4 sm:$0xff]  }
  0x48   :  { %5605 = vmatprep.subr.bf16.mxu0 %v5886_v43  ;;  %v5954_v43 = vld [vmem:[%s8312_s1 + $0x2d8] sm:$0xff]  }
  0x4a   :  { %1103 = vmatmul.mubr.bf16.gmra.mrb[12].mxu0 %v5885_v44  ;;  %v5955_v44 = vld [vmem:[%s8312_s1 + $0x298] sm:$0xff]  }
  0x4b   :  { %5606 = vmatpush3.bf16.msra.mxu0 %v5887_v45  ;;  %1143 = vmatprep.mubr.bf16.mxu0 %v5900_v46  ;;  %v5956_v45 = vld [vmem:[%s8312_s1 + $0x2e0] sm:$0xff]  }
  0x4c   :  { %5607 = vmatprep.subr.bf16.mxu0 %v5888_v47  ;;  %v5957_v46 = vld [vmem:[%s8312_s1 + $0x2a0] sm:$0xff]   ;;  %v5958_v47 = vld [vmem:[%s8312_s1 + $0x2e8] sm:$0xff]  }
  0x4f   :  { %5608 = vmatpush3.bf16.msra.mxu0 %v5889_v48  ;;  %v5959_v48 = vld [vmem:[%s8312_s1 + $0x2a8] sm:$0xff]  }
  0x50   :  { %5609 = vmatprep.subr.bf16.mxu0 %v5890_v49  ;;  %v5960_v49 = vld [vmem:[%s8312_s1 + $0x2f0] sm:$0xff]  }
  0x53   :  { %5610 = vmatpush3.bf16.msra.mxu0 %v5891_v50  ;;  %v5961_v50 = vld [vmem:[%s8312_s1 + $0x2b0] sm:$0xff]  }
  0x54   :  { %5611 = vmatprep.subr.bf16.mxu0 %v5892_v51  ;;  %v5962_v51 = vld [vmem:[%s8312_s1 + $0x2f8] sm:$0xff]  }
  0x57   :  { %5612 = vmatpush3.bf16.msra.mxu0 %v5893_v52  ;;  %v5963_v52 = vld [vmem:[%s8312_s1 + $0x2b8] sm:$0xff]  }
  0x58   :  { %5613 = vmatprep.subr.bf16.mxu0 %v5894_v53  ;;  %v5967_v53 = vld [vmem:[%s8312_s1 + $0x300] sm:$0xff]  }
  0x5b   :  { %5614 = vmatpush3.bf16.msra.mxu0 %v5895_v54  ;;  %v5964_v54 = vld [vmem:[%s8311_s0 + $0x28] ss:$52 sps:$4 sm:$0xff]  }
  0x5c   :  { %5615 = vmatprep.subr.bf16.mxu0 %v5896_v55  ;;  %v5969_v55 = vld [vmem:[%s8311_s0 + $0x94] ss:$52 sps:$4 sm:$0xff]  }
  0x5f   :  { %5616 = vmatpush3.bf16.msra.mxu0 %v5897_v56  ;;  %v5968_v56 = vld [vmem:[%s8312_s1 + $0x308] sm:$0xff]  }
  0x60   :  { %5629 = vmatprep.subr.bf16.mxu0 %v5901_v57  ;;  %v5972_v57 = vld [vmem:[%s8312_s1 + $0x310] sm:$0xff]  }
  0x62   :  { %1144 = vmatmul.mubr.bf16.vlgmr.msra.gmra.mrb[16].mxu0 %v5898_v58  ;;  %v5971_v58 = vld [vmem:[%s8311_s0 + $0x90] ss:$52 sps:$4 sm:$0xff]  }
  0x63   :  { %5630 = vmatpush3.bf16.msra.mxu0 %v5902_v59  ;;  %1151 = vmatprep.mubr.bf16.mxu0 %v5905_v60  ;;  %v5974_v59 = vld [vmem:[%s8311_s0 + $0x30] ss:$52 sps:$4 sm:$0xff]   ;;  %v5973_v60 = vld [vmem:[%s8312_s1 + $0x318] sm:$0xff]  }
  0x64   :  { %5631 = vmatprep.subr.bf16.mxu0 %v5903_v61  ;;  %v5975_v61 = vld [vmem:[%s8311_s0 + $0x98] ss:$52 sps:$4 sm:$0xff]  }
  0x67   :  { %5632 = vmatpush3.bf16.msra.mxu0 %v5904_v62 }
  0x68   :  { %5633 = vmatprep.subr.bf16.mxu0 %v5908_v63 }
  0x6a   :  { %1152 = vmatmul.mubr.bf16.gmra.mrb[20].mxu0 %v5907_v0 }
  0x6b   :  { %5634 = vmatpush3.bf16.msra.mxu0 %v5909_v1  ;;  %1192 = vmatprep.mubr.bf16.mxu0 %v5922_v2 }
  0x6c   :  { %5635 = vmatprep.subr.bf16.mxu0 %v5910_v3 }
  0x6f   :  { %5636 = vmatpush3.bf16.msra.mxu0 %v5911_v4 }
  0x70   :  { %5637 = vmatprep.subr.bf16.mxu0 %v5912_v5 }
  0x73   :  { %5638 = vmatpush3.bf16.msra.mxu0 %v5913_v6 }
  0x74   :  { %5639 = vmatprep.subr.bf16.mxu0 %v5914_v7 }
  0x77   :  { %5640 = vmatpush3.bf16.msra.mxu0 %v5915_v8 }
  0x78   :  { %5641 = vmatprep.subr.bf16.mxu0 %v5916_v9 }
  0x7b   :  { %5642 = vmatpush3.bf16.msra.mxu0 %v5917_v10 }
  0x7c   :  { %5643 = vmatprep.subr.bf16.mxu0 %v5918_v11 }
  0x7f   :  { %5644 = vmatpush3.bf16.msra.mxu0 %v5919_v12 }
  0x80   :  { %5657 = vmatprep.subr.bf16.mxu0 %v5923_v13 }
  0x82   :  { %1193 = vmatmul.mubr.bf16.vlgmr.msra.gmra.mrb[24].mxu0 %v5920_v14 }
  0x83   :  { %5658 = vmatpush3.bf16.msra.mxu0 %v5924_v15  ;;  %1200 = vmatprep.mubr.bf16.mxu0 %v5927_v16 }
  0x84   :  { %5659 = vmatprep.subr.bf16.mxu0 %v5925_v17 }
  0x87   :  { %5660 = vmatpush3.bf16.msra.mxu0 %v5926_v18 }
  0x88   :  { %5661 = vmatprep.subr.bf16.mxu0 %v5930_v19 }
  0x8a   :  { %1201 = vmatmul.mubr.bf16.gmra.mrb[28].mxu0 %v5929_v20 }
  0x8b   :  { %5662 = vmatpush3.bf16.msra.mxu0 %v5931_v21  ;;  %1241 = vmatprep.mubr.bf16.mxu0 %v5944_v22 }
  0x8c   :  { %5663 = vmatprep.subr.bf16.mxu0 %v5932_v23 }
  0x8f   :  { %5664 = vmatpush3.bf16.msra.mxu0 %v5933_v24 }
  0x90   :  { %5665 = vmatprep.subr.bf16.mxu0 %v5934_v25 }
  0x93   :  { %5666 = vmatpush3.bf16.msra.mxu0 %v5935_v26 }
  0x94   :  { %5667 = vmatprep.subr.bf16.mxu0 %v5936_v27 }
  0x97   :  { %5668 = vmatpush3.bf16.msra.mxu0 %v5937_v28 }
  0x98   :  { %5669 = vmatprep.subr.bf16.mxu0 %v5938_v29 }
  0x9b   :  { %5670 = vmatpush3.bf16.msra.mxu0 %v5939_v30 }
  0x9c   :  { %5671 = vmatprep.subr.bf16.mxu0 %v5940_v31 }
  0x9f   :  { %5672 = vmatpush3.bf16.msra.mxu0 %v5941_v32 }
  0xa0   :  { %5685 = vmatprep.subr.bf16.mxu0 %v5945_v33 }
  0xa2   :  { %1242 = vmatmul.mubr.bf16.vlgmr.msra.gmra.mrb[32].mxu0 %v5942_v34 }
  0xa3   :  { %5686 = vmatpush3.bf16.msra.mxu0 %v5946_v35  ;;  %1249 = vmatprep.mubr.bf16.mxu0 %v5949_v36 }
  0xa4   :  { %5687 = vmatprep.subr.bf16.mxu0 %v5947_v37 }
  0xa7   :  { %5688 = vmatpush3.bf16.msra.mxu0 %v5948_v38 }
  0xa8   :  { %5689 = vmatprep.subr.bf16.mxu0 %v5952_v39 }
  0xaa   :  { %1250 = vmatmul.mubr.bf16.gmra.mrb[36].mxu0 %v5951_v40 }
  0xab   :  { %5690 = vmatpush3.bf16.msra.mxu0 %v5953_v41  ;;  %1290 = vmatprep.mubr.bf16.mxu0 %v5966_v42 }
  0xac   :  { %5691 = vmatprep.subr.bf16.mxu0 %v5954_v43 }
  0xaf   :  { %5692 = vmatpush3.bf16.msra.mxu0 %v5955_v44 }
  0xb0   :  { %5693 = vmatprep.subr.bf16.mxu0 %v5956_v45 }
  0xb3   :  { %5694 = vmatpush3.bf16.msra.mxu0 %v5957_v46 }
  0xb4   :  { %5695 = vmatprep.subr.bf16.mxu0 %v5958_v47 }
  0xb7   :  { %5696 = vmatpush3.bf16.msra.mxu0 %v5959_v48 }
  0xb8   :  { %5697 = vmatprep.subr.bf16.mxu0 %v5960_v49 }
  0xbb   :  { %5698 = vmatpush3.bf16.msra.mxu0 %v5961_v50 }
  0xbc   :  { %5699 = vmatprep.subr.bf16.mxu0 %v5962_v51 }
  0xbf   :  { %5700 = vmatpush3.bf16.msra.mxu0 %v5963_v52 }
  0xc0   :  { %5763 = vmatprep.subr.bf16.mxu0 %v5967_v53 }
  0xc2   :  { %1291 = vmatmul.mubr.bf16.vlgmr.msra.gmra.mrb[40].mxu0 %v5964_v54 }
  0xc3   :  { %5764 = vmatpush3.bf16.msra.mxu0 %v5967_v53  ;;  %1298 = vmatprep.mubr.bf16.mxu0 %v5969_v55 }
  0xc4   :  { %5765 = vmatprep.subr.bf16.mxu0 %v5968_v56 }
  0xc7   :  { %5766 = vmatpush3.bf16.msra.mxu0 %v5968_v56 }
  0xc8   :  { %5767 = vmatprep.subr.bf16.mxu0 %v5972_v57 }
  0xca   :  { %1299 = vmatmul.mubr.bf16.gmra.mrb[44].mxu0 %v5971_v58 }
  0xcb   :  { %5768 = vmatpush3.bf16.msra.mxu0 %v5972_v57  ;;  %5771 = vmatprep.mubr.msk.bf16.mxu0 %vm1006_vm0, %v5974_v59 }
  0xcc   :  { %5769 = vmatprep.subr.bf16.mxu0 %v5973_v60 }
  0xcf   :  { %5770 = vmatpush3.bf16.msra.mxu0 %v5973_v60 }
  0xd2   :  { %5772 = vmatmul.mubr.msk.bf16.vlgmr.msra.gmra.mrb[48].mxu0 %vm1006_vm0, %v5975_v61 }
  0xf5   :  { %v5561_v62 = vpop.f32.mrb[0].mxu0 }
  0xf6   :  { %v5562_v63 = vpop.f32.mrb[1].mxu0 }
  0xf7   :  { %22 = vsyncpa [#allocation5], 0  ;;  %v5563_v0 = vadd.f32 %v5562_v63, %v5561_v62  ;;  %v5564_v1 = vpop.f32.mrb[2].mxu0  ;;  %v5978_v41 = vld [vmem:[%s8315_s4 + $0x84] ss:$8 sps:$4 sm:$0xff]   ;;  %vm3695_vm1 = vcmask 1041408  }
  0xf8   :  { %v5565_v2 = vpop.f32.mrb[3].mxu0  ;;  %v5979_v42 = vld [vmem:[%s8315_s4 + $0x104] ss:$8 sps:$4 sm:$0xff]   ;;  %v5976_v44 = vld [vmem:[%s8315_s4 + $0x80] ss:$8 sps:$4 sm:$0xff]   ;;  %1543 = vmatprep.subr.bf16.mxu0 %v5978_v41 }
  0xf9   :  { %v5566_v3 = vadd.f32 %v5565_v2, %v5564_v1  ;;  %v5981_v45 = vld [vmem:[%s8315_s4 + $0x100] ss:$8 sps:$4 sm:$0xff]   ;;  %1804 = vmatprep.subr.bf16.mxu1 %v5979_v42  ;;  %1544 = vmatpush1.bf16.msra.mxu0 %v5976_v44  ;;  %v5984_v46 = vld [vmem:[%s8315_s4 + $0x94] ss:$8 sps:$4 sm:$0xff]   ;;  %v5982_v48 = vld [vmem:[%s8315_s4 + $0x90] ss:$8 sps:$4 sm:$0xff]  }
  0xfa   :  { %1805 = vmatpush1.bf16.msra.mxu1 %v5981_v45  ;;  %v5985_v47 = vld [vmem:[%s8315_s4 + $0x114] ss:$8 sps:$4 sm:$0xff]   ;;  %v5987_v49 = vld [vmem:[%s8315_s4 + $0x110] ss:$8 sps:$4 sm:$0xff]   ;;  %1545 = vmatprep.subr.bf16.mxu0 %v5984_v46  ;;  %v5990_v50 = vld [vmem:[%s8315_s4 + $0xa4] ss:$8 sps:$4 sm:$0xff]  }
  0xfb   :  { %1806 = vmatprep.subr.bf16.mxu1 %v5985_v47  ;;  %v5991_v51 = vld [vmem:[%s8315_s4 + $0x124] ss:$8 sps:$4 sm:$0xff]   ;;  %v5988_v52 = vld [vmem:[%s8315_s4 + $0xa0] ss:$8 sps:$4 sm:$0xff]   ;;  %v5996_v54 = vld [vmem:[%s8315_s4 + $0xb4] ss:$8 sps:$4 sm:$0xff]  }
  0xfc   :  { %v5993_v53 = vld [vmem:[%s8315_s4 + $0x120] ss:$8 sps:$4 sm:$0xff]   ;;  %v5997_v55 = vld [vmem:[%s8315_s4 + $0x134] ss:$8 sps:$4 sm:$0xff]   ;;  %v5994_v56 = vld [vmem:[%s8315_s4 + $0xb0] ss:$8 sps:$4 sm:$0xff]  }
  0xfd   :  { %v5567_v4 = vpop.f32.mrb[4].mxu0  ;;  %1546 = vmatpush1.bf16.msra.mxu0 %v5982_v48  ;;  %v5999_v57 = vld [vmem:[%s8315_s4 + $0x130] ss:$8 sps:$4 sm:$0xff]   ;;  %v6002_v58 = vld [vmem:[%s8315_s4 + $0xc4] ss:$8 sps:$4 sm:$0xff]  }
  0xfe   :  { %v5568_v5 = vpop.f32.mrb[5].mxu0  ;;  %1807 = vmatpush1.bf16.msra.mxu1 %v5987_v49  ;;  %1547 = vmatprep.subr.bf16.mxu0 %v5990_v50  ;;  %v6003_v59 = vld [vmem:[%s8315_s4 + $0x144] ss:$8 sps:$4 sm:$0xff]   ;;  %v6000_v60 = vld [vmem:[%s8315_s4 + $0xc0] ss:$8 sps:$4 sm:$0xff]  }
  0xff   :  { %v5569_v6 = vadd.f32 %v5568_v5, %v5567_v4  ;;  %v5570_v7 = vpop.f32.mrb[6].mxu0  ;;  %1808 = vmatprep.subr.bf16.mxu1 %v5991_v51  ;;  %v6005_v61 = vld [vmem:[%s8315_s4 + $0x140] ss:$8 sps:$4 sm:$0xff]   ;;  %v6009_v1 = vld [vmem:[%s8315_s4 + $0x154] ss:$8 sps:$4 sm:$0xff]  }
 0x100   :  { %v5571_v8 = vpop.f32.mrb[7].mxu0  ;;  %v6006_v4 = vld [vmem:[%s8315_s4 + $0xd0] ss:$8 sps:$4 sm:$0xff]  }
 0x101   :  { %v5572_v9 = vadd.f32 %v5571_v8, %v5570_v7  ;;  %1548 = vmatpush1.bf16.msra.mxu0 %v5988_v52  ;;  %v6011_v5 = vld [vmem:[%s8315_s4 + $0x150] ss:$8 sps:$4 sm:$0xff]  }
 0x102   :  { %1809 = vmatpush1.bf16.msra.mxu1 %v5993_v53  ;;  %1549 = vmatprep.subr.bf16.mxu0 %v5996_v54 }
 0x103   :  { %1810 = vmatprep.subr.bf16.mxu1 %v5997_v55 }
 0x105   :  { %1550 = vmatpush1.bf16.msra.mxu0 %v5994_v56 }
 0x106   :  { %1811 = vmatpush1.bf16.msra.mxu1 %v5999_v57  ;;  %1551 = vmatprep.subr.bf16.mxu0 %v6002_v58 }
 0x107   :  { %1812 = vmatprep.subr.bf16.mxu1 %v6003_v59 }
 0x109   :  { %1552 = vmatpush1.bf16.msra.mxu0 %v6000_v60 }
 0x10a   :  { %1813 = vmatpush1.bf16.msra.mxu1 %v6005_v61 }
 0x10b   :  { %1814 = vmatprep.subr.bf16.mxu1 %v6009_v1 }
 0x10e   :  { %1815 = vmatpush1.bf16.msra.mxu1 %v6011_v5 }
 0x115   :  { %v5589_v10 = vpop.f32.mrb[8].mxu0 }
 0x116   :  { %v5590_v11 = vpop.f32.mrb[9].mxu0 }
 0x117   :  { %v5591_v12 = vadd.f32 %v5590_v11, %v5589_v10  ;;  %v5592_v13 = vpop.f32.mrb[10].mxu0  ;;  %v6015_v10 = vld [vmem:[%s8315_s4 + $0x164] ss:$8 sps:$4 sm:$0xff]  }
 0x118   :  { %v5593_v14 = vpop.f32.mrb[11].mxu0  ;;  %1816 = vmatprep.subr.bf16.mxu1 %v6015_v10 }
 0x119   :  { %v1097_v15 = vadd.f32 %v5591_v12, %v5563_v0  ;;  %v5594_v16 = vadd.f32 %v5593_v14, %v5592_v13  ;;  %v6008_v0 = vld [vmem:[%s8315_s4 + $0xd4] ss:$8 sps:$4 sm:$0xff]   ;;  %v6012_v12 = vld [vmem:[%s8315_s4 + $0xe0] ss:$8 sps:$4 sm:$0xff]  }
 0x11a   :  { %1553 = vmatprep.subr.bf16.mxu0 %v6008_v0  ;;  %v6017_v13 = vld [vmem:[%s8315_s4 + $0x160] ss:$8 sps:$4 sm:$0xff]   ;;  %v6020_v14 = vld [vmem:[%s8315_s4 + $0xf4] ss:$8 sps:$4 sm:$0xff]  }
 0x11b   :  { %v1100_v17 = vadd.f32 %v5594_v16, %v5566_v3  ;;  %1554 = vmatpush1.bf16.msra.mxu0 %v6006_v4  ;;  %1817 = vmatpush1.bf16.msra.mxu1 %v6017_v13 }
 0x11d   :  { %v5595_v18 = vpop.f32.mrb[12].mxu0 }
 0x11e   :  { %v5596_v19 = vpop.f32.mrb[13].mxu0 }
 0x11f   :  { %v5597_v20 = vadd.f32 %v5596_v19, %v5595_v18  ;;  %v5598_v21 = vpop.f32.mrb[14].mxu0  ;;  %v6023_v18 = vld [vmem:[%s8315_s4 + $0x170] ss:$8 sps:$4 sm:$0xff]  }
 0x120   :  { %v5599_v22 = vpop.f32.mrb[15].mxu0 }
 0x121   :  { %v1105_v23 = vadd.f32 %v5597_v20, %v5569_v6  ;;  %v5600_v24 = vadd.f32 %v5599_v22, %v5598_v21  ;;  %v6026_v20 = vld [vmem:[%s8315_s4 + $0x4] ss:$8 sps:$4 sm:$0xff]  }
 0x122   :  { %v6029_v21 = vld [vmem:[%s8315_s4 + $0x184] ss:$8 sps:$4 sm:$0xff]  }
 0x123   :  { %v1108_v25 = vadd.f32 %v5600_v24, %v5572_v9  ;;  %v6014_v9 = vld [vmem:[%s8315_s4 + $0xe4] ss:$8 sps:$4 sm:$0xff]   ;;  %v6572_v24 = vmov 0  }
 0x124   :  { %1555 = vmatprep.subr.bf16.mxu0 %v6014_v9  ;;  %1575 = vmatprep.mubr.bf16.mxu0 %v6572_v24 }
 0x125   :  { %1556 = vmatpush1.bf16.msra.mxu0 %v6012_v12  ;;  %1836 = vmatprep.mubr.bf16.mxu1 %v6572_v24 }
 0x126   :  { %1557 = vmatprep.subr.bf16.mxu0 %v6020_v14 }
 0x135   :  { %v5617_v26 = vpop.f32.mrb[16].mxu0 }
 0x136   :  { %v5618_v27 = vpop.f32.mrb[17].mxu0 }
 0x137   :  { %v5619_v28 = vadd.f32 %v5618_v27, %v5617_v26  ;;  %v5620_v29 = vpop.f32.mrb[18].mxu0 }
 0x138   :  { %v5621_v30 = vpop.f32.mrb[19].mxu0 }
 0x139   :  { %v1146_v31 = vadd.f32 %v5619_v28, %v1097_v15  ;;  %v5622_v32 = vadd.f32 %v5621_v30, %v5620_v29  ;;  %v6021_v15 = vld [vmem:[%s8315_s4 + $0x174] ss:$8 sps:$4 sm:$0xff]  }
 0x13a   :  { %1818 = vmatprep.subr.bf16.mxu1 %v6021_v15 }
 0x13b   :  { %v7035_v33 = vadd.f32 %v5622_v32, %v1100_v17  ;;  %v6018_v17 = vld [vmem:[%s8315_s4 + $0xf0] ss:$8 sps:$4 sm:$0xff]   ;;  %1819 = vmatpush1.bf16.msra.mxu1 %v6023_v18 }
 0x13c   :  { %1558 = vmatpush1.bf16.msra.mxu0 %v6018_v17  ;;  %1946 = vmatprep.subr.bf16.mxu1 %v6029_v21 }
 0x13d   :  { %v5623_v34 = vpop.f32.mrb[20].mxu0  ;;  %1664 = vmatprep.subr.bf16.mxu0 %v6026_v20 }
 0x13e   :  { %v5624_v35 = vpop.f32.mrb[21].mxu0 }
 0x13f   :  { %v5625_v36 = vadd.f32 %v5624_v35, %v5623_v34  ;;  %v5626_v37 = vpop.f32.mrb[22].mxu0 }
 0x140   :  { %v5627_v38 = vpop.f32.mrb[23].mxu0 }
 0x141   :  { %v7037_v39 = vadd.f32 %v5625_v36, %v1105_v23  ;;  %v5628_v40 = vadd.f32 %v5627_v38, %v5626_v37 }
 0x143   :  { %v7045_v43 = vadd.f32 %v5628_v40, %v1108_v25 }
 0x155   :  { %v5645_v62 = vpop.f32.mrb[24].mxu0 }
 0x156   :  { %v5646_v63 = vpop.f32.mrb[25].mxu0 }
 0x157   :  { %v5647_v2 = vadd.f32 %v5646_v63, %v5645_v62  ;;  %v5648_v3 = vpop.f32.mrb[26].mxu0 }
 0x158   :  { %v5649_v6 = vpop.f32.mrb[27].mxu0 }
 0x159   :  { %v1195_v7 = vadd.f32 %v5647_v2, %v1146_v31  ;;  %v5650_v8 = vadd.f32 %v5649_v6, %v5648_v3 }
 0x15b   :  { %v1198_v11 = vadd.f32 %v5650_v8, %v7035_v33 }
 0x15d   :  { %v5651_v16 = vpop.f32.mrb[28].mxu0 }
 0x15e   :  { %v5652_v19 = vpop.f32.mrb[29].mxu0 }
 0x15f   :  { %v5653_v22 = vadd.f32 %v5652_v19, %v5651_v16  ;;  %v5654_v23 = vpop.f32.mrb[30].mxu0 }
 0x160   :  { %v5655_v25 = vpop.f32.mrb[31].mxu0 }
 0x161   :  { %v1203_v26 = vadd.f32 %v5653_v22, %v7037_v39  ;;  %v5656_v27 = vadd.f32 %v5655_v25, %v5654_v23 }
 0x163   :  { %v1206_v28 = vadd.f32 %v5656_v27, %v7045_v43 }
 0x175   :  { %v5673_v29 = vpop.f32.mrb[32].mxu0 }
 0x176   :  { %v5674_v30 = vpop.f32.mrb[33].mxu0 }
 0x177   :  { %v5675_v31 = vadd.f32 %v5674_v30, %v5673_v29  ;;  %v5676_v32 = vpop.f32.mrb[34].mxu0 }
 0x178   :  { %v5677_v33 = vpop.f32.mrb[35].mxu0 }
 0x179   :  { %v1244_v34 = vadd.f32 %v5675_v31, %v1195_v7  ;;  %v5678_v35 = vadd.f32 %v5677_v33, %v5676_v32 }
 0x17b   :  { %v1247_v36 = vadd.f32 %v5678_v35, %v1198_v11 }
 0x17d   :  { %v5679_v37 = vpop.f32.mrb[36].mxu0 }
 0x17e   :  { %v5680_v38 = vpop.f32.mrb[37].mxu0 }
 0x17f   :  { %v5681_v40 = vadd.f32 %v5680_v38, %v5679_v37  ;;  %v5682_v41 = vpop.f32.mrb[38].mxu0  ;;  %v4949_v38 = vld [vmem:[%s8313_s2] ss:$0 sm:$0xff] }
 0x180   :  { %v5683_v39 = vpop.f32.mrb[39].mxu0 }
 0x181   :  { %v1252_v42 = vadd.f32 %v5681_v40, %v1203_v26  ;;  %v5684_v44 = vadd.f32 %v5683_v39, %v5682_v41 }
 0x183   :  { %v1255_v45 = vadd.f32 %v5684_v44, %v1206_v28  ;;  %v4950_v44 = vld [vmem:[%s8314_s3] ss:$0 sm:$0xff] }
 0x195   :  { %v5701_v46 = vpop.f32.mrb[40].mxu0 }
 0x196   :  { %v5702_v47 = vpop.f32.mrb[41].mxu0 }
 0x197   :  { %v5703_v48 = vadd.f32 %v5702_v47, %v5701_v46  ;;  %v5704_v43 = vpop.f32.mrb[42].mxu0 }
 0x198   :  { %v5705_v49 = vpop.f32.mrb[43].mxu0 }
 0x199   :  { %v5706_v50 = vadd.f32 %v5705_v49, %v5704_v43  ;;  %v1293_v51 = vadd.f32 %v5703_v48, %v1244_v34 }
 0x19b   :  { %v1296_v52 = vadd.f32 %v5706_v50, %v1247_v36 }
 0x19d   :  { %v5707_v53 = vpop.f32.mrb[44].mxu0 }
 0x19e   :  { %v5708_v54 = vpop.f32.mrb[45].mxu0 }
 0x19f   :  { %v5709_v55 = vadd.f32 %v5708_v54, %v5707_v53  ;;  %v5710_v56 = vpop.f32.mrb[46].mxu0 }
 0x1a0   :  { %v5711_v57 = vpop.f32.mrb[47].mxu0 }
 0x1a1   :  { %v5712_v58 = vadd.f32 %v5711_v57, %v5710_v56  ;;  %v1301_v59 = vadd.f32 %v5709_v55, %v1252_v42 }
 0x1a3   :  { %v1304_v60 = vadd.f32 %v5712_v58, %v1255_v45 }
 0x1a5   :  { %v5773_v61 = vpop.f32.mrb[48].mxu0 }
 0x1a6   :  { %v1350_v62 = vadd.f32 %v5773_v61, %v1301_v59  ;;  %v1341_v63 = vpop.f32.mrb[49].mxu0  ;;  %v6027_v61 = vld [vmem:[%s8315_s4 + $0x180] ss:$8 sps:$4 sm:$0xff]  }
 0x1a7   :  { %v1342_v0 = vadd.f32 %v1341_v63, %v1293_v51  ;;  %v5774_v1 = vpop.f32.mrb[50].mxu0 }
 0x1a8   :  { %v1353_v2 = vadd.f32 %v5774_v1, %v1304_v60  ;;  %v1344_v3 = vpop.f32.mrb[51].mxu0  ;;  %v1369_v8 = vmul.f32 %v1350_v62, %v1350_v62  ;;  %v6024_v60 = vld [vmem:[%s8315_s4] ss:$8 sps:$4 sm:$0xff]  }
 0x1a9   :  { %v1345_v4 = vadd.f32 %v1344_v3, %v1296_v52  ;;  %v1367_v5 = vmul.f32 %v1342_v0, %v1342_v0  ;;  %v6035_v3 = vld [vmem:[%s8315_s4 + $0x194] ss:$8 sps:$4 sm:$0xff]  }
 0x1aa   :  { %v1370_v11 = vmul.f32 %v1353_v2, %v1353_v2 }
 0x1ab   :  { %v1358_v6 = vadd.f32 %v1345_v4, %v1342_v0  ;;  %v1368_v7 = vmul.f32 %v1345_v4, %v1345_v4 }
 0x1ad   :  { %v1359_v9 = vadd.f32 %v1358_v6, %v1350_v62  ;;  %v1371_v10 = vadd.f32 %v1368_v7, %v1367_v5  ;;  %v6033_v5 = vld [vmem:[%s8315_s4 + $0x190] ss:$8 sps:$4 sm:$0xff]   ;;  %v6038_v6 = vld [vmem:[%s8315_s4 + $0x24] ss:$8 sps:$4 sm:$0xff]  }
 0x1ae   :  { %v6041_v7 = vld [vmem:[%s8315_s4 + $0x1a4] ss:$8 sps:$4 sm:$0xff]  }
 0x1af   :  { %v1360_v12 = vadd.f32 %v1359_v9, %v1353_v2  ;;  %v1372_v13 = vadd.f32 %v1371_v10, %v1369_v8  ;;  %v6036_v8 = vld [vmem:[%s8315_s4 + $0x20] ss:$8 sps:$4 sm:$0xff]   ;;  %v6044_v10 = vld [vmem:[%s8315_s4 + $0x34] ss:$8 sps:$4 sm:$0xff]  }
 0x1b0   :  { %v6039_v9 = vld [vmem:[%s8315_s4 + $0x1a0] ss:$8 sps:$4 sm:$0xff]  }
 0x1b1   :  { %v1361_v14 = vrot.slane %v1360_v12, 4  ;;  %v1373_v15 = vadd.f32 %v1372_v13, %v1370_v11  ;;  %v6047_v11 = vld [vmem:[%s8315_s4 + $0x1b4] ss:$8 sps:$4 sm:$0xff]   ;;  %v6045_v13 = vld [vmem:[%s8315_s4 + $0x1b0] ss:$8 sps:$4 sm:$0xff]  }
 0x1b3   :  { %v1362_v16 = vadd.f32 %v1361_v14, %v1360_v12  ;;  %v1374_v17 = vrot.slane %v1373_v15, 4  ;;  %v6042_v12 = vld [vmem:[%s8315_s4 + $0x30] ss:$8 sps:$4 sm:$0xff]   ;;  %v6050_v14 = vld [vmem:[%s8315_s4 + $0x44] ss:$8 sps:$4 sm:$0xff]  }
 0x1b5   :  { %v1363_v18 = vrot.slane %v1362_v16, 2  ;;  %v1375_v19 = vadd.f32 %v1374_v17, %v1373_v15  ;;  %v6053_v15 = vld [vmem:[%s8315_s4 + $0x1c4] ss:$8 sps:$4 sm:$0xff]   ;;  %v6051_v17 = vld [vmem:[%s8315_s4 + $0x1c0] ss:$8 sps:$4 sm:$0xff]  }
 0x1b7   :  { %v1364_v20 = vadd.f32 %v1363_v18, %v1362_v16  ;;  %v1376_v21 = vrot.slane %v1375_v19, 2  ;;  %v6048_v16 = vld [vmem:[%s8315_s4 + $0x40] ss:$8 sps:$4 sm:$0xff]   ;;  %v6056_v18 = vld [vmem:[%s8315_s4 + $0x54] ss:$8 sps:$4 sm:$0xff]  }
 0x1b9   :  { %v1365_v22 = vrot.slane %v1364_v20, 1  ;;  %v1377_v23 = vadd.f32 %v1376_v21, %v1375_v19  ;;  %v6059_v19 = vld [vmem:[%s8315_s4 + $0x1d4] ss:$8 sps:$4 sm:$0xff]   ;;  %v6057_v21 = vld [vmem:[%s8315_s4 + $0x1d0] ss:$8 sps:$4 sm:$0xff]  }
 0x1bb   :  { %v1366_v25 = vadd.f32 %v1365_v22, %v1364_v20  ;;  %v1378_v26 = vrot.slane %v1377_v23, 1  ;;  %v6054_v20 = vld [vmem:[%s8315_s4 + $0x50] ss:$8 sps:$4 sm:$0xff]   ;;  %v6062_v22 = vld [vmem:[%s8315_s4 + $0x64] ss:$8 sps:$4 sm:$0xff]  }
 0x1bd   :  { %v1379_v27 = vadd.f32 %v1378_v26, %v1377_v23  ;;  %v1380_v28 = vmul.f32 0.03125, %v1366_v25  ;;  %v6065_v23 = vld [vmem:[%s8315_s4 + $0x1e4] ss:$8 sps:$4 sm:$0xff]   ;;  %v6060_v25 = vld [vmem:[%s8315_s4 + $0x60] ss:$8 sps:$4 sm:$0xff]  }
 0x1be   :  { %v6063_v26 = vld [vmem:[%s8315_s4 + $0x1e0] ss:$8 sps:$4 sm:$0xff]  }
 0x1bf   :  { %v1381_v29 = vmul.f32 0.03125, %v1379_v27  ;;  %v1382_v30 = vmul.f32 %v1380_v28, %v1380_v28  ;;  %v1384_v31 = vsub.f32 %v1342_v0, %v1380_v28  ;;  %v1385_v32 = vsub.f32 %v1345_v4, %v1380_v28  ;;  %v6030_v4 = vld [vmem:[%s8315_s4 + $0x10] ss:$8 sps:$4 sm:$0xff]   ;;  %v6068_v27 = vld [vmem:[%s8315_s4 + $0x74] ss:$8 sps:$4 sm:$0xff]  }
 0x1c0   :  { %v1386_v33 = vsub.f32 %v1350_v62, %v1380_v28  ;;  %v1387_v34 = vsub.f32 %v1353_v2, %v1380_v28  ;;  %v6032_v2 = vld [vmem:[%s8315_s4 + $0x14] ss:$8 sps:$4 sm:$0xff]  }
 0x1c1   :  { %v1383_v35 = vsub.f32 %v1381_v29, %v1382_v30  ;;  %v6071_v28 = vld [vmem:[%s8315_s4 + $0x1f4] ss:$8 sps:$4 sm:$0xff]   ;;  %v6066_v29 = vld [vmem:[%s8315_s4 + $0x70] ss:$8 sps:$4 sm:$0xff]  }
 0x1c2   :  { %v6069_v30 = vld [vmem:[%s8315_s4 + $0x1f0] ss:$8 sps:$4 sm:$0xff]  }
 0x1c3   :  { %v1388_v36 = vadd.f32 1e-05, %v1383_v35 }
 0x1c5   :  { %6488 = vrsqrt.f32 %v1388_v36 }
 0x1cf   :  { %v6489_v37 = vpop.eup %6488 }
 0x1d0   :  { %v1390_v40 = vmul.f32 %v6489_v37, %v1384_v31  ;;  %v1391_v41 = vmul.f32 %v6489_v37, %v1385_v32  ;;  %v1392_v39 = vmul.f32 %v6489_v37, %v1386_v33  ;;  %v1393_v42 = vmul.f32 %v6489_v37, %v1387_v34  ;;  %v6074_v31 = vld [vmem:[%s8315_s4 + $0x204] ss:$8 sps:$4 sm:$0xff]   ;;  %v6072_v34 = vld [vmem:[%s8315_s4 + $0x200] ss:$8 sps:$4 sm:$0xff]   ;;  %v6077_v37 = vld [vmem:[%s8315_s4 + $0x214] ss:$8 sps:$4 sm:$0xff]  }
 0x1d2   :  { %v1400_v45 = vmul.f32 %v4949_v38, %v1390_v40  ;;  %v1401_v46 = vmul.f32 %v4949_v38, %v1391_v41  ;;  %v1402_v47 = vmul.f32 %v4949_v38, %v1392_v39  ;;  %v1403_v48 = vmul.f32 %v4949_v38, %v1393_v42  ;;  %v6075_v38 = vld [vmem:[%s8315_s4 + $0x210] ss:$8 sps:$4 sm:$0xff]   ;;  %v6080_v40 = vld [vmem:[%s8315_s4 + $0x224] ss:$8 sps:$4 sm:$0xff]   ;;  %v6078_v41 = vld [vmem:[%s8315_s4 + $0x220] ss:$8 sps:$4 sm:$0xff]  }
 0x1d3   :  { %v6083_v39 = vld [vmem:[%s8315_s4 + $0x234] ss:$8 sps:$4 sm:$0xff]   ;;  %v6081_v42 = vld [vmem:[%s8315_s4 + $0x230] ss:$8 sps:$4 sm:$0xff]  }
 0x1d4   :  { %v1410_v43 = vadd.f32 %v4950_v44, %v1400_v45  ;;  %v1411_v49 = vadd.f32 %v4950_v44, %v1401_v46  ;;  %v1412_v50 = vadd.f32 %v4950_v44, %v1402_v47  ;;  %v1413_v51 = vadd.f32 %v4950_v44, %v1403_v48  ;;  %v6086_v44 = vld [vmem:[%s8315_s4 + $0x244] ss:$8 sps:$4 sm:$0xff]   ;;  %v6084_v45 = vld [vmem:[%s8315_s4 + $0x240] ss:$8 sps:$4 sm:$0xff]   ;;  %v6089_v46 = vld [vmem:[%s8315_s4 + $0x254] ss:$8 sps:$4 sm:$0xff]  }
 0x1d5   :  { %v6087_v47 = vld [vmem:[%s8315_s4 + $0x250] ss:$8 sps:$4 sm:$0xff]   ;;  %v6092_v48 = vld [vmem:[%s8315_s4 + $0x264] ss:$8 sps:$4 sm:$0xff]  }
 0x1d6   :  { %v1414_v52 = vmul.f32 0.01, %v1410_v43  ;;  %v1415_v53 = vmul.f32 0.01, %v1411_v49  ;;  %v1416_v54 = vmul.f32 0.01, %v1412_v50 }
 0x1d7   :  { %v1417_v55 = vmul.f32 0.01, %v1413_v51 }
 0x1d8   :  { %v1418_v56 = vmax.f32 %v1410_v43, %v1414_v52  ;;  %v1419_v57 = vmax.f32 %v1411_v49, %v1415_v53  ;;  %v1420_v58 = vmax.f32 %v1412_v50, %v1416_v54  ;;  %v6090_v43 = vld [vmem:[%s8315_s4 + $0x260] ss:$8 sps:$4 sm:$0xff]   ;;  %v6095_v49 = vld [vmem:[%s8315_s4 + $0x274] ss:$8 sps:$4 sm:$0xff]   ;;  %v6093_v50 = vld [vmem:[%s8315_s4 + $0x270] ss:$8 sps:$4 sm:$0xff]  }
 0x1d9   :  { %v1421_v59 = vmax.f32 %v1413_v51, %v1417_v55  ;;  %v6098_v51 = vld [vmem:[%s8315_s4 + $0x284] ss:$8 sps:$4 sm:$0xff]   ;;  %v6096_v53 = vld [vmem:[%s8315_s4 + $0x280] ss:$8 sps:$4 sm:$0xff]   ;;  %v6101_v55 = vld [vmem:[%s8315_s4 + $0x294] ss:$8 sps:$4 sm:$0xff]  }
 0x1da   :  { %1422 = vst [vmem:[%s8326_s15] sm:$0xff] %v1418_v56  ;;  %1423 = vst [vmem:[%s8326_s15 + $0x8] sm:$0xff] %v1419_v57  ;;  %v6099_v56 = vld [vmem:[%s8315_s4 + $0x290] ss:$8 sps:$4 sm:$0xff]   ;;  %v6104_v57 = vld [vmem:[%s8315_s4 + $0x2a4] ss:$8 sps:$4 sm:$0xff]  }
 0x1db   :  { %1424 = vst [vmem:[%s8326_s15 + $0x10] sm:$0xff] %v1420_v58  ;;  %1425 = vst [vmem:[%s8326_s15 + $0x18] sm:$0xff] %v1421_v59  ;;  %v6102_v58 = vld [vmem:[%s8315_s4 + $0x2a0] ss:$8 sps:$4 sm:$0xff]   ;;  %v6107_v59 = vld [vmem:[%s8315_s4 + $0x2b4] ss:$8 sps:$4 sm:$0xff]  }
 0x1e1   :  { %v1444_v62 = vld [vmem:[%s8326_s15 + $0x2] sm:$0x3]  ;;  %v1705_v63 = vld [vmem:[%s8326_s15 + $0x4] sm:$0x3]  ;;  %v1426_v32 = vld [vmem:[%s8326_s15] sm:$0x3] }
 0x1e2   :  { %v1445_v0 = vpack.c.bf16 %v1444_v62, %v1444_v62  ;;  %v1706_v1 = vpack.c.bf16 %v1705_v63, %v1705_v63  ;;  %v1847_v33 = vld [vmem:[%s8326_s15 + $0x6] sm:$0x3]  ;;  %v1427_v35 = vpack.c.bf16 %v1426_v32, %v1426_v32  ;;  %v1989_v52 = vld [vmem:[%s8326_s15 + $0x8] sm:$0x3]  ;;  %v6113_v63 = vld [vmem:[%s8315_s4 + $0x2d4] ss:$8 sps:$4 sm:$0xff]  }
 0x1e3   :  { %v1848_v36 = vpack.c.bf16 %v1847_v33, %v1847_v33  ;;  %v1990_v54 = vpack.c.bf16 %v1989_v52, %v1989_v52  ;;  %v6108_v62 = vld [vmem:[%s8315_s4 + $0x2c0] ss:$8 sps:$4 sm:$0xff]   ;;  %v6155_v32 = vld [vmem:[%s8315_s4 + $0x3b4] ss:$8 sps:$4 sm:$0xff]   ;;  %v6153_v33 = vld [vmem:[%s8315_s4 + $0x3b0] ss:$8 sps:$4 sm:$0xff]  }
 0x1e4   :  { %1576 = vmatmul.mubr.bf16.vlgmr.msra.gmra.mrb[52].mxu0 %v1445_v0  ;;  %1837 = vmatmul.mubr.bf16.vlgmr.msra.gmra.mrb[0].mxu1 %v1706_v1  ;;  %v6111_v0 = vld [vmem:[%s8315_s4 + $0x2d0] ss:$8 sps:$4 sm:$0xff]   ;;  %v6116_v1 = vld [vmem:[%s8315_s4 + $0x2e4] ss:$8 sps:$4 sm:$0xff]  }
 0x1e5   :  { %1665 = vmatpush1.bf16.msra.mxu0 %v6024_v60  ;;  %1947 = vmatpush1.bf16.msra.mxu1 %v6027_v61  ;;  %v6105_v60 = vld [vmem:[%s8315_s4 + $0x2b0] ss:$8 sps:$4 sm:$0xff]   ;;  %v6110_v61 = vld [vmem:[%s8315_s4 + $0x2c4] ss:$8 sps:$4 sm:$0xff]  }
 0x1e6   :  { %1666 = vmatprep.subr.bf16.mxu0 %v6032_v2  ;;  %1948 = vmatprep.subr.bf16.mxu1 %v6035_v3  ;;  %v6114_v2 = vld [vmem:[%s8315_s4 + $0x2e0] ss:$8 sps:$4 sm:$0xff]   ;;  %v6119_v3 = vld [vmem:[%s8315_s4 + $0x2f4] ss:$8 sps:$4 sm:$0xff]   ;;  %v6182_v52 = vld [vmem:[%s8315_s4 + $0x444] ss:$8 sps:$4 sm:$0xff]  }
 0x1e7   :  { %1696 = vmatprep.mubr.bf16.mxu0 %v6572_v24  ;;  %1978 = vmatprep.mubr.bf16.mxu1 %v6572_v24 }
 0x1e9   :  { %1667 = vmatpush1.bf16.msra.mxu0 %v6030_v4  ;;  %1949 = vmatpush1.bf16.msra.mxu1 %v6033_v5  ;;  %v6117_v4 = vld [vmem:[%s8315_s4 + $0x2f0] ss:$8 sps:$4 sm:$0xff]   ;;  %v6122_v5 = vld [vmem:[%s8315_s4 + $0x304] ss:$8 sps:$4 sm:$0xff]  }
 0x1ea   :  { %1668 = vmatprep.subr.bf16.mxu0 %v6038_v6  ;;  %1950 = vmatprep.subr.bf16.mxu1 %v6041_v7  ;;  %v2131_v6 = vld [vmem:[%s8326_s15 + $0xa] sm:$0x3] }
 0x1eb   :  { %v6120_v7 = vld [vmem:[%s8315_s4 + $0x300] ss:$8 sps:$4 sm:$0xff]  }
 0x1ed   :  { %1669 = vmatpush1.bf16.msra.mxu0 %v6036_v8  ;;  %1951 = vmatpush1.bf16.msra.mxu1 %v6039_v9  ;;  %v2132_v8 = vpack.c.bf16 %v2131_v6, %v2131_v6  ;;  %v6125_v9 = vld [vmem:[%s8315_s4 + $0x314] ss:$8 sps:$4 sm:$0xff]   ;;  %v6206_v6 = vld [vmem:[%s8315_s4 + $0x4c4] ss:$8 sps:$4 sm:$0xff]  }
 0x1ee   :  { %1670 = vmatprep.subr.bf16.mxu0 %v6044_v10  ;;  %1952 = vmatprep.subr.bf16.mxu1 %v6047_v11  ;;  %v6123_v10 = vld [vmem:[%s8315_s4 + $0x310] ss:$8 sps:$4 sm:$0xff]   ;;  %v6128_v11 = vld [vmem:[%s8315_s4 + $0x324] ss:$8 sps:$4 sm:$0xff]  }
 0x1f1   :  { %1671 = vmatpush1.bf16.msra.mxu0 %v6042_v12  ;;  %1953 = vmatpush1.bf16.msra.mxu1 %v6045_v13  ;;  %v6126_v12 = vld [vmem:[%s8315_s4 + $0x320] ss:$8 sps:$4 sm:$0xff]   ;;  %v6131_v13 = vld [vmem:[%s8315_s4 + $0x334] ss:$8 sps:$4 sm:$0xff]  }
 0x1f2   :  { %1672 = vmatprep.subr.bf16.mxu0 %v6050_v14  ;;  %1954 = vmatprep.subr.bf16.mxu1 %v6053_v15  ;;  %v6129_v14 = vld [vmem:[%s8315_s4 + $0x330] ss:$8 sps:$4 sm:$0xff]   ;;  %v6134_v15 = vld [vmem:[%s8315_s4 + $0x344] ss:$8 sps:$4 sm:$0xff]  }
 0x1f5   :  { %1673 = vmatpush1.bf16.msra.mxu0 %v6048_v16  ;;  %1955 = vmatpush1.bf16.msra.mxu1 %v6051_v17  ;;  %v6132_v16 = vld [vmem:[%s8315_s4 + $0x340] ss:$8 sps:$4 sm:$0xff]   ;;  %v6137_v17 = vld [vmem:[%s8315_s4 + $0x354] ss:$8 sps:$4 sm:$0xff]  }
 0x1f6   :  { %1674 = vmatprep.subr.bf16.mxu0 %v6056_v18  ;;  %1956 = vmatprep.subr.bf16.mxu1 %v6059_v19  ;;  %v6135_v18 = vld [vmem:[%s8315_s4 + $0x350] ss:$8 sps:$4 sm:$0xff]   ;;  %v6140_v19 = vld [vmem:[%s8315_s4 + $0x364] ss:$8 sps:$4 sm:$0xff]  }
 0x1f9   :  { %1675 = vmatpush1.bf16.msra.mxu0 %v6054_v20  ;;  %1957 = vmatpush1.bf16.msra.mxu1 %v6057_v21  ;;  %v6138_v20 = vld [vmem:[%s8315_s4 + $0x360] ss:$8 sps:$4 sm:$0xff]   ;;  %v6143_v21 = vld [vmem:[%s8315_s4 + $0x374] ss:$8 sps:$4 sm:$0xff]  }
 0x1fa   :  { %1676 = vmatprep.subr.bf16.mxu0 %v6062_v22  ;;  %1958 = vmatprep.subr.bf16.mxu1 %v6065_v23  ;;  %v6141_v22 = vld [vmem:[%s8315_s4 + $0x370] ss:$8 sps:$4 sm:$0xff]   ;;  %v6146_v23 = vld [vmem:[%s8315_s4 + $0x384] ss:$8 sps:$4 sm:$0xff]  }
 0x1fd   :  { %1677 = vmatpush1.bf16.msra.mxu0 %v6060_v25  ;;  %1959 = vmatpush1.bf16.msra.mxu1 %v6063_v26  ;;  %v2273_v25 = vld [vmem:[%s8326_s15 + $0xc] sm:$0x3]  ;;  %v6144_v26 = vld [vmem:[%s8315_s4 + $0x380] ss:$8 sps:$4 sm:$0xff]  }
 0x1fe   :  { %1678 = vmatprep.subr.bf16.mxu0 %v6068_v27  ;;  %1960 = vmatprep.subr.bf16.mxu1 %v6071_v28  ;;  %v2274_v27 = vpack.c.bf16 %v2273_v25, %v2273_v25  ;;  %v6149_v28 = vld [vmem:[%s8315_s4 + $0x394] ss:$8 sps:$4 sm:$0xff]   ;;  %v6230_v25 = vld [vmem:[%s8315_s4 + $0x544] ss:$8 sps:$4 sm:$0xff]  }
 0x201   :  { %1679 = vmatpush1.bf16.msra.mxu0 %v6066_v29  ;;  %1961 = vmatpush1.bf16.msra.mxu1 %v6069_v30  ;;  %v6147_v29 = vld [vmem:[%s8315_s4 + $0x390] ss:$8 sps:$4 sm:$0xff]   ;;  %v6152_v30 = vld [vmem:[%s8315_s4 + $0x3a4] ss:$8 sps:$4 sm:$0xff]  }
 0x202   :  { %2088 = vmatprep.subr.bf16.mxu1 %v6074_v31  ;;  %v6150_v31 = vld [vmem:[%s8315_s4 + $0x3a0] ss:$8 sps:$4 sm:$0xff]  }
 0x204   :  { %1697 = vmatmul.mubr.bf16.vlgmr.msra.gmra.mrb[52].mxu0 %v1427_v35  ;;  %1979 = vmatmul.mubr.bf16.vlgmr.msra.gmra.mrb[0].mxu1 %v1848_v36  ;;  %v6156_v35 = vld [vmem:[%s8315_s4 + $0x3c0] ss:$8 sps:$4 sm:$0xff]   ;;  %v6161_v36 = vld [vmem:[%s8315_s4 + $0x3d4] ss:$8 sps:$4 sm:$0xff]  }
 0x205   :  { %2089 = vmatpush1.bf16.msra.mxu1 %v6072_v34  ;;  %2120 = vmatprep.mubr.bf16.mxu1 %v6572_v24  ;;  %v6158_v34 = vld [vmem:[%s8315_s4 + $0x3c4] ss:$8 sps:$4 sm:$0xff]  }
 0x206   :  { %2090 = vmatprep.subr.bf16.mxu1 %v6077_v37  ;;  %v6159_v37 = vld [vmem:[%s8315_s4 + $0x3d0] ss:$8 sps:$4 sm:$0xff]  }
 0x209   :  { %2091 = vmatpush1.bf16.msra.mxu1 %v6075_v38  ;;  %v6164_v38 = vld [vmem:[%s8315_s4 + $0x3e4] ss:$8 sps:$4 sm:$0xff]  }
 0x20a   :  { %2092 = vmatprep.subr.bf16.mxu1 %v6080_v40  ;;  %v6162_v40 = vld [vmem:[%s8315_s4 + $0x3e0] ss:$8 sps:$4 sm:$0xff]  }
 0x20d   :  { %2093 = vmatpush1.bf16.msra.mxu1 %v6078_v41  ;;  %v6167_v41 = vld [vmem:[%s8315_s4 + $0x3f4] ss:$8 sps:$4 sm:$0xff]  }
 0x20e   :  { %2094 = vmatprep.subr.bf16.mxu1 %v6083_v39  ;;  %v6165_v39 = vld [vmem:[%s8315_s4 + $0x3f0] ss:$8 sps:$4 sm:$0xff]  }
 0x211   :  { %2095 = vmatpush1.bf16.msra.mxu1 %v6081_v42  ;;  %v6170_v42 = vld [vmem:[%s8315_s4 + $0x404] ss:$8 sps:$4 sm:$0xff]  }
 0x212   :  { %2096 = vmatprep.subr.bf16.mxu1 %v6086_v44  ;;  %v2415_v44 = vld [vmem:[%s8326_s15 + $0xe] sm:$0x3] }
 0x215   :  { %2097 = vmatpush1.bf16.msra.mxu1 %v6084_v45  ;;  %v6168_v45 = vld [vmem:[%s8315_s4 + $0x400] ss:$8 sps:$4 sm:$0xff]  }
 0x216   :  { %2098 = vmatprep.subr.bf16.mxu1 %v6089_v46  ;;  %v2416_v46 = vpack.c.bf16 %v2415_v44, %v2415_v44  ;;  %v6248_v44 = vld [vmem:[%s8315_s4 + $0x5a4] ss:$8 sps:$4 sm:$0xff]  }
 0x219   :  { %2099 = vmatpush1.bf16.msra.mxu1 %v6087_v47  ;;  %v6173_v47 = vld [vmem:[%s8315_s4 + $0x414] ss:$8 sps:$4 sm:$0xff]  }
 0x21a   :  { %2100 = vmatprep.subr.bf16.mxu1 %v6092_v48  ;;  %v6171_v48 = vld [vmem:[%s8315_s4 + $0x410] ss:$8 sps:$4 sm:$0xff]  }
 0x21d   :  { %2101 = vmatpush1.bf16.msra.mxu1 %v6090_v43  ;;  %v6176_v43 = vld [vmem:[%s8315_s4 + $0x424] ss:$8 sps:$4 sm:$0xff]  }
 0x21e   :  { %2102 = vmatprep.subr.bf16.mxu1 %v6095_v49  ;;  %v6174_v49 = vld [vmem:[%s8315_s4 + $0x420] ss:$8 sps:$4 sm:$0xff]  }
 0x221   :  { %2103 = vmatpush1.bf16.msra.mxu1 %v6093_v50  ;;  %v6179_v50 = vld [vmem:[%s8315_s4 + $0x434] ss:$8 sps:$4 sm:$0xff]  }
 0x222   :  { %2230 = vmatprep.subr.bf16.mxu1 %v6098_v51  ;;  %v6177_v51 = vld [vmem:[%s8315_s4 + $0x430] ss:$8 sps:$4 sm:$0xff]  }
 0x224   :  { %2121 = vmatmul.mubr.bf16.vlgmr.msra.gmra.mrb[0].mxu1 %v1990_v54  ;;  %v6185_v54 = vld [vmem:[%s8315_s4 + $0x454] ss:$8 sps:$4 sm:$0xff]  }
 0x225   :  { %2231 = vmatpush1.bf16.msra.mxu1 %v6096_v53  ;;  %2262 = vmatprep.mubr.bf16.mxu1 %v6572_v24  ;;  %v6180_v53 = vld [vmem:[%s8315_s4 + $0x440] ss:$8 sps:$4 sm:$0xff]  }
 0x226   :  { %2232 = vmatprep.subr.bf16.mxu1 %v6101_v55  ;;  %v6183_v55 = vld [vmem:[%s8315_s4 + $0x450] ss:$8 sps:$4 sm:$0xff]  }
 0x229   :  { %2233 = vmatpush1.bf16.msra.mxu1 %v6099_v56  ;;  %v6188_v56 = vld [vmem:[%s8315_s4 + $0x464] ss:$8 sps:$4 sm:$0xff]  }
 0x22a   :  { %2234 = vmatprep.subr.bf16.mxu1 %v6104_v57  ;;  %v6186_v57 = vld [vmem:[%s8315_s4 + $0x460] ss:$8 sps:$4 sm:$0xff]  }
 0x22d   :  { %2235 = vmatpush1.bf16.msra.mxu1 %v6102_v58  ;;  %v6191_v58 = vld [vmem:[%s8315_s4 + $0x474] ss:$8 sps:$4 sm:$0xff]  }
 0x22e   :  { %2236 = vmatprep.subr.bf16.mxu1 %v6107_v59  ;;  %v6189_v59 = vld [vmem:[%s8315_s4 + $0x470] ss:$8 sps:$4 sm:$0xff]  }
 0x231   :  { %2237 = vmatpush1.bf16.msra.mxu1 %v6105_v60  ;;  %v6194_v60 = vld [vmem:[%s8315_s4 + $0x484] ss:$8 sps:$4 sm:$0xff]  }
 0x232   :  { %2238 = vmatprep.subr.bf16.mxu1 %v6110_v61  ;;  %v2557_v61 = vld [vmem:[%s8326_s15 + $0x10] sm:$0x3] }
 0x235   :  { %2239 = vmatpush1.bf16.msra.mxu1 %v6108_v62  ;;  %v6192_v62 = vld [vmem:[%s8315_s4 + $0x480] ss:$8 sps:$4 sm:$0xff]  }
 0x236   :  { %2240 = vmatprep.subr.bf16.mxu1 %v6113_v63  ;;  %v2558_v63 = vpack.c.bf16 %v2557_v61, %v2557_v61  ;;  %v6362_v61 = vld [vmem:[%s8318_s7 + $0x4] ss:$16 sps:$4 sm:$0xff]  }
 0x237   :  { %4170 = vmatprep.subr.bf16.mxu0 %v6362_v61  ;;  %v6339_v61 = vld [vmem:[%s8315_s4 + $0x790] ss:$8 sps:$4 sm:$0xff]  }
 0x239   :  { %2241 = vmatpush1.bf16.msra.mxu1 %v6111_v0  ;;  %v6197_v0 = vld [vmem:[%s8315_s4 + $0x494] ss:$8 sps:$4 sm:$0xff]  }
 0x23a   :  { %2242 = vmatprep.subr.bf16.mxu1 %v6116_v1  ;;  %v6195_v1 = vld [vmem:[%s8315_s4 + $0x490] ss:$8 sps:$4 sm:$0xff]  }
 0x23d   :  { %2243 = vmatpush1.bf16.msra.mxu1 %v6114_v2  ;;  %v6200_v2 = vld [vmem:[%s8315_s4 + $0x4a4] ss:$8 sps:$4 sm:$0xff]  }
 0x23e   :  { %2244 = vmatprep.subr.bf16.mxu1 %v6119_v3  ;;  %v6198_v3 = vld [vmem:[%s8315_s4 + $0x4a0] ss:$8 sps:$4 sm:$0xff]  }
 0x241   :  { %2245 = vmatpush1.bf16.msra.mxu1 %v6117_v4  ;;  %v6203_v4 = vld [vmem:[%s8315_s4 + $0x4b4] ss:$8 sps:$4 sm:$0xff]  }
 0x242   :  { %2372 = vmatprep.subr.bf16.mxu1 %v6122_v5  ;;  %v6201_v5 = vld [vmem:[%s8315_s4 + $0x4b0] ss:$8 sps:$4 sm:$0xff]  }
 0x244   :  { %2263 = vmatmul.mubr.bf16.vlgmr.msra.gmra.mrb[0].mxu1 %v2132_v8  ;;  %v6209_v8 = vld [vmem:[%s8315_s4 + $0x4d4] ss:$8 sps:$4 sm:$0xff]  }
 0x245   :  { %2373 = vmatpush1.bf16.msra.mxu1 %v6120_v7  ;;  %2404 = vmatprep.mubr.bf16.mxu1 %v6572_v24  ;;  %v6204_v7 = vld [vmem:[%s8315_s4 + $0x4c0] ss:$8 sps:$4 sm:$0xff]  }
 0x246   :  { %2374 = vmatprep.subr.bf16.mxu1 %v6125_v9  ;;  %v6207_v9 = vld [vmem:[%s8315_s4 + $0x4d0] ss:$8 sps:$4 sm:$0xff]  }
 0x249   :  { %2375 = vmatpush1.bf16.msra.mxu1 %v6123_v10  ;;  %v6212_v10 = vld [vmem:[%s8315_s4 + $0x4e4] ss:$8 sps:$4 sm:$0xff]  }
 0x24a   :  { %2376 = vmatprep.subr.bf16.mxu1 %v6128_v11  ;;  %v6210_v11 = vld [vmem:[%s8315_s4 + $0x4e0] ss:$8 sps:$4 sm:$0xff]  }
 0x24d   :  { %2377 = vmatpush1.bf16.msra.mxu1 %v6126_v12  ;;  %v6215_v12 = vld [vmem:[%s8315_s4 + $0x4f4] ss:$8 sps:$4 sm:$0xff]  }
 0x24e   :  { %2378 = vmatprep.subr.bf16.mxu1 %v6131_v13  ;;  %v6213_v13 = vld [vmem:[%s8315_s4 + $0x4f0] ss:$8 sps:$4 sm:$0xff]  }
 0x251   :  { %2379 = vmatpush1.bf16.msra.mxu1 %v6129_v14  ;;  %v6218_v14 = vld [vmem:[%s8315_s4 + $0x504] ss:$8 sps:$4 sm:$0xff]  }
 0x252   :  { %2380 = vmatprep.subr.bf16.mxu1 %v6134_v15  ;;  %v2699_v15 = vld [vmem:[%s8326_s15 + $0x12] sm:$0x3] }
 0x255   :  { %2381 = vmatpush1.bf16.msra.mxu1 %v6132_v16  ;;  %v6216_v16 = vld [vmem:[%s8315_s4 + $0x500] ss:$8 sps:$4 sm:$0xff]  }
 0x256   :  { %2382 = vmatprep.subr.bf16.mxu1 %v6137_v17  ;;  %v2700_v17 = vpack.c.bf16 %v2699_v15, %v2699_v15  ;;  %v6287_v15 = vld [vmem:[%s8315_s4 + $0x674] ss:$8 sps:$4 sm:$0xff]  }
 0x259   :  { %2383 = vmatpush1.bf16.msra.mxu1 %v6135_v18  ;;  %v6221_v18 = vld [vmem:[%s8315_s4 + $0x514] ss:$8 sps:$4 sm:$0xff]  }
 0x25a   :  { %2384 = vmatprep.subr.bf16.mxu1 %v6140_v19  ;;  %v6219_v19 = vld [vmem:[%s8315_s4 + $0x510] ss:$8 sps:$4 sm:$0xff]  }
 0x25d   :  { %2385 = vmatpush1.bf16.msra.mxu1 %v6138_v20  ;;  %v6224_v20 = vld [vmem:[%s8315_s4 + $0x524] ss:$8 sps:$4 sm:$0xff]  }
 0x25e   :  { %2386 = vmatprep.subr.bf16.mxu1 %v6143_v21  ;;  %v6222_v21 = vld [vmem:[%s8315_s4 + $0x520] ss:$8 sps:$4 sm:$0xff]  }
 0x261   :  { %2387 = vmatpush1.bf16.msra.mxu1 %v6141_v22  ;;  %v6227_v22 = vld [vmem:[%s8315_s4 + $0x534] ss:$8 sps:$4 sm:$0xff]  }
 0x262   :  { %2514 = vmatprep.subr.bf16.mxu1 %v6146_v23  ;;  %v6225_v23 = vld [vmem:[%s8315_s4 + $0x530] ss:$8 sps:$4 sm:$0xff]  }
 0x264   :  { %2405 = vmatmul.mubr.bf16.vlgmr.msra.gmra.mrb[0].mxu1 %v2274_v27  ;;  %v6233_v27 = vld [vmem:[%s8315_s4 + $0x554] ss:$8 sps:$4 sm:$0xff]  }
 0x265   :  { %2515 = vmatpush1.bf16.msra.mxu1 %v6144_v26  ;;  %2546 = vmatprep.mubr.bf16.mxu1 %v6572_v24  ;;  %v6228_v26 = vld [vmem:[%s8315_s4 + $0x540] ss:$8 sps:$4 sm:$0xff]  }
 0x266   :  { %2516 = vmatprep.subr.bf16.mxu1 %v6149_v28  ;;  %v6231_v28 = vld [vmem:[%s8315_s4 + $0x550] ss:$8 sps:$4 sm:$0xff]  }
 0x269   :  { %2517 = vmatpush1.bf16.msra.mxu1 %v6147_v29  ;;  %v6236_v29 = vld [vmem:[%s8315_s4 + $0x564] ss:$8 sps:$4 sm:$0xff]  }
 0x26a   :  { %2518 = vmatprep.subr.bf16.mxu1 %v6152_v30 }
 0x26d   :  { %2519 = vmatpush1.bf16.msra.mxu1 %v6150_v31 }
 0x26e   :  { %2520 = vmatprep.subr.bf16.mxu1 %v6155_v32 }
 0x271   :  { %2521 = vmatpush1.bf16.msra.mxu1 %v6153_v33  ;;  %v6234_v33 = vld [vmem:[%s8315_s4 + $0x560] ss:$8 sps:$4 sm:$0xff]  }
 0x272   :  { %2522 = vmatprep.subr.bf16.mxu1 %v6158_v34 }
 0x275   :  { %2523 = vmatpush1.bf16.msra.mxu1 %v6156_v35  ;;  %v6239_v35 = vld [vmem:[%s8315_s4 + $0x574] ss:$8 sps:$4 sm:$0xff]  }
 0x276   :  { %2524 = vmatprep.subr.bf16.mxu1 %v6161_v36  ;;  %v6237_v36 = vld [vmem:[%s8315_s4 + $0x570] ss:$8 sps:$4 sm:$0xff]  }
 0x279   :  { %2525 = vmatpush1.bf16.msra.mxu1 %v6159_v37  ;;  %v6242_v37 = vld [vmem:[%s8315_s4 + $0x584] ss:$8 sps:$4 sm:$0xff]  }
 0x27a   :  { %2526 = vmatprep.subr.bf16.mxu1 %v6164_v38  ;;  %v2841_v38 = vld [vmem:[%s8326_s15 + $0x14] sm:$0x3] }
 0x27d   :  { %2527 = vmatpush1.bf16.msra.mxu1 %v6162_v40  ;;  %v6240_v40 = vld [vmem:[%s8315_s4 + $0x580] ss:$8 sps:$4 sm:$0xff]  }
 0x27e   :  { %2528 = vmatprep.subr.bf16.mxu1 %v6167_v41  ;;  %v2842_v41 = vpack.c.bf16 %v2841_v38, %v2841_v38  ;;  %v6314_v38 = vld [vmem:[%s8315_s4 + $0x704] ss:$8 sps:$4 sm:$0xff]  }
 0x281   :  { %2529 = vmatpush1.bf16.msra.mxu1 %v6165_v39  ;;  %v6245_v39 = vld [vmem:[%s8315_s4 + $0x594] ss:$8 sps:$4 sm:$0xff]  }
 0x282   :  { %2656 = vmatprep.subr.bf16.mxu1 %v6170_v42  ;;  %v6243_v42 = vld [vmem:[%s8315_s4 + $0x590] ss:$8 sps:$4 sm:$0xff]  }
 0x284   :  { %2547 = vmatmul.mubr.bf16.vlgmr.msra.gmra.mrb[0].mxu1 %v2416_v46  ;;  %v6251_v46 = vld [vmem:[%s8315_s4 + $0x5b4] ss:$8 sps:$4 sm:$0xff]  }
 0x285   :  { %2657 = vmatpush1.bf16.msra.mxu1 %v6168_v45  ;;  %2688 = vmatprep.mubr.bf16.mxu1 %v6572_v24  ;;  %v6246_v45 = vld [vmem:[%s8315_s4 + $0x5a0] ss:$8 sps:$4 sm:$0xff]  }
 0x286   :  { %2658 = vmatprep.subr.bf16.mxu1 %v6173_v47  ;;  %v6249_v47 = vld [vmem:[%s8315_s4 + $0x5b0] ss:$8 sps:$4 sm:$0xff]  }
 0x289   :  { %2659 = vmatpush1.bf16.msra.mxu1 %v6171_v48  ;;  %v6254_v48 = vld [vmem:[%s8315_s4 + $0x5c4] ss:$8 sps:$4 sm:$0xff]  }
 0x28a   :  { %2660 = vmatprep.subr.bf16.mxu1 %v6176_v43  ;;  %v6252_v43 = vld [vmem:[%s8315_s4 + $0x5c0] ss:$8 sps:$4 sm:$0xff]  }
 0x28d   :  { %2661 = vmatpush1.bf16.msra.mxu1 %v6174_v49  ;;  %v6257_v49 = vld [vmem:[%s8315_s4 + $0x5d4] ss:$8 sps:$4 sm:$0xff]  }
 0x28e   :  { %2662 = vmatprep.subr.bf16.mxu1 %v6179_v50  ;;  %v6255_v50 = vld [vmem:[%s8315_s4 + $0x5d0] ss:$8 sps:$4 sm:$0xff]  }
 0x291   :  { %2663 = vmatpush1.bf16.msra.mxu1 %v6177_v51  ;;  %v6260_v51 = vld [vmem:[%s8315_s4 + $0x5e4] ss:$8 sps:$4 sm:$0xff]  }
 0x292   :  { %2664 = vmatprep.subr.bf16.mxu1 %v6182_v52  ;;  %v6258_v52 = vld [vmem:[%s8315_s4 + $0x5e0] ss:$8 sps:$4 sm:$0xff]  }
 0x295   :  { %2665 = vmatpush1.bf16.msra.mxu1 %v6180_v53  ;;  %v6263_v53 = vld [vmem:[%s8315_s4 + $0x5f4] ss:$8 sps:$4 sm:$0xff]  }
 0x296   :  { %2666 = vmatprep.subr.bf16.mxu1 %v6185_v54  ;;  %v6261_v54 = vld [vmem:[%s8315_s4 + $0x5f0] ss:$8 sps:$4 sm:$0xff]  }
 0x299   :  { %2667 = vmatpush1.bf16.msra.mxu1 %v6183_v55  ;;  %v6266_v55 = vld [vmem:[%s8315_s4 + $0x604] ss:$8 sps:$4 sm:$0xff]  }
 0x29a   :  { %2668 = vmatprep.subr.bf16.mxu1 %v6188_v56  ;;  %v2983_v56 = vld [vmem:[%s8326_s15 + $0x16] sm:$0x3] }
 0x29d   :  { %2669 = vmatpush1.bf16.msra.mxu1 %v6186_v57  ;;  %v6264_v57 = vld [vmem:[%s8315_s4 + $0x600] ss:$8 sps:$4 sm:$0xff]  }
 0x29e   :  { %2670 = vmatprep.subr.bf16.mxu1 %v6191_v58  ;;  %v2984_v58 = vpack.c.bf16 %v2983_v56, %v2983_v56  ;;  %v6338_v56 = vld [vmem:[%s8315_s4 + $0x784] ss:$8 sps:$4 sm:$0xff]  }
 0x2a1   :  { %2671 = vmatpush1.bf16.msra.mxu1 %v6189_v59  ;;  %v6269_v59 = vld [vmem:[%s8315_s4 + $0x614] ss:$8 sps:$4 sm:$0xff]  }
 0x2a2   :  { %2798 = vmatprep.subr.bf16.mxu1 %v6194_v60  ;;  %v6360_v60 = vld [vmem:[%s8318_s7] ss:$16 sps:$4 sm:$0xff]  }
 0x2a3   :  { %4171 = vmatpush1.bf16.msra.mxu0 %v6360_v60  ;;  %v6341_v60 = vld [vmem:[%s8315_s4 + $0x794] ss:$8 sps:$4 sm:$0xff]  }
 0x2a4   :  { %2689 = vmatmul.mubr.bf16.vlgmr.msra.gmra.mrb[0].mxu1 %v2558_v63  ;;  %v6365_v63 = vld [vmem:[%s8318_s7 + $0x24] ss:$16 sps:$4 sm:$0xff]  }
 0x2a5   :  { %2799 = vmatpush1.bf16.msra.mxu1 %v6192_v62  ;;  %2830 = vmatprep.mubr.bf16.mxu1 %v6572_v24  ;;  %v6267_v62 = vld [vmem:[%s8315_s4 + $0x610] ss:$8 sps:$4 sm:$0xff]  }
 0x2a6   :  { %2800 = vmatprep.subr.bf16.mxu1 %v6197_v0  ;;  %v6272_v0 = vld [vmem:[%s8315_s4 + $0x624] ss:$8 sps:$4 sm:$0xff]   ;;  %4172 = vmatprep.subr.bf16.mxu0 %v6365_v63  ;;  %v6342_v63 = vld [vmem:[%s8315_s4 + $0x7a0] ss:$8 sps:$4 sm:$0xff]  }
 0x2a9   :  { %2801 = vmatpush1.bf16.msra.mxu1 %v6195_v1  ;;  %v6363_v1 = vld [vmem:[%s8318_s7 + $0x20] ss:$16 sps:$4 sm:$0xff]  }
 0x2aa   :  { %2802 = vmatprep.subr.bf16.mxu1 %v6200_v2  ;;  %v6368_v2 = vld [vmem:[%s8318_s7 + $0x44] ss:$16 sps:$4 sm:$0xff]   ;;  %4173 = vmatpush1.bf16.msra.mxu0 %v6363_v1 }
 0x2ab   :  { %4174 = vmatprep.subr.bf16.mxu0 %v6368_v2  ;;  %v6350_v1 = vld [vmem:[%s8315_s4 + $0x7c4] ss:$8 sps:$4 sm:$0xff]   ;;  %v6348_v2 = vld [vmem:[%s8315_s4 + $0x7c0] ss:$8 sps:$4 sm:$0xff]  }
 0x2ad   :  { %2803 = vmatpush1.bf16.msra.mxu1 %v6198_v3  ;;  %v6270_v3 = vld [vmem:[%s8315_s4 + $0x620] ss:$8 sps:$4 sm:$0xff]  }
 0x2ae   :  { %2804 = vmatprep.subr.bf16.mxu1 %v6203_v4  ;;  %v6275_v4 = vld [vmem:[%s8315_s4 + $0x634] ss:$8 sps:$4 sm:$0xff]  }
 0x2b1   :  { %2805 = vmatpush1.bf16.msra.mxu1 %v6201_v5  ;;  %v6366_v5 = vld [vmem:[%s8318_s7 + $0x40] ss:$16 sps:$4 sm:$0xff]  }
 0x2b2   :  { %2806 = vmatprep.subr.bf16.mxu1 %v6206_v6  ;;  %v6371_v6 = vld [vmem:[%s8318_s7 + $0x64] ss:$16 sps:$4 sm:$0xff]   ;;  %4175 = vmatpush1.bf16.msra.mxu0 %v6366_v5 }
 0x2b3   :  { %4176 = vmatprep.subr.bf16.mxu0 %v6371_v6  ;;  %v6356_v5 = vld [vmem:[%s8315_s4 + $0x7e4] ss:$8 sps:$4 sm:$0xff]   ;;  %v6354_v6 = vld [vmem:[%s8315_s4 + $0x7e0] ss:$8 sps:$4 sm:$0xff]  }
 0x2b5   :  { %2807 = vmatpush1.bf16.msra.mxu1 %v6204_v7  ;;  %v6273_v7 = vld [vmem:[%s8315_s4 + $0x630] ss:$8 sps:$4 sm:$0xff]  }
 0x2b6   :  { %2808 = vmatprep.subr.bf16.mxu1 %v6209_v8  ;;  %v6278_v8 = vld [vmem:[%s8315_s4 + $0x644] ss:$8 sps:$4 sm:$0xff]  }
 0x2b9   :  { %2809 = vmatpush1.bf16.msra.mxu1 %v6207_v9  ;;  %v6369_v9 = vld [vmem:[%s8318_s7 + $0x60] ss:$16 sps:$4 sm:$0xff]  }
 0x2ba   :  { %2810 = vmatprep.subr.bf16.mxu1 %v6212_v10  ;;  %v6276_v10 = vld [vmem:[%s8315_s4 + $0x640] ss:$8 sps:$4 sm:$0xff]   ;;  %4177 = vmatpush1.bf16.msra.mxu0 %v6369_v9  ;;  %v3551_v9 = vld [vmem:[%s8326_s15 + $0x1e] sm:$0x3] }
 0x2bd   :  { %2811 = vmatpush1.bf16.msra.mxu1 %v6210_v11  ;;  %v6281_v11 = vld [vmem:[%s8315_s4 + $0x654] ss:$8 sps:$4 sm:$0xff]  }
 0x2be   :  { %2812 = vmatprep.subr.bf16.mxu1 %v6215_v12  ;;  %v6279_v12 = vld [vmem:[%s8315_s4 + $0x650] ss:$8 sps:$4 sm:$0xff]  }
 0x2c1   :  { %2813 = vmatpush1.bf16.msra.mxu1 %v6213_v13  ;;  %v6284_v13 = vld [vmem:[%s8315_s4 + $0x664] ss:$8 sps:$4 sm:$0xff]  }
 0x2c2   :  { %2940 = vmatprep.subr.bf16.mxu1 %v6218_v14  ;;  %v6282_v14 = vld [vmem:[%s8315_s4 + $0x660] ss:$8 sps:$4 sm:$0xff]  }
 0x2c4   :  { %2831 = vmatmul.mubr.bf16.vlgmr.msra.gmra.mrb[0].mxu1 %v2700_v17  ;;  %v6290_v17 = vld [vmem:[%s8315_s4 + $0x684] ss:$8 sps:$4 sm:$0xff]  }
 0x2c5   :  { %2941 = vmatpush1.bf16.msra.mxu1 %v6216_v16  ;;  %2972 = vmatprep.mubr.bf16.mxu1 %v6572_v24  ;;  %v6285_v16 = vld [vmem:[%s8315_s4 + $0x670] ss:$8 sps:$4 sm:$0xff]  }
 0x2c6   :  { %2942 = vmatprep.subr.bf16.mxu1 %v6221_v18  ;;  %v3125_v18 = vld [vmem:[%s8326_s15 + $0x18] sm:$0x3] }
 0x2c9   :  { %2943 = vmatpush1.bf16.msra.mxu1 %v6219_v19  ;;  %v6288_v19 = vld [vmem:[%s8315_s4 + $0x680] ss:$8 sps:$4 sm:$0xff]  }
 0x2ca   :  { %2944 = vmatprep.subr.bf16.mxu1 %v6224_v20  ;;  %v3126_v20 = vpack.c.bf16 %v3125_v18, %v3125_v18  ;;  %v6381_v18 = vld [vmem:[%s8318_s7 + $0xe0] ss:$16 sps:$4 sm:$0xff]  }
 0x2cd   :  { %2945 = vmatpush1.bf16.msra.mxu1 %v6222_v21  ;;  %v6293_v21 = vld [vmem:[%s8315_s4 + $0x694] ss:$8 sps:$4 sm:$0xff]  }
 0x2ce   :  { %2946 = vmatprep.subr.bf16.mxu1 %v6227_v22  ;;  %v6291_v22 = vld [vmem:[%s8315_s4 + $0x690] ss:$8 sps:$4 sm:$0xff]  }
 0x2d1   :  { %2947 = vmatpush1.bf16.msra.mxu1 %v6225_v23  ;;  %v6296_v23 = vld [vmem:[%s8315_s4 + $0x6a4] ss:$8 sps:$4 sm:$0xff]  }
 0x2d2   :  { %2948 = vmatprep.subr.bf16.mxu1 %v6230_v25  ;;  %v6294_v25 = vld [vmem:[%s8315_s4 + $0x6a0] ss:$8 sps:$4 sm:$0xff]  }
 0x2d5   :  { %2949 = vmatpush1.bf16.msra.mxu1 %v6228_v26  ;;  %v6299_v26 = vld [vmem:[%s8315_s4 + $0x6b4] ss:$8 sps:$4 sm:$0xff]  }
 0x2d6   :  { %2950 = vmatprep.subr.bf16.mxu1 %v6233_v27  ;;  %v6297_v27 = vld [vmem:[%s8315_s4 + $0x6b0] ss:$8 sps:$4 sm:$0xff]  }
 0x2d7   :  { %v7622_v30 = vpop.f32.mrb[52].mxu0 }
 0x2d8   :  { %v7624_v31 = vpop.f32.mrb[53].mxu0 }
 0x2d9   :  { %v1702_v32 = vpop.f32.mrb[54].mxu0  ;;  %2951 = vmatpush1.bf16.msra.mxu1 %v6231_v28  ;;  %v6302_v28 = vld [vmem:[%s8315_s4 + $0x6c4] ss:$8 sps:$4 sm:$0xff]  }
 0x2da   :  { %v1703_v34 = vpop.f32.mrb[55].mxu0  ;;  %2952 = vmatprep.subr.bf16.mxu1 %v6236_v29  ;;  %v6300_v29 = vld [vmem:[%s8315_s4 + $0x6c0] ss:$8 sps:$4 sm:$0xff]   ;;  %v6305_v32 = vld [vmem:[%s8315_s4 + $0x6d4] ss:$8 sps:$4 sm:$0xff]  }
 0x2db   :  { %v6308_v34 = vld [vmem:[%s8315_s4 + $0x6e4] ss:$8 sps:$4 sm:$0xff]  }
 0x2dd   :  { %2953 = vmatpush1.bf16.msra.mxu1 %v6234_v33  ;;  %v6303_v33 = vld [vmem:[%s8315_s4 + $0x6d0] ss:$8 sps:$4 sm:$0xff]  }
 0x2de   :  { %2954 = vmatprep.subr.bf16.mxu1 %v6239_v35  ;;  %v6306_v35 = vld [vmem:[%s8315_s4 + $0x6e0] ss:$8 sps:$4 sm:$0xff]  }
 0x2e1   :  { %2955 = vmatpush1.bf16.msra.mxu1 %v6237_v36  ;;  %v6311_v36 = vld [vmem:[%s8315_s4 + $0x6f4] ss:$8 sps:$4 sm:$0xff]  }
 0x2e2   :  { %3082 = vmatprep.subr.bf16.mxu1 %v6242_v37  ;;  %v6309_v37 = vld [vmem:[%s8315_s4 + $0x6f0] ss:$8 sps:$4 sm:$0xff]  }
 0x2e4   :  { %2973 = vmatmul.mubr.bf16.vlgmr.msra.gmra.mrb[0].mxu1 %v2842_v41  ;;  %v6312_v41 = vld [vmem:[%s8315_s4 + $0x700] ss:$8 sps:$4 sm:$0xff]  }
 0x2e5   :  { %3083 = vmatpush1.bf16.msra.mxu1 %v6240_v40  ;;  %3114 = vmatprep.mubr.bf16.mxu1 %v6572_v24  ;;  %v3267_v40 = vld [vmem:[%s8326_s15 + $0x1a] sm:$0x3] }
 0x2e6   :  { %3084 = vmatprep.subr.bf16.mxu1 %v6245_v39  ;;  %v3268_v39 = vpack.c.bf16 %v3267_v40, %v3267_v40 }
 0x2e9   :  { %3085 = vmatpush1.bf16.msra.mxu1 %v6243_v42  ;;  %v6317_v42 = vld [vmem:[%s8315_s4 + $0x714] ss:$8 sps:$4 sm:$0xff]  }
 0x2ea   :  { %3086 = vmatprep.subr.bf16.mxu1 %v6248_v44  ;;  %v6315_v44 = vld [vmem:[%s8315_s4 + $0x710] ss:$8 sps:$4 sm:$0xff]  }
 0x2ed   :  { %3087 = vmatpush1.bf16.msra.mxu1 %v6246_v45  ;;  %v6320_v45 = vld [vmem:[%s8315_s4 + $0x724] ss:$8 sps:$4 sm:$0xff]  }
 0x2ee   :  { %3088 = vmatprep.subr.bf16.mxu1 %v6251_v46  ;;  %v6318_v46 = vld [vmem:[%s8315_s4 + $0x720] ss:$8 sps:$4 sm:$0xff]  }
 0x2f1   :  { %3089 = vmatpush1.bf16.msra.mxu1 %v6249_v47  ;;  %v6323_v47 = vld [vmem:[%s8315_s4 + $0x734] ss:$8 sps:$4 sm:$0xff]  }
 0x2f2   :  { %3090 = vmatprep.subr.bf16.mxu1 %v6254_v48  ;;  %v6321_v48 = vld [vmem:[%s8315_s4 + $0x730] ss:$8 sps:$4 sm:$0xff]  }
 0x2f5   :  { %3091 = vmatpush1.bf16.msra.mxu1 %v6252_v43  ;;  %v6326_v43 = vld [vmem:[%s8315_s4 + $0x744] ss:$8 sps:$4 sm:$0xff]  }
 0x2f6   :  { %3092 = vmatprep.subr.bf16.mxu1 %v6257_v49  ;;  %v6324_v49 = vld [vmem:[%s8315_s4 + $0x740] ss:$8 sps:$4 sm:$0xff]  }
 0x2f9   :  { %3093 = vmatpush1.bf16.msra.mxu1 %v6255_v50  ;;  %v6329_v50 = vld [vmem:[%s8315_s4 + $0x754] ss:$8 sps:$4 sm:$0xff]  }
 0x2fa   :  { %3094 = vmatprep.subr.bf16.mxu1 %v6260_v51  ;;  %v6327_v51 = vld [vmem:[%s8315_s4 + $0x750] ss:$8 sps:$4 sm:$0xff]  }
 0x2fd   :  { %3095 = vmatpush1.bf16.msra.mxu1 %v6258_v52  ;;  %v6332_v52 = vld [vmem:[%s8315_s4 + $0x764] ss:$8 sps:$4 sm:$0xff]  }
 0x2fe   :  { %3096 = vmatprep.subr.bf16.mxu1 %v6263_v53  ;;  %v6330_v53 = vld [vmem:[%s8315_s4 + $0x760] ss:$8 sps:$4 sm:$0xff]  }
 0x301   :  { %3097 = vmatpush1.bf16.msra.mxu1 %v6261_v54  ;;  %v6335_v54 = vld [vmem:[%s8315_s4 + $0x774] ss:$8 sps:$4 sm:$0xff]  }
 0x302   :  { %3224 = vmatprep.subr.bf16.mxu1 %v6266_v55  ;;  %v6333_v55 = vld [vmem:[%s8315_s4 + $0x770] ss:$8 sps:$4 sm:$0xff]  }
 0x304   :  { %3115 = vmatmul.mubr.bf16.vlgmr.msra.gmra.mrb[0].mxu1 %v2984_v58  ;;  %v6336_v58 = vld [vmem:[%s8315_s4 + $0x780] ss:$8 sps:$4 sm:$0xff]  }
 0x305   :  { %3225 = vmatpush1.bf16.msra.mxu1 %v6264_v57  ;;  %3256 = vmatprep.mubr.bf16.mxu1 %v6572_v24  ;;  %v3409_v57 = vld [vmem:[%s8326_s15 + $0x1c] sm:$0x3] }
 0x306   :  { %3226 = vmatprep.subr.bf16.mxu1 %v6269_v59  ;;  %v3410_v59 = vpack.c.bf16 %v3409_v57, %v3409_v57 }
 0x309   :  { %3227 = vmatpush1.bf16.msra.mxu1 %v6267_v62  ;;  %v6344_v62 = vld [vmem:[%s8315_s4 + $0x7a4] ss:$8 sps:$4 sm:$0xff]  }
 0x30a   :  { %3228 = vmatprep.subr.bf16.mxu1 %v6272_v0  ;;  %v6347_v0 = vld [vmem:[%s8315_s4 + $0x7b4] ss:$8 sps:$4 sm:$0xff]  }
 0x30d   :  { %3229 = vmatpush1.bf16.msra.mxu1 %v6270_v3  ;;  %v6353_v3 = vld [vmem:[%s8315_s4 + $0x7d4] ss:$8 sps:$4 sm:$0xff]  }
 0x30e   :  { %3230 = vmatprep.subr.bf16.mxu1 %v6275_v4  ;;  %v6351_v4 = vld [vmem:[%s8315_s4 + $0x7d0] ss:$8 sps:$4 sm:$0xff]  }
 0x311   :  { %3231 = vmatpush1.bf16.msra.mxu1 %v6273_v7  ;;  %v6359_v7 = vld [vmem:[%s8315_s4 + $0x7f4] ss:$8 sps:$4 sm:$0xff]  }
 0x312   :  { %3232 = vmatprep.subr.bf16.mxu1 %v6278_v8  ;;  %v6357_v8 = vld [vmem:[%s8315_s4 + $0x7f0] ss:$8 sps:$4 sm:$0xff]  }
 0x315   :  { %3233 = vmatpush1.bf16.msra.mxu1 %v6276_v10  ;;  %v3552_v10 = vpack.c.bf16 %v3551_v9, %v3551_v9 }
 0x316   :  { %3234 = vmatprep.subr.bf16.mxu1 %v6281_v11  ;;  %v6374_v11 = vld [vmem:[%s8318_s7 + $0x84] ss:$16 sps:$4 sm:$0xff]  }
 0x317   :  { %4178 = vmatprep.subr.bf16.mxu0 %v6374_v11 }
 0x319   :  { %3235 = vmatpush1.bf16.msra.mxu1 %v6279_v12  ;;  %v6372_v12 = vld [vmem:[%s8318_s7 + $0x80] ss:$16 sps:$4 sm:$0xff]  }
 0x31a   :  { %3236 = vmatprep.subr.bf16.mxu1 %v6284_v13  ;;  %4179 = vmatpush1.bf16.msra.mxu0 %v6372_v12  ;;  %v6377_v13 = vld [vmem:[%s8318_s7 + $0xa4] ss:$16 sps:$4 sm:$0xff]  }
 0x31b   :  { %4180 = vmatprep.subr.bf16.mxu0 %v6377_v13 }
 0x31d   :  { %3237 = vmatpush1.bf16.msra.mxu1 %v6282_v14  ;;  %v6375_v14 = vld [vmem:[%s8318_s7 + $0xa0] ss:$16 sps:$4 sm:$0xff]  }
 0x31e   :  { %3238 = vmatprep.subr.bf16.mxu1 %v6287_v15  ;;  %4181 = vmatpush1.bf16.msra.mxu0 %v6375_v14  ;;  %v6380_v15 = vld [vmem:[%s8318_s7 + $0xc4] ss:$16 sps:$4 sm:$0xff]  }
 0x31f   :  { %4182 = vmatprep.subr.bf16.mxu0 %v6380_v15  ;;  %v3743_v15 = vlaneseq }
 0x321   :  { %3239 = vmatpush1.bf16.msra.mxu1 %v6285_v16  ;;  %v6378_v16 = vld [vmem:[%s8318_s7 + $0xc0] ss:$16 sps:$4 sm:$0xff]  }
 0x322   :  { %3366 = vmatprep.subr.bf16.mxu1 %v6290_v17  ;;  %4183 = vmatpush1.bf16.msra.mxu0 %v6378_v16  ;;  %v6383_v17 = vld [vmem:[%s8318_s7 + $0xe4] ss:$16 sps:$4 sm:$0xff]  }
 0x323   :  { %4184 = vmatprep.subr.bf16.mxu0 %v6383_v17 }
 0x324   :  { %3257 = vmatmul.mubr.bf16.vlgmr.msra.gmra.mrb[0].mxu1 %v3126_v20  ;;  %v6384_v20 = vld [vmem:[%s8318_s7 + $0x100] ss:$16 sps:$4 sm:$0xff]  }
 0x325   :  { %3367 = vmatpush1.bf16.msra.mxu1 %v6288_v19  ;;  %3398 = vmatprep.mubr.bf16.mxu1 %v6572_v24  ;;  %v6386_v19 = vld [vmem:[%s8318_s7 + $0x104] ss:$16 sps:$4 sm:$0xff]  }
 0x326   :  { %3368 = vmatprep.subr.bf16.mxu1 %v6293_v21  ;;  %4185 = vmatpush1.bf16.msra.mxu0 %v6381_v18  ;;  %v6389_v21 = vld [vmem:[%s8318_s7 + $0x124] ss:$16 sps:$4 sm:$0xff]  }
 0x327   :  { %4186 = vmatprep.subr.bf16.mxu0 %v6386_v19  ;;  %v8003_v19 = vshrl.u32 %v3743_v15, 7  ;;  %v6459_v15 = vld [vmem:[%s8321_s10 + $0x8] sm:$0xff]  }
 0x329   :  { %3369 = vmatpush1.bf16.msra.mxu1 %v6291_v22  ;;  %v6387_v22 = vld [vmem:[%s8318_s7 + $0x120] ss:$16 sps:$4 sm:$0xff]  }
 0x32a   :  { %3370 = vmatprep.subr.bf16.mxu1 %v6296_v23  ;;  %4187 = vmatpush1.bf16.msra.mxu0 %v6384_v20  ;;  %v6392_v23 = vld [vmem:[%s8318_s7 + $0x144] ss:$16 sps:$4 sm:$0xff]   ;;  %v8006_v20 = vsub.s32 0, %v8003_v19 }
 0x32b   :  { %4188 = vmatprep.subr.bf16.mxu0 %v6389_v21  ;;  %v3693_v21 = vld [vmem:[%s8316_s5] sm:$0x3] }
 0x32d   :  { %3371 = vmatpush1.bf16.msra.mxu1 %v6294_v25  ;;  %v6390_v25 = vld [vmem:[%s8318_s7 + $0x140] ss:$16 sps:$4 sm:$0xff]  }
 0x32e   :  { %3372 = vmatprep.subr.bf16.mxu1 %v6299_v26  ;;  %4189 = vmatpush1.bf16.msra.mxu0 %v6387_v22  ;;  %v6395_v26 = vld [vmem:[%s8318_s7 + $0x164] ss:$16 sps:$4 sm:$0xff]   ;;  %v8012_v22 = vsub.s32 1, %v8003_v19 }
 0x32f   :  { %4190 = vmatprep.subr.bf16.mxu0 %v6392_v23  ;;  %v3694_v23 = vld [vmem:[%s8317_s6] sm:$0x3] }
 0x331   :  { %3373 = vmatpush1.bf16.msra.mxu1 %v6297_v27  ;;  %v6393_v27 = vld [vmem:[%s8318_s7 + $0x160] ss:$16 sps:$4 sm:$0xff]  }
 0x332   :  { %3374 = vmatprep.subr.bf16.mxu1 %v6302_v28  ;;  %4191 = vmatpush1.bf16.msra.mxu0 %v6390_v25  ;;  %v6398_v28 = vld [vmem:[%s8318_s7 + $0x184] ss:$16 sps:$4 sm:$0xff]  }
 0x333   :  { %4192 = vmatprep.subr.bf16.mxu0 %v6395_v26  ;;  %v3746_v26 = vrot.slane %v3693_v21, %v8006_v20 }
 0x335   :  { %3375 = vmatpush1.bf16.msra.mxu1 %v6300_v29  ;;  %v6396_v29 = vld [vmem:[%s8318_s7 + $0x180] ss:$16 sps:$4 sm:$0xff]  }
 0x336   :  { %3376 = vmatprep.subr.bf16.mxu1 %v6305_v32  ;;  %4193 = vmatpush1.bf16.msra.mxu0 %v6393_v27  ;;  %v6399_v32 = vld [vmem:[%s8318_s7 + $0x1a0] ss:$16 sps:$4 sm:$0xff]  }
 0x337   :  { %4194 = vmatprep.subr.bf16.mxu0 %v6398_v28 }
 0x339   :  { %3377 = vmatpush1.bf16.msra.mxu1 %v6303_v33  ;;  %v6401_v33 = vld [vmem:[%s8318_s7 + $0x1a4] ss:$16 sps:$4 sm:$0xff]  }
 0x33a   :  { %3378 = vmatprep.subr.bf16.mxu1 %v6308_v34  ;;  %4195 = vmatpush1.bf16.msra.mxu0 %v6396_v29  ;;  %v6404_v34 = vld [vmem:[%s8318_s7 + $0x1c4] ss:$16 sps:$4 sm:$0xff]   ;;  %v3750_v29 = vrot.slane %v3693_v21, %v8012_v22  ;;  %v6463_v21 = vld [vmem:[%s8321_s10 + $0x18] sm:$0xff]  }
 0x33b   :  { %4196 = vmatprep.subr.bf16.mxu0 %v6401_v33 }
 0x33d   :  { %3379 = vmatpush1.bf16.msra.mxu1 %v6306_v35  ;;  %v6402_v35 = vld [vmem:[%s8318_s7 + $0x1c0] ss:$16 sps:$4 sm:$0xff]  }
 0x33e   :  { %3380 = vmatprep.subr.bf16.mxu1 %v6311_v36  ;;  %4197 = vmatpush1.bf16.msra.mxu0 %v6399_v32  ;;  %v6407_v36 = vld [vmem:[%s8318_s7 + $0x1e4] ss:$16 sps:$4 sm:$0xff]  }
 0x33f   :  { %4198 = vmatprep.subr.bf16.mxu0 %v6404_v34  ;;  %v3759_v34 = vrot.slane %v3694_v23, %v8006_v20 }
 0x341   :  { %3381 = vmatpush1.bf16.msra.mxu1 %v6309_v37  ;;  %v6405_v37 = vld [vmem:[%s8318_s7 + $0x1e0] ss:$16 sps:$4 sm:$0xff]  }
 0x342   :  { %3508 = vmatprep.subr.bf16.mxu1 %v6314_v38  ;;  %4199 = vmatpush1.bf16.msra.mxu0 %v6402_v35  ;;  %v6410_v38 = vld [vmem:[%s8318_s7 + $0xc] ss:$16 sps:$4 sm:$0xff]  }
 0x343   :  { %4200 = vmatprep.subr.bf16.mxu0 %v6407_v36  ;;  %v3763_v36 = vrot.slane %v3694_v23, %v8012_v22  ;;  %v6464_v23 = vld [vmem:[%s8321_s10 + $0x60] sm:$0xff]  }
 0x344   :  { %3399 = vmatmul.mubr.bf16.vlgmr.msra.gmra.mrb[0].mxu1 %v3268_v39 }
 0x345   :  { %3509 = vmatpush1.bf16.msra.mxu1 %v6312_v41  ;;  %3540 = vmatprep.mubr.bf16.mxu1 %v6572_v24 }
 0x346   :  { %3510 = vmatprep.subr.bf16.mxu1 %v6317_v42  ;;  %4201 = vmatpush1.bf16.msra.mxu0 %v6405_v37 }
 0x347   :  { %4211 = vmatprep.subr.bf16.mxu0 %v6410_v38 }
 0x349   :  { %3511 = vmatpush1.bf16.msra.mxu1 %v6315_v44 }
 0x34a   :  { %3512 = vmatprep.subr.bf16.mxu1 %v6320_v45 }
 0x34d   :  { %3513 = vmatpush1.bf16.msra.mxu1 %v6318_v46 }
 0x34e   :  { %3514 = vmatprep.subr.bf16.mxu1 %v6323_v47 }
 0x351   :  { %3515 = vmatpush1.bf16.msra.mxu1 %v6321_v48 }
 0x352   :  { %3516 = vmatprep.subr.bf16.mxu1 %v6326_v43 }
 0x355   :  { %3517 = vmatpush1.bf16.msra.mxu1 %v6324_v49 }
 0x356   :  { %3518 = vmatprep.subr.bf16.mxu1 %v6329_v50 }
 0x359   :  { %3519 = vmatpush1.bf16.msra.mxu1 %v6327_v51 }
 0x35a   :  { %3520 = vmatprep.subr.bf16.mxu1 %v6332_v52 }
 0x35d   :  { %3521 = vmatpush1.bf16.msra.mxu1 %v6330_v53 }
 0x35e   :  { %3522 = vmatprep.subr.bf16.mxu1 %v6335_v54 }
 0x361   :  { %3523 = vmatpush1.bf16.msra.mxu1 %v6333_v55 }
 0x362   :  { %3650 = vmatprep.subr.bf16.mxu1 %v6338_v56 }
 0x364   :  { %3541 = vmatmul.mubr.bf16.vlgmr.msra.gmra.mrb[0].mxu1 %v3410_v59 }
 0x365   :  { %3651 = vmatpush1.bf16.msra.mxu1 %v6336_v58  ;;  %3682 = vmatprep.mubr.bf16.mxu1 %v6572_v24  ;;  %v6345_v24 = vld [vmem:[%s8315_s4 + $0x7b0] ss:$8 sps:$4 sm:$0xff]  }
 0x366   :  { %3652 = vmatprep.subr.bf16.mxu1 %v6341_v60 }
 0x369   :  { %3653 = vmatpush1.bf16.msra.mxu1 %v6339_v61 }
 0x36a   :  { %3654 = vmatprep.subr.bf16.mxu1 %v6344_v62 }
 0x36d   :  { %3655 = vmatpush1.bf16.msra.mxu1 %v6342_v63 }
 0x36e   :  { %3656 = vmatprep.subr.bf16.mxu1 %v6347_v0 }
 0x371   :  { %3657 = vmatpush1.bf16.msra.mxu1 %v6345_v24 }
 0x372   :  { %3658 = vmatprep.subr.bf16.mxu1 %v6350_v1 }
 0x375   :  { %3659 = vmatpush1.bf16.msra.mxu1 %v6348_v2 }
 0x376   :  { %3660 = vmatprep.subr.bf16.mxu1 %v6353_v3 }
 0x379   :  { %3661 = vmatpush1.bf16.msra.mxu1 %v6351_v4 }
 0x37a   :  { %3662 = vmatprep.subr.bf16.mxu1 %v6356_v5 }
 0x37d   :  { %3663 = vmatpush1.bf16.msra.mxu1 %v6354_v6 }
 0x37e   :  { %3664 = vmatprep.subr.bf16.mxu1 %v6359_v7 }
 0x381   :  { %3665 = vmatpush1.bf16.msra.mxu1 %v6357_v8 }
 0x384   :  { %3683 = vmatmul.mubr.bf16.vlgmr.msra.gmra.mrb[0].mxu1 %v3552_v10 }
 0x457   :  { %v3684_v40 = vpop.f32.mrb[0].mxu1 }
 0x458   :  { %v5775_v41 = vadd.f32 %v3684_v40, %v7622_v30  ;;  %v3686_v39 = vpop.f32.mrb[1].mxu1 }
 0x459   :  { %v5776_v42 = vadd.f32 %v3686_v39, %v7624_v31  ;;  %v3688_v44 = vpop.f32.mrb[2].mxu1 }
 0x45a   :  { %v3696_v45 = vsel %vm3695_vm1, %v5775_v41, 0.0  ;;  %v3710_v46 = vmul.f32 %v5775_v41, %v5775_v41  ;;  %v3689_v47 = vpop.f32.mrb[3].mxu1 }
 0x45b   :  { %v3697_v48 = vrot.slane %v3696_v45, 4  ;;  %v3703_v43 = vsel %vm3695_vm1, %v5776_v42, 0.0  ;;  %v3711_v49 = vmul.f32 %v5776_v42, %v5776_v42 }
 0x45c   :  { %v3712_v50 = vsel %vm3695_vm1, %v3710_v46, 0.0  ;;  %v3704_v51 = vrot.slane %v3703_v43, 4 }
 0x45d   :  { %v3698_v52 = vadd.f32 %v3697_v48, %v3696_v45  ;;  %v3713_v53 = vrot.slane %v3712_v50, 4  ;;  %v3719_v54 = vsel %vm3695_vm1, %v3711_v49, 0.0  ;;  %v6413_v49 = vld [vmem:[%s8318_s7 + $0x2c] ss:$16 sps:$4 sm:$0xff]  }
 0x45e   :  { %v3705_v30 = vadd.f32 %v3704_v51, %v3703_v43  ;;  %v3720_v55 = vrot.slane %v3719_v54, 4  ;;  %v6416_v51 = vld [vmem:[%s8318_s7 + $0x4c] ss:$16 sps:$4 sm:$0xff]  }
 0x45f   :  { %v3699_v56 = vrot.slane %v3698_v52, 2  ;;  %v3714_v31 = vadd.f32 %v3713_v53, %v3712_v50  ;;  %v6411_v50 = vld [vmem:[%s8318_s7 + $0x28] ss:$16 sps:$4 sm:$0xff]   ;;  %v6419_v53 = vld [vmem:[%s8318_s7 + $0x6c] ss:$16 sps:$4 sm:$0xff]  }
 0x460   :  { %v3706_v57 = vrot.slane %v3705_v30, 2  ;;  %v3721_v58 = vadd.f32 %v3720_v55, %v3719_v54  ;;  %v6417_v54 = vld [vmem:[%s8318_s7 + $0x68] ss:$16 sps:$4 sm:$0xff]  }
 0x461   :  { %v3700_v59 = vadd.f32 %v3699_v56, %v3698_v52  ;;  %v3715_v60 = vrot.slane %v3714_v31, 2  ;;  %v6414_v52 = vld [vmem:[%s8318_s7 + $0x48] ss:$16 sps:$4 sm:$0xff]   ;;  %v6425_v56 = vld [vmem:[%s8318_s7 + $0xac] ss:$16 sps:$4 sm:$0xff]  }
 0x462   :  { %v3707_v61 = vadd.f32 %v3706_v57, %v3705_v30  ;;  %v3722_v62 = vrot.slane %v3721_v58, 2  ;;  %v6422_v30 = vld [vmem:[%s8318_s7 + $0x8c] ss:$16 sps:$4 sm:$0xff]   ;;  %v6420_v55 = vld [vmem:[%s8318_s7 + $0x88] ss:$16 sps:$4 sm:$0xff]  }
 0x463   :  { %v3701_v63 = vrot.slane %v3700_v59, 1  ;;  %v3716_v0 = vadd.f32 %v3715_v60, %v3714_v31  ;;  %v6423_v31 = vld [vmem:[%s8318_s7 + $0xa8] ss:$16 sps:$4 sm:$0xff]   ;;  %v6428_v57 = vld [vmem:[%s8318_s7 + $0xcc] ss:$16 sps:$4 sm:$0xff]  }
 0x464   :  { %v3708_v24 = vrot.slane %v3707_v61, 1  ;;  %v3723_v1 = vadd.f32 %v3722_v62, %v3721_v58  ;;  %v6426_v58 = vld [vmem:[%s8318_s7 + $0xc8] ss:$16 sps:$4 sm:$0xff]  }
 0x465   :  { %v3702_v2 = vadd.f32 %v3701_v63, %v3700_v59  ;;  %v3717_v3 = vrot.slane %v3716_v0, 1  ;;  %v6431_v59 = vld [vmem:[%s8318_s7 + $0xec] ss:$16 sps:$4 sm:$0xff]   ;;  %v6429_v60 = vld [vmem:[%s8318_s7 + $0xe8] ss:$16 sps:$4 sm:$0xff]  }
 0x466   :  { %v3709_v4 = vadd.f32 %v3708_v24, %v3707_v61  ;;  %v3724_v5 = vrot.slane %v3723_v1, 1  ;;  %v6434_v61 = vld [vmem:[%s8318_s7 + $0x10c] ss:$16 sps:$4 sm:$0xff]   ;;  %v6432_v62 = vld [vmem:[%s8318_s7 + $0x108] ss:$16 sps:$4 sm:$0xff]  }
 0x467   :  { %v3718_v6 = vadd.f32 %v3717_v3, %v3716_v0  ;;  %v3726_v7 = vmul.f32 0.5, %v3702_v2  ;;  %v6437_v63 = vld [vmem:[%s8318_s7 + $0x12c] ss:$16 sps:$4 sm:$0xff]   ;;  %v6435_v0 = vld [vmem:[%s8318_s7 + $0x128] ss:$16 sps:$4 sm:$0xff]  }
 0x468   :  { %v3725_v8 = vadd.f32 %v3724_v5, %v3723_v1  ;;  %v3727_v9 = vmul.f32 0.5, %v3709_v4  ;;  %v6440_v24 = vld [vmem:[%s8318_s7 + $0x14c] ss:$16 sps:$4 sm:$0xff]   ;;  %v6438_v1 = vld [vmem:[%s8318_s7 + $0x148] ss:$16 sps:$4 sm:$0xff]  }
 0x469   :  { %v3728_v10 = vmul.f32 0.5, %v3718_v6  ;;  %v3730_v11 = vmul.f32 %v3726_v7, %v3726_v7  ;;  %v3734_v25 = vsub.f32 %v5775_v41, %v3726_v7  ;;  %v6443_v2 = vld [vmem:[%s8318_s7 + $0x16c] ss:$16 sps:$4 sm:$0xff]   ;;  %v6441_v3 = vld [vmem:[%s8318_s7 + $0x168] ss:$16 sps:$4 sm:$0xff]  }
 0x46a   :  { %v3729_v12 = vmul.f32 0.5, %v3725_v8  ;;  %v3731_v13 = vmul.f32 %v3727_v9, %v3727_v9  ;;  %v3735_v28 = vsub.f32 %v5776_v42, %v3727_v9  ;;  %v6408_v42 = vld [vmem:[%s8318_s7 + $0x8] ss:$16 sps:$4 sm:$0xff]   ;;  %v6446_v4 = vld [vmem:[%s8318_s7 + $0x18c] ss:$16 sps:$4 sm:$0xff]  }
 0x46b   :  { %v3732_v14 = vsub.f32 %v3728_v10, %v3730_v11  ;;  %v6444_v5 = vld [vmem:[%s8318_s7 + $0x188] ss:$16 sps:$4 sm:$0xff]   ;;  %v6449_v6 = vld [vmem:[%s8318_s7 + $0x1ac] ss:$16 sps:$4 sm:$0xff]  }
 0x46c   :  { %v3733_v16 = vsub.f32 %v3729_v12, %v3731_v13  ;;  %v6447_v7 = vld [vmem:[%s8318_s7 + $0x1a8] ss:$16 sps:$4 sm:$0xff]   ;;  %v6452_v8 = vld [vmem:[%s8318_s7 + $0x1cc] ss:$16 sps:$4 sm:$0xff]   ;;  %v6456_v12 = vld [vmem:[%s8321_s10 + $0x40] sm:$0xff]  }
 0x46d   :  { %v3736_v17 = vadd.f32 1e-05, %v3732_v14  ;;  %v6450_v9 = vld [vmem:[%s8318_s7 + $0x1c8] ss:$16 sps:$4 sm:$0xff]   ;;  %v6455_v10 = vld [vmem:[%s8318_s7 + $0x1ec] ss:$16 sps:$4 sm:$0xff]  }
 0x46e   :  { %v3737_v18 = vadd.f32 1e-05, %v3733_v16  ;;  %v6453_v11 = vld [vmem:[%s8318_s7 + $0x1e8] ss:$16 sps:$4 sm:$0xff]   ;;  %v6457_v13 = vld [vmem:[%s8321_s10] sm:$0xff]   ;;  %v6460_v16 = vld [vmem:[%s8321_s10 + $0x50] sm:$0xff]  }
 0x46f   :  { %6490 = vrsqrt.f32 %v3736_v17  ;;  %v6458_v14 = vld [vmem:[%s8321_s10 + $0x48] sm:$0xff]   ;;  %v6461_v17 = vld [vmem:[%s8321_s10 + $0x10] sm:$0xff]  }
 0x470   :  { %6492 = vrsqrt.f32 %v3737_v18  ;;  %v6462_v18 = vld [vmem:[%s8321_s10 + $0x58] sm:$0xff]  }
 0x479   :  { %v6491_v27 = vpop.eup %6490 }
 0x47a   :  { %v6493_v32 = vpop.eup %6492  ;;  %v3740_v33 = vmul.f32 %v6491_v27, %v3734_v25  ;;  %v6465_v25 = vld [vmem:[%s8321_s10 + $0x20] sm:$0xff]   ;;  %v6467_v27 = vld [vmem:[%s8321_s10 + $0x28] sm:$0xff]  }
 0x47b   :  { %v3741_v35 = vmul.f32 %v6493_v32, %v3735_v28  ;;  %v6468_v28 = vld [vmem:[%s8321_s10 + $0x70] sm:$0xff]   ;;  %v6470_v32 = vld [vmem:[%s8321_s10 + $0x78] sm:$0xff]  }
 0x47c   :  { %v3753_v37 = vmul.f32 %v3746_v26, %v3740_v33  ;;  %v6466_v26 = vld [vmem:[%s8321_s10 + $0x68] sm:$0xff]   ;;  %v6471_v33 = vld [vmem:[%s8321_s10 + $0x38] sm:$0xff]  }
 0x47d   :  { %v3754_v38 = vmul.f32 %v3750_v29, %v3741_v35  ;;  %v6469_v29 = vld [vmem:[%s8321_s10 + $0x30] sm:$0xff]  }
 0x47e   :  { %v3766_v40 = vadd.f32 %v3759_v34, %v3753_v37  ;;  %v6472_v34 = vld [vmem:[%s8321_s10 + $0xc0] sm:$0xff]  }
 0x47f   :  { %v3767_v39 = vadd.f32 %v3763_v36, %v3754_v38 }
 0x480   :  { %v3768_v44 = vmul.f32 0.01, %v3766_v40 }
 0x481   :  { %v3769_v45 = vmul.f32 0.01, %v3767_v39 }
 0x482   :  { %v3770_v41 = vmax.f32 %v3766_v40, %v3768_v44 }
 0x483   :  { %v3771_v46 = vmax.f32 %v3767_v39, %v3769_v45 }
 0x484   :  { %v8024_v43 = vpack.c.bf16 %v3770_v41, %v3770_v41 }
 0x485   :  { %v3785_v47 = vpack.c.bf16 %v3771_v46, %v3771_v46  ;;  %v3774_v48 = vcombine.low %v3770_v41, %v3771_v46 }
 0x487   :  { %4202 = vmatprep.mubr.bf16.mxu0 %v3785_v47  ;;  %5447 = vst.sshfl [vmem:[#allocation6] sm:$0x33 pattern:$0x76325410] %v3774_v48 }
 0x488   :  { %4203 = vmatmul.mubr.bf16.vlgmr.msra.gmra.mrb[56].mxu0 %v8024_v43 }
 0x489   :  { %4212 = vmatpush1.bf16.msra.mxu0 %v6408_v42  ;;  %4243 = vmatprep.mubr.bf16.mxu0 %v3785_v47 }
 0x48a   :  { %4213 = vmatprep.subr.bf16.mxu0 %v6413_v49 }
 0x48d   :  { %4214 = vmatpush1.bf16.msra.mxu0 %v6411_v50 }
 0x48e   :  { %4215 = vmatprep.subr.bf16.mxu0 %v6416_v51 }
 0x491   :  { %4216 = vmatpush1.bf16.msra.mxu0 %v6414_v52 }
 0x492   :  { %4217 = vmatprep.subr.bf16.mxu0 %v6419_v53 }
 0x495   :  { %4218 = vmatpush1.bf16.msra.mxu0 %v6417_v54 }
 0x496   :  { %4219 = vmatprep.subr.bf16.mxu0 %v6422_v30 }
 0x499   :  { %4220 = vmatpush1.bf16.msra.mxu0 %v6420_v55 }
 0x49a   :  { %4221 = vmatprep.subr.bf16.mxu0 %v6425_v56 }
 0x49d   :  { %4222 = vmatpush1.bf16.msra.mxu0 %v6423_v31 }
 0x49e   :  { %4223 = vmatprep.subr.bf16.mxu0 %v6428_v57 }
 0x4a1   :  { %4224 = vmatpush1.bf16.msra.mxu0 %v6426_v58 }
 0x4a2   :  { %4225 = vmatprep.subr.bf16.mxu0 %v6431_v59 }
 0x4a5   :  { %4226 = vmatpush1.bf16.msra.mxu0 %v6429_v60 }
 0x4a6   :  { %4227 = vmatprep.subr.bf16.mxu0 %v6434_v61 }
 0x4a9   :  { %4228 = vmatpush1.bf16.msra.mxu0 %v6432_v62 }
 0x4aa   :  { %4229 = vmatprep.subr.bf16.mxu0 %v6437_v63 }
 0x4ad   :  { %4230 = vmatpush1.bf16.msra.mxu0 %v6435_v0 }
 0x4ae   :  { %4231 = vmatprep.subr.bf16.mxu0 %v6440_v24 }
 0x4b1   :  { %4232 = vmatpush1.bf16.msra.mxu0 %v6438_v1 }
 0x4b2   :  { %4233 = vmatprep.subr.bf16.mxu0 %v6443_v2 }
 0x4b5   :  { %4234 = vmatpush1.bf16.msra.mxu0 %v6441_v3 }
 0x4b6   :  { %4235 = vmatprep.subr.bf16.mxu0 %v6446_v4 }
 0x4b9   :  { %4236 = vmatpush1.bf16.msra.mxu0 %v6444_v5 }
 0x4ba   :  { %4237 = vmatprep.subr.bf16.mxu0 %v6449_v6 }
 0x4bd   :  { %4238 = vmatpush1.bf16.msra.mxu0 %v6447_v7 }
 0x4be   :  { %4239 = vmatprep.subr.bf16.mxu0 %v6452_v8 }
 0x4c1   :  { %4240 = vmatpush1.bf16.msra.mxu0 %v6450_v9 }
 0x4c2   :  { %4241 = vmatprep.subr.bf16.mxu0 %v6455_v10 }
 0x4c5   :  { %4242 = vmatpush1.bf16.msra.mxu0 %v6453_v11 }
 0x4c6   :  { %5719 = vmatprep.subr.bf16.mxu0 %v6456_v12  ;;  %v8176_v12 = vld [vmem:[%s8319_s8] sm:$0xf] }
 0x4c8   :  { %4244 = vmatmul.mubr.bf16.vlgmr.msra.gmra.mrb[60].mxu0 %v8024_v43 }
 0x4c9   :  { %5720 = vmatpush3.bf16.msra.mxu0 %v6457_v13  ;;  %v8181_v13 = vld [vmem:[%s8320_s9] sm:$0xf] }
 0x4ca   :  { %5721 = vmatprep.subr.bf16.mxu0 %v6458_v14 }
 0x4cd   :  { %5722 = vmatpush3.bf16.msra.mxu0 %v6459_v15  ;;  %v4350_v15 = vrot.slane %v8176_v12, %v8006_v20 }
 0x4ce   :  { %5723 = vmatprep.subr.bf16.mxu0 %v6460_v16 }
 0x4d1   :  { %5724 = vmatpush3.bf16.msra.mxu0 %v6461_v17 }
 0x4d2   :  { %5725 = vmatprep.subr.bf16.mxu0 %v6462_v18  ;;  %v4354_v18 = vrot.slane %v8176_v12, %v8012_v22 }
 0x4d5   :  { %5726 = vmatpush3.bf16.msra.mxu0 %v6463_v21 }
 0x4d6   :  { %5727 = vmatprep.subr.bf16.mxu0 %v6464_v23 }
 0x4d9   :  { %5728 = vmatpush3.bf16.msra.mxu0 %v6465_v25  ;;  %v4375_v25 = vrot.slane %v8181_v13, %v8006_v20  ;;  %v6473_v20 = vld [vmem:[%s8321_s10 + $0x80] sm:$0xff]  }
 0x4da   :  { %5729 = vmatprep.subr.bf16.mxu0 %v6466_v26 }
 0x4dd   :  { %5730 = vmatpush3.bf16.msra.mxu0 %v6467_v27  ;;  %v4379_v27 = vrot.slane %v8181_v13, %v8012_v22 }
 0x4de   :  { %5731 = vmatprep.subr.bf16.mxu0 %v6468_v28 }
 0x4e1   :  { %5732 = vmatpush3.bf16.msra.mxu0 %v6469_v29 }
 0x4e2   :  { %5733 = vmatprep.subr.bf16.mxu0 %v6470_v32 }
 0x4e5   :  { %5734 = vmatpush3.bf16.msra.mxu0 %v6471_v33 }
 0x4e6   :  { %5741 = vmatprep.subr.bf16.mxu0 %v6472_v34 }
 0x55b   :  { %v4204_v35 = vpop.f32.mrb[56].mxu0 }
 0x55c   :  { %v4254_v36 = vsel %vm3695_vm1, %v4204_v35, 0.0  ;;  %v4282_v37 = vmul.f32 %v4204_v35, %v4204_v35  ;;  %v4206_v38 = vpop.f32.mrb[57].mxu0 }
 0x55d   :  { %v4255_v40 = vrot.slane %v4254_v36, 4  ;;  %v4261_v39 = vsel %vm3695_vm1, %v4206_v38, 0.0  ;;  %v4283_v44 = vmul.f32 %v4206_v38, %v4206_v38  ;;  %v4208_v45 = vpop.f32.mrb[58].mxu0 }
 0x55e   :  { %v4286_v41 = vsel %vm3695_vm1, %v4282_v37, 0.0  ;;  %v4262_v46 = vrot.slane %v4261_v39, 4  ;;  %v4209_v47 = vpop.f32.mrb[59].mxu0  ;;  %v6476_v45 = vld [vmem:[%s8321_s10 + $0xd0] sm:$0xff]  }
 0x55f   :  { %v4256_v42 = vadd.f32 %v4255_v40, %v4254_v36  ;;  %v4287_v48 = vrot.slane %v4286_v41, 4  ;;  %v4293_v43 = vsel %vm3695_vm1, %v4283_v44, 0.0  ;;  %v6475_v44 = vld [vmem:[%s8321_s10 + $0x88] sm:$0xff]   ;;  %v6479_v47 = vld [vmem:[%s8321_s10 + $0x98] sm:$0xff]  }
 0x560   :  { %v4263_v49 = vadd.f32 %v4262_v46, %v4261_v39  ;;  %v4294_v50 = vrot.slane %v4293_v43, 4  ;;  %v6474_v39 = vld [vmem:[%s8321_s10 + $0xc8] sm:$0xff]   ;;  %v6478_v46 = vld [vmem:[%s8321_s10 + $0xd8] sm:$0xff]  }
 0x561   :  { %v4257_v51 = vrot.slane %v4256_v42, 2  ;;  %v4288_v52 = vadd.f32 %v4287_v48, %v4286_v41  ;;  %v6477_v41 = vld [vmem:[%s8321_s10 + $0x90] sm:$0xff]   ;;  %v6481_v48 = vld [vmem:[%s8321_s10 + $0xa0] sm:$0xff]  }
 0x562   :  { %v4264_v53 = vrot.slane %v4263_v49, 2  ;;  %v4295_v54 = vadd.f32 %v4294_v50, %v4293_v43  ;;  %v6482_v43 = vld [vmem:[%s8321_s10 + $0xe8] sm:$0xff]  }
 0x563   :  { %v4258_v30 = vadd.f32 %v4257_v51, %v4256_v42  ;;  %v4289_v55 = vrot.slane %v4288_v52, 2  ;;  %v6480_v42 = vld [vmem:[%s8321_s10 + $0xe0] sm:$0xff]   ;;  %v6483_v50 = vld [vmem:[%s8321_s10 + $0xa8] sm:$0xff]  }
 0x564   :  { %v4265_v56 = vadd.f32 %v4264_v53, %v4263_v49  ;;  %v4296_v31 = vrot.slane %v4295_v54, 2 }
 0x565   :  { %v4259_v57 = vrot.slane %v4258_v30, 1  ;;  %v4290_v58 = vadd.f32 %v4289_v55, %v4288_v52 }
 0x566   :  { %v4266_v59 = vrot.slane %v4265_v56, 1  ;;  %v4297_v60 = vadd.f32 %v4296_v31, %v4295_v54  ;;  %v6484_v54 = vld [vmem:[%s8321_s10 + $0xf0] sm:$0xff]  }
 0x567   :  { %v4260_v61 = vadd.f32 %v4259_v57, %v4258_v30  ;;  %v4291_v62 = vrot.slane %v4290_v58, 1 }
 0x568   :  { %v4267_v63 = vadd.f32 %v4266_v59, %v4265_v56  ;;  %v4298_v0 = vrot.slane %v4297_v60, 1 }
 0x569   :  { %v4292_v24 = vadd.f32 %v4291_v62, %v4290_v58  ;;  %v4314_v1 = vmul.f32 0.5, %v4260_v61 }
 0x56a   :  { %v4299_v2 = vadd.f32 %v4298_v0, %v4297_v60  ;;  %v4315_v3 = vmul.f32 0.5, %v4267_v63  ;;  %v6485_v63 = vld [vmem:[%s8321_s10 + $0xb0] sm:$0xff]  }
 0x56b   :  { %v4318_v4 = vmul.f32 0.5, %v4292_v24  ;;  %v4322_v5 = vmul.f32 %v4314_v1, %v4314_v1  ;;  %v4330_v14 = vsub.f32 %v4204_v35, %v4314_v1  ;;  %v6486_v1 = vld [vmem:[%s8321_s10 + $0xf8] sm:$0xff]  }
 0x56c   :  { %v4319_v6 = vmul.f32 0.5, %v4299_v2  ;;  %v4323_v7 = vmul.f32 %v4315_v3, %v4315_v3  ;;  %v4331_v17 = vsub.f32 %v4206_v38, %v4315_v3 }
 0x56d   :  { %v4326_v8 = vsub.f32 %v4318_v4, %v4322_v5 }
 0x56e   :  { %v4327_v9 = vsub.f32 %v4319_v6, %v4323_v7 }
 0x56f   :  { %v4334_v10 = vadd.f32 1e-05, %v4326_v8  ;;  %v6487_v8 = vld [vmem:[%s8321_s10 + $0xb8] sm:$0xff]   ;;  %s6574_s10 = smov [#allocation4]  }
 0x570   :  { %v4335_v11 = vadd.f32 1e-05, %v4327_v9  ;;  %s4792_s18 = sshll.u32 %s6574_s10, 4  ;;  %s4793_s18 = int_to_ptr.vmem [resolvable:$true] %s4792_s18 }
 0x571   :  { %6494 = vrsqrt.f32 %v4334_v10  ;;  %s6502_s19 = scalar_lea.vmem %s4793_s18, 128  ;;  %p6507_p1 = scmp.lt.s32.totalorder %s4793_s18, %s4793_s18 }
 0x572   :  { %6496 = vrsqrt.f32 %v4335_v11  ;;  %p6503_p0 = scmp.ne.s32.totalorder %s4793_s18, %s6502_s19  ;;  %p6508_p2 = scmp.lt.s32.totalorder %s6502_s19, %s6502_s19 }
 0x574   :  { %p6509_p3 = por %p6508_p2, %p6507_p1 }
 0x576   :  { %p6510_p4 = pnand %p6509_p3, %p6503_p0 }
 0x57b   :  { %v6495_v16 = vpop.eup %6494 }
 0x57c   :  { %v6497_v21 = vpop.eup %6496  ;;  %v4342_v23 = vmul.f32 %v6495_v16, %v4330_v14 }
 0x57d   :  { %v4343_v26 = vmul.f32 %v6497_v21, %v4331_v17 }
 0x57e   :  { %v4367_v28 = vmul.f32 %v4350_v15, %v4342_v23 }
 0x57f   :  { %v4368_v29 = vmul.f32 %v4354_v18, %v4343_v26 }
 0x580   :  { %v4392_v32 = vadd.f32 %v4375_v25, %v4367_v28 }
 0x581   :  { %v4393_v33 = vadd.f32 %v4379_v27, %v4368_v29 }
 0x582   :  { %v4396_v34 = vmul.f32 0.01, %v4392_v32 }
 0x583   :  { %v4397_v35 = vmul.f32 0.01, %v4393_v33 }
 0x584   :  { %v8191_v36 = vmax.f32 %v4392_v32, %v4396_v34 }
 0x585   :  { %v8193_v37 = vmax.f32 %v4393_v33, %v4397_v35 }
 0x586   :  { %v4427_v40 = vpack.c.bf16 %v8191_v36, %v8191_v36 }
 0x587   :  { %v4428_v38 = vpack.c.bf16 %v8193_v37, %v8193_v37  ;;  %v4408_v22 = vcombine.low %v8191_v36, %v8193_v37 }
 0x589   :  { %4726 = vmatprep.mubr.bf16.mxu0 %v4428_v38 }
 0x58a   :  { %4727 = vmatmul.mubr.bf16.vlgmr.msra.gmra.mrb[64].mxu0 %v4427_v40 }
 0x58b   :  { %5742 = vmatpush3.bf16.msra.mxu0 %v6473_v20 }
 0x58c   :  { %5743 = vmatprep.subr.bf16.mxu0 %v6474_v39  ;;  %v4357_v39 = vsub.s32 2, %v8003_v19 }
 0x58f   :  { %5744 = vmatpush3.bf16.msra.mxu0 %v6475_v44  ;;  %v4361_v44 = vsub.s32 3, %v8003_v19 }
 0x590   :  { %5745 = vmatprep.subr.bf16.mxu0 %v6476_v45 }
 0x593   :  { %5746 = vmatpush3.bf16.msra.mxu0 %v6477_v41  ;;  %v4358_v41 = vrot.slane %v8176_v12, %v4357_v39 }
 0x594   :  { %5747 = vmatprep.subr.bf16.mxu0 %v6478_v46 }
 0x597   :  { %5748 = vmatpush3.bf16.msra.mxu0 %v6479_v47 }
 0x598   :  { %5749 = vmatprep.subr.bf16.mxu0 %v6480_v42  ;;  %v4362_v42 = vrot.slane %v8176_v12, %v4361_v44 }
 0x59b   :  { %v8231_v49 = vpop.f32.mrb[60].mxu0  ;;  %5750 = vmatpush3.bf16.msra.mxu0 %v6481_v48 }
 0x59c   :  { %v4268_v51 = vsel %vm3695_vm1, %v8231_v49, 0.0  ;;  %v4284_v52 = vmul.f32 %v8231_v49, %v8231_v49  ;;  %v8240_v53 = vpop.f32.mrb[61].mxu0  ;;  %5751 = vmatprep.subr.bf16.mxu0 %v6482_v43 }
 0x59d   :  { %v4269_v30 = vrot.slane %v4268_v51, 4  ;;  %v4275_v55 = vsel %vm3695_vm1, %v8240_v53, 0.0  ;;  %v4285_v56 = vmul.f32 %v8240_v53, %v8240_v53  ;;  %v4249_v31 = vpop.f32.mrb[62].mxu0 }
 0x59e   :  { %v4300_v57 = vsel %vm3695_vm1, %v4284_v52, 0.0  ;;  %v4276_v58 = vrot.slane %v4275_v55, 4  ;;  %v4250_v59 = vpop.f32.mrb[63].mxu0  ;;  %v4387_v52 = vrot.slane %v8181_v13, %v4361_v44 }
 0x59f   :  { %v4270_v60 = vadd.f32 %v4269_v30, %v4268_v51  ;;  %v4301_v61 = vrot.slane %v4300_v57, 4  ;;  %v4307_v62 = vsel %vm3695_vm1, %v4285_v56, 0.0  ;;  %5752 = vmatpush3.bf16.msra.mxu0 %v6483_v50  ;;  %v4383_v50 = vrot.slane %v8181_v13, %v4357_v39 }
 0x5a0   :  { %v4277_v0 = vadd.f32 %v4276_v58, %v4275_v55  ;;  %v4308_v24 = vrot.slane %v4307_v62, 4  ;;  %5753 = vmatprep.subr.bf16.mxu0 %v6484_v54  ;;  %v6573_v54 = vmov 1983009808  }
 0x5a1   :  { %v4271_v2 = vrot.slane %v4270_v60, 2  ;;  %v4302_v3 = vadd.f32 %v4301_v61, %v4300_v57  ;;  %v4411_v30 = vunpack.c.l.s4 %v6573_v54 }
 0x5a2   :  { %v4278_v4 = vrot.slane %v4277_v0, 2  ;;  %v4309_v5 = vadd.f32 %v4308_v24, %v4307_v62 }
 0x5a3   :  { %v4272_v6 = vadd.f32 %v4271_v2, %v4270_v60  ;;  %v4303_v7 = vrot.slane %v4302_v3, 2  ;;  %5754 = vmatpush3.bf16.msra.mxu0 %v6485_v63  ;;  %v4412_v57 = vunpack.c.0.s8 %v4411_v30 }
 0x5a4   :  { %v4279_v9 = vadd.f32 %v4278_v4, %v4277_v0  ;;  %v4310_v10 = vrot.slane %v4309_v5, 2  ;;  %5755 = vmatprep.subr.bf16.mxu0 %v6486_v1 }
 0x5a5   :  { %v4273_v11 = vrot.slane %v4272_v6, 1  ;;  %v4304_v14 = vadd.f32 %v4303_v7, %v4302_v3  ;;  %v4415_v12 = vsub.s32 %v4412_v57, %v8003_v19 }
 0x5a6   :  { %v4280_v15 = vrot.slane %v4279_v9, 1  ;;  %v4311_v16 = vadd.f32 %v4310_v10, %v4309_v5 }
 0x5a7   :  { %v4274_v17 = vadd.f32 %v4273_v11, %v4272_v6  ;;  %v4305_v18 = vrot.slane %v4304_v14, 1  ;;  %5756 = vmatpush3.bf16.msra.mxu0 %v6487_v8  ;;  %v4416_v13 = vrot.slane %v4408_v22, %v4415_v12 }
 0x5a8   :  { %v4281_v21 = vadd.f32 %v4280_v15, %v4279_v9  ;;  %v4312_v23 = vrot.slane %v4311_v16, 1 }
 0x5a9   :  { %v4306_v25 = vadd.f32 %v4305_v18, %v4304_v14  ;;  %v4316_v26 = vmul.f32 0.5, %v4274_v17 }
 0x5aa   :  { %v4313_v27 = vadd.f32 %v4312_v23, %v4311_v16  ;;  %v4317_v28 = vmul.f32 0.5, %v4281_v21 }
 0x5ab   :  { %v4320_v29 = vmul.f32 0.5, %v4306_v25  ;;  %v4324_v32 = vmul.f32 %v4316_v26, %v4316_v26  ;;  %v4332_v45 = vsub.f32 %v8231_v49, %v4316_v26 }
 0x5ac   :  { %v4321_v33 = vmul.f32 0.5, %v4313_v27  ;;  %v4325_v34 = vmul.f32 %v4317_v28, %v4317_v28  ;;  %v4333_v47 = vsub.f32 %v8240_v53, %v4317_v28 }
 0x5ad   :  { %v4328_v35 = vsub.f32 %v4320_v29, %v4324_v32 }
 0x5ae   :  { %v4329_v38 = vsub.f32 %v4321_v33, %v4325_v34 }
 0x5af   :  { %v4336_v20 = vadd.f32 1e-05, %v4328_v35 }
 0x5b0   :  { %v4337_v40 = vadd.f32 1e-05, %v4329_v38 }
 0x5b1   :  { %6498 = vrsqrt.f32 %v4336_v20 }
 0x5b2   :  { %6500 = vrsqrt.f32 %v4337_v40 }
 0x5bb   :  { %v6499_v46 = vpop.eup %6498 }
 0x5bc   :  { %v6501_v48 = vpop.eup %6500  ;;  %v4344_v43 = vmul.f32 %v6499_v46, %v4332_v45 }
 0x5bd   :  { %v4345_v51 = vmul.f32 %v6501_v48, %v4333_v47 }
 0x5be   :  { %v4369_v55 = vmul.f32 %v4358_v41, %v4344_v43 }
 0x5bf   :  { %v4370_v56 = vmul.f32 %v4362_v42, %v4345_v51 }
 0x5c0   :  { %v4394_v31 = vadd.f32 %v4383_v50, %v4369_v55 }
 0x5c1   :  { %v4395_v49 = vadd.f32 %v4387_v52, %v4370_v56 }
 0x5c2   :  { %v4398_v58 = vmul.f32 0.01, %v4394_v31 }
 0x5c3   :  { %v4399_v59 = vmul.f32 0.01, %v4395_v49 }
 0x5c4   :  { %v4402_v60 = vmax.f32 %v4394_v31, %v4398_v58 }
 0x5c5   :  { %v4403_v53 = vmax.f32 %v4395_v49, %v4399_v59 }
 0x5c6   :  { %v4429_v63 = vpack.c.bf16 %v4402_v60, %v4402_v60 }
 0x5c7   :  { %v4430_v61 = vpack.c.bf16 %v4403_v53, %v4403_v53  ;;  %v4409_v62 = vcombine.low %v4402_v60, %v4403_v53 }
 0x5c9   :  { %4766 = vmatprep.mubr.bf16.mxu0 %v4430_v61  ;;  %v4423_v0 = vrot.slane %v4409_v62, %v4415_v12 }
 0x5ca   :  { %4767 = vmatmul.mubr.bf16.vlgmr.msra.gmra.mrb[68].mxu0 %v4429_v63 }
 0x5cb   :  { %v4424_v24 = vcombine.low %v4416_v13, %v4423_v0 }
 0x5cd   :  { %4426 = vst [vmem:[#allocation4] sm:$0xff] %v4424_v24 }
 0x5ce   :  { %6513 = shalt.err (!%p6510_p4)
}
 0x5cf   :  { %s6514_s22 = scalar_lea.hbm %s8324_s13, 128 }
 0x5d0   :  { %p6515_p5 = scmp.ne.s32.totalorder %s8324_s13, %s6514_s22  ;;  %p6518_p6 = scmp.lt.u32.totalorder %s6514_s22, %s8324_s13 }
 0x5d2   :  { %p6520_p7 = pnand %p6518_p6, %p6515_p5 }
 0x5d4   :  { %6523 = shalt.err (!%p6520_p7)
}
 0x5d5   :  { %4795 = dma.vmem_to_hbm [thread:$0]  %s4793_s18, 128, %s8324_s13, [#allocation5]  }
 0x5d6   :  { %s6575_s15 = smov [#allocation6]  }
 0x5d7   :  { %s4802_s28 = sshll.u32 %s6575_s15, 4  ;;  %s4803_s28 = int_to_ptr.vmem [resolvable:$true] %s4802_s28 }
 0x5d8   :  { %s6524_s29 = scalar_lea.vmem %s4803_s28, 64  ;;  %p6529_p9 = scmp.lt.s32.totalorder %s4803_s28, %s4803_s28 }
 0x5d9   :  { %p6525_p8 = scmp.ne.s32.totalorder %s4803_s28, %s6524_s29  ;;  %p6530_p10 = scmp.lt.s32.totalorder %s6524_s29, %s6524_s29 }
 0x5db   :  { %p6531_p11 = por %p6530_p10, %p6529_p9 }
 0x5dd   :  { %p6532_p12 = pnand %p6531_p11, %p6525_p8 }
 0x5df   :  { %6535 = shalt.err (!%p6532_p12)
}
 0x5e0   :  { %s6536_s5 = scalar_lea.hbm %s8325_s14, 64 }
 0x5e1   :  { %p6537_p13 = scmp.ne.s32.totalorder %s8325_s14, %s6536_s5  ;;  %p6540_p0 = scmp.lt.u32.totalorder %s6536_s5, %s8325_s14 }
 0x5e3   :  { %p6542_p1 = pnand %p6540_p0, %p6537_p13 }
 0x5e5   :  { %6545 = shalt.err (!%p6542_p1)
}
 0x5e6   :  { %4805 = dma.vmem_to_hbm [thread:$0]  %s4803_s28, 64, %s8325_s14, [#allocation5]   ;;  %v5512_v2 = vld [vmem:[%s8322_s11] ss:$0 sm:$0xff]  ;;  %vm4774_vm2 = vcmask 254976  }
 0x5e7   :  { %s6576_s17 = smov [#allocation2]  }
 0x5e8   :  { %s4782_s3 = sshll.u32 %s6576_s17, 4  ;;  %s4783_s3 = int_to_ptr.vmem [resolvable:$true] %s4782_s3 }
 0x5e9   :  { %s6546_s14 = scalar_lea.vmem %s4783_s3, 32  ;;  %p6551_p3 = scmp.lt.s32.totalorder %s4783_s3, %s4783_s3 }
 0x5ea   :  { %p6547_p2 = scmp.ne.s32.totalorder %s4783_s3, %s6546_s14  ;;  %p6552_p4 = scmp.lt.s32.totalorder %s6546_s14, %s6546_s14 }
 0x5ec   :  { %p6553_p5 = por %p6552_p4, %p6551_p3 }
 0x5ee   :  { %p6554_p6 = pnand %p6553_p5, %p6547_p2 }
 0x65d   :  { %v5735_v19 = vpop.f32.mrb[64].mxu0 }
 0x65e   :  { %v5736_v36 = vpop.f32.mrb[65].mxu0 }
 0x65f   :  { %v5737_v37 = vadd.f32 %v5736_v36, %v5735_v19  ;;  %v5738_v22 = vpop.f32.mrb[66].mxu0 }
 0x660   :  { %v5739_v1 = vpop.f32.mrb[67].mxu0 }
 0x661   :  { %v4729_v5 = vadd.f32 %v5737_v37, %v5512_v2 }
 0x69d   :  { %v5757_v3 = vpop.f32.mrb[68].mxu0 }
 0x69e   :  { %v5758_v4 = vpop.f32.mrb[69].mxu0 }
 0x69f   :  { %v5759_v6 = vadd.f32 %v5758_v4, %v5757_v3  ;;  %v5760_v7 = vpop.f32.mrb[70].mxu0 }
 0x6a0   :  { %v5761_v8 = vpop.f32.mrb[71].mxu0 }
 0x6a1   :  { %v4769_v9 = vadd.f32 %v5759_v6, %v4729_v5 }
 0x6a3   :  { %4775 = vst.msk [vmem:[#allocation2] sm:$0x3] %vm4774_vm2, %v4769_v9 }
 0x6a4   :  { %6557 = shalt.err (!%p6554_p6)
}
 0x6a5   :  { %s6558_s18 = scalar_lea.hbm %s8323_s12, 32 }
 0x6a6   :  { %p6559_p7 = scmp.ne.s32.totalorder %s8323_s12, %s6558_s18  ;;  %p6562_p8 = scmp.lt.u32.totalorder %s6558_s18, %s8323_s12 }
 0x6a8   :  { %p6564_p9 = pnand %p6562_p8, %p6559_p7 }
 0x6aa   :  { %6567 = shalt.err (!%p6564_p9)
}
 0x6ab   :  { %4785 = dma.vmem_to_hbm [thread:$0]  %s4783_s3, 32, %s8323_s12, [#allocation3]  }
 0x6ac   :  { %6568 = dma.done.wait [#allocation3], 32  }
 0x6ad   :  { %6569 = vsyncadd [#allocation3], 4294967264 }
 0x6ae   :  { %6570 = dma.done.wait [#allocation5], 192  }
 0x6af   :  { %6571 = vsyncadd [#allocation5], 4294967104 }
 0x6b0   :  { %4819 = vsyncpa [#allocation3], 1 }
 0x6b1   :  { %4820 = vsyncpa [#allocation5], 1 }

</bundles_post_ra>
